<compile_context>
chip_gen: v7x
topology: tpu7x:2x2x1
jax: 0.10.0
libtpu: 0.0.40
codegen_flags: <defaults>
</compile_context>

<pallas_src>
import functools

import numpy as np
import jax
import jax.numpy as jnp
from jax import lax
from jax.experimental import pallas as pl
from jax.experimental.pallas import tpu as pltpu


_MAX_PM = 8                        # W1 K-tile = pm*1024*900 int8 ~= pm MiB / buffer
_VMEM_LIMIT = 40 * 1024 * 1024     # fits v5e/v6e (128 MiB) and v7x (64 MiB) VMEM


def _choose_tiling(P):
    """(pm, P_pad): conv output positions per grid step and the padded total.

    Prefer an exact divisor of P (no zero-padded W1 rows streamed from HBM) as
    long as the tile stays reasonably large; otherwise pad P up to a multiple of
    pm.  Padded positions use zero patches and zero W1 rows -> zero contribution.
    """
    for d in range(_MAX_PM, 0, -1):
        if P % d == 0 and 2 * d >= _MAX_PM:
            return d, P
    pm = min(_MAX_PM, P)
    return pm, -(-P // pm) * pm


# ---------------------------------------------------------------------------
# Fused kernel: conv (im2col matmul) + int8 Linear1 K-accumulation + MLP tail.
# ---------------------------------------------------------------------------
def _fused_nn1_kernel(patches_ref, wc_ref, bc_ref,
                      w1_ref, s1_ref, b1_ref,
                      w2_ref, b2_ref, w3_ref, b3_ref,
                      w4_ref, b4_ref, w5_ref, b5_ref,
                      wo_ref, bo_ref,
                      o_ref, acc1):
    """One grid step = `pm` conv output positions + their K-slice of linear1.

    patches_ref: (pm, B, kc_pad)   bf16  im2col patches for this step's positions
    wc_ref:      (kc_pad, 1024)    bf16  conv weight (taps x out-channels)
    bc_ref:      (1, 1024)         f32
    w1_ref:      (pm, 1024, 900)   int8  K-tile of the (row-permuted) first layer
    s1_ref:      (1, 900)          f32   per-output-column dequant scales for W1
    b1..b5/w2..w5/wo/bo:                 small MLP weights, VMEM-resident all steps
    o_ref:       (B, 128)          f32   lane-dense padded output (sliced outside)
    acc1:        (B, 900)          f32   linear1 accumulator across the K grid
    """
    k = pl.program_id(0)

    @pl.when(k == 0)
    def _():
        acc1[...] = jnp.zeros_like(acc1)

    pm = patches_ref.shape[0]

    # Hoisted out of the position loop (JAX does not CSE broadcast_in_dim).
    wc = wc_ref[...]
    bc = bc_ref[...]

    def body(q, carry):
        # Conv (im2col matmul) + bias + ReLU for one output position: (B, 1024).
        a = jnp.dot(patches_ref[q], wc, preferred_element_type=jnp.float32)
        a = jnp.maximum(a + bc, 0.0).astype(jnp.bfloat16)
        # Dequantize this position's int8 W1 slice (exact int8 -> bf16 cast); the
        # per-column scale is applied once to the f32 accumulator at the end.
        w = w1_ref[q].astype(jnp.bfloat16)                    # (1024, 900)
        acc1[...] += jnp.dot(a, w, preferred_element_type=jnp.float32)
        return carry

    lax.fori_loop(0, pm, body, None)

    @pl.when(k == pl.num_programs(0) - 1)
    def _():
        def dense(h, w_ref, b_ref, relu):
            y = jnp.dot(h.astype(w_ref.dtype), w_ref[...],
                        preferred_element_type=jnp.float32) + b_ref[...]
            return jnp.maximum(y, 0.0) if relu else y

        # int8 dequant (scale accumulator) + bias + ReLU for linear1.
        h = jnp.maximum(acc1[...] * s1_ref[...] + b1_ref[...], 0.0)
        # (dropout == identity at inference)
        h = dense(h, w2_ref, b2_ref, True)
        h = dense(h, w3_ref, b3_ref, True)
        h = dense(h, w4_ref, b4_ref, True)
        h = dense(h, w5_ref, b5_ref, True)
        o_ref[...] = dense(h, wo_ref, bo_ref, False)          # output head (padded)


# ---------------------------------------------------------------------------
# Host-side helpers.
# ---------------------------------------------------------------------------
def _im2col(x_nchw, ksize):
    """(B, C, S, S) -> (P, B, C*k*k) patches; feature order matches PyTorch's
    conv-weight flatten (ci*9 + ky*3 + kx), position order p = h*O + w."""
    B, C, S, _ = x_nchw.shape
    O = S - ksize + 1
    taps = []
    for ci in range(C):
        for ky in range(ksize):
            for kx in range(ksize):
                taps.append(x_nchw[:, ci, ky:ky + O, kx:kx + O])   # (B, O, O)
    p = jnp.stack(taps, axis=-1).reshape(B, O * O, C * ksize * ksize)
    return jnp.transpose(p, (1, 0, 2))                             # (P, B, C*k*k)


def prepare_kernel_params(p, num_actions):
    """One-time repack / quantization of PyTorch-layout params into kernel-friendly
    layouts (done outside the forward pass; no per-call weight transposes)."""
    cout, cin, kh, kw = p["conv_w"].shape
    kc = cin * kh * kw
    kc_pad = int(np.ceil(kc / 16) * 16)            # sublane/packing-friendly K
    h1, f = p["l1_w"].shape
    P = f // cout                                  # conv output positions
    _, P_pad = _choose_tiling(P)
    a_pad = max(128, int(np.ceil(num_actions / 128) * 128))

    wc = jnp.zeros((kc_pad, cout), jnp.bfloat16)
    wc = wc.at[:kc, :].set(p["conv_w"].reshape(cout, kc).T.astype(jnp.bfloat16))

    # Linear1: permute rows from PyTorch NCHW-flatten order (c*P + p) into the
    # kernel's position-major order w1[p, c, n] = l1_w[n, c*P + p], then quantize
    # to int8 with per-output-column (n) scales.  Dequant uses f32 accumulation.
    w1f = (p["l1_w"].T.reshape(cout, P, h1)
           .transpose(1, 0, 2).astype(jnp.float32))              # (P, 1024, 900)
    s1 = jnp.max(jnp.abs(w1f), axis=(0, 1)) / 127.0              # (900,)
    s1 = jnp.where(s1 > 0, s1, 1.0)
    w1_i8 = jnp.clip(jnp.round(w1f / s1[None, None, :]), -127, 127).astype(jnp.int8)
    if P_pad != P:
        w1_i8 = jnp.pad(w1_i8, ((0, P_pad - P), (0, 0), (0, 0)))  # zero remainder

    wo = jnp.zeros((p["out_w"].shape[1], a_pad), jnp.bfloat16)
    wo = wo.at[:, :num_actions].set(p["out_w"].T.astype(jnp.bfloat16))
    bo = jnp.zeros((1, a_pad), jnp.float32).at[0, :num_actions].set(p["out_b"])

    kp = {
        "wc": wc, "bc": p["conv_b"].reshape(1, cout).astype(jnp.float32),
        "w1": w1_i8,
        "s1": s1.reshape(1, h1).astype(jnp.float32),
        "b1": p["l1_b"].reshape(1, h1).astype(jnp.float32),
        "wo": wo, "bo": bo,
    }
    for i in range(2, 6):
        kp[f"w{i}"] = p[f"l{i}_w"].T.astype(jnp.bfloat16)
        kp[f"b{i}"] = p[f"l{i}_b"].reshape(1, -1).astype(jnp.float32)
    return kp


def nn1_forward(x_nchw, kp, num_actions):
    """Fused Pallas forward pass for NN_1 (inference semantics)."""
    B, _, S, _ = x_nchw.shape
    O = S - 3 + 1
    P = O * O
    pm, P_pad = _choose_tiling(P)
    kt = P_pad // pm

    kc_pad, cout = kp["wc"].shape
    h1 = kp["w1"].shape[-1]
    h2 = kp["w2"].shape[1]
    h3 = kp["w3"].shape[1]
    h4 = kp["w4"].shape[1]
    h5 = kp["w5"].shape[1]
    a_pad = kp["wo"].shape[1]
    assert kp["w1"].shape == (P_pad, cout, h1)

    patches = _im2col(x_nchw, 3)                               # (P, B, kc)
    kc = patches.shape[-1]
    patches = jnp.pad(patches, ((0, P_pad - P), (0, 0), (0, kc_pad - kc)))
    patches = patches.astype(jnp.bfloat16)

    out_padded = pl.pallas_call(
        _fused_nn1_kernel,
        out_shape=jax.ShapeDtypeStruct((B, a_pad), jnp.float32),
        grid_spec=pltpu.PrefetchScalarGridSpec(
            num_scalar_prefetch=0,
            grid=(kt,),
            in_specs=[
                pl.BlockSpec((pm, B, kc_pad), lambda k: (k, 0, 0)),   # patches
                pl.BlockSpec((kc_pad, cout), lambda k: (0, 0)),       # conv W
                pl.BlockSpec((1, cout), lambda k: (0, 0)),            # conv b
                pl.BlockSpec((pm, cout, h1), lambda k: (k, 0, 0)),    # W1 int8 tile
                pl.BlockSpec((1, h1), lambda k: (0, 0)),              # W1 scales
                pl.BlockSpec((1, h1), lambda k: (0, 0)),              # b1
                pl.BlockSpec((h1, h2), lambda k: (0, 0)),             # W2
                pl.BlockSpec((1, h2), lambda k: (0, 0)),
                pl.BlockSpec((h2, h3), lambda k: (0, 0)),             # W3
                pl.BlockSpec((1, h3), lambda k: (0, 0)),
                pl.BlockSpec((h3, h4), lambda k: (0, 0)),             # W4
                pl.BlockSpec((1, h4), lambda k: (0, 0)),
                pl.BlockSpec((h4, h5), lambda k: (0, 0)),             # W5
                pl.BlockSpec((1, h5), lambda k: (0, 0)),
                pl.BlockSpec((h5, a_pad), lambda k: (0, 0)),          # W_out (padded)
                pl.BlockSpec((1, a_pad), lambda k: (0, 0)),
            ],
            out_specs=pl.BlockSpec((B, a_pad), lambda k: (0, 0)),
            scratch_shapes=[pltpu.VMEM((B, h1), jnp.float32)],        # linear1 acc
        ),
        compiler_params=pltpu.CompilerParams(
            dimension_semantics=("arbitrary",),        # K-reduction over W1 tiles
            vmem_limit_bytes=_VMEM_LIMIT),
    )(patches, kp["wc"], kp["bc"], kp["w1"], kp["s1"], kp["b1"],
      kp["w2"], kp["b2"], kp["w3"], kp["b3"], kp["w4"], kp["b4"],
      kp["w5"], kp["b5"], kp["wo"], kp["bo"])
    return out_padded[:, :num_actions]


# ---------------------------------------------------------------------------
# Pure-JAX reference (PyTorch NN_1 semantics, f32) + parameter init.
# ---------------------------------------------------------------------------
def nn1_reference(x_nchw, p):
    y = jax.lax.conv_general_dilated(
        x_nchw, p["conv_w"], window_strides=(1, 1), padding="VALID",
        dimension_numbers=("NCHW", "OIHW", "NCHW"))
    y = jax.nn.relu(y + p["conv_b"][None, :, None, None])
    h = y.reshape(y.shape[0], -1)                      # x.view(-1, n_features)
    for i in range(1, 6):
        h = jax.nn.relu(h @ p[f"l{i}_w"].T + p[f"l{i}_b"])  # (dropout = identity)
    return h @ p["out_w"].T + p["out_b"]


def init_params(key, system_size, num_actions):
    o = system_size - 3 + 1
    sizes = [o * o * 1024, 900, 700, 600, 512, 256]
    ks = jax.random.split(key, 2 + 2 * len(sizes))
    p = {
        "conv_w": jax.random.normal(ks[0], (1024, 2, 3, 3), jnp.float32) / np.sqrt(18.0),
        "conv_b": jax.random.normal(ks[1], (1024,), jnp.float32) * 0.01,
    }
    idx = 2
    for i in range(1, len(sizes)):
        fin, fout = sizes[i - 1], sizes[i]
        p[f"l{i}_w"] = jax.random.normal(ks[idx], (fout, fin), jnp.float32) / np.sqrt(fin)
        p[f"l{i}_b"] = jax.random.normal(ks[idx + 1], (fout,), jnp.float32) * 0.01
        idx += 2
    p["out_w"] = (jax.random.normal(ks[idx], (num_actions, sizes[-1]), jnp.float32)
                  / np.sqrt(sizes[-1]))
    p["out_b"] = jax.random.normal(ks[idx + 1], (num_actions,), jnp.float32) * 0.01
    return p


if __name__ == "__main__":
    SYSTEM_SIZE = 8      # conv output 6x6 -> F = 36864
    BATCH = 2
    NUM_ACTIONS = 3

    key = jax.random.PRNGKey(0)
    k_x, k_p = jax.random.split(key)
    x = jax.random.normal(k_x, (BATCH, 2, SYSTEM_SIZE, SYSTEM_SIZE), jnp.float32)

    params = init_params(k_p, SYSTEM_SIZE, NUM_ACTIONS)
    kparams = prepare_kernel_params(params, NUM_ACTIONS)   # one-time repack + quant

    fwd = jax.jit(functools.partial(nn1_forward, num_actions=NUM_ACTIONS))
    out = jax.block_until_ready(fwd(x, kparams))
    assert out.shape == (BATCH, NUM_ACTIONS)

    ref = jax.block_until_ready(nn1_reference(x, params))
    # int8 W1 (per-column scales, f32 accumulation) + bf16 operands elsewhere:
    # slightly relaxed tolerance vs. the pure-f32 reference.
    np.testing.assert_allclose(np.asarray(out), np.asarray(ref), rtol=5e-2, atol=5e-2)
    print("KERNEL_OK")
</pallas_src>

<mosaic_0001>
module attributes {stable_mosaic.version = 11 : i64} {
  func.func @_fused_nn1_kernel(%arg0: i32, %arg1: memref<6x2x32xbf16, #tpu.memory_space<vmem>>, %arg2: memref<32x1024xbf16, #tpu.memory_space<vmem>>, %arg3: memref<1x1024xf32, #tpu.memory_space<vmem>>, %arg4: memref<6x1024x900xi8, #tpu.memory_space<vmem>>, %arg5: memref<1x900xf32, #tpu.memory_space<vmem>>, %arg6: memref<1x900xf32, #tpu.memory_space<vmem>>, %arg7: memref<900x700xbf16, #tpu.memory_space<vmem>>, %arg8: memref<1x700xf32, #tpu.memory_space<vmem>>, %arg9: memref<700x600xbf16, #tpu.memory_space<vmem>>, %arg10: memref<1x600xf32, #tpu.memory_space<vmem>>, %arg11: memref<600x512xbf16, #tpu.memory_space<vmem>>, %arg12: memref<1x512xf32, #tpu.memory_space<vmem>>, %arg13: memref<512x256xbf16, #tpu.memory_space<vmem>>, %arg14: memref<1x256xf32, #tpu.memory_space<vmem>>, %arg15: memref<256x128xbf16, #tpu.memory_space<vmem>>, %arg16: memref<1x128xf32, #tpu.memory_space<vmem>>, %arg17: memref<2x128xf32, #tpu.memory_space<vmem>>, %arg18: memref<2x900xf32, #tpu.memory_space<vmem>>) attributes {dimension_semantics = [#tpu.dimension_semantics<arbitrary>], iteration_bounds = array<i64: 6>, scalar_prefetch = 0 : i64, scratch_operands = 1 : i64, tpu.core_type = #tpu.core_type<tc>, window_params = [{transform_indices = @transform_0, window_bounds = array<i64: 6, 2, 32>}, {pipeline_mode = #tpu.pipeline_mode<synchronous>, transform_indices = @transform_1, window_bounds = array<i64: 32, 1024>}, {pipeline_mode = #tpu.pipeline_mode<synchronous>, transform_indices = @transform_2, window_bounds = array<i64: 1, 1024>}, {transform_indices = @transform_3, window_bounds = array<i64: 6, 1024, 900>}, {pipeline_mode = #tpu.pipeline_mode<synchronous>, transform_indices = @transform_4, window_bounds = array<i64: 1, 900>}, {pipeline_mode = #tpu.pipeline_mode<synchronous>, transform_indices = @transform_5, window_bounds = array<i64: 1, 900>}, {pipeline_mode = #tpu.pipeline_mode<synchronous>, transform_indices = @transform_6, window_bounds = array<i64: 900, 700>}, {pipeline_mode = #tpu.pipeline_mode<synchronous>, transform_indices = @transform_7, window_bounds = array<i64: 1, 700>}, {pipeline_mode = #tpu.pipeline_mode<synchronous>, transform_indices = @transform_8, window_bounds = array<i64: 700, 600>}, {pipeline_mode = #tpu.pipeline_mode<synchronous>, transform_indices = @transform_9, window_bounds = array<i64: 1, 600>}, {pipeline_mode = #tpu.pipeline_mode<synchronous>, transform_indices = @transform_10, window_bounds = array<i64: 600, 512>}, {pipeline_mode = #tpu.pipeline_mode<synchronous>, transform_indices = @transform_11, window_bounds = array<i64: 1, 512>}, {pipeline_mode = #tpu.pipeline_mode<synchronous>, transform_indices = @transform_12, window_bounds = array<i64: 512, 256>}, {pipeline_mode = #tpu.pipeline_mode<synchronous>, transform_indices = @transform_13, window_bounds = array<i64: 1, 256>}, {pipeline_mode = #tpu.pipeline_mode<synchronous>, transform_indices = @transform_14, window_bounds = array<i64: 256, 128>}, {pipeline_mode = #tpu.pipeline_mode<synchronous>, transform_indices = @transform_15, window_bounds = array<i64: 1, 128>}, {pipeline_mode = #tpu.pipeline_mode<synchronous>, transform_indices = @transform_16, window_bounds = array<i64: 2, 128>}]} {
    %c0_i32 = arith.constant 0 : i32
    %0 = arith.cmpi eq, %arg0, %c0_i32 : i32
    %1 = arith.extui %0 : i1 to i32
    %c0_i32_0 = arith.constant 0 : i32
    %2 = arith.cmpi ne, %1, %c0_i32_0 : i32
    scf.if %2 {
      %cst = arith.constant 0.000000e+00 : f32
      %9 = vector.broadcast %cst : f32 to vector<2x900xf32>
      %c0_7 = arith.constant 0 : index
      %c0_8 = arith.constant 0 : index
      %10 = vector.load %arg18[%c0_7, %c0_8] : memref<2x900xf32, #tpu.memory_space<vmem>>, vector<2x900xf32>
      tpu.vector_store %arg18[%c0_7, %c0_8], %9 {strides = array<i32>} : memref<2x900xf32, #tpu.memory_space<vmem>>, vector<2x900xf32>,
    } else {
    }
    %c0 = arith.constant 0 : index
    %c0_1 = arith.constant 0 : index
    %3 = vector.load %arg2[%c0, %c0_1] : memref<32x1024xbf16, #tpu.memory_space<vmem>>, vector<32x1024xbf16>
    %c0_2 = arith.constant 0 : index
    %c0_3 = arith.constant 0 : index
    %4 = vector.load %arg3[%c0_2, %c0_3] : memref<1x1024xf32, #tpu.memory_space<vmem>>, vector<1x1024xf32>
    %c0_i32_4 = arith.constant 0 : i32
    %c6_i32 = arith.constant 6 : i32
    %5 = arith.addi %c0_i32_4, %c6_i32 : i32
    %c1_i32 = arith.constant 1 : i32
    scf.for %arg19 = %c0_i32_4 to %5 step %c1_i32  : i32 {
      %9 = arith.index_cast %arg19 : i32 to index
      %c0_7 = arith.constant 0 : index
      %c0_8 = arith.constant 0 : index
      %10 = vector.load %arg1[%9, %c0_7, %c0_8] : memref<6x2x32xbf16, #tpu.memory_space<vmem>>, vector<1x2x32xbf16>
      %11 = vector.shape_cast %10 : vector<1x2x32xbf16> to vector<2x32xbf16>
      %cst = arith.constant dense<0.000000e+00> : vector<2x1024xf32>
      %12 = tpu.matmul %11, %3, %cst {dimension_numbers = #tpu.dot_dimension_numbers<[1], [0], [0], [1], [0, 0, 1, 1], [], []>} : vector<2x32xbf16>, vector<32x1024xbf16>, vector<2x1024xf32> -> vector<2x1024xf32>
      %13 = vector.broadcast %4 : vector<1x1024xf32> to vector<2x1024xf32>
      %14 = arith.addf %12, %13 : vector<2x1024xf32>
      %cst_9 = arith.constant 0.000000e+00 : f32
      %15 = vector.broadcast %cst_9 : f32 to vector<2x1024xf32>
      %16 = arith.maximumf %14, %15 : vector<2x1024xf32>
      %17 = arith.truncf %16 : vector<2x1024xf32> to vector<2x1024xbf16>
      %18 = arith.index_cast %arg19 : i32 to index
      %c0_10 = arith.constant 0 : index
      %c0_11 = arith.constant 0 : index
      %19 = vector.load %arg4[%18, %c0_10, %c0_11] : memref<6x1024x900xi8, #tpu.memory_space<vmem>>, vector<1x1024x900xi8>
      %20 = vector.shape_cast %19 : vector<1x1024x900xi8> to vector<1024x900xi8>
      %21 = arith.sitofp %20 : vector<1024x900xi8> to vector<1024x900xbf16>
      %c0_12 = arith.constant 0 : index
      %c0_13 = arith.constant 0 : index
      %22 = vector.load %arg18[%c0_12, %c0_13] : memref<2x900xf32, #tpu.memory_space<vmem>>, vector<2x900xf32>
      %cst_14 = arith.constant dense<0.000000e+00> : vector<2x900xf32>
      %23 = tpu.matmul %17, %21, %cst_14 {dimension_numbers = #tpu.dot_dimension_numbers<[1], [0], [0], [1], [0, 0, 1, 1], [], []>} : vector<2x1024xbf16>, vector<1024x900xbf16>, vector<2x900xf32> -> vector<2x900xf32>
      %24 = arith.addf %22, %23 : vector<2x900xf32>
      %c0_15 = arith.constant 0 : index
      %c0_16 = arith.constant 0 : index
      %25 = vector.load %arg18[%c0_15, %c0_16] : memref<2x900xf32, #tpu.memory_space<vmem>>, vector<2x900xf32>
      tpu.vector_store %arg18[%c0_15, %c0_16], %24 {strides = array<i32>} : memref<2x900xf32, #tpu.memory_space<vmem>>, vector<2x900xf32>,
    }
    %c6_i32_5 = arith.constant 6 : i32
    %c5_i32 = arith.constant 5 : i32
    %6 = arith.cmpi eq, %arg0, %c5_i32 : i32
    %7 = arith.extui %6 : i1 to i32
    %c0_i32_6 = arith.constant 0 : i32
    %8 = arith.cmpi ne, %7, %c0_i32_6 : i32
    scf.if %8 {
      %c0_7 = arith.constant 0 : index
      %c0_8 = arith.constant 0 : index
      %9 = vector.load %arg18[%c0_7, %c0_8] : memref<2x900xf32, #tpu.memory_space<vmem>>, vector<2x900xf32>
      %c0_9 = arith.constant 0 : index
      %c0_10 = arith.constant 0 : index
      %10 = vector.load %arg5[%c0_9, %c0_10] : memref<1x900xf32, #tpu.memory_space<vmem>>, vector<1x900xf32>
      %11 = vector.broadcast %10 : vector<1x900xf32> to vector<2x900xf32>
      %12 = arith.mulf %9, %11 : vector<2x900xf32>
      %c0_11 = arith.constant 0 : index
      %c0_12 = arith.constant 0 : index
      %13 = vector.load %arg6[%c0_11, %c0_12] : memref<1x900xf32, #tpu.memory_space<vmem>>, vector<1x900xf32>
      %14 = vector.broadcast %13 : vector<1x900xf32> to vector<2x900xf32>
      %15 = arith.addf %12, %14 : vector<2x900xf32>
      %cst = arith.constant 0.000000e+00 : f32
      %16 = vector.broadcast %cst : f32 to vector<2x900xf32>
      %17 = arith.maximumf %15, %16 : vector<2x900xf32>
      %18 = arith.truncf %17 : vector<2x900xf32> to vector<2x900xbf16>
      %c0_13 = arith.constant 0 : index
      %c0_14 = arith.constant 0 : index
      %19 = vector.load %arg7[%c0_13, %c0_14] : memref<900x700xbf16, #tpu.memory_space<vmem>>, vector<900x700xbf16>
      %cst_15 = arith.constant dense<0.000000e+00> : vector<2x700xf32>
      %20 = tpu.matmul %18, %19, %cst_15 {dimension_numbers = #tpu.dot_dimension_numbers<[1], [0], [0], [1], [0, 0, 1, 1], [], []>} : vector<2x900xbf16>, vector<900x700xbf16>, vector<2x700xf32> -> vector<2x700xf32>
      %c0_16 = arith.constant 0 : index
      %c0_17 = arith.constant 0 : index
      %21 = vector.load %arg8[%c0_16, %c0_17] : memref<1x700xf32, #tpu.memory_space<vmem>>, vector<1x700xf32>
      %22 = vector.broadcast %21 : vector<1x700xf32> to vector<2x700xf32>
      %23 = arith.addf %20, %22 : vector<2x700xf32>
      %cst_18 = arith.constant 0.000000e+00 : f32
      %24 = vector.broadcast %cst_18 : f32 to vector<2x700xf32>
      %25 = arith.maximumf %23, %24 : vector<2x700xf32>
      %26 = arith.truncf %25 : vector<2x700xf32> to vector<2x700xbf16>
      %c0_19 = arith.constant 0 : index
      %c0_20 = arith.constant 0 : index
      %27 = vector.load %arg9[%c0_19, %c0_20] : memref<700x600xbf16, #tpu.memory_space<vmem>>, vector<700x600xbf16>
      %cst_21 = arith.constant dense<0.000000e+00> : vector<2x600xf32>
      %28 = tpu.matmul %26, %27, %cst_21 {dimension_numbers = #tpu.dot_dimension_numbers<[1], [0], [0], [1], [0, 0, 1, 1], [], []>} : vector<2x700xbf16>, vector<700x600xbf16>, vector<2x600xf32> -> vector<2x600xf32>
      %c0_22 = arith.constant 0 : index
      %c0_23 = arith.constant 0 : index
      %29 = vector.load %arg10[%c0_22, %c0_23] : memref<1x600xf32, #tpu.memory_space<vmem>>, vector<1x600xf32>
      %30 = vector.broadcast %29 : vector<1x600xf32> to vector<2x600xf32>
      %31 = arith.addf %28, %30 : vector<2x600xf32>
      %cst_24 = arith.constant 0.000000e+00 : f32
      %32 = vector.broadcast %cst_24 : f32 to vector<2x600xf32>
      %33 = arith.maximumf %31, %32 : vector<2x600xf32>
      %34 = arith.truncf %33 : vector<2x600xf32> to vector<2x600xbf16>
      %c0_25 = arith.constant 0 : index
      %c0_26 = arith.constant 0 : index
      %35 = vector.load %arg11[%c0_25, %c0_26] : memref<600x512xbf16, #tpu.memory_space<vmem>>, vector<600x512xbf16>
      %cst_27 = arith.constant dense<0.000000e+00> : vector<2x512xf32>
      %36 = tpu.matmul %34, %35, %cst_27 {dimension_numbers = #tpu.dot_dimension_numbers<[1], [0], [0], [1], [0, 0, 1, 1], [], []>} : vector<2x600xbf16>, vector<600x512xbf16>, vector<2x512xf32> -> vector<2x512xf32>
      %c0_28 = arith.constant 0 : index
      %c0_29 = arith.constant 0 : index
      %37 = vector.load %arg12[%c0_28, %c0_29] : memref<1x512xf32, #tpu.memory_space<vmem>>, vector<1x512xf32>
      %38 = vector.broadcast %37 : vector<1x512xf32> to vector<2x512xf32>
      %39 = arith.addf %36, %38 : vector<2x512xf32>
      %cst_30 = arith.constant 0.000000e+00 : f32
      %40 = vector.broadcast %cst_30 : f32 to vector<2x512xf32>
      %41 = arith.maximumf %39, %40 : vector<2x512xf32>
      %42 = arith.truncf %41 : vector<2x512xf32> to vector<2x512xbf16>
      %c0_31 = arith.constant 0 : index
      %c0_32 = arith.constant 0 : index
      %43 = vector.load %arg13[%c0_31, %c0_32] : memref<512x256xbf16, #tpu.memory_space<vmem>>, vector<512x256xbf16>
      %cst_33 = arith.constant dense<0.000000e+00> : vector<2x256xf32>
      %44 = tpu.matmul %42, %43, %cst_33 {dimension_numbers = #tpu.dot_dimension_numbers<[1], [0], [0], [1], [0, 0, 1, 1], [], []>} : vector<2x512xbf16>, vector<512x256xbf16>, vector<2x256xf32> -> vector<2x256xf32>
      %c0_34 = arith.constant 0 : index
      %c0_35 = arith.constant 0 : index
      %45 = vector.load %arg14[%c0_34, %c0_35] : memref<1x256xf32, #tpu.memory_space<vmem>>, vector<1x256xf32>
      %46 = vector.broadcast %45 : vector<1x256xf32> to vector<2x256xf32>
      %47 = arith.addf %44, %46 : vector<2x256xf32>
      %cst_36 = arith.constant 0.000000e+00 : f32
      %48 = vector.broadcast %cst_36 : f32 to vector<2x256xf32>
      %49 = arith.maximumf %47, %48 : vector<2x256xf32>
      %50 = arith.truncf %49 : vector<2x256xf32> to vector<2x256xbf16>
      %c0_37 = arith.constant 0 : index
      %c0_38 = arith.constant 0 : index
      %51 = vector.load %arg15[%c0_37, %c0_38] : memref<256x128xbf16, #tpu.memory_space<vmem>>, vector<256x128xbf16>
      %cst_39 = arith.constant dense<0.000000e+00> : vector<2x128xf32>
      %52 = tpu.matmul %50, %51, %cst_39 {dimension_numbers = #tpu.dot_dimension_numbers<[1], [0], [0], [1], [0, 0, 1, 1], [], []>} : vector<2x256xbf16>, vector<256x128xbf16>, vector<2x128xf32> -> vector<2x128xf32>
      %c0_40 = arith.constant 0 : index
      %c0_41 = arith.constant 0 : index
      %53 = vector.load %arg16[%c0_40, %c0_41] : memref<1x128xf32, #tpu.memory_space<vmem>>, vector<1x128xf32>
      %54 = vector.broadcast %53 : vector<1x128xf32> to vector<2x128xf32>
      %55 = arith.addf %52, %54 : vector<2x128xf32>
      %c0_42 = arith.constant 0 : index
      %c0_43 = arith.constant 0 : index
      %56 = vector.load %arg17[%c0_42, %c0_43] : memref<2x128xf32, #tpu.memory_space<vmem>>, vector<2x128xf32>
      tpu.vector_store %arg17[%c0_42, %c0_43], %55 {strides = array<i32>} : memref<2x128xf32, #tpu.memory_space<vmem>>, vector<2x128xf32>,
    } else {
    }
    return
  }
  func.func @transform_0(%arg0: i32) -> (i32, i32, i32) {
    %c0_i32 = arith.constant 0 : i32
    %c0_i32_0 = arith.constant 0 : i32
    %c0_i32_1 = arith.constant 0 : i32
    return %arg0, %c0_i32, %c0_i32_0 : i32, i32, i32
  }
  func.func @transform_1(%arg0: i32) -> (i32, i32) {
    %c0_i32 = arith.constant 0 : i32
    %c0_i32_0 = arith.constant 0 : i32
    %c0_i32_1 = arith.constant 0 : i32
    return %c0_i32, %c0_i32_0 : i32, i32
  }
  func.func @transform_2(%arg0: i32) -> (i32, i32) {
    %c0_i32 = arith.constant 0 : i32
    %c0_i32_0 = arith.constant 0 : i32
    %c0_i32_1 = arith.constant 0 : i32
    return %c0_i32, %c0_i32_0 : i32, i32
  }
  func.func @transform_3(%arg0: i32) -> (i32, i32, i32) {
    %c0_i32 = arith.constant 0 : i32
    %c0_i32_0 = arith.constant 0 : i32
    %c0_i32_1 = arith.constant 0 : i32
    return %arg0, %c0_i32, %c0_i32_0 : i32, i32, i32
  }
  func.func @transform_4(%arg0: i32) -> (i32, i32) {
    %c0_i32 = arith.constant 0 : i32
    %c0_i32_0 = arith.constant 0 : i32
    %c0_i32_1 = arith.constant 0 : i32
    return %c0_i32, %c0_i32_0 : i32, i32
  }
  func.func @transform_5(%arg0: i32) -> (i32, i32) {
    %c0_i32 = arith.constant 0 : i32
    %c0_i32_0 = arith.constant 0 : i32
    %c0_i32_1 = arith.constant 0 : i32
    return %c0_i32, %c0_i32_0 : i32, i32
  }
  func.func @transform_6(%arg0: i32) -> (i32, i32) {
    %c0_i32 = arith.constant 0 : i32
    %c0_i32_0 = arith.constant 0 : i32
    %c0_i32_1 = arith.constant 0 : i32
    return %c0_i32, %c0_i32_0 : i32, i32
  }
  func.func @transform_7(%arg0: i32) -> (i32, i32) {
    %c0_i32 = arith.constant 0 : i32
    %c0_i32_0 = arith.constant 0 : i32
    %c0_i32_1 = arith.constant 0 : i32
    return %c0_i32, %c0_i32_0 : i32, i32
  }
  func.func @transform_8(%arg0: i32) -> (i32, i32) {
    %c0_i32 = arith.constant 0 : i32
    %c0_i32_0 = arith.constant 0 : i32
    %c0_i32_1 = arith.constant 0 : i32
    return %c0_i32, %c0_i32_0 : i32, i32
  }
  func.func @transform_9(%arg0: i32) -> (i32, i32) {
    %c0_i32 = arith.constant 0 : i32
    %c0_i32_0 = arith.constant 0 : i32
    %c0_i32_1 = arith.constant 0 : i32
    return %c0_i32, %c0_i32_0 : i32, i32
  }
  func.func @transform_10(%arg0: i32) -> (i32, i32) {
    %c0_i32 = arith.constant 0 : i32
    %c0_i32_0 = arith.constant 0 : i32
    %c0_i32_1 = arith.constant 0 : i32
    return %c0_i32, %c0_i32_0 : i32, i32
  }
  func.func @transform_11(%arg0: i32) -> (i32, i32) {
    %c0_i32 = arith.constant 0 : i32
    %c0_i32_0 = arith.constant 0 : i32
    %c0_i32_1 = arith.constant 0 : i32
    return %c0_i32, %c0_i32_0 : i32, i32
  }
  func.func @transform_12(%arg0: i32) -> (i32, i32) {
    %c0_i32 = arith.constant 0 : i32
    %c0_i32_0 = arith.constant 0 : i32
    %c0_i32_1 = arith.constant 0 : i32
    return %c0_i32, %c0_i32_0 : i32, i32
  }
  func.func @transform_13(%arg0: i32) -> (i32, i32) {
    %c0_i32 = arith.constant 0 : i32
    %c0_i32_0 = arith.constant 0 : i32
    %c0_i32_1 = arith.constant 0 : i32
    return %c0_i32, %c0_i32_0 : i32, i32
  }
  func.func @transform_14(%arg0: i32) -> (i32, i32) {
    %c0_i32 = arith.constant 0 : i32
    %c0_i32_0 = arith.constant 0 : i32
    %c0_i32_1 = arith.constant 0 : i32
    return %c0_i32, %c0_i32_0 : i32, i32
  }
  func.func @transform_15(%arg0: i32) -> (i32, i32) {
    %c0_i32 = arith.constant 0 : i32
    %c0_i32_0 = arith.constant 0 : i32
    %c0_i32_1 = arith.constant 0 : i32
    return %c0_i32, %c0_i32_0 : i32, i32
  }
  func.func @transform_16(%arg0: i32) -> (i32, i32) {
    %c0_i32 = arith.constant 0 : i32
    %c0_i32_0 = arith.constant 0 : i32
    %c0_i32_1 = arith.constant 0 : i32
    return %c0_i32, %c0_i32_0 : i32, i32
  }
}

</mosaic_0001>

<bundles_post_ra>
// kernel: nn1_forward.1
= control target key start
LH: loop header
LB: loop body
LE: loop exit
PB: predicated region body
PF: predicated region fallthrough
CT: control target
= control target key end

     0   :  { %s14625_s0 = inlined_call_operand.vmem [shape: bf16[36,2,32], index: 0, kind: input, shape index: {}]   ;;  %s14626_s1 = inlined_call_operand.vmem [shape: bf16[32,1024], index: 1, kind: input, shape index: {}]   ;;  %s14627_s2 = inlined_call_operand.vmem [shape: f32[1,1024], index: 2, kind: input, shape index: {}]   ;;  %s14628_s3 = inlined_call_operand.hbm [shape: s8[36,1024,900], index: 3, kind: input, shape index: {}]   ;;  %s14629_s4 = inlined_call_operand.vmem [shape: f32[1,900], index: 4, kind: input, shape index: {}]   ;;  %s14630_s5 = inlined_call_operand.vmem [shape: f32[1,900], index: 5, kind: input, shape index: {}]   ;;  %s14631_s6 = inlined_call_operand.vmem [shape: bf16[900,700], index: 6, kind: input, shape index: {}]   ;;  %s14632_s7 = inlined_call_operand.vmem [shape: f32[1,700], index: 7, kind: input, shape index: {}]   ;;  %s14633_s8 = inlined_call_operand.vmem [shape: bf16[700,600], index: 8, kind: input, shape index: {}]   ;;  %s14634_s9 = inlined_call_operand.vmem [shape: f32[1,600], index: 9, kind: input, shape index: {}]   ;;  %s14635_s10 = inlined_call_operand.vmem [shape: bf16[600,512], index: 10, kind: input, shape index: {}]   ;;  %s14636_s11 = inlined_call_operand.vmem [shape: f32[1,512], index: 11, kind: input, shape index: {}]   ;;  %s14637_s12 = inlined_call_operand.vmem [shape: bf16[512,256], index: 12, kind: input, shape index: {}]   ;;  %s14638_s13 = inlined_call_operand.vmem [shape: f32[1,256], index: 13, kind: input, shape index: {}]   ;;  %s14639_s14 = inlined_call_operand.vmem [shape: bf16[256,128], index: 14, kind: input, shape index: {}]   ;;  %s14640_s15 = inlined_call_operand.vmem [shape: f32[1,128], index: 15, kind: input, shape index: {}]   ;;  %s14641_s16 = inlined_call_operand.hbm [shape: f32[2,128], index: 16, kind: output, shape index: {}]  }
   0x1   :  { %14646 = sst [smem:[#allocation12_spill]] %s14625_s0 }
   0x2   :  { %14647 = sst [smem:[#allocation13_spill]] %s14641_s16 }
   0x3   :  { %21 = vsyncpa [#allocation4], 0 }
   0x4   :  { %23 = vsyncpa [#allocation4 + $0x1], 0 }
   0x5   :  { %24 = vsyncpa [#allocation5], 0  ;;  %s11388_s21 = smov 0   ;;  %s11390_s22 = smov 0  }
   0x6   :  { %s11392_s23 = smov 0   ;;  %s11394_s24 = smov 0  }
   0x7 LB: > { %14648 = sst [smem:[#allocation9_spill]] %s11285_s23  ;;  %s11407_s25 = sadd.s32 4294967295, %s11289_s24   ;;  %s11289_s24 = sphi %s11394_s24, %s14657_s24   ;;  %s11285_s23 = sphi %s11392_s23, %s14659_s23   ;;  %s11281_s22 = sphi %s11390_s22, %s14661_s22   ;;  %s11277_s21 = sphi %s11388_s21, %s14660_s21  }
   0x8   : > { %s11410_s26 = sadd.s32 1, %s11289_s24   ;;  %s105_s28 = sadd.s32 1, %s11285_s23 }
   0x9   : > { %14649 = sst [smem:[#allocation10_spill]] %s11410_s26  ;;  %s102_s27 = ssub.s32 %s11289_s24, %s11410_s26 }
   0xa   : > { %p103_p0 = scmp.eq.s32.totalorder %s102_s27, 0  ;;  %p112_p1 = scmp.ne.s32.totalorder %s11285_s23, %s11281_s22 }
   0xb   : > { %p113_p2 = scmp.eq.s32.totalorder %s11289_s24, 0  ;;  %p118_p3 = scmp.ne.s32.totalorder %s11281_s22, %s11277_s21 }
   0xc   : > { %s11420_s29 = scalar_select %p103_p0, %s11285_s23, %s105_s28  }
   0xd   : > { %p114_p4 = por %p113_p2, %p112_p1  ;;  %p119_p5 = scmp.eq.s32.totalorder %s11407_s25, 0 }
   0xe   : > { %14650 = sst [smem:[#allocation11_spill]] %s11420_s29  ;;  %p9985_p6 = scmp.lt.s32.totalorder %s11289_s24, 6 }
   0xf   : > { %p11424_p7 = por %p119_p5, %p118_p3  ;;  %s465_s0 = sand.u32 1, %s11285_s23  }
  0x10   : > { %s9973_s17 = smul.u32 12288, %s465_s0  ;;  %p11430_p8 = pnand %p9985_p6, %p114_p4 }
  0x11   : > { %s9772_s18 = smul.u32 196608, %s11289_s24  ;;  %s11442_s23 = scalar_lea.sflag [#allocation4], %s465_s0 }
  0x12   : > { %s469_s28 = scalar_lea.vmem [#allocation3], %s9973_s17  ;;  %p11193_p11 = pneg %p11430_p8 }
  0x13   : > { %s11437_s21 = scalar_lea.hbm %s14628_s3, %s9772_s18  ;;  %s477_s29 = sshll.u32 %s469_s28, 4  ;;  %s11439_s29 = int_to_ptr.vmem [resolvable:$true] %s477_s29 }
  0x14   : > { %s11191_s26 = scalar_lea.hbm %s11437_s21, 196608  ;;  %s11196_s27 = scalar_lea.hbm %s14628_s3, 1179648 }
  0x15   : > { %p11192_p10 = scmp.ne.s32.totalorder %s11437_s21, %s11191_s26  ;;  %p11197_p0 = scmp.lt.u32.totalorder %s11437_s21, %s14628_s3 }
  0x16   : > { %p11198_p1 = scmp.lt.u32.totalorder %s11196_s27, %s11191_s26  ;;  %p11200_p3 = scmp.lt.u32.totalorder %s11191_s26, %s11437_s21 }
  0x17   : > { %p11194_p12 = pnand %p11193_p11, %p11192_p10 }
  0x18   : > { %p11199_p2 = por %p11198_p1, %p11197_p0 }
  0x19   : > { %p11195_p13 = pneg %p11194_p12 }
  0x1a   : > { %p11201_p4 = por %p11200_p3, %p11199_p2 }
  0x1c   : > { %p11202_p5 = pnand %p11201_p4, %p11195_p13 }
  0x1e   : > { %11205 = shalt.err (!%p11202_p5)
}
  0x1f   : > { %s11206_s0 = scalar_lea.vmem %s11439_s29, 196608  ;;  %s11295_s28 = smov [#allocation3]  }
  0x20   : > { %p11207_p6 = scmp.ne.s32.totalorder %s11439_s29, %s11206_s0  ;;  %s11211_s18 = sshll.u32 %s11295_s28, 4  ;;  %s11212_s18 = int_to_ptr.vmem [resolvable:$false] %s11211_s18 }
  0x21   : > { %s11213_s16 = scalar_lea.vmem %s11212_s18, 393216  ;;  %p11214_p9 = scmp.lt.s32.totalorder %s11439_s29, %s11212_s18 }
  0x22   : > { %p11209_p10 = pnand %p11207_p6, %p11193_p11  ;;  %p11215_p0 = scmp.lt.s32.totalorder %s11213_s16, %s11206_s0 }
  0x24   : > { %p11210_p12 = pneg %p11209_p10  ;;  %p11216_p1 = por %p11215_p0, %p11214_p9 }
  0x26   : > { %p11217_p2 = pnand %p11216_p1, %p11210_p12 }
  0x28   : > { %11220 = shalt.err (!%p11217_p2)
}
  0x29   : > { %s11296_s26 = smov 1024   ;;  %s11297_s20 = smov 64  }
  0x2a   : > { %9984 = dma.hbm_to_vmem [thread:$0]  (!%p11430_p8), %s11437_s21, 196608, %s11439_s29, %s11442_s23, %s11296_s26, %s11296_s26, %s11297_s20  }
  0x2b   : > { %p485_p11 = scmp.lt.s32.totalorder %s11289_s24, 7  ;;  %p14653_p13 = scmp.ge.s32.totalorder %s11289_s24, 1 }
  0x2d   : > { %p486_p3 = pnand %p14653_p13, %p485_p11 }
  0x2e   : > { %s491_s27 = sand.u32 (!%p486_p3), 1, %s11281_s22  }
  0x2f   : > { %489 = sbr.rel (%p486_p3) target bundleno = 2786 (0xae2), region = 84  ;;  %s492_s0 = scalar_lea.sflag (!%p486_p3), [#allocation4], %s491_s27 }
  0x30   : > { %s11474_s17 = smul.u32 (!%p486_p3), 12288, %s491_s27 }
  0x32   : > { %s495_s28 = scalar_lea.vmem (!%p486_p3), [#allocation3], %s11474_s17 }
  0x36   : > { %11268 = dma.done.wait (%p11424_p7), %s492_s0, 196608  }
  0x37   : > { %11270 = vsyncadd (%p11424_p7), %s492_s0, 4294770688  ;;  %s543_s19 = smul.u32 6, %s11407_s25  ;;  %s14654_s29 = sld [smem:[#allocation12_spill]] }
  0x38   : > { %p8931_p9 = scmp.ne.s32.totalorder %s11407_s25, 0 }
  0x39   : > { %p544_p8 = scmp.lt.s32.totalorder %s543_s19, 35  ;;  %vm555_vm0 = vcmask (!%p8931_p9), 1041408   ;;  %vm556_vm1 = vcmask (!%p8931_p9), 1043458   ;;  %vm558_vm2 = vcmask (!%p8931_p9), 1045508   ;;  %v11298_v0 = vmov (!%p8931_p9), 0.0  }
  0x3a   : > { %553 = sbr.rel (%p8931_p9) target bundleno = 65 (0x41), region = 92  ;;  %554 = vst [vmem:[#allocation2] sm:$0xff] (!%p8931_p9), %v11298_v0  ;;  %vm557_vm3 = vmor (!%p8931_p9), %vm556_vm1, %vm555_vm0  ;;  %vm560_vm4 = vcmask (!%p8931_p9), 31750  }
  0x3b   : > { %s14663_s19 = smov (!%p544_p8, %s543_s19), 35  ;;  %vm559_vm5 = vmor (!%p8931_p9), %vm558_vm2, %vm557_vm3 }
  0x3c   : > { %vm561_vm6 = vmor (!%p8931_p9), %vm560_vm4, %vm559_vm5 }
  0x3d   : > { %s546_s21 = scalar_lea.vmem %s14654_s29, %s14663_s19  ;;  %562 = vst.msk [vmem:[#allocation2 + $0x8] sm:$0xff] (!%p8931_p9), %vm561_vm6, %v11298_v0 }
  0x41 PF: > { %v11492_v1 = vld [vmem:[%s14626_s1] sm:$0xff]  ;;  %v11497_v2 = vld [vmem:[%s14626_s1 + $0x8] sm:$0xff]  ;;  %v11502_v3 = vld [vmem:[%s14626_s1 + $0x10] sm:$0xff]  ;;  %s11574_s20 = smov 0  }
  0x42   : > { %v11507_v4 = vld [vmem:[%s14626_s1 + $0x18] sm:$0xff]  ;;  %v11512_v5 = vld [vmem:[%s14626_s1 + $0x20] sm:$0xff]  ;;  %v11517_v6 = vld [vmem:[%s14626_s1 + $0x28] sm:$0xff] }
  0x43   : > { %v11522_v7 = vld [vmem:[%s14626_s1 + $0x30] sm:$0xff]  ;;  %v11527_v8 = vld [vmem:[%s14626_s1 + $0x38] sm:$0xff]  ;;  %v11532_v9 = vld [vmem:[%s14626_s1 + $0x40] sm:$0xff] }
  0x44   : > { %v11537_v10 = vld [vmem:[%s14626_s1 + $0x48] sm:$0xff]  ;;  %v11542_v11 = vld [vmem:[%s14626_s1 + $0x50] sm:$0xff]  ;;  %v11547_v12 = vld [vmem:[%s14626_s1 + $0x58] sm:$0xff] }
  0x45   : > { %v11552_v13 = vld [vmem:[%s14626_s1 + $0x60] sm:$0xff]  ;;  %v11557_v14 = vld [vmem:[%s14626_s1 + $0x68] sm:$0xff]  ;;  %v11562_v15 = vld [vmem:[%s14626_s1 + $0x70] sm:$0xff] }
  0x46   : > { %v11567_v16 = vld [vmem:[%s14626_s1 + $0x78] sm:$0xff]  ;;  %v11572_v17 = vld [vmem:[%s14627_s2] sm:$0xff] }
  0x47 LB: >> { %v8933_v18 = vcombine.high %v11492_v1, %v11512_v5  ;;  %v8932_v19 = vcombine.low %v11492_v1, %v11512_v5  ;;  %v8941_v20 = vcombine.high %v11532_v9, %v11552_v13  ;;  %v8935_v21 = vcombine.high %v11497_v2, %v11517_v6  ;;  %s9771_s27 = sshll.u32 %s11293_s20, 11  ;;  %s586_s29 = scalar_lea.vmem %s546_s21, %s11293_s20  ;;  %s11293_s20 = sphi %s11574_s20, %s585_s20  }
  0x48   : >> { %v8934_v22 = vcombine.low %v11497_v2, %v11517_v6  ;;  %v11299_v23 = vmov 0   ;;  %v8943_v24 = vcombine.high %v11537_v10, %v11557_v14  ;;  %v8940_v25 = vcombine.low %v11532_v9, %v11552_v13  ;;  %s11608_s30 = scalar_lea.vmem %s495_s28, %s9771_s27 [#allocation3]  ;;  %v587_v29 = vld [vmem:[%s586_s29] sm:$0x1]  ;;  %s585_s20 = sadd.s32 1, %s11293_s20  }
  0x49   : >> { %713 = vmatprep.subr.bf16.mxu0 %v8933_v18  ;;  %745 = vmatprep.mubr.bf16.mxu0 %v11299_v23  ;;  %v8942_v26 = vcombine.low %v11537_v10, %v11557_v14  ;;  %v8937_v27 = vcombine.high %v11502_v3, %v11522_v7  ;;  %v8939_v28 = vcombine.high %v11507_v4, %v11527_v8  ;;  %vm709_vm7 = vcmask 261120   ;;  %v897_v33 = vld [vmem:[%s11608_s30 + $0x8] sm:$0xff]  ;;  %v899_v36 = vld [vmem:[%s11608_s30 + $0x18] sm:$0xff]  ;;  %v896_v38 = vld [vmem:[%s11608_s30] sm:$0xff]  ;;  %p582_p7 = scmp.ge.s32.totalorder %s585_s20, 6  }
  0x4a   : >> { %714 = vmatpush1.bf16.msra.mxu0 %v8932_v19  ;;  %754 = vmatprep.subr.bf16.mxu1 %v8935_v21  ;;  %v8936_v30 = vcombine.low %v11502_v3, %v11522_v7  ;;  %v8945_v31 = vcombine.high %v11542_v11, %v11562_v15  ;;  %v8938_v32 = vcombine.low %v11507_v4, %v11527_v8  ;;  %v1153_v37 = vunpack.c.l.s8.bf16 %v897_v33  ;;  %v898_v41 = vld [vmem:[%s11608_s30 + $0x10] sm:$0xff]  ;;  %v905_v45 = vld [vmem:[%s11608_s30 + $0x48] sm:$0xff]  ;;  %v907_v48 = vld [vmem:[%s11608_s30 + $0x58] sm:$0xff]  ;;  %p8954_p4 = scmp.ne.s32.totalorder (%p582_p7), %s11407_s25, 5 }
  0x4b   : >> { %715 = vmatprep.subr.bf16.mxu0 %v8941_v20  ;;  %755 = vmatpush1.bf16.msra.mxu1 %v8934_v22  ;;  %v8947_v34 = vcombine.high %v11547_v12, %v11567_v16  ;;  %v8944_v35 = vcombine.low %v11542_v11, %v11562_v15  ;;  %v8946_v39 = vcombine.low %v11547_v12, %v11567_v16  ;;  %v1155_v40 = vunpack.c.l.s8.bf16 %v899_v36  ;;  %v904_v50 = vld [vmem:[%s11608_s30 + $0x40] sm:$0xff]  ;;  %v906_v53 = vld [vmem:[%s11608_s30 + $0x50] sm:$0xff]  ;;  %v913_v57 = vld [vmem:[%s11608_s30 + $0x88] sm:$0xff] }
  0x4c   : >> { %756 = vmatprep.subr.bf16.mxu1 %v8943_v24  ;;  %786 = vmatprep.mubr.bf16.mxu1 %v11299_v23  ;;  %v1152_v42 = vunpack.c.l.s8.bf16 %v896_v38  ;;  %v1161_v43 = vunpack.c.h.s8.bf16 %v897_v33  ;;  %v1154_v44 = vunpack.c.l.s8.bf16 %v898_v41  ;;  %v1163_v46 = vunpack.c.h.s8.bf16 %v899_v36  ;;  %v915_v60 = vld [vmem:[%s11608_s30 + $0x98] sm:$0xff]  ;;  %v912_v62 = vld [vmem:[%s11608_s30 + $0x80] sm:$0xff]  ;;  %v914_v18 = vld [vmem:[%s11608_s30 + $0x90] sm:$0xff] }
  0x4d   : >> { %v1160_v47 = vunpack.c.h.s8.bf16 %v896_v38  ;;  %v1169_v49 = vunpack.c.l.s8.bf16 %v905_v45  ;;  %v1162_v51 = vunpack.c.h.s8.bf16 %v898_v41  ;;  %v1171_v52 = vunpack.c.l.s8.bf16 %v907_v48  ;;  %v921_v22 = vld [vmem:[%s11608_s30 + $0xc8] sm:$0xff] }
  0x4e   : >> { %716 = vmatpush1.bf16.msra.mxu0 %v8940_v25  ;;  %v1168_v54 = vunpack.c.l.s8.bf16 %v904_v50  ;;  %v1177_v55 = vunpack.c.h.s8.bf16 %v905_v45  ;;  %v1170_v56 = vunpack.c.l.s8.bf16 %v906_v53  ;;  %v1179_v58 = vunpack.c.h.s8.bf16 %v907_v48  ;;  %v923_v25 = vld [vmem:[%s11608_s30 + $0xd8] sm:$0xff] }
  0x4f   : >> { %757 = vmatpush1.bf16.msra.mxu1 %v8942_v26  ;;  %795 = vmatprep.subr.bf16.mxu0 %v8937_v27  ;;  %v1176_v59 = vunpack.c.h.s8.bf16 %v904_v50  ;;  %v1185_v61 = vunpack.c.l.s8.bf16 %v913_v57  ;;  %v1178_v63 = vunpack.c.h.s8.bf16 %v906_v53  ;;  %v1187_v0 = vunpack.c.l.s8.bf16 %v915_v60  ;;  %v920_v27 = vld [vmem:[%s11608_s30 + $0xc0] sm:$0xff] }
  0x50   : >> { %836 = vmatprep.subr.bf16.mxu1 %v8939_v28  ;;  %v1184_v19 = vunpack.c.l.s8.bf16 %v912_v62  ;;  %v1193_v20 = vunpack.c.h.s8.bf16 %v913_v57  ;;  %v1186_v21 = vunpack.c.l.s8.bf16 %v914_v18  ;;  %v1192_v24 = vunpack.c.h.s8.bf16 %v912_v62 }
  0x51   : >> { %8948 = vmatmul.mubr.msk.bf16.vlgmr.msra.gmra.mrb[0].mxu0 %vm709_vm7, %v587_v29  ;;  %v1201_v26 = vunpack.c.l.s8.bf16 %v921_v22  ;;  %v1194_v28 = vunpack.c.h.s8.bf16 %v914_v18  ;;  %v1208_v36 = vunpack.c.h.s8.bf16 %v920_v27  ;;  %vm2369_vm8 = vcmask 1041408  }
  0x52   : >> { %8949 = vmatmul.mubr.msk.bf16.vlgmr.msra.gmra.mrb[0].mxu1 %vm709_vm7, %v587_v29  ;;  %796 = vmatpush1.bf16.msra.mxu0 %v8936_v30  ;;  %v922_v30 = vld [vmem:[%s11608_s30 + $0xd0] sm:$0xff]  ;;  %vm2370_vm9 = vcmask 1043458   ;;  %vm2372_vm11 = vcmask 1045508   ;;  %vm2374_vm13 = vcmask 31750  }
  0x53   : >> { %797 = vmatprep.subr.bf16.mxu0 %v8945_v31  ;;  %827 = vmatprep.mubr.bf16.mxu0 %v11299_v23  ;;  %v1200_v31 = vunpack.c.l.s8.bf16 %v920_v27  ;;  %v1202_v33 = vunpack.c.l.s8.bf16 %v922_v30  ;;  %v955_v27 = vld [vmem:[%s11608_s30 + $0x1d8] sm:$0xff]  ;;  %vm2371_vm10 = vmor %vm2370_vm9, %vm2369_vm8 }
  0x54   : >> { %837 = vmatpush1.bf16.msra.mxu1 %v8938_v32  ;;  %868 = vmatprep.mubr.bf16.mxu1 %v11299_v23  ;;  %v1195_v23 = vunpack.c.h.s8.bf16 %v915_v60  ;;  %v1209_v32 = vunpack.c.h.s8.bf16 %v921_v22  ;;  %vm2373_vm12 = vmor %vm2372_vm11, %vm2371_vm10 }
  0x55   : >> { %838 = vmatprep.subr.bf16.mxu1 %v8947_v34  ;;  %v929_v34 = vld [vmem:[%s11608_s30 + $0x108] sm:$0xff]  ;;  %vm2375_vm14 = vmor %vm2374_vm13, %vm2373_vm12 }
  0x56   : >> { %798 = vmatpush1.bf16.msra.mxu0 %v8944_v35  ;;  %v1211_v35 = vunpack.c.h.s8.bf16 %v923_v25  ;;  %v1217_v38 = vunpack.c.l.s8.bf16 %v929_v34 }
  0x57   : >> { %1666 = vmatprep.subr.bf16.mxu0 %v1153_v37  ;;  %v931_v37 = vld [vmem:[%s11608_s30 + $0x118] sm:$0xff] }
  0x58   : >> { %839 = vmatpush1.bf16.msra.mxu1 %v8946_v39  ;;  %v928_v39 = vld [vmem:[%s11608_s30 + $0x100] sm:$0xff]  ;;  %v1219_v41 = vunpack.c.l.s8.bf16 %v931_v37 }
  0x59   : >> { %8950 = vmatmul.mubr.msk.bf16.vlgmr.msra.gmra.mrb[4].mxu0 %vm709_vm7, %v587_v29  ;;  %1830 = vmatprep.subr.bf16.mxu1 %v1155_v40  ;;  %v1210_v40 = vunpack.c.h.s8.bf16 %v922_v30  ;;  %v1224_v48 = vunpack.c.h.s8.bf16 %v928_v39  ;;  %v952_v30 = vld [vmem:[%s11608_s30 + $0x1c0] sm:$0xff] }
  0x5a   : >> { %1667 = vmatpush1.bf16.msra.mxu0 %v1152_v42  ;;  %v930_v42 = vld [vmem:[%s11608_s30 + $0x110] sm:$0xff] }
  0x5b   : >> { %8951 = vmatmul.mubr.msk.bf16.vlgmr.msra.gmra.mrb[4].mxu1 %vm709_vm7, %v587_v29  ;;  %1668 = vmatprep.subr.bf16.mxu0 %v1161_v43  ;;  %v1203_v29 = vunpack.c.l.s8.bf16 %v923_v25  ;;  %v1216_v43 = vunpack.c.l.s8.bf16 %v928_v39  ;;  %v1218_v45 = vunpack.c.l.s8.bf16 %v930_v42  ;;  %v963_v39 = vld [vmem:[%s11608_s30 + $0x218] sm:$0xff] }
  0x5c   : >> { %1831 = vmatpush1.bf16.msra.mxu1 %v1154_v44  ;;  %v1225_v44 = vunpack.c.h.s8.bf16 %v929_v34 }
  0x5d   : >> { %1832 = vmatprep.subr.bf16.mxu1 %v1163_v46  ;;  %v937_v46 = vld [vmem:[%s11608_s30 + $0x148] sm:$0xff] }
  0x5e   : >> { %1669 = vmatpush1.bf16.msra.mxu0 %v1160_v47  ;;  %v1227_v47 = vunpack.c.h.s8.bf16 %v931_v37  ;;  %v1233_v50 = vunpack.c.l.s8.bf16 %v937_v46 }
  0x5f   : >> { %1670 = vmatprep.subr.bf16.mxu0 %v1169_v49  ;;  %v939_v49 = vld [vmem:[%s11608_s30 + $0x158] sm:$0xff] }
  0x60   : >> { %1833 = vmatpush1.bf16.msra.mxu1 %v1162_v51  ;;  %v936_v51 = vld [vmem:[%s11608_s30 + $0x140] sm:$0xff]  ;;  %v1235_v53 = vunpack.c.l.s8.bf16 %v939_v49 }
  0x61   : >> { %1834 = vmatprep.subr.bf16.mxu1 %v1171_v52  ;;  %v1226_v52 = vunpack.c.h.s8.bf16 %v930_v42  ;;  %v1240_v60 = vunpack.c.h.s8.bf16 %v936_v51  ;;  %v589_v42 = vlaneseq }
  0x62   : >> { %1671 = vmatpush1.bf16.msra.mxu0 %v1168_v54  ;;  %v938_v54 = vld [vmem:[%s11608_s30 + $0x150] sm:$0xff] }
  0x63   : >> { %1672 = vmatprep.subr.bf16.mxu0 %v1177_v55  ;;  %v1232_v55 = vunpack.c.l.s8.bf16 %v936_v51  ;;  %v1234_v57 = vunpack.c.l.s8.bf16 %v938_v54 }
  0x64   : >> { %1835 = vmatpush1.bf16.msra.mxu1 %v1170_v56  ;;  %v1241_v56 = vunpack.c.h.s8.bf16 %v937_v46 }
  0x65   : >> { %1836 = vmatprep.subr.bf16.mxu1 %v1179_v58  ;;  %v945_v58 = vld [vmem:[%s11608_s30 + $0x188] sm:$0xff] }
  0x66   : >> { %1673 = vmatpush1.bf16.msra.mxu0 %v1176_v59  ;;  %v1243_v59 = vunpack.c.h.s8.bf16 %v939_v49  ;;  %v1249_v62 = vunpack.c.l.s8.bf16 %v945_v58 }
  0x67   : >> { %1674 = vmatprep.subr.bf16.mxu0 %v1185_v61  ;;  %v947_v61 = vld [vmem:[%s11608_s30 + $0x198] sm:$0xff] }
  0x68   : >> { %1837 = vmatpush1.bf16.msra.mxu1 %v1178_v63  ;;  %v944_v63 = vld [vmem:[%s11608_s30 + $0x180] sm:$0xff]  ;;  %v1251_v18 = vunpack.c.l.s8.bf16 %v947_v61 }
  0x69   : >> { %1838 = vmatprep.subr.bf16.mxu1 %v1187_v0  ;;  %v1242_v0 = vunpack.c.h.s8.bf16 %v938_v54 }
  0x6a   : >> { %1675 = vmatpush1.bf16.msra.mxu0 %v1184_v19  ;;  %v946_v19 = vld [vmem:[%s11608_s30 + $0x190] sm:$0xff] }
  0x6b   : >> { %1676 = vmatprep.subr.bf16.mxu0 %v1193_v20  ;;  %v1248_v20 = vunpack.c.l.s8.bf16 %v944_v63  ;;  %v1250_v22 = vunpack.c.l.s8.bf16 %v946_v19  ;;  %v1258_v25 = vunpack.c.h.s8.bf16 %v946_v19 }
  0x6c   : >> { %1839 = vmatpush1.bf16.msra.mxu1 %v1186_v21  ;;  %v1257_v21 = vunpack.c.h.s8.bf16 %v945_v58 }
  0x6d   : >> { %1840 = vmatprep.subr.bf16.mxu1 %v1195_v23  ;;  %v1259_v23 = vunpack.c.h.s8.bf16 %v947_v61 }
  0x6e   : >> { %1677 = vmatpush1.bf16.msra.mxu0 %v1192_v24  ;;  %v1256_v24 = vunpack.c.h.s8.bf16 %v944_v63 }
  0x6f   : >> { %1678 = vmatprep.subr.bf16.mxu0 %v1201_v26  ;;  %v953_v26 = vld [vmem:[%s11608_s30 + $0x1c8] sm:$0xff] }
  0x70   : >> { %1841 = vmatpush1.bf16.msra.mxu1 %v1194_v28  ;;  %v1265_v28 = vunpack.c.l.s8.bf16 %v953_v26  ;;  %v1273_v34 = vunpack.c.h.s8.bf16 %v953_v26  ;;  %v971_v26 = vld [vmem:[%s11608_s30 + $0x258] sm:$0xff] }
  0x71   : >> { %1842 = vmatprep.subr.bf16.mxu1 %v1203_v29  ;;  %v1267_v29 = vunpack.c.l.s8.bf16 %v955_v27 }
  0x72   : >> { %1679 = vmatpush1.bf16.msra.mxu0 %v1200_v31  ;;  %v954_v31 = vld [vmem:[%s11608_s30 + $0x1d0] sm:$0xff] }
  0x73   : >> { %1680 = vmatprep.subr.bf16.mxu0 %v1209_v32  ;;  %v1264_v32 = vunpack.c.l.s8.bf16 %v952_v30  ;;  %v1274_v37 = vunpack.c.h.s8.bf16 %v954_v31 }
  0x74   : >> { %1843 = vmatpush1.bf16.msra.mxu1 %v1202_v33  ;;  %v1266_v33 = vunpack.c.l.s8.bf16 %v954_v31 }
  0x75   : >> { %1844 = vmatprep.subr.bf16.mxu1 %v1211_v35  ;;  %v1275_v35 = vunpack.c.h.s8.bf16 %v955_v27 }
  0x76   : >> { %1681 = vmatpush1.bf16.msra.mxu0 %v1208_v36  ;;  %v1272_v36 = vunpack.c.h.s8.bf16 %v952_v30 }
  0x77   : >> { %1682 = vmatprep.subr.bf16.mxu0 %v1217_v38  ;;  %v961_v38 = vld [vmem:[%s11608_s30 + $0x208] sm:$0xff] }
  0x78   : >> { %1845 = vmatpush1.bf16.msra.mxu1 %v1210_v40  ;;  %v1281_v40 = vunpack.c.l.s8.bf16 %v961_v38 }
  0x79   : >> { %1846 = vmatprep.subr.bf16.mxu1 %v1219_v41  ;;  %v1283_v41 = vunpack.c.l.s8.bf16 %v963_v39 }
  0x7a   : >> { %1683 = vmatpush1.bf16.msra.mxu0 %v1216_v43  ;;  %v11660_v43 = vshrl.u32 %v589_v42, 7  ;;  %v977_v42 = vld [vmem:[%s11608_s30 + $0x288] sm:$0xff] }
  0x7b   : >> { %1684 = vmatprep.subr.bf16.mxu0 %v1225_v44 }
  0x7c   : >> { %1847 = vmatpush1.bf16.msra.mxu1 %v1218_v45  ;;  %v11663_v44 = vsub.s32 0, %v11660_v43  ;;  %v11666_v45 = vsub.s32 1, %v11660_v43  ;;  %v11669_v46 = vsub.s32 3, %v11660_v43 }
  0x7d   : >> { %1848 = vmatprep.subr.bf16.mxu1 %v1227_v47 }
  0x7e   : >> { %1685 = vmatpush1.bf16.msra.mxu0 %v1224_v48  ;;  %v592_v47 = vrot.slane %v11572_v17, %v11663_v44  ;;  %v596_v48 = vrot.slane %v11572_v17, %v11666_v45  ;;  %v604_v49 = vrot.slane %v11572_v17, %v11669_v46 }
  0x7f   : >> { %1686 = vmatprep.subr.bf16.mxu0 %v1233_v50 }
  0x80   : >> { %1849 = vmatpush1.bf16.msra.mxu1 %v1226_v52 }
  0x81   : >> { %1850 = vmatprep.subr.bf16.mxu1 %v1235_v53 }
  0x82   : >> { %1687 = vmatpush1.bf16.msra.mxu0 %v1232_v55 }
  0x83   : >> { %1688 = vmatprep.subr.bf16.mxu0 %v1241_v56 }
  0x84   : >> { %1851 = vmatpush1.bf16.msra.mxu1 %v1234_v57 }
  0x85   : >> { %1852 = vmatprep.subr.bf16.mxu1 %v1243_v59  ;;  %v960_v59 = vld [vmem:[%s11608_s30 + $0x200] sm:$0xff] }
  0x86   : >> { %1689 = vmatpush1.bf16.msra.mxu0 %v1240_v60  ;;  %v962_v60 = vld [vmem:[%s11608_s30 + $0x210] sm:$0xff]  ;;  %v1288_v30 = vunpack.c.h.s8.bf16 %v960_v59 }
  0x87   : >> { %1690 = vmatprep.subr.bf16.mxu0 %v1249_v62  ;;  %v1290_v31 = vunpack.c.h.s8.bf16 %v962_v60 }
  0x88   : >> { %1853 = vmatpush1.bf16.msra.mxu1 %v1242_v0 }
  0x89   : >> { %1854 = vmatprep.subr.bf16.mxu1 %v1251_v18 }
  0x8a   : >> { %1691 = vmatpush1.bf16.msra.mxu0 %v1248_v20  ;;  %v1280_v20 = vunpack.c.l.s8.bf16 %v960_v59 }
  0x8b   : >> { %1692 = vmatprep.subr.bf16.mxu0 %v1257_v21  ;;  %v1282_v21 = vunpack.c.l.s8.bf16 %v962_v60  ;;  %v985_v60 = vld [vmem:[%s11608_s30 + $0x2c8] sm:$0xff] }
  0x8c   : >> { %1855 = vmatpush1.bf16.msra.mxu1 %v1250_v22 }
  0x8d   : >> { %1856 = vmatprep.subr.bf16.mxu1 %v1259_v23  ;;  %v1289_v23 = vunpack.c.h.s8.bf16 %v961_v38 }
  0x8e   : >> { %1693 = vmatpush1.bf16.msra.mxu0 %v1256_v24  ;;  %v1291_v24 = vunpack.c.h.s8.bf16 %v963_v39 }
  0x8f   : >> { %1694 = vmatprep.subr.bf16.mxu0 %v1265_v28 }
  0x90   : >> { %1857 = vmatpush1.bf16.msra.mxu1 %v1258_v25  ;;  %v969_v25 = vld [vmem:[%s11608_s30 + $0x248] sm:$0xff] }
  0x91   : >> { %1858 = vmatprep.subr.bf16.mxu1 %v1267_v29 }
  0x92   : >> { %1695 = vmatpush1.bf16.msra.mxu0 %v1264_v32 }
  0x93   : >> { %1696 = vmatprep.subr.bf16.mxu0 %v1273_v34  ;;  %v1299_v34 = vunpack.c.l.s8.bf16 %v971_v26 }
  0x94   : >> { %1859 = vmatpush1.bf16.msra.mxu1 %v1266_v33  ;;  %v1297_v33 = vunpack.c.l.s8.bf16 %v969_v25 }
  0x95   : >> { %1860 = vmatprep.subr.bf16.mxu1 %v1275_v35  ;;  %v968_v35 = vld [vmem:[%s11608_s30 + $0x240] sm:$0xff] }
  0x96   : >> { %1697 = vmatpush1.bf16.msra.mxu0 %v1272_v36  ;;  %v970_v36 = vld [vmem:[%s11608_s30 + $0x250] sm:$0xff]  ;;  %v1296_v38 = vunpack.c.l.s8.bf16 %v968_v35 }
  0x97   : >> { %1707 = vmatprep.subr.bf16.mxu0 %v1281_v40  ;;  %v1298_v39 = vunpack.c.l.s8.bf16 %v970_v36  ;;  %v1305_v40 = vunpack.c.h.s8.bf16 %v969_v25 }
  0x98   : >> { %1861 = vmatpush1.bf16.msra.mxu1 %v1274_v37 }
  0x99   : >> { %1871 = vmatprep.subr.bf16.mxu1 %v1283_v41  ;;  %v1307_v41 = vunpack.c.h.s8.bf16 %v971_v26 }
 0x124   : >> { %v747_v50 = vpop.f32.mrb[0].mxu0 }
 0x125   : >> { %v748_v51 = vadd.f32 %v747_v50, %v592_v47  ;;  %v749_v52 = vpop.f32.mrb[1].mxu0  ;;  %v11677_v53 = vpop.f32.mrb[0].mxu1  ;;  %v979_v47 = vld [vmem:[%s11608_s30 + $0x298] sm:$0xff]  ;;  %v1313_v50 = vunpack.c.l.s8.bf16 %v977_v42 }
 0x126   : >> { %v750_v54 = vadd.f32 %v749_v52, %v596_v48  ;;  %v751_v55 = vpop.f32.mrb[2].mxu0  ;;  %v790_v56 = vpop.f32.mrb[1].mxu1  ;;  %v1304_v48 = vunpack.c.h.s8.bf16 %v968_v35  ;;  %v976_v52 = vld [vmem:[%s11608_s30 + $0x280] sm:$0xff] }
 0x127   : >> { %v877_v57 = vmax.f32 %v748_v51, 0.0  ;;  %v752_v58 = vpop.f32.mrb[3].mxu0  ;;  %v791_v61 = vadd.f32 %v790_v56, %v604_v49  ;;  %v792_v62 = vpop.f32.mrb[2].mxu1  ;;  %v1306_v49 = vunpack.c.h.s8.bf16 %v970_v36  ;;  %v1315_v51 = vunpack.c.l.s8.bf16 %v979_v47 }
 0x128   : >> { %v878_v63 = vmax.f32 %v750_v54, 0.0  ;;  %v793_v0 = vpop.f32.mrb[3].mxu1  ;;  %v978_v54 = vld [vmem:[%s11608_s30 + $0x290] sm:$0xff]  ;;  %v1312_v55 = vunpack.c.l.s8.bf16 %v976_v52  ;;  %v1323_v58 = vunpack.c.h.s8.bf16 %v979_v47  ;;  %v1320_v62 = vunpack.c.h.s8.bf16 %v976_v52 }
 0x129   : >> { %v880_v18 = vmax.f32 %v791_v61, 0.0  ;;  %v11683_v22 = vpack.c.bf16 %v877_v57, %v877_v57  ;;  %v1314_v56 = vunpack.c.l.s8.bf16 %v978_v54  ;;  %v1321_v57 = vunpack.c.h.s8.bf16 %v977_v42  ;;  %v987_v61 = vld [vmem:[%s11608_s30 + $0x2d8] sm:$0xff] }
 0x12a   : >> { %v11681_v19 = vpack.c.bf16 %v878_v63, %v878_v63  ;;  %v1322_v63 = vunpack.c.h.s8.bf16 %v978_v54 }
 0x12b   : >> { %v11689_v27 = vpack.c.bf16 %v880_v18, %v880_v18  ;;  %v1329_v18 = vunpack.c.l.s8.bf16 %v985_v60 }
 0x12c   : >> { %1698 = vmatprep.mubr.bf16.mxu0 %v11681_v19  ;;  %1862 = vmatprep.mubr.bf16.mxu1 %v11681_v19  ;;  %v11691_v28 = vpop.f32.mrb[4].mxu0 }
 0x12d   : >> { %1699 = vmatmul.mubr.bf16.vlgmr.msra.gmra.mrb[8].mxu0 %v11683_v22  ;;  %1863 = vmatmul.mubr.bf16.vlgmr.msra.gmra.mrb[8].mxu1 %v11683_v22  ;;  %v11695_v29 = vpop.f32.mrb[5].mxu0 }
 0x12e   : >> { %1708 = vmatpush1.bf16.msra.mxu0 %v1280_v20  ;;  %1872 = vmatpush1.bf16.msra.mxu1 %v1282_v21  ;;  %v833_v32 = vpop.f32.mrb[6].mxu0  ;;  %v11705_v59 = vpop.f32.mrb[4].mxu1  ;;  %v1331_v20 = vunpack.c.l.s8.bf16 %v987_v61  ;;  %v984_v21 = vld [vmem:[%s11608_s30 + $0x2c0] sm:$0xff] }
 0x12f   : >> { %1709 = vmatprep.subr.bf16.mxu0 %v1289_v23  ;;  %1873 = vmatprep.subr.bf16.mxu1 %v1291_v24  ;;  %v834_v37 = vpop.f32.mrb[7].mxu0  ;;  %v11709_v0 = vpop.f32.mrb[5].mxu1  ;;  %v986_v23 = vld [vmem:[%s11608_s30 + $0x2d0] sm:$0xff]  ;;  %v1328_v26 = vunpack.c.l.s8.bf16 %v984_v21  ;;  %v1339_v32 = vunpack.c.h.s8.bf16 %v987_v61  ;;  %v1336_v35 = vunpack.c.h.s8.bf16 %v984_v21 }
 0x130   : >> { %1739 = vmatprep.mubr.bf16.mxu0 %v11689_v27  ;;  %1903 = vmatprep.mubr.bf16.mxu1 %v11689_v27  ;;  %v874_v24 = vpop.f32.mrb[6].mxu1  ;;  %v1338_v36 = vunpack.c.h.s8.bf16 %v986_v23 }
 0x131   : >> { %v875_v25 = vpop.f32.mrb[7].mxu1 }
 0x132   : >> { %1710 = vmatpush1.bf16.msra.mxu0 %v1288_v30  ;;  %1874 = vmatpush1.bf16.msra.mxu1 %v1290_v31  ;;  %v1330_v30 = vunpack.c.l.s8.bf16 %v986_v23  ;;  %v1337_v31 = vunpack.c.h.s8.bf16 %v985_v60  ;;  %v1008_v25 = vld [vmem:[%s11608_s30 + $0x380] sm:$0xff] }
 0x133   : >> { %1711 = vmatprep.subr.bf16.mxu0 %v1297_v33  ;;  %1875 = vmatprep.subr.bf16.mxu1 %v1299_v34  ;;  %v993_v33 = vld [vmem:[%s11608_s30 + $0x308] sm:$0xff]  ;;  %v995_v34 = vld [vmem:[%s11608_s30 + $0x318] sm:$0xff] }
 0x134   : >> { %v1345_v37 = vunpack.c.l.s8.bf16 %v993_v33  ;;  %v1353_v47 = vunpack.c.h.s8.bf16 %v993_v33 }
 0x136   : >> { %1712 = vmatpush1.bf16.msra.mxu0 %v1296_v38  ;;  %1876 = vmatpush1.bf16.msra.mxu1 %v1298_v39  ;;  %v1347_v38 = vunpack.c.l.s8.bf16 %v995_v34  ;;  %v992_v39 = vld [vmem:[%s11608_s30 + $0x300] sm:$0xff] }
 0x137   : >> { %1713 = vmatprep.subr.bf16.mxu0 %v1305_v40  ;;  %1877 = vmatprep.subr.bf16.mxu1 %v1307_v41  ;;  %v994_v40 = vld [vmem:[%s11608_s30 + $0x310] sm:$0xff]  ;;  %v1344_v41 = vunpack.c.l.s8.bf16 %v992_v39 }
 0x138   : >> { %v1346_v42 = vunpack.c.l.s8.bf16 %v994_v40  ;;  %v1354_v52 = vunpack.c.h.s8.bf16 %v994_v40 }
 0x13a   : >> { %1714 = vmatpush1.bf16.msra.mxu0 %v1304_v48  ;;  %1878 = vmatpush1.bf16.msra.mxu1 %v1306_v49  ;;  %v1355_v48 = vunpack.c.h.s8.bf16 %v995_v34  ;;  %v1001_v49 = vld [vmem:[%s11608_s30 + $0x348] sm:$0xff] }
 0x13b   : >> { %1715 = vmatprep.subr.bf16.mxu0 %v1313_v50  ;;  %1879 = vmatprep.subr.bf16.mxu1 %v1315_v51  ;;  %v1003_v50 = vld [vmem:[%s11608_s30 + $0x358] sm:$0xff]  ;;  %v1352_v51 = vunpack.c.h.s8.bf16 %v992_v39  ;;  %v1361_v54 = vunpack.c.l.s8.bf16 %v1001_v49  ;;  %v1369_v61 = vunpack.c.h.s8.bf16 %v1001_v49  ;;  %v1384_v39 = vunpack.c.h.s8.bf16 %v1008_v25 }
 0x13e   : >> { %1716 = vmatpush1.bf16.msra.mxu0 %v1312_v55  ;;  %1880 = vmatpush1.bf16.msra.mxu1 %v1314_v56  ;;  %v1363_v55 = vunpack.c.l.s8.bf16 %v1003_v50  ;;  %v1000_v56 = vld [vmem:[%s11608_s30 + $0x340] sm:$0xff] }
 0x13f   : >> { %1717 = vmatprep.subr.bf16.mxu0 %v1321_v57  ;;  %1881 = vmatprep.subr.bf16.mxu1 %v1323_v58  ;;  %v1002_v57 = vld [vmem:[%s11608_s30 + $0x350] sm:$0xff]  ;;  %v1360_v58 = vunpack.c.l.s8.bf16 %v1000_v56 }
 0x140   : >> { %v1362_v60 = vunpack.c.l.s8.bf16 %v1002_v57  ;;  %v1370_v21 = vunpack.c.h.s8.bf16 %v1002_v57  ;;  %v1027_v57 = vld [vmem:[%s11608_s30 + $0x418] sm:$0xff] }
 0x142   : >> { %1718 = vmatpush1.bf16.msra.mxu0 %v1320_v62  ;;  %1882 = vmatpush1.bf16.msra.mxu1 %v1322_v63  ;;  %v1371_v62 = vunpack.c.h.s8.bf16 %v1003_v50  ;;  %v1009_v63 = vld [vmem:[%s11608_s30 + $0x388] sm:$0xff] }
 0x143   : >> { %1719 = vmatprep.subr.bf16.mxu0 %v1329_v18  ;;  %1883 = vmatprep.subr.bf16.mxu1 %v1331_v20  ;;  %v1011_v18 = vld [vmem:[%s11608_s30 + $0x398] sm:$0xff]  ;;  %v1368_v20 = vunpack.c.h.s8.bf16 %v1000_v56  ;;  %v1377_v23 = vunpack.c.l.s8.bf16 %v1009_v63  ;;  %v1385_v33 = vunpack.c.h.s8.bf16 %v1009_v63  ;;  %v1025_v56 = vld [vmem:[%s11608_s30 + $0x408] sm:$0xff]  ;;  %v1411_v63 = vunpack.c.l.s8.bf16 %v1027_v57 }
 0x144   : >> { %v1379_v24 = vunpack.c.l.s8.bf16 %v1011_v18  ;;  %v1387_v34 = vunpack.c.h.s8.bf16 %v1011_v18  ;;  %v1024_v18 = vld [vmem:[%s11608_s30 + $0x400] sm:$0xff] }
 0x146   : >> { %1720 = vmatpush1.bf16.msra.mxu0 %v1328_v26  ;;  %1884 = vmatpush1.bf16.msra.mxu1 %v1330_v30  ;;  %v1010_v26 = vld [vmem:[%s11608_s30 + $0x390] sm:$0xff]  ;;  %v11726_v30 = vsub.s32 2, %v11660_v43 }
 0x147   : >> { %1721 = vmatprep.subr.bf16.mxu0 %v1337_v31  ;;  %1885 = vmatprep.subr.bf16.mxu1 %v1339_v32  ;;  %v1376_v31 = vunpack.c.l.s8.bf16 %v1008_v25  ;;  %v1378_v32 = vunpack.c.l.s8.bf16 %v1010_v26  ;;  %v1386_v40 = vunpack.c.h.s8.bf16 %v1010_v26  ;;  %v1417_v25 = vunpack.c.h.s8.bf16 %v1025_v56 }
 0x148   : >> { %v1419_v26 = vunpack.c.h.s8.bf16 %v1027_v57  ;;  %v1042_v57 = vld [vmem:[%s11608_s30 + $0x490] sm:$0xff] }
 0x14a   : >> { %1722 = vmatpush1.bf16.msra.mxu0 %v1336_v35  ;;  %1886 = vmatpush1.bf16.msra.mxu1 %v1338_v36  ;;  %v1017_v35 = vld [vmem:[%s11608_s30 + $0x3c8] sm:$0xff]  ;;  %v1019_v36 = vld [vmem:[%s11608_s30 + $0x3d8] sm:$0xff] }
 0x14b   : >> { %1723 = vmatprep.subr.bf16.mxu0 %v1345_v37  ;;  %1887 = vmatprep.subr.bf16.mxu1 %v1347_v38  ;;  %v11731_v37 = vsub.s32 5, %v11660_v43  ;;  %v600_v38 = vrot.slane %v11572_v17, %v11726_v30 }
 0x14d   : >> { %v612_v49 = vrot.slane %v11572_v17, %v11731_v37  ;;  %v789_v50 = vadd.f32 %v11677_v53, %v600_v38  ;;  %v1409_v53 = vunpack.c.l.s8.bf16 %v1025_v56  ;;  %v1040_v56 = vld [vmem:[%s11608_s30 + $0x480] sm:$0xff] }
 0x14e   : >> { %1724 = vmatpush1.bf16.msra.mxu0 %v1344_v41  ;;  %1888 = vmatpush1.bf16.msra.mxu1 %v1346_v42  ;;  %v1393_v41 = vunpack.c.l.s8.bf16 %v1017_v35  ;;  %v1395_v42 = vunpack.c.l.s8.bf16 %v1019_v36 }
 0x14f   : >> { %1725 = vmatprep.subr.bf16.mxu0 %v1353_v47  ;;  %1889 = vmatprep.subr.bf16.mxu1 %v1355_v48  ;;  %v1016_v47 = vld [vmem:[%s11608_s30 + $0x3c0] sm:$0xff]  ;;  %v1018_v48 = vld [vmem:[%s11608_s30 + $0x3d0] sm:$0xff] }
 0x152   : >> { %1726 = vmatpush1.bf16.msra.mxu0 %v1352_v51  ;;  %1890 = vmatpush1.bf16.msra.mxu1 %v1354_v52  ;;  %v1392_v51 = vunpack.c.l.s8.bf16 %v1016_v47  ;;  %v1394_v52 = vunpack.c.l.s8.bf16 %v1018_v48 }
 0x153   : >> { %1727 = vmatprep.subr.bf16.mxu0 %v1361_v54  ;;  %1891 = vmatprep.subr.bf16.mxu1 %v1363_v55  ;;  %v1401_v54 = vunpack.c.h.s8.bf16 %v1017_v35  ;;  %v1403_v55 = vunpack.c.h.s8.bf16 %v1019_v36 }
 0x156   : >> { %1728 = vmatpush1.bf16.msra.mxu0 %v1360_v58  ;;  %1892 = vmatpush1.bf16.msra.mxu1 %v1362_v60  ;;  %v832_v58 = vadd.f32 %v11695_v29, %v612_v49  ;;  %v879_v60 = vmax.f32 %v789_v50, 0.0  ;;  %v1041_v49 = vld [vmem:[%s11608_s30 + $0x488] sm:$0xff]  ;;  %v1043_v50 = vld [vmem:[%s11608_s30 + $0x498] sm:$0xff] }
 0x157   : >> { %1729 = vmatprep.subr.bf16.mxu0 %v1369_v61  ;;  %1893 = vmatprep.subr.bf16.mxu1 %v1371_v62  ;;  %v1400_v61 = vunpack.c.h.s8.bf16 %v1016_v47  ;;  %v1402_v62 = vunpack.c.h.s8.bf16 %v1018_v48 }
 0x15a   : >> { %1730 = vmatpush1.bf16.msra.mxu0 %v1368_v20  ;;  %1894 = vmatpush1.bf16.msra.mxu1 %v1370_v21  ;;  %v1026_v20 = vld [vmem:[%s11608_s30 + $0x410] sm:$0xff]  ;;  %v882_v21 = vmax.f32 %v832_v58, 0.0  ;;  %v1440_v58 = vunpack.c.l.s8.bf16 %v1040_v56 }
 0x15b   : >> { %1731 = vmatprep.subr.bf16.mxu0 %v1377_v23  ;;  %1895 = vmatprep.subr.bf16.mxu1 %v1379_v24  ;;  %v11745_v23 = vpack.c.bf16 %v879_v60, %v879_v60  ;;  %v1408_v24 = vunpack.c.l.s8.bf16 %v1024_v18  ;;  %v1410_v29 = vunpack.c.l.s8.bf16 %v1026_v20  ;;  %v1418_v35 = vunpack.c.h.s8.bf16 %v1026_v20 }
 0x15c   : >> { %v1442_v60 = vunpack.c.l.s8.bf16 %v1042_v57  ;;  %v1450_v20 = vunpack.c.h.s8.bf16 %v1042_v57 }
 0x15e   : >> { %1732 = vmatpush1.bf16.msra.mxu0 %v1376_v31  ;;  %1896 = vmatpush1.bf16.msra.mxu1 %v1378_v32  ;;  %v1033_v31 = vld [vmem:[%s11608_s30 + $0x448] sm:$0xff]  ;;  %v1035_v32 = vld [vmem:[%s11608_s30 + $0x458] sm:$0xff] }
 0x15f   : >> { %1733 = vmatprep.subr.bf16.mxu0 %v1385_v33  ;;  %1897 = vmatprep.subr.bf16.mxu1 %v1387_v34  ;;  %v11749_v33 = vpack.c.bf16 %v882_v21, %v882_v21  ;;  %v1416_v34 = vunpack.c.h.s8.bf16 %v1024_v18  ;;  %v1425_v36 = vunpack.c.l.s8.bf16 %v1033_v31  ;;  %v1427_v38 = vunpack.c.l.s8.bf16 %v1035_v32 }
 0x160   : >> { %v1433_v47 = vunpack.c.h.s8.bf16 %v1033_v31  ;;  %v1435_v48 = vunpack.c.h.s8.bf16 %v1035_v32  ;;  %v1448_v18 = vunpack.c.h.s8.bf16 %v1040_v56 }
 0x162   : >> { %1734 = vmatpush1.bf16.msra.mxu0 %v1384_v39  ;;  %1898 = vmatpush1.bf16.msra.mxu1 %v1386_v40  ;;  %v1032_v39 = vld [vmem:[%s11608_s30 + $0x440] sm:$0xff]  ;;  %v1034_v40 = vld [vmem:[%s11608_s30 + $0x450] sm:$0xff] }
 0x163   : >> { %1735 = vmatprep.subr.bf16.mxu0 %v1393_v41  ;;  %1899 = vmatprep.subr.bf16.mxu1 %v1395_v42  ;;  %v1424_v41 = vunpack.c.l.s8.bf16 %v1032_v39  ;;  %v1426_v42 = vunpack.c.l.s8.bf16 %v1034_v40 }
 0x166   : >> { %1736 = vmatpush1.bf16.msra.mxu0 %v1392_v51  ;;  %1900 = vmatpush1.bf16.msra.mxu1 %v1394_v52  ;;  %v1432_v51 = vunpack.c.h.s8.bf16 %v1032_v39  ;;  %v1434_v52 = vunpack.c.h.s8.bf16 %v1034_v40 }
 0x167   : >> { %1737 = vmatprep.subr.bf16.mxu0 %v1401_v54  ;;  %1901 = vmatprep.subr.bf16.mxu1 %v1403_v55  ;;  %v1441_v54 = vunpack.c.l.s8.bf16 %v1041_v49  ;;  %v1443_v55 = vunpack.c.l.s8.bf16 %v1043_v50 }
 0x16a   : >> { %1738 = vmatpush1.bf16.msra.mxu0 %v1400_v61  ;;  %1902 = vmatpush1.bf16.msra.mxu1 %v1402_v62  ;;  %v1449_v61 = vunpack.c.h.s8.bf16 %v1041_v49  ;;  %v1451_v62 = vunpack.c.h.s8.bf16 %v1043_v50 }
 0x16b   : >> { %1748 = vmatprep.subr.bf16.mxu0 %v1409_v53  ;;  %1912 = vmatprep.subr.bf16.mxu1 %v1411_v63  ;;  %v1049_v53 = vld [vmem:[%s11608_s30 + $0x4c8] sm:$0xff]  ;;  %v1051_v63 = vld [vmem:[%s11608_s30 + $0x4d8] sm:$0xff] }
 0x16c   : >> { %v1457_v21 = vunpack.c.l.s8.bf16 %v1049_v53  ;;  %v1465_v32 = vunpack.c.h.s8.bf16 %v1049_v53 }
 0x16d   : >> { %1740 = vmatmul.mubr.bf16.vlgmr.msra.gmra.mrb[8].mxu0 %v11745_v23  ;;  %1904 = vmatmul.mubr.bf16.vlgmr.msra.gmra.mrb[8].mxu1 %v11745_v23 }
 0x16e   : >> { %1749 = vmatpush1.bf16.msra.mxu0 %v1408_v24  ;;  %1913 = vmatpush1.bf16.msra.mxu1 %v1410_v29  ;;  %v1459_v24 = vunpack.c.l.s8.bf16 %v1051_v63  ;;  %v1048_v29 = vld [vmem:[%s11608_s30 + $0x4c0] sm:$0xff] }
 0x16f   : >> { %1750 = vmatprep.subr.bf16.mxu0 %v1417_v25  ;;  %1914 = vmatprep.subr.bf16.mxu1 %v1419_v26  ;;  %v1050_v25 = vld [vmem:[%s11608_s30 + $0x4d0] sm:$0xff]  ;;  %v1456_v26 = vunpack.c.l.s8.bf16 %v1048_v29 }
 0x170   : >> { %1780 = vmatprep.mubr.bf16.mxu0 %v11749_v33  ;;  %1944 = vmatprep.mubr.bf16.mxu1 %v11749_v33  ;;  %v1458_v31 = vunpack.c.l.s8.bf16 %v1050_v25  ;;  %v1466_v39 = vunpack.c.h.s8.bf16 %v1050_v25 }
 0x172   : >> { %1751 = vmatpush1.bf16.msra.mxu0 %v1416_v34  ;;  %1915 = vmatpush1.bf16.msra.mxu1 %v1418_v35  ;;  %v1467_v34 = vunpack.c.h.s8.bf16 %v1051_v63  ;;  %v1057_v35 = vld [vmem:[%s11608_s30 + $0x508] sm:$0xff] }
 0x173   : >> { %1752 = vmatprep.subr.bf16.mxu0 %v1425_v36  ;;  %1916 = vmatprep.subr.bf16.mxu1 %v1427_v38  ;;  %v1059_v36 = vld [vmem:[%s11608_s30 + $0x518] sm:$0xff]  ;;  %v1464_v38 = vunpack.c.h.s8.bf16 %v1048_v29  ;;  %v1473_v40 = vunpack.c.l.s8.bf16 %v1057_v35  ;;  %v1481_v50 = vunpack.c.h.s8.bf16 %v1057_v35 }
 0x176   : >> { %1753 = vmatpush1.bf16.msra.mxu0 %v1424_v41  ;;  %1917 = vmatpush1.bf16.msra.mxu1 %v1426_v42  ;;  %v1475_v41 = vunpack.c.l.s8.bf16 %v1059_v36  ;;  %v1056_v42 = vld [vmem:[%s11608_s30 + $0x500] sm:$0xff] }
 0x177   : >> { %1754 = vmatprep.subr.bf16.mxu0 %v1433_v47  ;;  %1918 = vmatprep.subr.bf16.mxu1 %v1435_v48  ;;  %v1058_v47 = vld [vmem:[%s11608_s30 + $0x510] sm:$0xff]  ;;  %v1472_v48 = vunpack.c.l.s8.bf16 %v1056_v42 }
 0x178   : >> { %v1474_v49 = vunpack.c.l.s8.bf16 %v1058_v47  ;;  %v1482_v56 = vunpack.c.h.s8.bf16 %v1058_v47 }
 0x17a   : >> { %1755 = vmatpush1.bf16.msra.mxu0 %v1432_v51  ;;  %1919 = vmatpush1.bf16.msra.mxu1 %v1434_v52  ;;  %v1483_v51 = vunpack.c.h.s8.bf16 %v1059_v36  ;;  %v1065_v52 = vld [vmem:[%s11608_s30 + $0x548] sm:$0xff] }
 0x17b   : >> { %1756 = vmatprep.subr.bf16.mxu0 %v1441_v54  ;;  %1920 = vmatprep.subr.bf16.mxu1 %v1443_v55  ;;  %v1067_v54 = vld [vmem:[%s11608_s30 + $0x558] sm:$0xff]  ;;  %v1480_v55 = vunpack.c.h.s8.bf16 %v1056_v42  ;;  %v1489_v57 = vunpack.c.l.s8.bf16 %v1065_v52  ;;  %v1497_v63 = vunpack.c.h.s8.bf16 %v1065_v52  ;;  %v11783_v42 = vsub.s32 7, %v11660_v43  ;;  %v1080_v52 = vld [vmem:[%s11608_s30 + $0x5c0] sm:$0xff] }
 0x17e   : >> { %1757 = vmatpush1.bf16.msra.mxu0 %v1440_v58  ;;  %1921 = vmatpush1.bf16.msra.mxu1 %v1442_v60  ;;  %v1491_v58 = vunpack.c.l.s8.bf16 %v1067_v54  ;;  %v1064_v60 = vld [vmem:[%s11608_s30 + $0x540] sm:$0xff] }
 0x17f   : >> { %1758 = vmatprep.subr.bf16.mxu0 %v1449_v61  ;;  %1922 = vmatprep.subr.bf16.mxu1 %v1451_v62  ;;  %v1066_v61 = vld [vmem:[%s11608_s30 + $0x550] sm:$0xff]  ;;  %v1488_v62 = vunpack.c.l.s8.bf16 %v1064_v60 }
 0x180   : >> { %v1490_v53 = vunpack.c.l.s8.bf16 %v1066_v61  ;;  %v1498_v29 = vunpack.c.h.s8.bf16 %v1066_v61 }
 0x182   : >> { %1759 = vmatpush1.bf16.msra.mxu0 %v1448_v18  ;;  %1923 = vmatpush1.bf16.msra.mxu1 %v1450_v20  ;;  %v1499_v18 = vunpack.c.h.s8.bf16 %v1067_v54  ;;  %v1073_v20 = vld [vmem:[%s11608_s30 + $0x588] sm:$0xff]  ;;  %v1082_v54 = vld [vmem:[%s11608_s30 + $0x5d0] sm:$0xff] }
 0x183   : >> { %1760 = vmatprep.subr.bf16.mxu0 %v1457_v21  ;;  %1924 = vmatprep.subr.bf16.mxu1 %v1459_v24  ;;  %v1075_v21 = vld [vmem:[%s11608_s30 + $0x598] sm:$0xff]  ;;  %v1496_v24 = vunpack.c.h.s8.bf16 %v1064_v60  ;;  %v1505_v25 = vunpack.c.l.s8.bf16 %v1073_v20 }
 0x186   : >> { %1761 = vmatpush1.bf16.msra.mxu0 %v1456_v26  ;;  %1925 = vmatpush1.bf16.msra.mxu1 %v1458_v31  ;;  %v1507_v26 = vunpack.c.l.s8.bf16 %v1075_v21  ;;  %v1072_v31 = vld [vmem:[%s11608_s30 + $0x580] sm:$0xff] }
 0x187   : >> { %1762 = vmatprep.subr.bf16.mxu0 %v1465_v32  ;;  %1926 = vmatprep.subr.bf16.mxu1 %v1467_v34  ;;  %v1074_v32 = vld [vmem:[%s11608_s30 + $0x590] sm:$0xff]  ;;  %v11778_v34 = vsub.s32 4, %v11660_v43  ;;  %v1504_v35 = vunpack.c.l.s8.bf16 %v1072_v31 }
 0x188   : >> { %v1506_v36 = vunpack.c.l.s8.bf16 %v1074_v32 }
 0x189   : >> { %v608_v47 = vrot.slane %v11572_v17, %v11778_v34 }
 0x18a   : >> { %1763 = vmatpush1.bf16.msra.mxu0 %v1464_v38  ;;  %1927 = vmatpush1.bf16.msra.mxu1 %v1466_v39  ;;  %v1513_v38 = vunpack.c.h.s8.bf16 %v1073_v20  ;;  %v1515_v39 = vunpack.c.h.s8.bf16 %v1075_v21  ;;  %v1528_v20 = vunpack.c.h.s8.bf16 %v1080_v52  ;;  %v1530_v21 = vunpack.c.h.s8.bf16 %v1082_v54 }
 0x18b   : >> { %1764 = vmatprep.subr.bf16.mxu0 %v1473_v40  ;;  %1928 = vmatprep.subr.bf16.mxu1 %v1475_v41  ;;  %v1081_v40 = vld [vmem:[%s11608_s30 + $0x5c8] sm:$0xff]  ;;  %v1083_v41 = vld [vmem:[%s11608_s30 + $0x5d8] sm:$0xff] }
 0x18c   : >> { %v1529_v60 = vunpack.c.h.s8.bf16 %v1081_v40  ;;  %v1531_v61 = vunpack.c.h.s8.bf16 %v1083_v41 }
 0x18e   : >> { %1765 = vmatpush1.bf16.msra.mxu0 %v1472_v48  ;;  %1929 = vmatpush1.bf16.msra.mxu1 %v1474_v49  ;;  %v1512_v48 = vunpack.c.h.s8.bf16 %v1072_v31  ;;  %v1514_v49 = vunpack.c.h.s8.bf16 %v1074_v32 }
 0x18f   : >> { %1766 = vmatprep.subr.bf16.mxu0 %v1481_v50  ;;  %1930 = vmatprep.subr.bf16.mxu1 %v1483_v51  ;;  %v1521_v50 = vunpack.c.l.s8.bf16 %v1081_v40  ;;  %v1523_v51 = vunpack.c.l.s8.bf16 %v1083_v41 }
 0x192   : >> { %1767 = vmatpush1.bf16.msra.mxu0 %v1480_v55  ;;  %1931 = vmatpush1.bf16.msra.mxu1 %v1482_v56  ;;  %v620_v55 = vrot.slane %v11572_v17, %v11783_v42  ;;  %v830_v56 = vadd.f32 %v11691_v28, %v608_v47 }
 0x193   : >> { %1768 = vmatprep.subr.bf16.mxu0 %v1489_v57  ;;  %1932 = vmatprep.subr.bf16.mxu1 %v1491_v58  ;;  %v1520_v57 = vunpack.c.l.s8.bf16 %v1080_v52  ;;  %v1522_v58 = vunpack.c.l.s8.bf16 %v1082_v54 }
 0x196   : >> { %1769 = vmatpush1.bf16.msra.mxu0 %v1488_v62  ;;  %1933 = vmatpush1.bf16.msra.mxu1 %v1490_v53  ;;  %v1089_v62 = vld [vmem:[%s11608_s30 + $0x608] sm:$0xff]  ;;  %v1091_v53 = vld [vmem:[%s11608_s30 + $0x618] sm:$0xff] }
 0x197   : >> { %1770 = vmatprep.subr.bf16.mxu0 %v1497_v63  ;;  %1934 = vmatprep.subr.bf16.mxu1 %v1499_v18  ;;  %v873_v63 = vadd.f32 %v11709_v0, %v620_v55  ;;  %v881_v18 = vmax.f32 %v830_v56, 0.0  ;;  %v1537_v28 = vunpack.c.l.s8.bf16 %v1089_v62 }
 0x199   : >> { %v11797_v31 = vpack.c.bf16 %v881_v18, %v881_v18  ;;  %v1106_v18 = vld [vmem:[%s11608_s30 + $0x690] sm:$0xff] }
 0x19a   : >> { %1771 = vmatpush1.bf16.msra.mxu0 %v1496_v24  ;;  %1935 = vmatpush1.bf16.msra.mxu1 %v1498_v29  ;;  %v1539_v24 = vunpack.c.l.s8.bf16 %v1091_v53  ;;  %v1088_v29 = vld [vmem:[%s11608_s30 + $0x600] sm:$0xff] }
 0x19b   : >> { %1772 = vmatprep.subr.bf16.mxu0 %v1505_v25  ;;  %1936 = vmatprep.subr.bf16.mxu1 %v1507_v26  ;;  %v1090_v25 = vld [vmem:[%s11608_s30 + $0x610] sm:$0xff]  ;;  %v884_v26 = vmax.f32 %v873_v63, 0.0  ;;  %v1536_v32 = vunpack.c.l.s8.bf16 %v1088_v29  ;;  %v1544_v41 = vunpack.c.h.s8.bf16 %v1088_v29  ;;  %v1104_v63 = vld [vmem:[%s11608_s30 + $0x680] sm:$0xff]  ;;  %v1113_v29 = vld [vmem:[%s11608_s30 + $0x6c8] sm:$0xff] }
 0x19c   : >> { %v1538_v0 = vunpack.c.l.s8.bf16 %v1090_v25  ;;  %v1546_v47 = vunpack.c.h.s8.bf16 %v1090_v25  ;;  %v1115_v25 = vld [vmem:[%s11608_s30 + $0x6d8] sm:$0xff] }
 0x19d   : >> { %v11801_v40 = vpack.c.bf16 %v884_v26, %v884_v26  ;;  %v1576_v26 = vunpack.c.h.s8.bf16 %v1104_v63 }
 0x19e   : >> { %1773 = vmatpush1.bf16.msra.mxu0 %v1504_v35  ;;  %1937 = vmatpush1.bf16.msra.mxu1 %v1506_v36  ;;  %v1545_v35 = vunpack.c.h.s8.bf16 %v1089_v62  ;;  %v1547_v36 = vunpack.c.h.s8.bf16 %v1091_v53 }
 0x19f   : >> { %1774 = vmatprep.subr.bf16.mxu0 %v1513_v38  ;;  %1938 = vmatprep.subr.bf16.mxu1 %v1515_v39  ;;  %v1097_v38 = vld [vmem:[%s11608_s30 + $0x648] sm:$0xff]  ;;  %v1099_v39 = vld [vmem:[%s11608_s30 + $0x658] sm:$0xff] }
 0x1a0   : >> { %v1561_v55 = vunpack.c.h.s8.bf16 %v1097_v38  ;;  %v1563_v56 = vunpack.c.h.s8.bf16 %v1099_v39 }
 0x1a2   : >> { %1775 = vmatpush1.bf16.msra.mxu0 %v1512_v48  ;;  %1939 = vmatpush1.bf16.msra.mxu1 %v1514_v49  ;;  %v1553_v48 = vunpack.c.l.s8.bf16 %v1097_v38  ;;  %v1555_v49 = vunpack.c.l.s8.bf16 %v1099_v39  ;;  %v1114_v38 = vld [vmem:[%s11608_s30 + $0x6d0] sm:$0xff] }
 0x1a3   : >> { %1776 = vmatprep.subr.bf16.mxu0 %v1521_v50  ;;  %1940 = vmatprep.subr.bf16.mxu1 %v1523_v51  ;;  %v1096_v50 = vld [vmem:[%s11608_s30 + $0x640] sm:$0xff]  ;;  %v1098_v51 = vld [vmem:[%s11608_s30 + $0x650] sm:$0xff] }
 0x1a4   : >> { %v1552_v52 = vunpack.c.l.s8.bf16 %v1096_v50  ;;  %v1554_v54 = vunpack.c.l.s8.bf16 %v1098_v51 }
 0x1a6   : >> { %1777 = vmatpush1.bf16.msra.mxu0 %v1520_v57  ;;  %1941 = vmatpush1.bf16.msra.mxu1 %v1522_v58  ;;  %v1105_v57 = vld [vmem:[%s11608_s30 + $0x688] sm:$0xff]  ;;  %v1107_v58 = vld [vmem:[%s11608_s30 + $0x698] sm:$0xff] }
 0x1a7   : >> { %1778 = vmatprep.subr.bf16.mxu0 %v1529_v60  ;;  %1942 = vmatprep.subr.bf16.mxu1 %v1531_v61  ;;  %v1560_v60 = vunpack.c.h.s8.bf16 %v1096_v50  ;;  %v1562_v61 = vunpack.c.h.s8.bf16 %v1098_v51  ;;  %v1569_v62 = vunpack.c.l.s8.bf16 %v1105_v57  ;;  %v1571_v53 = vunpack.c.l.s8.bf16 %v1107_v58  ;;  %v1123_v50 = vld [vmem:[%s11608_s30 + $0x718] sm:$0xff] }
 0x1aa   : >> { %1779 = vmatpush1.bf16.msra.mxu0 %v1528_v20  ;;  %1943 = vmatpush1.bf16.msra.mxu1 %v1530_v21  ;;  %v1568_v20 = vunpack.c.l.s8.bf16 %v1104_v63  ;;  %v1570_v21 = vunpack.c.l.s8.bf16 %v1106_v18  ;;  %v1131_v63 = vld [vmem:[%s11608_s30 + $0x758] sm:$0xff] }
 0x1ab   : >> { %1789 = vmatprep.subr.bf16.mxu0 %v1537_v28  ;;  %1953 = vmatprep.subr.bf16.mxu1 %v1539_v24  ;;  %v1577_v28 = vunpack.c.h.s8.bf16 %v1105_v57  ;;  %v1579_v24 = vunpack.c.h.s8.bf16 %v1107_v58  ;;  %v1122_v57 = vld [vmem:[%s11608_s30 + $0x710] sm:$0xff] }
 0x1ad   : >> { %1781 = vmatmul.mubr.bf16.vlgmr.msra.gmra.mrb[8].mxu0 %v11797_v31  ;;  %1945 = vmatmul.mubr.bf16.vlgmr.msra.gmra.mrb[8].mxu1 %v11797_v31 }
 0x1ae   : >> { %1790 = vmatpush1.bf16.msra.mxu0 %v1536_v32  ;;  %1954 = vmatpush1.bf16.msra.mxu1 %v1538_v0  ;;  %v1578_v32 = vunpack.c.h.s8.bf16 %v1106_v18  ;;  %v1585_v0 = vunpack.c.l.s8.bf16 %v1113_v29 }
 0x1af   : >> { %1791 = vmatprep.subr.bf16.mxu0 %v1545_v35  ;;  %1955 = vmatprep.subr.bf16.mxu1 %v1547_v36  ;;  %v1587_v35 = vunpack.c.l.s8.bf16 %v1115_v25  ;;  %v1112_v36 = vld [vmem:[%s11608_s30 + $0x6c0] sm:$0xff] }
 0x1b0   : >> { %1821 = vmatprep.mubr.bf16.mxu0 %v11801_v40  ;;  %1985 = vmatprep.mubr.bf16.mxu1 %v11801_v40  ;;  %v1584_v39 = vunpack.c.l.s8.bf16 %v1112_v36  ;;  %v1592_v51 = vunpack.c.h.s8.bf16 %v1112_v36  ;;  %v1139_v36 = vld [vmem:[%s11608_s30 + $0x798] sm:$0xff] }
 0x1b2   : >> { %1792 = vmatpush1.bf16.msra.mxu0 %v1544_v41  ;;  %1956 = vmatpush1.bf16.msra.mxu1 %v1546_v47  ;;  %v1586_v41 = vunpack.c.l.s8.bf16 %v1114_v38  ;;  %v1593_v47 = vunpack.c.h.s8.bf16 %v1113_v29  ;;  %v1130_v29 = vld [vmem:[%s11608_s30 + $0x750] sm:$0xff] }
 0x1b3   : >> { %1793 = vmatprep.subr.bf16.mxu0 %v1553_v48  ;;  %1957 = vmatprep.subr.bf16.mxu1 %v1555_v49  ;;  %v1595_v48 = vunpack.c.h.s8.bf16 %v1115_v25  ;;  %v1121_v49 = vld [vmem:[%s11608_s30 + $0x708] sm:$0xff] }
 0x1b6   : >> { %1794 = vmatpush1.bf16.msra.mxu0 %v1552_v52  ;;  %1958 = vmatpush1.bf16.msra.mxu1 %v1554_v54  ;;  %v1594_v52 = vunpack.c.h.s8.bf16 %v1114_v38  ;;  %v1601_v54 = vunpack.c.l.s8.bf16 %v1121_v49 }
 0x1b7   : >> { %1795 = vmatprep.subr.bf16.mxu0 %v1561_v55  ;;  %1959 = vmatprep.subr.bf16.mxu1 %v1563_v56  ;;  %v1603_v55 = vunpack.c.l.s8.bf16 %v1123_v50  ;;  %v1120_v56 = vld [vmem:[%s11608_s30 + $0x700] sm:$0xff] }
 0x1b8   : >> { %v1600_v58 = vunpack.c.l.s8.bf16 %v1120_v56  ;;  %v1608_v18 = vunpack.c.h.s8.bf16 %v1120_v56  ;;  %v1145_v56 = vld [vmem:[%s11608_s30 + $0x7c8] sm:$0xff] }
 0x1ba   : >> { %1796 = vmatpush1.bf16.msra.mxu0 %v1560_v60  ;;  %1960 = vmatpush1.bf16.msra.mxu1 %v1562_v61  ;;  %v1602_v60 = vunpack.c.l.s8.bf16 %v1122_v57  ;;  %v1609_v61 = vunpack.c.h.s8.bf16 %v1121_v49  ;;  %v1138_v49 = vld [vmem:[%s11608_s30 + $0x790] sm:$0xff] }
 0x1bb   : >> { %1797 = vmatprep.subr.bf16.mxu0 %v1569_v62  ;;  %1961 = vmatprep.subr.bf16.mxu1 %v1571_v53  ;;  %v1611_v62 = vunpack.c.h.s8.bf16 %v1123_v50  ;;  %v1129_v53 = vld [vmem:[%s11608_s30 + $0x748] sm:$0xff] }
 0x1be   : >> { %1798 = vmatpush1.bf16.msra.mxu0 %v1568_v20  ;;  %1962 = vmatpush1.bf16.msra.mxu1 %v1570_v21  ;;  %v1610_v20 = vunpack.c.h.s8.bf16 %v1122_v57  ;;  %v1617_v21 = vunpack.c.l.s8.bf16 %v1129_v53  ;;  %v1147_v57 = vld [vmem:[%s11608_s30 + $0x7d8] sm:$0xff] }
 0x1bf   : >> { %1799 = vmatprep.subr.bf16.mxu0 %v1577_v28  ;;  %1963 = vmatprep.subr.bf16.mxu1 %v1579_v24  ;;  %v1619_v28 = vunpack.c.l.s8.bf16 %v1131_v63  ;;  %v1128_v24 = vld [vmem:[%s11608_s30 + $0x740] sm:$0xff] }
 0x1c0   : >> { %v1616_v25 = vunpack.c.l.s8.bf16 %v1128_v24  ;;  %v1624_v38 = vunpack.c.h.s8.bf16 %v1128_v24  ;;  %v1657_v24 = vunpack.c.h.s8.bf16 %v1145_v56 }
 0x1c2   : >> { %1800 = vmatpush1.bf16.msra.mxu0 %v1576_v26  ;;  %1964 = vmatpush1.bf16.msra.mxu1 %v1578_v32  ;;  %v1618_v26 = vunpack.c.l.s8.bf16 %v1130_v29  ;;  %v1625_v32 = vunpack.c.h.s8.bf16 %v1129_v53  ;;  %v1651_v53 = vunpack.c.l.s8.bf16 %v1147_v57 }
 0x1c3   : >> { %1801 = vmatprep.subr.bf16.mxu0 %v1585_v0  ;;  %1965 = vmatprep.subr.bf16.mxu1 %v1587_v35  ;;  %v1627_v0 = vunpack.c.h.s8.bf16 %v1131_v63  ;;  %v1137_v35 = vld [vmem:[%s11608_s30 + $0x788] sm:$0xff]  ;;  %v1144_v63 = vld [vmem:[%s11608_s30 + $0x7c0] sm:$0xff] }
 0x1c6   : >> { %1802 = vmatpush1.bf16.msra.mxu0 %v1584_v39  ;;  %1966 = vmatpush1.bf16.msra.mxu1 %v1586_v41  ;;  %v1626_v39 = vunpack.c.h.s8.bf16 %v1130_v29  ;;  %v1633_v41 = vunpack.c.l.s8.bf16 %v1137_v35  ;;  %v1659_v29 = vunpack.c.h.s8.bf16 %v1147_v57 }
 0x1c7   : >> { %1803 = vmatprep.subr.bf16.mxu0 %v1593_v47  ;;  %1967 = vmatprep.subr.bf16.mxu1 %v1595_v48  ;;  %v1635_v47 = vunpack.c.l.s8.bf16 %v1139_v36  ;;  %v1136_v48 = vld [vmem:[%s11608_s30 + $0x780] sm:$0xff] }
 0x1c8   : >> { %v1632_v50 = vunpack.c.l.s8.bf16 %v1136_v48 }
 0x1ca   : >> { %1804 = vmatpush1.bf16.msra.mxu0 %v1592_v51  ;;  %1968 = vmatpush1.bf16.msra.mxu1 %v1594_v52  ;;  %v1634_v51 = vunpack.c.l.s8.bf16 %v1138_v49  ;;  %v11830_v52 = vsub.s32 6, %v11660_v43 }
 0x1cb   : >> { %1805 = vmatprep.subr.bf16.mxu0 %v1601_v54  ;;  %1969 = vmatprep.subr.bf16.mxu1 %v1603_v55  ;;  %v1641_v54 = vunpack.c.h.s8.bf16 %v1137_v35  ;;  %v1643_v55 = vunpack.c.h.s8.bf16 %v1139_v36 }
 0x1ce   : >> { %1806 = vmatpush1.bf16.msra.mxu0 %v1600_v58  ;;  %1970 = vmatpush1.bf16.msra.mxu1 %v1602_v60  ;;  %v1640_v58 = vunpack.c.h.s8.bf16 %v1136_v48  ;;  %v1642_v60 = vunpack.c.h.s8.bf16 %v1138_v49 }
 0x1cf   : >> { %1807 = vmatprep.subr.bf16.mxu0 %v1609_v61  ;;  %1971 = vmatprep.subr.bf16.mxu1 %v1611_v62  ;;  %v616_v61 = vrot.slane %v11572_v17, %v11830_v52  ;;  %v1649_v62 = vunpack.c.l.s8.bf16 %v1145_v56 }
 0x1d2   : >> { %1808 = vmatpush1.bf16.msra.mxu0 %v1608_v18  ;;  %1972 = vmatpush1.bf16.msra.mxu1 %v1610_v20  ;;  %v1146_v18 = vld [vmem:[%s11608_s30 + $0x7d0] sm:$0xff]  ;;  %v1648_v20 = vunpack.c.l.s8.bf16 %v1144_v63 }
 0x1d3   : >> { %1809 = vmatprep.subr.bf16.mxu0 %v1617_v21  ;;  %1973 = vmatprep.subr.bf16.mxu1 %v1619_v28  ;;  %v1650_v21 = vunpack.c.l.s8.bf16 %v1146_v18  ;;  %v871_v28 = vadd.f32 %v11705_v59, %v616_v61  ;;  %v900_v59 = vld [vmem:[%s11608_s30 + $0x20] sm:$0xff]  ;;  %v910_v61 = vld [vmem:[%s11608_s30 + $0x70] sm:$0xff] }
 0x1d5   : >> { %v883_v35 = vmax.f32 %v871_v28, 0.0  ;;  %v1182_v28 = vunpack.c.h.s8.bf16 %v910_v61 }
 0x1d6   : >> { %1810 = vmatpush1.bf16.msra.mxu0 %v1616_v25  ;;  %1974 = vmatpush1.bf16.msra.mxu1 %v1618_v26  ;;  %v901_v25 = vld [vmem:[%s11608_s30 + $0x28] sm:$0xff]  ;;  %v903_v26 = vld [vmem:[%s11608_s30 + $0x38] sm:$0xff] }
 0x1d7   : >> { %1811 = vmatprep.subr.bf16.mxu0 %v1625_v32  ;;  %1975 = vmatprep.subr.bf16.mxu1 %v1627_v0  ;;  %v1656_v32 = vunpack.c.h.s8.bf16 %v1144_v63  ;;  %v1658_v0 = vunpack.c.h.s8.bf16 %v1146_v18  ;;  %v1157_v36 = vunpack.c.l.s8.bf16 %v901_v25  ;;  %v1165_v49 = vunpack.c.h.s8.bf16 %v901_v25 }
 0x1da   : >> { %1812 = vmatpush1.bf16.msra.mxu0 %v1624_v38  ;;  %1976 = vmatpush1.bf16.msra.mxu1 %v1626_v39  ;;  %v1159_v38 = vunpack.c.l.s8.bf16 %v903_v26  ;;  %v902_v39 = vld [vmem:[%s11608_s30 + $0x30] sm:$0xff] }
 0x1db   : >> { %1813 = vmatprep.subr.bf16.mxu0 %v1633_v41  ;;  %1977 = vmatprep.subr.bf16.mxu1 %v1635_v47  ;;  %v1156_v41 = vunpack.c.l.s8.bf16 %v900_v59  ;;  %v11843_v47 = vpack.c.bf16 %v883_v35, %v883_v35  ;;  %v1158_v48 = vunpack.c.l.s8.bf16 %v902_v39  ;;  %v1166_v56 = vunpack.c.h.s8.bf16 %v902_v39 }
 0x1de   : >> { %1814 = vmatpush1.bf16.msra.mxu0 %v1632_v50  ;;  %1978 = vmatpush1.bf16.msra.mxu1 %v1634_v51  ;;  %v1167_v50 = vunpack.c.h.s8.bf16 %v903_v26  ;;  %v909_v51 = vld [vmem:[%s11608_s30 + $0x68] sm:$0xff]  ;;  %v918_v26 = vld [vmem:[%s11608_s30 + $0xb0] sm:$0xff] }
 0x1df   : >> { %1815 = vmatprep.subr.bf16.mxu0 %v1641_v54  ;;  %1979 = vmatprep.subr.bf16.mxu1 %v1643_v55  ;;  %v911_v54 = vld [vmem:[%s11608_s30 + $0x78] sm:$0xff]  ;;  %v1164_v55 = vunpack.c.h.s8.bf16 %v900_v59  ;;  %v1173_v57 = vunpack.c.l.s8.bf16 %v909_v51  ;;  %v1181_v63 = vunpack.c.h.s8.bf16 %v909_v51  ;;  %v926_v51 = vld [vmem:[%s11608_s30 + $0xf0] sm:$0xff] }
 0x1e0   : >> { %v1183_v18 = vunpack.c.h.s8.bf16 %v911_v54  ;;  %v927_v59 = vld [vmem:[%s11608_s30 + $0xf8] sm:$0xff] }
 0x1e2   : >> { %1816 = vmatpush1.bf16.msra.mxu0 %v1640_v58  ;;  %1980 = vmatpush1.bf16.msra.mxu1 %v1642_v60  ;;  %v908_v58 = vld [vmem:[%s11608_s30 + $0x60] sm:$0xff]  ;;  %v1175_v60 = vunpack.c.l.s8.bf16 %v911_v54 }
 0x1e3   : >> { %1817 = vmatprep.subr.bf16.mxu0 %v1649_v62  ;;  %1981 = vmatprep.subr.bf16.mxu1 %v1651_v53  ;;  %v1172_v62 = vunpack.c.l.s8.bf16 %v908_v58  ;;  %v1174_v53 = vunpack.c.l.s8.bf16 %v910_v61 }
 0x1e6   : >> { %1818 = vmatpush1.bf16.msra.mxu0 %v1648_v20  ;;  %1982 = vmatpush1.bf16.msra.mxu1 %v1650_v21  ;;  %v919_v20 = vld [vmem:[%s11608_s30 + $0xb8] sm:$0xff]  ;;  %v1180_v21 = vunpack.c.h.s8.bf16 %v908_v58  ;;  %v933_v58 = vld [vmem:[%s11608_s30 + $0x128] sm:$0xff] }
 0x1e7   : >> { %1819 = vmatprep.subr.bf16.mxu0 %v1657_v24  ;;  %1983 = vmatprep.subr.bf16.mxu1 %v1659_v29  ;;  %v916_v29 = vld [vmem:[%s11608_s30 + $0xa0] sm:$0xff]  ;;  %v1191_v25 = vunpack.c.l.s8.bf16 %v919_v20 }
 0x1e8   : >> { %v1196_v39 = vunpack.c.h.s8.bf16 %v916_v29 }
 0x1ea   : >> { %1820 = vmatpush1.bf16.msra.mxu0 %v1656_v32  ;;  %1984 = vmatpush1.bf16.msra.mxu1 %v1658_v0  ;;  %v1188_v32 = vunpack.c.l.s8.bf16 %v916_v29  ;;  %v1190_v0 = vunpack.c.l.s8.bf16 %v918_v26  ;;  %v941_v29 = vld [vmem:[%s11608_s30 + $0x168] sm:$0xff] }
 0x1eb   : >> { %1994 = vmatprep.subr.bf16.mxu0 %v1157_v36  ;;  %2158 = vmatprep.subr.bf16.mxu1 %v1159_v38  ;;  %v1199_v36 = vunpack.c.h.s8.bf16 %v919_v20  ;;  %v925_v38 = vld [vmem:[%s11608_s30 + $0xe8] sm:$0xff] }
 0x1ed   : >> { %1822 = vmatmul.mubr.bf16.vlgmr.msra.gmra.mrb[8].mxu0 %v11843_v47  ;;  %1986 = vmatmul.mubr.bf16.vlgmr.msra.gmra.mrb[8].mxu1 %v11843_v47 }
 0x1ee   : >> { %1995 = vmatpush1.bf16.msra.mxu0 %v1156_v41  ;;  %2026 = vmatprep.mubr.bf16.mxu0 %v11681_v19  ;;  %v1198_v41 = vunpack.c.h.s8.bf16 %v918_v26 }
 0x1ef   : >> { %2159 = vmatpush1.bf16.msra.mxu1 %v1158_v48  ;;  %2190 = vmatprep.mubr.bf16.mxu1 %v11681_v19  ;;  %v917_v19 = vld [vmem:[%s11608_s30 + $0xa8] sm:$0xff]  ;;  %v1205_v48 = vunpack.c.l.s8.bf16 %v925_v38 }
 0x1f0   : >> { %1996 = vmatprep.subr.bf16.mxu0 %v1165_v49  ;;  %2160 = vmatprep.subr.bf16.mxu1 %v1167_v50  ;;  %v1189_v24 = vunpack.c.l.s8.bf16 %v917_v19  ;;  %v1197_v35 = vunpack.c.h.s8.bf16 %v917_v19  ;;  %v924_v49 = vld [vmem:[%s11608_s30 + $0xe0] sm:$0xff]  ;;  %v1207_v50 = vunpack.c.l.s8.bf16 %v927_v59  ;;  %v934_v19 = vld [vmem:[%s11608_s30 + $0x130] sm:$0xff] }
 0x1f1   : >> { %v1204_v54 = vunpack.c.l.s8.bf16 %v924_v49  ;;  %v1212_v61 = vunpack.c.h.s8.bf16 %v924_v49  ;;  %v949_v49 = vld [vmem:[%s11608_s30 + $0x1a8] sm:$0xff] }
 0x1f2   : >> { %1997 = vmatpush1.bf16.msra.mxu0 %v1164_v55  ;;  %v1206_v55 = vunpack.c.l.s8.bf16 %v926_v51 }
 0x1f3   : >> { %2161 = vmatpush1.bf16.msra.mxu1 %v1166_v56  ;;  %1998 = vmatprep.subr.bf16.mxu0 %v1173_v57  ;;  %v1213_v56 = vunpack.c.h.s8.bf16 %v925_v38  ;;  %v1215_v57 = vunpack.c.h.s8.bf16 %v927_v59  ;;  %v942_v38 = vld [vmem:[%s11608_s30 + $0x170] sm:$0xff] }
 0x1f4   : >> { %2162 = vmatprep.subr.bf16.mxu1 %v1175_v60  ;;  %v935_v60 = vld [vmem:[%s11608_s30 + $0x138] sm:$0xff] }
 0x1f6   : >> { %1999 = vmatpush1.bf16.msra.mxu0 %v1172_v62  ;;  %v1214_v62 = vunpack.c.h.s8.bf16 %v926_v51 }
 0x1f7   : >> { %2163 = vmatpush1.bf16.msra.mxu1 %v1174_v53  ;;  %2000 = vmatprep.subr.bf16.mxu0 %v1181_v63  ;;  %v1221_v53 = vunpack.c.l.s8.bf16 %v933_v58  ;;  %v932_v63 = vld [vmem:[%s11608_s30 + $0x120] sm:$0xff] }
 0x1f8   : >> { %2164 = vmatprep.subr.bf16.mxu1 %v1183_v18  ;;  %v1223_v18 = vunpack.c.l.s8.bf16 %v935_v60  ;;  %v1220_v20 = vunpack.c.l.s8.bf16 %v932_v63  ;;  %v1228_v26 = vunpack.c.h.s8.bf16 %v932_v63  ;;  %v957_v63 = vld [vmem:[%s11608_s30 + $0x1e8] sm:$0xff] }
 0x1fa   : >> { %2001 = vmatpush1.bf16.msra.mxu0 %v1180_v21  ;;  %v1222_v21 = vunpack.c.l.s8.bf16 %v934_v19 }
 0x1fb   : >> { %2165 = vmatpush1.bf16.msra.mxu1 %v1182_v28  ;;  %2002 = vmatprep.subr.bf16.mxu0 %v1189_v24  ;;  %v1229_v28 = vunpack.c.h.s8.bf16 %v933_v58  ;;  %v1231_v24 = vunpack.c.h.s8.bf16 %v935_v60  ;;  %v950_v58 = vld [vmem:[%s11608_s30 + $0x1b0] sm:$0xff] }
 0x1fc   : >> { %2166 = vmatprep.subr.bf16.mxu1 %v1191_v25  ;;  %v943_v25 = vld [vmem:[%s11608_s30 + $0x178] sm:$0xff] }
 0x1fe   : >> { %2003 = vmatpush1.bf16.msra.mxu0 %v1188_v32  ;;  %v1230_v32 = vunpack.c.h.s8.bf16 %v934_v19 }
 0x1ff   : >> { %2167 = vmatpush1.bf16.msra.mxu1 %v1190_v0  ;;  %2004 = vmatprep.subr.bf16.mxu0 %v1197_v35  ;;  %v1237_v0 = vunpack.c.l.s8.bf16 %v941_v29  ;;  %v940_v35 = vld [vmem:[%s11608_s30 + $0x160] sm:$0xff] }
 0x200   : >> { %2168 = vmatprep.subr.bf16.mxu1 %v1199_v36  ;;  %v1239_v36 = vunpack.c.l.s8.bf16 %v943_v25  ;;  %v1236_v59 = vunpack.c.l.s8.bf16 %v940_v35  ;;  %v1244_v51 = vunpack.c.h.s8.bf16 %v940_v35  ;;  %v965_v35 = vld [vmem:[%s11608_s30 + $0x228] sm:$0xff] }
 0x202   : >> { %2005 = vmatpush1.bf16.msra.mxu0 %v1196_v39  ;;  %v1238_v39 = vunpack.c.l.s8.bf16 %v942_v38 }
 0x203   : >> { %2169 = vmatpush1.bf16.msra.mxu1 %v1198_v41  ;;  %2006 = vmatprep.subr.bf16.mxu0 %v1205_v48  ;;  %v1245_v41 = vunpack.c.h.s8.bf16 %v941_v29  ;;  %v1247_v48 = vunpack.c.h.s8.bf16 %v943_v25  ;;  %v958_v29 = vld [vmem:[%s11608_s30 + $0x1f0] sm:$0xff] }
 0x204   : >> { %2170 = vmatprep.subr.bf16.mxu1 %v1207_v50  ;;  %v951_v50 = vld [vmem:[%s11608_s30 + $0x1b8] sm:$0xff] }
 0x206   : >> { %2007 = vmatpush1.bf16.msra.mxu0 %v1204_v54  ;;  %v1246_v54 = vunpack.c.h.s8.bf16 %v942_v38 }
 0x207   : >> { %2171 = vmatpush1.bf16.msra.mxu1 %v1206_v55  ;;  %2008 = vmatprep.subr.bf16.mxu0 %v1213_v56  ;;  %v1253_v55 = vunpack.c.l.s8.bf16 %v949_v49  ;;  %v948_v56 = vld [vmem:[%s11608_s30 + $0x1a0] sm:$0xff] }
 0x208   : >> { %2172 = vmatprep.subr.bf16.mxu1 %v1215_v57  ;;  %v1255_v57 = vunpack.c.l.s8.bf16 %v951_v50  ;;  %v1252_v60 = vunpack.c.l.s8.bf16 %v948_v56  ;;  %v1260_v19 = vunpack.c.h.s8.bf16 %v948_v56 }
 0x20a   : >> { %2009 = vmatpush1.bf16.msra.mxu0 %v1212_v61  ;;  %v1254_v61 = vunpack.c.l.s8.bf16 %v950_v58 }
 0x20b   : >> { %2173 = vmatpush1.bf16.msra.mxu1 %v1214_v62  ;;  %2010 = vmatprep.subr.bf16.mxu0 %v1221_v53  ;;  %v1261_v62 = vunpack.c.h.s8.bf16 %v949_v49  ;;  %v1263_v53 = vunpack.c.h.s8.bf16 %v951_v50  ;;  %v966_v49 = vld [vmem:[%s11608_s30 + $0x230] sm:$0xff] }
 0x20c   : >> { %2174 = vmatprep.subr.bf16.mxu1 %v1223_v18  ;;  %v959_v18 = vld [vmem:[%s11608_s30 + $0x1f8] sm:$0xff] }
 0x20e   : >> { %2011 = vmatpush1.bf16.msra.mxu0 %v1220_v20  ;;  %v1262_v20 = vunpack.c.h.s8.bf16 %v950_v58 }
 0x20f   : >> { %2175 = vmatpush1.bf16.msra.mxu1 %v1222_v21  ;;  %2012 = vmatprep.subr.bf16.mxu0 %v1229_v28  ;;  %v1269_v21 = vunpack.c.l.s8.bf16 %v957_v63  ;;  %v956_v28 = vld [vmem:[%s11608_s30 + $0x1e0] sm:$0xff] }
 0x210   : >> { %2176 = vmatprep.subr.bf16.mxu1 %v1231_v24  ;;  %v1271_v24 = vunpack.c.l.s8.bf16 %v959_v18  ;;  %v1268_v25 = vunpack.c.l.s8.bf16 %v956_v28  ;;  %v1276_v38 = vunpack.c.h.s8.bf16 %v956_v28  ;;  %v983_v28 = vld [vmem:[%s11608_s30 + $0x2b8] sm:$0xff] }
 0x212   : >> { %2013 = vmatpush1.bf16.msra.mxu0 %v1228_v26  ;;  %v1270_v26 = vunpack.c.l.s8.bf16 %v958_v29 }
 0x213   : >> { %2177 = vmatpush1.bf16.msra.mxu1 %v1230_v32  ;;  %2014 = vmatprep.subr.bf16.mxu0 %v1237_v0  ;;  %v1277_v32 = vunpack.c.h.s8.bf16 %v957_v63  ;;  %v1279_v0 = vunpack.c.h.s8.bf16 %v959_v18  ;;  %v974_v63 = vld [vmem:[%s11608_s30 + $0x270] sm:$0xff] }
 0x214   : >> { %2178 = vmatprep.subr.bf16.mxu1 %v1239_v36  ;;  %v967_v36 = vld [vmem:[%s11608_s30 + $0x238] sm:$0xff] }
 0x215   : >> { %v1295_v56 = vunpack.c.h.s8.bf16 %v967_v36 }
 0x216   : >> { %2015 = vmatpush1.bf16.msra.mxu0 %v1236_v59  ;;  %v1278_v59 = vunpack.c.h.s8.bf16 %v958_v29 }
 0x217   : >> { %2179 = vmatpush1.bf16.msra.mxu1 %v1238_v39  ;;  %2016 = vmatprep.subr.bf16.mxu0 %v1245_v41  ;;  %v1285_v39 = vunpack.c.l.s8.bf16 %v965_v35  ;;  %v964_v41 = vld [vmem:[%s11608_s30 + $0x220] sm:$0xff] }
 0x218   : >> { %2180 = vmatprep.subr.bf16.mxu1 %v1247_v48  ;;  %v1287_v48 = vunpack.c.l.s8.bf16 %v967_v36  ;;  %v1284_v50 = vunpack.c.l.s8.bf16 %v964_v41  ;;  %v1292_v58 = vunpack.c.h.s8.bf16 %v964_v41 }
 0x21a   : >> { %2017 = vmatpush1.bf16.msra.mxu0 %v1244_v51  ;;  %v1286_v51 = vunpack.c.l.s8.bf16 %v966_v49 }
 0x21b   : >> { %2181 = vmatpush1.bf16.msra.mxu1 %v1246_v54  ;;  %2018 = vmatprep.subr.bf16.mxu0 %v1253_v55  ;;  %v1293_v54 = vunpack.c.h.s8.bf16 %v965_v35  ;;  %v973_v55 = vld [vmem:[%s11608_s30 + $0x268] sm:$0xff] }
 0x21c   : >> { %2182 = vmatprep.subr.bf16.mxu1 %v1255_v57  ;;  %v975_v57 = vld [vmem:[%s11608_s30 + $0x278] sm:$0xff] }
 0x21e   : >> { %2019 = vmatpush1.bf16.msra.mxu0 %v1252_v60  ;;  %v1294_v60 = vunpack.c.h.s8.bf16 %v966_v49 }
 0x21f   : >> { %2183 = vmatpush1.bf16.msra.mxu1 %v1254_v61  ;;  %2020 = vmatprep.subr.bf16.mxu0 %v1261_v62  ;;  %v1301_v61 = vunpack.c.l.s8.bf16 %v973_v55  ;;  %v972_v62 = vld [vmem:[%s11608_s30 + $0x260] sm:$0xff] }
 0x220   : >> { %2184 = vmatprep.subr.bf16.mxu1 %v1263_v53  ;;  %v1303_v53 = vunpack.c.l.s8.bf16 %v975_v57  ;;  %v1300_v18 = vunpack.c.l.s8.bf16 %v972_v62 }
 0x222   : >> { %2021 = vmatpush1.bf16.msra.mxu0 %v1260_v19  ;;  %v1309_v19 = vunpack.c.h.s8.bf16 %v973_v55 }
 0x223   : >> { %2185 = vmatpush1.bf16.msra.mxu1 %v1262_v20  ;;  %2022 = vmatprep.subr.bf16.mxu0 %v1269_v21  ;;  %v1311_v20 = vunpack.c.h.s8.bf16 %v975_v57  ;;  %v981_v21 = vld [vmem:[%s11608_s30 + $0x2a8] sm:$0xff] }
 0x224   : >> { %2186 = vmatprep.subr.bf16.mxu1 %v1271_v24  ;;  %v1308_v24 = vunpack.c.h.s8.bf16 %v972_v62  ;;  %v1317_v29 = vunpack.c.l.s8.bf16 %v981_v21  ;;  %v1325_v36 = vunpack.c.h.s8.bf16 %v981_v21 }
 0x226   : >> { %2023 = vmatpush1.bf16.msra.mxu0 %v1268_v25  ;;  %v980_v25 = vld [vmem:[%s11608_s30 + $0x2a0] sm:$0xff] }
 0x227   : >> { %2187 = vmatpush1.bf16.msra.mxu1 %v1270_v26  ;;  %2024 = vmatprep.subr.bf16.mxu0 %v1277_v32  ;;  %v1319_v26 = vunpack.c.l.s8.bf16 %v983_v28  ;;  %v982_v32 = vld [vmem:[%s11608_s30 + $0x2b0] sm:$0xff]  ;;  %v1324_v41 = vunpack.c.h.s8.bf16 %v980_v25 }
 0x228   : >> { %2188 = vmatprep.subr.bf16.mxu1 %v1279_v0  ;;  %v1316_v0 = vunpack.c.l.s8.bf16 %v980_v25  ;;  %v1318_v35 = vunpack.c.l.s8.bf16 %v982_v32 }
 0x22a   : >> { %2025 = vmatpush1.bf16.msra.mxu0 %v1276_v38  ;;  %v1327_v38 = vunpack.c.h.s8.bf16 %v983_v28 }
 0x22b   : >> { %2189 = vmatpush1.bf16.msra.mxu1 %v1278_v59  ;;  %2035 = vmatprep.subr.bf16.mxu0 %v1285_v39  ;;  %v989_v59 = vld [vmem:[%s11608_s30 + $0x2e8] sm:$0xff]  ;;  %v991_v39 = vld [vmem:[%s11608_s30 + $0x2f8] sm:$0xff] }
 0x22c   : >> { %2199 = vmatprep.subr.bf16.mxu1 %v1287_v48  ;;  %v1326_v48 = vunpack.c.h.s8.bf16 %v982_v32  ;;  %v1333_v49 = vunpack.c.l.s8.bf16 %v989_v59  ;;  %v1341_v57 = vunpack.c.h.s8.bf16 %v989_v59 }
 0x22d   : >> { %2027 = vmatmul.mubr.bf16.vlgmr.msra.gmra.mrb[12].mxu0 %v11683_v22 }
 0x22e   : >> { %2191 = vmatmul.mubr.bf16.vlgmr.msra.gmra.mrb[12].mxu1 %v11683_v22  ;;  %2036 = vmatpush1.bf16.msra.mxu0 %v1284_v50  ;;  %v1302_v22 = vunpack.c.l.s8.bf16 %v974_v63  ;;  %v988_v50 = vld [vmem:[%s11608_s30 + $0x2e0] sm:$0xff] }
 0x22f   : >> { %2067 = vmatprep.mubr.bf16.mxu0 %v11689_v27  ;;  %2200 = vmatpush1.bf16.msra.mxu1 %v1286_v51  ;;  %v1335_v51 = vunpack.c.l.s8.bf16 %v991_v39  ;;  %v1332_v55 = vunpack.c.l.s8.bf16 %v988_v50  ;;  %v1340_v62 = vunpack.c.h.s8.bf16 %v988_v50 }
 0x230   : >> { %2231 = vmatprep.mubr.bf16.mxu1 %v11689_v27  ;;  %2037 = vmatprep.subr.bf16.mxu0 %v1293_v54  ;;  %v1310_v27 = vunpack.c.h.s8.bf16 %v974_v63  ;;  %v990_v54 = vld [vmem:[%s11608_s30 + $0x2f0] sm:$0xff] }
 0x231   : >> { %2201 = vmatprep.subr.bf16.mxu1 %v1295_v56  ;;  %v1334_v56 = vunpack.c.l.s8.bf16 %v990_v54 }
 0x232   : >> { %2038 = vmatpush1.bf16.msra.mxu0 %v1292_v58  ;;  %v1343_v58 = vunpack.c.h.s8.bf16 %v991_v39 }
 0x233   : >> { %2202 = vmatpush1.bf16.msra.mxu1 %v1294_v60  ;;  %2039 = vmatprep.subr.bf16.mxu0 %v1301_v61  ;;  %v997_v60 = vld [vmem:[%s11608_s30 + $0x328] sm:$0xff]  ;;  %v999_v61 = vld [vmem:[%s11608_s30 + $0x338] sm:$0xff] }
 0x234   : >> { %2203 = vmatprep.subr.bf16.mxu1 %v1303_v53  ;;  %v1342_v53 = vunpack.c.h.s8.bf16 %v990_v54  ;;  %v1349_v63 = vunpack.c.l.s8.bf16 %v997_v60  ;;  %v1357_v28 = vunpack.c.h.s8.bf16 %v997_v60 }
 0x236   : >> { %2040 = vmatpush1.bf16.msra.mxu0 %v1300_v18  ;;  %v996_v18 = vld [vmem:[%s11608_s30 + $0x320] sm:$0xff] }
 0x237   : >> { %2204 = vmatpush1.bf16.msra.mxu1 %v1302_v22  ;;  %2041 = vmatprep.subr.bf16.mxu0 %v1309_v19  ;;  %v1351_v22 = vunpack.c.l.s8.bf16 %v999_v61  ;;  %v998_v19 = vld [vmem:[%s11608_s30 + $0x330] sm:$0xff]  ;;  %v1356_v25 = vunpack.c.h.s8.bf16 %v996_v18 }
 0x238   : >> { %2205 = vmatprep.subr.bf16.mxu1 %v1311_v20  ;;  %v1348_v20 = vunpack.c.l.s8.bf16 %v996_v18  ;;  %v1350_v21 = vunpack.c.l.s8.bf16 %v998_v19 }
 0x23a   : >> { %2042 = vmatpush1.bf16.msra.mxu0 %v1308_v24  ;;  %v1359_v24 = vunpack.c.h.s8.bf16 %v999_v61 }
 0x23b   : >> { %2206 = vmatpush1.bf16.msra.mxu1 %v1310_v27  ;;  %2043 = vmatprep.subr.bf16.mxu0 %v1317_v29  ;;  %v1005_v27 = vld [vmem:[%s11608_s30 + $0x368] sm:$0xff]  ;;  %v1007_v29 = vld [vmem:[%s11608_s30 + $0x378] sm:$0xff] }
 0x23c   : >> { %2207 = vmatprep.subr.bf16.mxu1 %v1319_v26  ;;  %v1358_v26 = vunpack.c.h.s8.bf16 %v998_v19  ;;  %v1365_v32 = vunpack.c.l.s8.bf16 %v1005_v27  ;;  %v1373_v39 = vunpack.c.h.s8.bf16 %v1005_v27 }
 0x23e   : >> { %2044 = vmatpush1.bf16.msra.mxu0 %v1316_v0  ;;  %v1004_v0 = vld [vmem:[%s11608_s30 + $0x360] sm:$0xff] }
 0x23f   : >> { %2208 = vmatpush1.bf16.msra.mxu1 %v1318_v35  ;;  %2045 = vmatprep.subr.bf16.mxu0 %v1325_v36  ;;  %v1367_v35 = vunpack.c.l.s8.bf16 %v1007_v29  ;;  %v1006_v36 = vld [vmem:[%s11608_s30 + $0x370] sm:$0xff]  ;;  %v1372_v50 = vunpack.c.h.s8.bf16 %v1004_v0 }
 0x240   : >> { %2209 = vmatprep.subr.bf16.mxu1 %v1327_v38  ;;  %v1364_v38 = vunpack.c.l.s8.bf16 %v1004_v0  ;;  %v1366_v59 = vunpack.c.l.s8.bf16 %v1006_v36 }
 0x242   : >> { %2046 = vmatpush1.bf16.msra.mxu0 %v1324_v41  ;;  %v1375_v41 = vunpack.c.h.s8.bf16 %v1007_v29 }
 0x243   : >> { %2210 = vmatpush1.bf16.msra.mxu1 %v1326_v48  ;;  %2047 = vmatprep.subr.bf16.mxu0 %v1333_v49  ;;  %v1013_v48 = vld [vmem:[%s11608_s30 + $0x3a8] sm:$0xff]  ;;  %v1015_v49 = vld [vmem:[%s11608_s30 + $0x3b8] sm:$0xff] }
 0x244   : >> { %2211 = vmatprep.subr.bf16.mxu1 %v1335_v51  ;;  %v1374_v51 = vunpack.c.h.s8.bf16 %v1006_v36  ;;  %v1381_v54 = vunpack.c.l.s8.bf16 %v1013_v48  ;;  %v1389_v61 = vunpack.c.h.s8.bf16 %v1013_v48 }
 0x246   : >> { %2048 = vmatpush1.bf16.msra.mxu0 %v1332_v55  ;;  %v1012_v55 = vld [vmem:[%s11608_s30 + $0x3a0] sm:$0xff] }
 0x247   : >> { %2212 = vmatpush1.bf16.msra.mxu1 %v1334_v56  ;;  %2049 = vmatprep.subr.bf16.mxu0 %v1341_v57  ;;  %v1383_v56 = vunpack.c.l.s8.bf16 %v1015_v49  ;;  %v1014_v57 = vld [vmem:[%s11608_s30 + $0x3b0] sm:$0xff]  ;;  %v1388_v18 = vunpack.c.h.s8.bf16 %v1012_v55 }
 0x248   : >> { %2213 = vmatprep.subr.bf16.mxu1 %v1343_v58  ;;  %v1380_v58 = vunpack.c.l.s8.bf16 %v1012_v55  ;;  %v1382_v60 = vunpack.c.l.s8.bf16 %v1014_v57 }
 0x24a   : >> { %2050 = vmatpush1.bf16.msra.mxu0 %v1340_v62  ;;  %v1391_v62 = vunpack.c.h.s8.bf16 %v1015_v49 }
 0x24b   : >> { %2214 = vmatpush1.bf16.msra.mxu1 %v1342_v53  ;;  %2051 = vmatprep.subr.bf16.mxu0 %v1349_v63  ;;  %v1021_v53 = vld [vmem:[%s11608_s30 + $0x3e8] sm:$0xff]  ;;  %v1023_v63 = vld [vmem:[%s11608_s30 + $0x3f8] sm:$0xff] }
 0x24c   : >> { %2215 = vmatprep.subr.bf16.mxu1 %v1351_v22  ;;  %v1390_v22 = vunpack.c.h.s8.bf16 %v1014_v57  ;;  %v1397_v19 = vunpack.c.l.s8.bf16 %v1021_v53  ;;  %v1405_v29 = vunpack.c.h.s8.bf16 %v1021_v53 }
 0x24e   : >> { %2052 = vmatpush1.bf16.msra.mxu0 %v1348_v20  ;;  %v1020_v20 = vld [vmem:[%s11608_s30 + $0x3e0] sm:$0xff] }
 0x24f   : >> { %2216 = vmatpush1.bf16.msra.mxu1 %v1350_v21  ;;  %2053 = vmatprep.subr.bf16.mxu0 %v1357_v28  ;;  %v1399_v21 = vunpack.c.l.s8.bf16 %v1023_v63  ;;  %v1022_v28 = vld [vmem:[%s11608_s30 + $0x3f0] sm:$0xff]  ;;  %v1404_v0 = vunpack.c.h.s8.bf16 %v1020_v20 }
 0x250   : >> { %2217 = vmatprep.subr.bf16.mxu1 %v1359_v24  ;;  %v1396_v24 = vunpack.c.l.s8.bf16 %v1020_v20  ;;  %v1398_v27 = vunpack.c.l.s8.bf16 %v1022_v28 }
 0x252   : >> { %2054 = vmatpush1.bf16.msra.mxu0 %v1356_v25  ;;  %v1407_v25 = vunpack.c.h.s8.bf16 %v1023_v63 }
 0x253   : >> { %2218 = vmatpush1.bf16.msra.mxu1 %v1358_v26  ;;  %2055 = vmatprep.subr.bf16.mxu0 %v1365_v32  ;;  %v1029_v26 = vld [vmem:[%s11608_s30 + $0x428] sm:$0xff]  ;;  %v1031_v32 = vld [vmem:[%s11608_s30 + $0x438] sm:$0xff] }
 0x254   : >> { %2219 = vmatprep.subr.bf16.mxu1 %v1367_v35  ;;  %v1406_v35 = vunpack.c.h.s8.bf16 %v1022_v28  ;;  %v1413_v36 = vunpack.c.l.s8.bf16 %v1029_v26  ;;  %v1421_v49 = vunpack.c.h.s8.bf16 %v1029_v26 }
 0x256   : >> { %2056 = vmatpush1.bf16.msra.mxu0 %v1364_v38  ;;  %v1028_v38 = vld [vmem:[%s11608_s30 + $0x420] sm:$0xff] }
 0x257   : >> { %2220 = vmatpush1.bf16.msra.mxu1 %v1366_v59  ;;  %2057 = vmatprep.subr.bf16.mxu0 %v1373_v39  ;;  %v1415_v59 = vunpack.c.l.s8.bf16 %v1031_v32  ;;  %v1030_v39 = vld [vmem:[%s11608_s30 + $0x430] sm:$0xff]  ;;  %v1420_v55 = vunpack.c.h.s8.bf16 %v1028_v38 }
 0x258   : >> { %2221 = vmatprep.subr.bf16.mxu1 %v1375_v41  ;;  %v1412_v41 = vunpack.c.l.s8.bf16 %v1028_v38  ;;  %v1414_v48 = vunpack.c.l.s8.bf16 %v1030_v39 }
 0x25a   : >> { %2058 = vmatpush1.bf16.msra.mxu0 %v1372_v50  ;;  %v1037_v50 = vld [vmem:[%s11608_s30 + $0x468] sm:$0xff] }
 0x25b   : >> { %2222 = vmatpush1.bf16.msra.mxu1 %v1374_v51  ;;  %2059 = vmatprep.subr.bf16.mxu0 %v1381_v54  ;;  %v1423_v51 = vunpack.c.h.s8.bf16 %v1031_v32  ;;  %v1039_v54 = vld [vmem:[%s11608_s30 + $0x478] sm:$0xff]  ;;  %v1429_v57 = vunpack.c.l.s8.bf16 %v1037_v50  ;;  %v1437_v53 = vunpack.c.h.s8.bf16 %v1037_v50  ;;  %v1053_v32 = vld [vmem:[%s11608_s30 + $0x4e8] sm:$0xff] }
 0x25c   : >> { %2223 = vmatprep.subr.bf16.mxu1 %v1383_v56  ;;  %v1422_v56 = vunpack.c.h.s8.bf16 %v1030_v39  ;;  %v1439_v63 = vunpack.c.h.s8.bf16 %v1039_v54  ;;  %v1461_v38 = vunpack.c.l.s8.bf16 %v1053_v32  ;;  %v1469_v50 = vunpack.c.h.s8.bf16 %v1053_v32 }
 0x25e   : >> { %2060 = vmatpush1.bf16.msra.mxu0 %v1380_v58  ;;  %v1036_v58 = vld [vmem:[%s11608_s30 + $0x460] sm:$0xff] }
 0x25f   : >> { %2224 = vmatpush1.bf16.msra.mxu1 %v1382_v60  ;;  %2061 = vmatprep.subr.bf16.mxu0 %v1389_v61  ;;  %v1431_v60 = vunpack.c.l.s8.bf16 %v1039_v54  ;;  %v1038_v61 = vld [vmem:[%s11608_s30 + $0x470] sm:$0xff]  ;;  %v1061_v54 = vld [vmem:[%s11608_s30 + $0x528] sm:$0xff] }
 0x260   : >> { %2225 = vmatprep.subr.bf16.mxu1 %v1391_v62  ;;  %v1428_v62 = vunpack.c.l.s8.bf16 %v1036_v58 }
 0x262   : >> { %2062 = vmatpush1.bf16.msra.mxu0 %v1388_v18  ;;  %v1045_v18 = vld [vmem:[%s11608_s30 + $0x4a8] sm:$0xff] }
 0x263   : >> { %2226 = vmatpush1.bf16.msra.mxu1 %v1390_v22  ;;  %2063 = vmatprep.subr.bf16.mxu0 %v1397_v19  ;;  %v1047_v22 = vld [vmem:[%s11608_s30 + $0x4b8] sm:$0xff]  ;;  %v1436_v19 = vunpack.c.h.s8.bf16 %v1036_v58  ;;  %v1445_v20 = vunpack.c.l.s8.bf16 %v1045_v18  ;;  %v1477_v58 = vunpack.c.l.s8.bf16 %v1061_v54 }
 0x264   : >> { %2227 = vmatprep.subr.bf16.mxu1 %v1399_v21  ;;  %v1044_v21 = vld [vmem:[%s11608_s30 + $0x4a0] sm:$0xff]  ;;  %v1447_v28 = vunpack.c.l.s8.bf16 %v1047_v22  ;;  %v1455_v26 = vunpack.c.h.s8.bf16 %v1047_v22  ;;  %v1069_v22 = vld [vmem:[%s11608_s30 + $0x568] sm:$0xff] }
 0x266   : >> { %2064 = vmatpush1.bf16.msra.mxu0 %v1396_v24  ;;  %v1046_v24 = vld [vmem:[%s11608_s30 + $0x4b0] sm:$0xff] }
 0x267   : >> { %2228 = vmatpush1.bf16.msra.mxu1 %v1398_v27  ;;  %2065 = vmatprep.subr.bf16.mxu0 %v1405_v29  ;;  %v1444_v27 = vunpack.c.l.s8.bf16 %v1044_v21  ;;  %v1446_v29 = vunpack.c.l.s8.bf16 %v1046_v24 }
 0x268   : >> { %2229 = vmatprep.subr.bf16.mxu1 %v1407_v25  ;;  %v1453_v25 = vunpack.c.h.s8.bf16 %v1045_v18 }
 0x26a   : >> { %2066 = vmatpush1.bf16.msra.mxu0 %v1404_v0  ;;  %v1055_v0 = vld [vmem:[%s11608_s30 + $0x4f8] sm:$0xff] }
 0x26b   : >> { %2230 = vmatpush1.bf16.msra.mxu1 %v1406_v35  ;;  %2076 = vmatprep.subr.bf16.mxu0 %v1413_v36  ;;  %v1452_v35 = vunpack.c.h.s8.bf16 %v1044_v21  ;;  %v1454_v36 = vunpack.c.h.s8.bf16 %v1046_v24  ;;  %v1463_v39 = vunpack.c.l.s8.bf16 %v1055_v0  ;;  %v1493_v21 = vunpack.c.l.s8.bf16 %v1069_v22 }
 0x26c   : >> { %2240 = vmatprep.subr.bf16.mxu1 %v1415_v59  ;;  %v1052_v59 = vld [vmem:[%s11608_s30 + $0x4e0] sm:$0xff] }
 0x26d   : >> { %2068 = vmatmul.mubr.bf16.vlgmr.msra.gmra.mrb[12].mxu0 %v11745_v23 }
 0x26e   : >> { %2232 = vmatmul.mubr.bf16.vlgmr.msra.gmra.mrb[12].mxu1 %v11745_v23  ;;  %2077 = vmatpush1.bf16.msra.mxu0 %v1412_v41  ;;  %v1430_v23 = vunpack.c.l.s8.bf16 %v1038_v61  ;;  %v1054_v41 = vld [vmem:[%s11608_s30 + $0x4f0] sm:$0xff] }
 0x26f   : >> { %2108 = vmatprep.mubr.bf16.mxu0 %v11749_v33  ;;  %2241 = vmatpush1.bf16.msra.mxu1 %v1414_v48  ;;  %v1460_v48 = vunpack.c.l.s8.bf16 %v1052_v59 }
 0x270   : >> { %2272 = vmatprep.mubr.bf16.mxu1 %v11749_v33  ;;  %2078 = vmatprep.subr.bf16.mxu0 %v1421_v49  ;;  %v1438_v33 = vunpack.c.h.s8.bf16 %v1038_v61  ;;  %v1462_v49 = vunpack.c.l.s8.bf16 %v1054_v41 }
 0x271   : >> { %2242 = vmatprep.subr.bf16.mxu1 %v1423_v51  ;;  %v1471_v51 = vunpack.c.h.s8.bf16 %v1055_v0  ;;  %v1077_v0 = vld [vmem:[%s11608_s30 + $0x5a8] sm:$0xff] }
 0x272   : >> { %2079 = vmatpush1.bf16.msra.mxu0 %v1420_v55  ;;  %v1063_v55 = vld [vmem:[%s11608_s30 + $0x538] sm:$0xff] }
 0x273   : >> { %2243 = vmatpush1.bf16.msra.mxu1 %v1422_v56  ;;  %2080 = vmatprep.subr.bf16.mxu0 %v1429_v57  ;;  %v1468_v56 = vunpack.c.h.s8.bf16 %v1052_v59  ;;  %v1470_v57 = vunpack.c.h.s8.bf16 %v1054_v41  ;;  %v1479_v61 = vunpack.c.l.s8.bf16 %v1063_v55  ;;  %v1487_v18 = vunpack.c.h.s8.bf16 %v1063_v55  ;;  %v1085_v55 = vld [vmem:[%s11608_s30 + $0x5e8] sm:$0xff] }
 0x274   : >> { %2244 = vmatprep.subr.bf16.mxu1 %v1431_v60  ;;  %v1060_v60 = vld [vmem:[%s11608_s30 + $0x520] sm:$0xff]  ;;  %v1509_v59 = vunpack.c.l.s8.bf16 %v1077_v0 }
 0x276   : >> { %2081 = vmatpush1.bf16.msra.mxu0 %v1428_v62  ;;  %v1062_v62 = vld [vmem:[%s11608_s30 + $0x530] sm:$0xff] }
 0x277   : >> { %2245 = vmatpush1.bf16.msra.mxu1 %v1430_v23  ;;  %2082 = vmatprep.subr.bf16.mxu0 %v1437_v53  ;;  %v1476_v23 = vunpack.c.l.s8.bf16 %v1060_v60  ;;  %v1478_v53 = vunpack.c.l.s8.bf16 %v1062_v62 }
 0x278   : >> { %2246 = vmatprep.subr.bf16.mxu1 %v1439_v63  ;;  %v1485_v63 = vunpack.c.h.s8.bf16 %v1061_v54 }
 0x27a   : >> { %2083 = vmatpush1.bf16.msra.mxu0 %v1436_v19  ;;  %v1071_v19 = vld [vmem:[%s11608_s30 + $0x578] sm:$0xff] }
 0x27b   : >> { %2247 = vmatpush1.bf16.msra.mxu1 %v1438_v33  ;;  %2084 = vmatprep.subr.bf16.mxu0 %v1445_v20  ;;  %v1484_v33 = vunpack.c.h.s8.bf16 %v1060_v60  ;;  %v1486_v20 = vunpack.c.h.s8.bf16 %v1062_v62  ;;  %v1495_v24 = vunpack.c.l.s8.bf16 %v1071_v19  ;;  %v1503_v32 = vunpack.c.h.s8.bf16 %v1071_v19  ;;  %v1093_v19 = vld [vmem:[%s11608_s30 + $0x628] sm:$0xff] }
 0x27c   : >> { %2248 = vmatprep.subr.bf16.mxu1 %v1447_v28  ;;  %v1068_v28 = vld [vmem:[%s11608_s30 + $0x560] sm:$0xff]  ;;  %v1525_v60 = vunpack.c.l.s8.bf16 %v1085_v55 }
 0x27e   : >> { %2085 = vmatpush1.bf16.msra.mxu0 %v1444_v27  ;;  %v1070_v27 = vld [vmem:[%s11608_s30 + $0x570] sm:$0xff] }
 0x27f   : >> { %2249 = vmatpush1.bf16.msra.mxu1 %v1446_v29  ;;  %2086 = vmatprep.subr.bf16.mxu0 %v1453_v25  ;;  %v1492_v29 = vunpack.c.l.s8.bf16 %v1068_v28  ;;  %v1494_v25 = vunpack.c.l.s8.bf16 %v1070_v27 }
 0x280   : >> { %2250 = vmatprep.subr.bf16.mxu1 %v1455_v26  ;;  %v1501_v26 = vunpack.c.h.s8.bf16 %v1069_v22 }
 0x282   : >> { %2087 = vmatpush1.bf16.msra.mxu0 %v1452_v35  ;;  %v1079_v35 = vld [vmem:[%s11608_s30 + $0x5b8] sm:$0xff] }
 0x283   : >> { %2251 = vmatpush1.bf16.msra.mxu1 %v1454_v36  ;;  %2088 = vmatprep.subr.bf16.mxu0 %v1461_v38  ;;  %v1500_v36 = vunpack.c.h.s8.bf16 %v1068_v28  ;;  %v1502_v38 = vunpack.c.h.s8.bf16 %v1070_v27  ;;  %v1511_v41 = vunpack.c.l.s8.bf16 %v1079_v35  ;;  %v1519_v54 = vunpack.c.h.s8.bf16 %v1079_v35 }
 0x284   : >> { %2252 = vmatprep.subr.bf16.mxu1 %v1463_v39  ;;  %v1076_v39 = vld [vmem:[%s11608_s30 + $0x5a0] sm:$0xff]  ;;  %v1541_v28 = vunpack.c.l.s8.bf16 %v1093_v19 }
 0x286   : >> { %2089 = vmatpush1.bf16.msra.mxu0 %v1460_v48  ;;  %v1078_v48 = vld [vmem:[%s11608_s30 + $0x5b0] sm:$0xff] }
 0x287   : >> { %2253 = vmatpush1.bf16.msra.mxu1 %v1462_v49  ;;  %2090 = vmatprep.subr.bf16.mxu0 %v1469_v50  ;;  %v1508_v49 = vunpack.c.l.s8.bf16 %v1076_v39  ;;  %v1510_v50 = vunpack.c.l.s8.bf16 %v1078_v48 }
 0x288   : >> { %2254 = vmatprep.subr.bf16.mxu1 %v1471_v51  ;;  %v1517_v51 = vunpack.c.h.s8.bf16 %v1077_v0  ;;  %v1101_v0 = vld [vmem:[%s11608_s30 + $0x668] sm:$0xff] }
 0x28a   : >> { %2091 = vmatpush1.bf16.msra.mxu0 %v1468_v56  ;;  %v1087_v56 = vld [vmem:[%s11608_s30 + $0x5f8] sm:$0xff] }
 0x28b   : >> { %2255 = vmatpush1.bf16.msra.mxu1 %v1470_v57  ;;  %2092 = vmatprep.subr.bf16.mxu0 %v1477_v58  ;;  %v1516_v57 = vunpack.c.h.s8.bf16 %v1076_v39  ;;  %v1518_v58 = vunpack.c.h.s8.bf16 %v1078_v48  ;;  %v1527_v62 = vunpack.c.l.s8.bf16 %v1087_v56  ;;  %v1535_v22 = vunpack.c.h.s8.bf16 %v1087_v56  ;;  %v1111_v56 = vld [vmem:[%s11608_s30 + $0x6b8] sm:$0xff] }
 0x28c   : >> { %2256 = vmatprep.subr.bf16.mxu1 %v1479_v61  ;;  %v1084_v61 = vld [vmem:[%s11608_s30 + $0x5e0] sm:$0xff]  ;;  %v1557_v39 = vunpack.c.l.s8.bf16 %v1101_v0 }
 0x28e   : >> { %2093 = vmatpush1.bf16.msra.mxu0 %v1476_v23  ;;  %v1086_v23 = vld [vmem:[%s11608_s30 + $0x5f0] sm:$0xff] }
 0x28f   : >> { %2257 = vmatpush1.bf16.msra.mxu1 %v1478_v53  ;;  %2094 = vmatprep.subr.bf16.mxu0 %v1485_v63  ;;  %v1524_v53 = vunpack.c.l.s8.bf16 %v1084_v61  ;;  %v1526_v63 = vunpack.c.l.s8.bf16 %v1086_v23 }
 0x290   : >> { %2258 = vmatprep.subr.bf16.mxu1 %v1487_v18  ;;  %v1533_v18 = vunpack.c.h.s8.bf16 %v1085_v55  ;;  %v1109_v55 = vld [vmem:[%s11608_s30 + $0x6a8] sm:$0xff] }
 0x292   : >> { %2095 = vmatpush1.bf16.msra.mxu0 %v1484_v33  ;;  %v1095_v33 = vld [vmem:[%s11608_s30 + $0x638] sm:$0xff] }
 0x293   : >> { %2259 = vmatpush1.bf16.msra.mxu1 %v1486_v20  ;;  %2096 = vmatprep.subr.bf16.mxu0 %v1493_v21  ;;  %v1532_v20 = vunpack.c.h.s8.bf16 %v1084_v61  ;;  %v1534_v21 = vunpack.c.h.s8.bf16 %v1086_v23  ;;  %v1543_v27 = vunpack.c.l.s8.bf16 %v1095_v33  ;;  %v1551_v35 = vunpack.c.h.s8.bf16 %v1095_v33 }
 0x294   : >> { %2260 = vmatprep.subr.bf16.mxu1 %v1495_v24  ;;  %v1092_v24 = vld [vmem:[%s11608_s30 + $0x620] sm:$0xff]  ;;  %v1575_v61 = vunpack.c.l.s8.bf16 %v1111_v56  ;;  %v11300_v23 = vmov 1983009808   ;;  %v1583_v33 = vunpack.c.h.s8.bf16 %v1111_v56 }
 0x296   : >> { %2097 = vmatpush1.bf16.msra.mxu0 %v1492_v29  ;;  %v1094_v29 = vld [vmem:[%s11608_s30 + $0x630] sm:$0xff] }
 0x297   : >> { %2261 = vmatpush1.bf16.msra.mxu1 %v1494_v25  ;;  %2098 = vmatprep.subr.bf16.mxu0 %v1501_v26  ;;  %v1540_v25 = vunpack.c.l.s8.bf16 %v1092_v24  ;;  %v1542_v26 = vunpack.c.l.s8.bf16 %v1094_v29 }
 0x298   : >> { %2262 = vmatprep.subr.bf16.mxu1 %v1503_v32  ;;  %v1549_v32 = vunpack.c.h.s8.bf16 %v1093_v19 }
 0x29a   : >> { %2099 = vmatpush1.bf16.msra.mxu0 %v1500_v36  ;;  %v1103_v36 = vld [vmem:[%s11608_s30 + $0x678] sm:$0xff] }
 0x29b   : >> { %2263 = vmatpush1.bf16.msra.mxu1 %v1502_v38  ;;  %2100 = vmatprep.subr.bf16.mxu0 %v1509_v59  ;;  %v1548_v38 = vunpack.c.h.s8.bf16 %v1092_v24  ;;  %v1550_v59 = vunpack.c.h.s8.bf16 %v1094_v29  ;;  %v1559_v48 = vunpack.c.l.s8.bf16 %v1103_v36  ;;  %v1116_v29 = vld [vmem:[%s11608_s30 + $0x6e0] sm:$0xff] }
 0x29c   : >> { %2264 = vmatprep.subr.bf16.mxu1 %v1511_v41  ;;  %v1100_v41 = vld [vmem:[%s11608_s30 + $0x660] sm:$0xff] }
 0x29e   : >> { %2101 = vmatpush1.bf16.msra.mxu0 %v1508_v49  ;;  %v1102_v49 = vld [vmem:[%s11608_s30 + $0x670] sm:$0xff] }
 0x29f   : >> { %2265 = vmatpush1.bf16.msra.mxu1 %v1510_v50  ;;  %2102 = vmatprep.subr.bf16.mxu0 %v1517_v51  ;;  %v1556_v50 = vunpack.c.l.s8.bf16 %v1100_v41  ;;  %v1565_v51 = vunpack.c.h.s8.bf16 %v1101_v0 }
 0x2a0   : >> { %2266 = vmatprep.subr.bf16.mxu1 %v1519_v54  ;;  %v1567_v54 = vunpack.c.h.s8.bf16 %v1103_v36 }
 0x2a2   : >> { %2103 = vmatpush1.bf16.msra.mxu0 %v1516_v57  ;;  %v1564_v57 = vunpack.c.h.s8.bf16 %v1100_v41 }
 0x2a3   : >> { %2267 = vmatpush1.bf16.msra.mxu1 %v1518_v58  ;;  %2104 = vmatprep.subr.bf16.mxu0 %v1525_v60  ;;  %v1573_v58 = vunpack.c.l.s8.bf16 %v1109_v55  ;;  %v1108_v60 = vld [vmem:[%s11608_s30 + $0x6a0] sm:$0xff] }
 0x2a4   : >> { %2268 = vmatprep.subr.bf16.mxu1 %v1527_v62  ;;  %v1110_v62 = vld [vmem:[%s11608_s30 + $0x6b0] sm:$0xff] }
 0x2a5   : >> { %v1582_v24 = vunpack.c.h.s8.bf16 %v1110_v62 }
 0x2a6   : >> { %2105 = vmatpush1.bf16.msra.mxu0 %v1524_v53  ;;  %v2333_v53 = vunpack.c.l.s4 %v11300_v23 }
 0x2a7   : >> { %2269 = vmatpush1.bf16.msra.mxu1 %v1526_v63  ;;  %2106 = vmatprep.subr.bf16.mxu0 %v1533_v18  ;;  %v1572_v63 = vunpack.c.l.s8.bf16 %v1108_v60  ;;  %v1574_v18 = vunpack.c.l.s8.bf16 %v1110_v62 }
 0x2a8   : >> { %2270 = vmatprep.subr.bf16.mxu1 %v1535_v22  ;;  %v1581_v22 = vunpack.c.h.s8.bf16 %v1109_v55  ;;  %v2334_v19 = vunpack.c.0.s8 %v2333_v53  ;;  %v1124_v53 = vld [vmem:[%s11608_s30 + $0x720] sm:$0xff] }
 0x2aa   : >> { %2107 = vmatpush1.bf16.msra.mxu0 %v1532_v20  ;;  %v1117_v20 = vld [vmem:[%s11608_s30 + $0x6e8] sm:$0xff] }
 0x2ab   : >> { %2271 = vmatpush1.bf16.msra.mxu1 %v1534_v21  ;;  %2117 = vmatprep.subr.bf16.mxu0 %v1541_v28  ;;  %v1119_v21 = vld [vmem:[%s11608_s30 + $0x6f8] sm:$0xff]  ;;  %v1580_v28 = vunpack.c.h.s8.bf16 %v1108_v60 }
 0x2ac   : >> { %2281 = vmatprep.subr.bf16.mxu1 %v1543_v27  ;;  %v1589_v27 = vunpack.c.l.s8.bf16 %v1117_v20  ;;  %v1591_v0 = vunpack.c.l.s8.bf16 %v1119_v21  ;;  %v1599_v56 = vunpack.c.h.s8.bf16 %v1119_v21 }
 0x2ad   : >> { %2109 = vmatmul.mubr.bf16.vlgmr.msra.gmra.mrb[12].mxu0 %v11797_v31 }
 0x2ae   : >> { %2273 = vmatmul.mubr.bf16.vlgmr.msra.gmra.mrb[12].mxu1 %v11797_v31  ;;  %2118 = vmatpush1.bf16.msra.mxu0 %v1540_v25  ;;  %v1558_v31 = vunpack.c.l.s8.bf16 %v1102_v49 }
 0x2af   : >> { %2149 = vmatprep.mubr.bf16.mxu0 %v11801_v40  ;;  %2282 = vmatpush1.bf16.msra.mxu1 %v1542_v26 }
 0x2b0   : >> { %2313 = vmatprep.mubr.bf16.mxu1 %v11801_v40  ;;  %2119 = vmatprep.subr.bf16.mxu0 %v1549_v32  ;;  %v1566_v40 = vunpack.c.h.s8.bf16 %v1102_v49  ;;  %v11969_v32 = vsub.s32 %v2334_v19, %v11660_v43  ;;  %v1588_v49 = vunpack.c.l.s8.bf16 %v1116_v29  ;;  %v1597_v43 = vunpack.c.h.s8.bf16 %v1117_v20 }
 0x2b1   : >> { %2283 = vmatprep.subr.bf16.mxu1 %v1551_v35  ;;  %v1118_v35 = vld [vmem:[%s11608_s30 + $0x6f0] sm:$0xff]  ;;  %v1604_v19 = vunpack.c.l.s8.bf16 %v1124_v53 }
 0x2b2   : >> { %2120 = vmatpush1.bf16.msra.mxu0 %v1548_v38  ;;  %v1598_v62 = vunpack.c.h.s8.bf16 %v1118_v35 }
 0x2b3   : >> { %2284 = vmatpush1.bf16.msra.mxu1 %v1550_v59  ;;  %2121 = vmatprep.subr.bf16.mxu0 %v1557_v39 }
 0x2b4   : >> { %2285 = vmatprep.subr.bf16.mxu1 %v1559_v48 }
 0x2b6   : >> { %2122 = vmatpush1.bf16.msra.mxu0 %v1556_v50 }
 0x2b7   : >> { %2286 = vmatpush1.bf16.msra.mxu1 %v1558_v31  ;;  %2123 = vmatprep.subr.bf16.mxu0 %v1565_v51  ;;  %v1590_v51 = vunpack.c.l.s8.bf16 %v1118_v35  ;;  %v1134_v35 = vld [vmem:[%s11608_s30 + $0x770] sm:$0xff] }
 0x2b8   : >> { %2287 = vmatprep.subr.bf16.mxu1 %v1567_v54 }
 0x2ba   : >> { %2124 = vmatpush1.bf16.msra.mxu0 %v1564_v57  ;;  %v1125_v57 = vld [vmem:[%s11608_s30 + $0x728] sm:$0xff] }
 0x2bb   : >> { %2288 = vmatpush1.bf16.msra.mxu1 %v1566_v40  ;;  %2125 = vmatprep.subr.bf16.mxu0 %v1573_v58  ;;  %v1664_v40 = vld [vmem:[#allocation2] sm:$0xff]  ;;  %v1127_v58 = vld [vmem:[%s11608_s30 + $0x738] sm:$0xff]  ;;  %v1605_v23 = vunpack.c.l.s8.bf16 %v1125_v57  ;;  %v1613_v20 = vunpack.c.h.s8.bf16 %v1125_v57 }
 0x2bc   : >> { %2289 = vmatprep.subr.bf16.mxu1 %v1575_v61  ;;  %v1596_v61 = vunpack.c.h.s8.bf16 %v1116_v29  ;;  %v1615_v21 = vunpack.c.h.s8.bf16 %v1127_v58 }
 0x2be   : >> { %2126 = vmatpush1.bf16.msra.mxu0 %v1572_v63 }
 0x2bf   : >> { %2290 = vmatpush1.bf16.msra.mxu1 %v1574_v18  ;;  %2127 = vmatprep.subr.bf16.mxu0 %v1581_v22  ;;  %v1607_v18 = vunpack.c.l.s8.bf16 %v1127_v58  ;;  %v1126_v22 = vld [vmem:[%s11608_s30 + $0x730] sm:$0xff]  ;;  %v1149_v58 = vld [vmem:[%s11608_s30 + $0x7e8] sm:$0xff] }
 0x2c0   : >> { %v1823_v25 = vpop.f32.mrb[8].mxu0  ;;  %v1987_v26 = vpop.f32.mrb[8].mxu1  ;;  %2291 = vmatprep.subr.bf16.mxu1 %v1583_v33  ;;  %v1606_v33 = vunpack.c.l.s8.bf16 %v1126_v22  ;;  %v1614_v29 = vunpack.c.h.s8.bf16 %v1126_v22 }
 0x2c1   : >> { %v1825_v36 = vpop.f32.mrb[9].mxu0  ;;  %v1989_v38 = vpop.f32.mrb[9].mxu1 }
 0x2c2   : >> { %v2330_v59 = vcombine.low %v1823_v25, %v1825_v36  ;;  %v2331_v39 = vcombine.low %v1987_v26, %v1989_v38  ;;  %v1827_v41 = vpop.f32.mrb[10].mxu0  ;;  %v1991_v48 = vpop.f32.mrb[10].mxu1  ;;  %2128 = vmatpush1.bf16.msra.mxu0 %v1580_v28  ;;  %v1133_v28 = vld [vmem:[%s11608_s30 + $0x768] sm:$0xff]  ;;  %v1132_v26 = vld [vmem:[%s11608_s30 + $0x760] sm:$0xff]  ;;  %v1622_v38 = vunpack.c.l.s8.bf16 %v1134_v35 }
 0x2c3   : >> { %2292 = vmatpush1.bf16.msra.mxu1 %v1582_v24  ;;  %v1828_v50 = vpop.f32.mrb[11].mxu0  ;;  %v1992_v31 = vpop.f32.mrb[11].mxu1  ;;  %2129 = vmatprep.subr.bf16.mxu0 %v1589_v27  ;;  %v1135_v24 = vld [vmem:[%s11608_s30 + $0x778] sm:$0xff]  ;;  %v1612_v27 = vunpack.c.h.s8.bf16 %v1124_v53  ;;  %v1621_v25 = vunpack.c.l.s8.bf16 %v1133_v28  ;;  %v1620_v36 = vunpack.c.l.s8.bf16 %v1132_v26  ;;  %v1141_v41 = vld [vmem:[%s11608_s30 + $0x7a8] sm:$0xff]  ;;  %v1148_v53 = vld [vmem:[%s11608_s30 + $0x7e0] sm:$0xff] }
 0x2c4   : >> { %v2338_v54 = vrot.slane %v2330_v59, %v11969_v32  ;;  %v2345_v55 = vrot.slane %v2331_v39, %v11969_v32  ;;  %2293 = vmatprep.subr.bf16.mxu1 %v1591_v0  ;;  %v1623_v0 = vunpack.c.l.s8.bf16 %v1135_v24  ;;  %v1629_v59 = vunpack.c.h.s8.bf16 %v1133_v28  ;;  %v1143_v48 = vld [vmem:[%s11608_s30 + $0x7b8] sm:$0xff] }
 0x2c5   : >> { %v1631_v39 = vunpack.c.h.s8.bf16 %v1135_v24  ;;  %v1630_v50 = vunpack.c.h.s8.bf16 %v1134_v35  ;;  %v1637_v31 = vunpack.c.l.s8.bf16 %v1141_v41  ;;  %v1645_v57 = vunpack.c.h.s8.bf16 %v1141_v41 }
 0x2c6   : >> { %v2346_v60 = vcombine.low %v2338_v54, %v2345_v55  ;;  %2130 = vmatpush1.bf16.msra.mxu0 %v1588_v49  ;;  %v1628_v49 = vunpack.c.h.s8.bf16 %v1132_v26  ;;  %v1142_v54 = vld [vmem:[%s11608_s30 + $0x7b0] sm:$0xff]  ;;  %v1652_v22 = vunpack.c.l.s8.bf16 %v1148_v53 }
 0x2c7   : >> { %2294 = vmatpush1.bf16.msra.mxu1 %v1590_v51  ;;  %2131 = vmatprep.subr.bf16.mxu0 %v1597_v43  ;;  %v1140_v51 = vld [vmem:[%s11608_s30 + $0x7a0] sm:$0xff]  ;;  %v1639_v43 = vunpack.c.l.s8.bf16 %v1143_v48 }
 0x2c8   : >> { %v2366_v63 = vadd.f32 %v2346_v60, %v1664_v40  ;;  %2295 = vmatprep.subr.bf16.mxu1 %v1599_v56  ;;  %v1636_v55 = vunpack.c.l.s8.bf16 %v1140_v51  ;;  %v1638_v56 = vunpack.c.l.s8.bf16 %v1142_v54  ;;  %v1647_v40 = vunpack.c.h.s8.bf16 %v1143_v48  ;;  %v1151_v60 = vld [vmem:[%s11608_s30 + $0x7f8] sm:$0xff] }
 0x2ca   : >> { %2368 = vst [vmem:[#allocation2] sm:$0xff] %v2366_v63  ;;  %2132 = vmatpush1.bf16.msra.mxu0 %v1596_v61  ;;  %v1644_v61 = vunpack.c.h.s8.bf16 %v1140_v51  ;;  %v1655_v63 = vunpack.c.l.s8.bf16 %v1151_v60 }
 0x2cb   : >> { %2296 = vmatpush1.bf16.msra.mxu1 %v1598_v62  ;;  %2133 = vmatprep.subr.bf16.mxu0 %v1605_v23  ;;  %v1646_v62 = vunpack.c.h.s8.bf16 %v1142_v54  ;;  %v1653_v23 = vunpack.c.l.s8.bf16 %v1149_v58 }
 0x2cc   : >> { %2297 = vmatprep.subr.bf16.mxu1 %v1607_v18  ;;  %v1150_v18 = vld [vmem:[%s11608_s30 + $0x7f0] sm:$0xff] }
 0x2cd   : >> { %v1662_v28 = vunpack.c.h.s8.bf16 %v1150_v18 }
 0x2ce   : >> { %2134 = vmatpush1.bf16.msra.mxu0 %v1604_v19  ;;  %v1654_v19 = vunpack.c.l.s8.bf16 %v1150_v18 }
 0x2cf   : >> { %2298 = vmatpush1.bf16.msra.mxu1 %v1606_v33  ;;  %2135 = vmatprep.subr.bf16.mxu0 %v1613_v20  ;;  %v1661_v33 = vunpack.c.h.s8.bf16 %v1149_v58  ;;  %v1663_v20 = vunpack.c.h.s8.bf16 %v1151_v60 }
 0x2d0   : >> { %2299 = vmatprep.subr.bf16.mxu1 %v1615_v21  ;;  %v1660_v21 = vunpack.c.h.s8.bf16 %v1148_v53 }
 0x2d2   : >> { %2136 = vmatpush1.bf16.msra.mxu0 %v1612_v27 }
 0x2d3   : >> { %2300 = vmatpush1.bf16.msra.mxu1 %v1614_v29  ;;  %2137 = vmatprep.subr.bf16.mxu0 %v1621_v25 }
 0x2d4   : >> { %2301 = vmatprep.subr.bf16.mxu1 %v1623_v0 }
 0x2d6   : >> { %2138 = vmatpush1.bf16.msra.mxu0 %v1620_v36 }
 0x2d7   : >> { %2302 = vmatpush1.bf16.msra.mxu1 %v1622_v38  ;;  %2139 = vmatprep.subr.bf16.mxu0 %v1629_v59 }
 0x2d8   : >> { %2303 = vmatprep.subr.bf16.mxu1 %v1631_v39 }
 0x2da   : >> { %2140 = vmatpush1.bf16.msra.mxu0 %v1628_v49 }
 0x2db   : >> { %2304 = vmatpush1.bf16.msra.mxu1 %v1630_v50  ;;  %2141 = vmatprep.subr.bf16.mxu0 %v1637_v31 }
 0x2dc   : >> { %2305 = vmatprep.subr.bf16.mxu1 %v1639_v43 }
 0x2de   : >> { %2142 = vmatpush1.bf16.msra.mxu0 %v1636_v55 }
 0x2df   : >> { %2306 = vmatpush1.bf16.msra.mxu1 %v1638_v56  ;;  %2143 = vmatprep.subr.bf16.mxu0 %v1645_v57 }
 0x2e0   : >> { %2307 = vmatprep.subr.bf16.mxu1 %v1647_v40 }
 0x2e2   : >> { %2144 = vmatpush1.bf16.msra.mxu0 %v1644_v61 }
 0x2e3   : >> { %2308 = vmatpush1.bf16.msra.mxu1 %v1646_v62  ;;  %2145 = vmatprep.subr.bf16.mxu0 %v1653_v23 }
 0x2e4   : >> { %2309 = vmatprep.subr.bf16.mxu1 %v1655_v63 }
 0x2e6   : >> { %2146 = vmatpush1.bf16.msra.mxu0 %v1652_v22 }
 0x2e7   : >> { %2310 = vmatpush1.bf16.msra.mxu1 %v1654_v19  ;;  %2147 = vmatprep.subr.bf16.mxu0 %v1661_v33 }
 0x2e8   : >> { %2311 = vmatprep.subr.bf16.mxu1 %v1663_v20 }
 0x2ea   : >> { %2148 = vmatpush1.bf16.msra.mxu0 %v1660_v21 }
 0x2eb   : >> { %2312 = vmatpush1.bf16.msra.mxu1 %v1662_v28 }
 0x2ed   : >> { %2150 = vmatmul.mubr.bf16.vlgmr.msra.gmra.mrb[12].mxu0 %v11843_v47 }
 0x2ee   : >> { %2314 = vmatmul.mubr.bf16.vlgmr.msra.gmra.mrb[12].mxu1 %v11843_v47  ;;  %v1665_v47 = vld [vmem:[#allocation2 + $0x8] sm:$0xff] }
 0x3c0   : >> { %v2151_v24 = vpop.f32.mrb[12].mxu0 }
 0x3c1   : >> { %v2315_v27 = vpop.f32.mrb[12].mxu1  ;;  %v2153_v29 = vpop.f32.mrb[13].mxu0 }
 0x3c2   : >> { %v2347_v25 = vcombine.low %v2151_v24, %v2153_v29  ;;  %v2317_v26 = vpop.f32.mrb[13].mxu1  ;;  %v2155_v0 = vpop.f32.mrb[14].mxu0 }
 0x3c3   : >> { %v2348_v35 = vcombine.low %v2315_v27, %v2317_v26  ;;  %v2319_v36 = vpop.f32.mrb[14].mxu1  ;;  %v2156_v38 = vpop.f32.mrb[15].mxu0 }
 0x3c4   : >> { %v2355_v59 = vrot.slane %v2347_v25, %v11969_v32  ;;  %v2320_v39 = vpop.f32.mrb[15].mxu1 }
 0x3c5   : >> { %v2362_v41 = vrot.slane %v2348_v35, %v11969_v32  ;;  %584 = sbr.rel (!%p582_p7) target bundleno = 71 (0x47), region = 141 }
 0x3c7   : >> { %v2363_v48 = vcombine.low %v2355_v59, %v2362_v41 }
 0x3c9   : >> { %v2367_v49 = vadd.f32 %v2363_v48, %v1665_v47 }
 0x3cb   : >> { %2376 = vst.msk [vmem:[#allocation2 + $0x8] sm:$0xff] %vm2375_vm14, %v2367_v49 }
 0x3cc   : > { %2380 = sbr.rel (%p8954_p4) target bundleno = 2755 (0xac3), region = 103  ;;  %v10035_v50 = vld [vmem:[%s14631_s6 + $0x4] ss:$24 sps:$4 sm:$0xff] (!%p8954_p4)   ;;  %v10039_v51 = vld [vmem:[%s14631_s6] ss:$24 sps:$4 sm:$0xff] (!%p8954_p4)   ;;  %vm4647_vm15 = vcmask (!%p8954_p4), 31744  }
 0x3cd   : > { %v10037_v31 = vld [vmem:[%s14631_s6 + $0x904] ss:$24 sps:$4 sm:$0xff] (!%p8954_p4)   ;;  %4670 = vmatprep.subr.bf16.mxu0 (!%p8954_p4), %v10035_v50  ;;  %v10040_v43 = vld [vmem:[%s14631_s6 + $0x900] ss:$24 sps:$4 sm:$0xff] (!%p8954_p4)   ;;  %v10041_v1 = vld [vmem:[%s14631_s6 + $0x34] ss:$24 sps:$4 sm:$0xff] (!%p8954_p4)  }
 0x3ce   : > { %4793 = vmatprep.subr.bf16.mxu1 (!%p8954_p4), %v10037_v31  ;;  %4671 = vmatpush1.bf16.msra.mxu0 (!%p8954_p4), %v10039_v51  ;;  %v10043_v2 = vld [vmem:[%s14631_s6 + $0x934] ss:$24 sps:$4 sm:$0xff] (!%p8954_p4)   ;;  %v10045_v3 = vld [vmem:[%s14631_s6 + $0x30] ss:$24 sps:$4 sm:$0xff] (!%p8954_p4)   ;;  %v10047_v5 = vld [vmem:[%s14631_s6 + $0x64] ss:$24 sps:$4 sm:$0xff] (!%p8954_p4)  }
 0x3cf   : > { %4794 = vmatpush1.bf16.msra.mxu1 (!%p8954_p4), %v10040_v43  ;;  %4672 = vmatprep.subr.bf16.mxu0 (!%p8954_p4), %v10041_v1  ;;  %v10046_v4 = vld [vmem:[%s14631_s6 + $0x930] ss:$24 sps:$4 sm:$0xff] (!%p8954_p4)   ;;  %v10049_v6 = vld [vmem:[%s14631_s6 + $0x964] ss:$24 sps:$4 sm:$0xff] (!%p8954_p4)   ;;  %v10051_v7 = vld [vmem:[%s14631_s6 + $0x60] ss:$24 sps:$4 sm:$0xff] (!%p8954_p4)  }
 0x3d0   : > { %4795 = vmatprep.subr.bf16.mxu1 (!%p8954_p4), %v10043_v2  ;;  %v10052_v8 = vld [vmem:[%s14631_s6 + $0x960] ss:$24 sps:$4 sm:$0xff] (!%p8954_p4)   ;;  %v10053_v9 = vld [vmem:[%s14631_s6 + $0x94] ss:$24 sps:$4 sm:$0xff] (!%p8954_p4)   ;;  %v10057_v11 = vld [vmem:[%s14631_s6 + $0x90] ss:$24 sps:$4 sm:$0xff] (!%p8954_p4)  }
 0x3d1   : > { %v10055_v10 = vld [vmem:[%s14631_s6 + $0x994] ss:$24 sps:$4 sm:$0xff] (!%p8954_p4)   ;;  %v10058_v12 = vld [vmem:[%s14631_s6 + $0x990] ss:$24 sps:$4 sm:$0xff] (!%p8954_p4)   ;;  %v10059_v13 = vld [vmem:[%s14631_s6 + $0xc4] ss:$24 sps:$4 sm:$0xff] (!%p8954_p4)  }
 0x3d2   : > { %4673 = vmatpush1.bf16.msra.mxu0 (!%p8954_p4), %v10045_v3  ;;  %v10061_v14 = vld [vmem:[%s14631_s6 + $0x9c4] ss:$24 sps:$4 sm:$0xff] (!%p8954_p4)   ;;  %v10063_v15 = vld [vmem:[%s14631_s6 + $0xc0] ss:$24 sps:$4 sm:$0xff] (!%p8954_p4)   ;;  %v10065_v17 = vld [vmem:[%s14631_s6 + $0xf4] ss:$24 sps:$4 sm:$0xff] (!%p8954_p4)  }
 0x3d3   : > { %4796 = vmatpush1.bf16.msra.mxu1 %v10046_v4  ;;  %4674 = vmatprep.subr.bf16.mxu0 %v10047_v5  ;;  %v10064_v16 = vld [vmem:[%s14631_s6 + $0x9c0] ss:$24 sps:$4 sm:$0xff]   ;;  %v10067_v54 = vld [vmem:[%s14631_s6 + $0x9f4] ss:$24 sps:$4 sm:$0xff]   ;;  %v10069_v55 = vld [vmem:[%s14631_s6 + $0xf0] ss:$24 sps:$4 sm:$0xff]  }
 0x3d4   : > { %4797 = vmatprep.subr.bf16.mxu1 %v10049_v6  ;;  %v10070_v56 = vld [vmem:[%s14631_s6 + $0x9f0] ss:$24 sps:$4 sm:$0xff]   ;;  %v10071_v57 = vld [vmem:[%s14631_s6 + $0x124] ss:$24 sps:$4 sm:$0xff]   ;;  %v10075_v58 = vld [vmem:[%s14631_s6 + $0x120] ss:$24 sps:$4 sm:$0xff]  }
 0x3d5   : > { %v10073_v40 = vld [vmem:[%s14631_s6 + $0xa24] ss:$24 sps:$4 sm:$0xff]   ;;  %v10076_v61 = vld [vmem:[%s14631_s6 + $0xa20] ss:$24 sps:$4 sm:$0xff]   ;;  %v10077_v62 = vld [vmem:[%s14631_s6 + $0x154] ss:$24 sps:$4 sm:$0xff]  }
 0x3d6   : > { %4675 = vmatpush1.bf16.msra.mxu0 %v10051_v7  ;;  %v2917_v60 = vld [vmem:[%s14631_s6 + $0xa80] sm:$0x33]  ;;  %v10079_v22 = vld [vmem:[%s14631_s6 + $0xa54] ss:$24 sps:$4 sm:$0xff]   ;;  %v10081_v35 = vld [vmem:[%s14631_s6 + $0x150] ss:$24 sps:$4 sm:$0xff]  }
 0x3d7   : > { %4798 = vmatpush1.bf16.msra.mxu1 %v10052_v8  ;;  %4676 = vmatprep.subr.bf16.mxu0 %v10053_v9  ;;  %v9292_v23 = vcombine.high %v2917_v60, %v2917_v60  ;;  %v9291_v53 = vcombine.low %v2917_v60, %v2917_v60  ;;  %v2383_v63 = vld [vmem:[%s14629_s4] sm:$0xff]  ;;  %v10082_v36 = vld [vmem:[%s14631_s6 + $0xa50] ss:$24 sps:$4 sm:$0xff]   ;;  %v10088_v5 = vld [vmem:[%s14631_s6 + $0x1b4] ss:$24 sps:$4 sm:$0xff]   ;;  %vm6608_vm0 = vcmask 1045504  }
 0x3d8   : > { %4799 = vmatprep.subr.bf16.mxu1 %v10055_v10  ;;  %v2455_v18 = vld [vmem:[%s14630_s5] sm:$0xff]  ;;  %v2404_v19 = vrot.slane %v2383_v63, %v11778_v34  ;;  %v2408_v33 = vrot.slane %v2383_v63, %v11731_v37  ;;  %v2412_v20 = vrot.slane %v2383_v63, %v11830_v52  ;;  %v2416_v21 = vrot.slane %v2383_v63, %v11783_v42  ;;  %v2382_v43 = vld [vmem:[#allocation2 + $0x8] sm:$0xff] }
 0x3d9   : > { %v2476_v28 = vrot.slane %v2455_v18, %v11778_v34  ;;  %v2480_v24 = vrot.slane %v2455_v18, %v11731_v37  ;;  %v2484_v27 = vrot.slane %v2455_v18, %v11830_v52  ;;  %v2488_v25 = vrot.slane %v2455_v18, %v11783_v42  ;;  %v10083_v42 = vld [vmem:[%s14631_s6 + $0x184] ss:$24 sps:$4 sm:$0xff]   ;;  %v10086_v51 = vld [vmem:[%s14631_s6 + $0x180] ss:$24 sps:$4 sm:$0xff]  }
 0x3da   : > { %4677 = vmatpush1.bf16.msra.mxu0 %v10057_v11  ;;  %v2434_v29 = vcombine.low %v2404_v19, %v2408_v33  ;;  %v2388_v26 = vrot.slane %v2383_v63, %v11663_v44  ;;  %v2392_v0 = vrot.slane %v2383_v63, %v11666_v45  ;;  %v2435_v38 = vcombine.low %v2412_v20, %v2416_v21  ;;  %v10092_v10 = vld [vmem:[%s14631_s6 + $0xc] ss:$24 sps:$4 sm:$0xff]   ;;  %v10099_v60 = vld [vmem:[%s14631_s6 + $0x1e0] ss:$24 sps:$4 sm:$0xff]  }
 0x3db   : > { %4800 = vmatpush1.bf16.msra.mxu1 %v10058_v12  ;;  %4678 = vmatprep.subr.bf16.mxu0 %v10059_v13  ;;  %v2506_v59 = vcombine.low %v2476_v28, %v2480_v24  ;;  %v2396_v52 = vrot.slane %v2383_v63, %v11726_v30  ;;  %v2507_v41 = vcombine.low %v2484_v27, %v2488_v25  ;;  %v4653_v8 = vsel %vm2369_vm8, %v9291_v53, 0  ;;  %v2381_v53 = vld [vmem:[#allocation2] sm:$0xff]  ;;  %v10098_v24 = vld [vmem:[%s14631_s6 + $0x3c] ss:$24 sps:$4 sm:$0xff]  }
 0x3dc   : > { %4801 = vmatprep.subr.bf16.mxu1 %v10061_v14  ;;  %v2442_v39 = vrot.slane %v2434_v29, %v11969_v32  ;;  %v2400_v47 = vrot.slane %v2383_v63, %v11669_v46  ;;  %v2449_v48 = vrot.slane %v2435_v38, %v11969_v32  ;;  %v2417_v50 = vcombine.low %v2388_v26, %v2392_v0  ;;  %v10106_v33 = vld [vmem:[%s14631_s6 + $0x244] ss:$24 sps:$4 sm:$0xff]   ;;  %v10090_v28 = vld [vmem:[%s14631_s6 + $0x8] ss:$24 sps:$4 sm:$0xff]   ;;  %v10112_v25 = vld [vmem:[%s14631_s6 + $0x274] ss:$24 sps:$4 sm:$0xff]  }
 0x3dd   : > { %v2514_v49 = vrot.slane %v2506_v59, %v11969_v32  ;;  %v2460_v31 = vrot.slane %v2455_v18, %v11663_v44  ;;  %v2521_v1 = vrot.slane %v2507_v41, %v11969_v32  ;;  %v2464_v3 = vrot.slane %v2455_v18, %v11666_v45  ;;  %v10111_v29 = vld [vmem:[%s14631_s6 + $0x240] ss:$24 sps:$4 sm:$0xff]   ;;  %v10117_v38 = vld [vmem:[%s14631_s6 + $0x270] ss:$24 sps:$4 sm:$0xff]   ;;  %v10110_v41 = vld [vmem:[%s14631_s6 + $0x9c] ss:$24 sps:$4 sm:$0xff]  }
 0x3de   : > { %4679 = vmatpush1.bf16.msra.mxu0 %v10063_v15  ;;  %v2418_v2 = vcombine.low %v2396_v52, %v2400_v47  ;;  %v2468_v4 = vrot.slane %v2455_v18, %v11726_v30  ;;  %v2450_v6 = vcombine.low %v2442_v39, %v2449_v48  ;;  %v2472_v7 = vrot.slane %v2455_v18, %v11669_v46  ;;  %v10096_v0 = vld [vmem:[%s14631_s6 + $0x38] ss:$24 sps:$4 sm:$0xff]   ;;  %v10118_v52 = vld [vmem:[%s14631_s6 + $0x2a4] ss:$24 sps:$4 sm:$0xff]   ;;  %v10102_v39 = vld [vmem:[%s14631_s6 + $0x68] ss:$24 sps:$4 sm:$0xff]  }
 0x3df   : > { %4802 = vmatpush1.bf16.msra.mxu1 %v10064_v16  ;;  %4680 = vmatprep.subr.bf16.mxu0 %v10065_v17  ;;  %v2522_v9 = vcombine.low %v2514_v49, %v2521_v1  ;;  %v2489_v11 = vcombine.low %v2460_v31, %v2464_v3  ;;  %v2425_v14 = vrot.slane %v2417_v50, %v11969_v32  ;;  %v10093_v17 = vld [vmem:[%s14631_s6 + $0x1b0] ss:$24 sps:$4 sm:$0xff]   ;;  %v10123_v47 = vld [vmem:[%s14631_s6 + $0x2a0] ss:$24 sps:$4 sm:$0xff]   ;;  %v10124_v49 = vld [vmem:[%s14631_s6 + $0x2d4] ss:$24 sps:$4 sm:$0xff]  }
 0x3e0   : > { %4803 = vmatprep.subr.bf16.mxu1 %v10067_v54  ;;  %v2454_v12 = vmul.f32 %v2450_v6, %v2382_v43  ;;  %v2490_v13 = vcombine.low %v2468_v4, %v2472_v7  ;;  %v2432_v15 = vrot.slane %v2418_v2, %v11969_v32  ;;  %v10094_v54 = vld [vmem:[%s14631_s6 + $0x1e4] ss:$24 sps:$4 sm:$0xff]   ;;  %v10108_v50 = vld [vmem:[%s14631_s6 + $0x98] ss:$24 sps:$4 sm:$0xff]   ;;  %v10114_v2 = vld [vmem:[%s14631_s6 + $0xc8] ss:$24 sps:$4 sm:$0xff]  }
 0x3e1   : > { %v10116_v31 = vld [vmem:[%s14631_s6 + $0xcc] ss:$24 sps:$4 sm:$0xff]   ;;  %v10122_v3 = vld [vmem:[%s14631_s6 + $0xfc] ss:$24 sps:$4 sm:$0xff]   ;;  %vm6604_vm1 = vcmask 490496   ;;  %vm7926_vm2 = vcmask 1043456  }
 0x3e2   : > { %4681 = vmatpush1.bf16.msra.mxu0 %v10069_v55  ;;  %v2526_v16 = vadd.f32 %v2522_v9, %v2454_v12  ;;  %v2497_v55 = vrot.slane %v2489_v11, %v11969_v32  ;;  %v10132_v1 = vld [vmem:[%s14631_s6 + $0x304] ss:$24 sps:$4 sm:$0xff]   ;;  %v10138_v7 = vld [vmem:[%s14631_s6 + $0x334] ss:$24 sps:$4 sm:$0xff]   ;;  %v10126_v12 = vld [vmem:[%s14631_s6 + $0x128] ss:$24 sps:$4 sm:$0xff]  }
 0x3e3   : > { %4804 = vmatpush1.bf16.msra.mxu1 %v10070_v56  ;;  %4682 = vmatprep.subr.bf16.mxu0 %v10071_v57  ;;  %v2504_v56 = vrot.slane %v2490_v13, %v11969_v32  ;;  %v10128_v9 = vld [vmem:[%s14631_s6 + $0x12c] ss:$24 sps:$4 sm:$0xff]   ;;  %v10135_v13 = vld [vmem:[%s14631_s6 + $0x15c] ss:$24 sps:$4 sm:$0xff]   ;;  %vm7922_vm3 = vcmask 719872  }
 0x3e4   : > { %4805 = vmatprep.subr.bf16.mxu1 %v10073_v40  ;;  %v12148_v57 = vmax.f32 %v2526_v16, 0.0  ;;  %v2433_v40 = vcombine.low %v2425_v14, %v2432_v15  ;;  %v10144_v11 = vld [vmem:[%s14631_s6 + $0x364] ss:$24 sps:$4 sm:$0xff]   ;;  %v10142_v14 = vld [vmem:[%s14631_s6 + $0x360] ss:$24 sps:$4 sm:$0xff]  }
 0x3e5   : > { %v10150_v15 = vld [vmem:[%s14631_s6 + $0x394] ss:$24 sps:$4 sm:$0xff]   ;;  %v10133_v16 = vld [vmem:[%s14631_s6 + $0x158] ss:$24 sps:$4 sm:$0xff]  }
 0x3e6   : > { %4683 = vmatpush1.bf16.msra.mxu0 %v10075_v58  ;;  %v2548_v58 = vcombine.high %v12148_v57, %v12148_v57  ;;  %v2453_v63 = vmul.f32 %v2433_v40, %v2381_v53  ;;  %v10147_v40 = vld [vmem:[%s14631_s6 + $0x1bc] ss:$24 sps:$4 sm:$0xff]  }
 0x3e7   : > { %4806 = vmatpush1.bf16.msra.mxu1 %v10076_v61  ;;  %4684 = vmatprep.subr.bf16.mxu0 %v10077_v62  ;;  %v10100_v61 = vld [vmem:[%s14631_s6 + $0x214] ss:$24 sps:$4 sm:$0xff]   ;;  %v2505_v62 = vcombine.low %v2497_v55, %v2504_v56  ;;  %v10156_v55 = vld [vmem:[%s14631_s6 + $0x3c4] ss:$24 sps:$4 sm:$0xff]   ;;  %v10139_v56 = vld [vmem:[%s14631_s6 + $0x188] ss:$24 sps:$4 sm:$0xff]  }
 0x3e8   : > { %4807 = vmatprep.subr.bf16.mxu1 %v10079_v22  ;;  %v10105_v22 = vld [vmem:[%s14631_s6 + $0x210] ss:$24 sps:$4 sm:$0xff]   ;;  %v10168_v53 = vld [vmem:[%s14631_s6 + $0x424] ss:$24 sps:$4 sm:$0xff]  }
 0x3e9   : > { %v2525_v20 = vadd.f32 %v2505_v62, %v2453_v63  ;;  %v10153_v62 = vld [vmem:[%s14631_s6 + $0x1ec] ss:$24 sps:$4 sm:$0xff]   ;;  %v10151_v63 = vld [vmem:[%s14631_s6 + $0x1e8] ss:$24 sps:$4 sm:$0xff]  }
 0x3ea   : > { %4685 = vmatpush1.bf16.msra.mxu0 %v10081_v35  ;;  %v10104_v35 = vld [vmem:[%s14631_s6 + $0x6c] ss:$24 sps:$4 sm:$0xff]  }
 0x3eb   : > { %4808 = vmatpush1.bf16.msra.mxu1 %v10082_v36  ;;  %4686 = vmatprep.subr.bf16.mxu0 %v10083_v42  ;;  %v2527_v27 = vmax.f32 %v2525_v20, 0.0  ;;  %v10157_v20 = vld [vmem:[%s14631_s6 + $0x218] ss:$24 sps:$4 sm:$0xff]  }
 0x3ec   : > { %9297 = vmatprep.subr.msk.bf16.mxu1 %vm2369_vm8, %v9292_v23  ;;  %v2562_v23 = vrot.slane %v2548_v58, %v11969_v32  ;;  %v10154_v58 = vld [vmem:[%s14631_s6 + $0x3c0] ss:$24 sps:$4 sm:$0xff]  }
 0x3ed   : > { %v2538_v26 = vrot.slane %v2527_v27, %v11969_v32  ;;  %v2531_v59 = vcombine.high %v2527_v27, %v2527_v27  ;;  %v10180_v27 = vld [vmem:[%s14631_s6 + $0x484] ss:$24 sps:$4 sm:$0xff]  }
 0x3ee   : > { %4687 = vmatpush1.bf16.msra.mxu0 %v10086_v51  ;;  %v2564_v18 = vcombine.high %v2562_v23, %v2562_v23  ;;  %v12162_v19 = vpack.c.bf16 %v2562_v23, %v2562_v23  ;;  %v10129_v51 = vld [vmem:[%s14631_s6 + $0x2d0] ss:$24 sps:$4 sm:$0xff]  }
 0x3ef   : > { %4810 = vmatpush1.bf16.msra.mxu1 %v4653_v8  ;;  %4688 = vmatprep.subr.bf16.mxu0 %v10088_v5  ;;  %v2546_v36 = vcombine.high %v2538_v26, %v2538_v26  ;;  %v12211_v48 = vrot.slane %v2531_v59, %v11969_v32  ;;  %v12236_v4 = vpack.c.bf16 %v2538_v26, %v2538_v26  ;;  %v10130_v5 = vld [vmem:[%s14631_s6 + $0x300] ss:$24 sps:$4 sm:$0xff]   ;;  %v10160_v23 = vld [vmem:[%s14631_s6 + $0x3f0] ss:$24 sps:$4 sm:$0xff]   ;;  %v10192_v59 = vld [vmem:[%s14631_s6 + $0x4e4] ss:$24 sps:$4 sm:$0xff]  }
 0x3f0   : > { %4834 = vmatprep.subr.bf16.mxu1 %v10092_v10  ;;  %v12167_v21 = vpack.c.bf16 %v2564_v18, %v2564_v18  ;;  %v10120_v8 = vld [vmem:[%s14631_s6 + $0xf8] ss:$24 sps:$4 sm:$0xff]   ;;  %v10159_v18 = vld [vmem:[%s14631_s6 + $0x21c] ss:$24 sps:$4 sm:$0xff]  }
 0x3f1   : > { %v12197_v42 = vpack.c.bf16 %v2546_v36, %v2546_v36  ;;  %v2547_v43 = vcombine.high %v12211_v48, %v12211_v48  ;;  %v10136_v10 = vld [vmem:[%s14631_s6 + $0x330] ss:$24 sps:$4 sm:$0xff]   ;;  %v10178_v26 = vld [vmem:[%s14631_s6 + $0x480] ss:$24 sps:$4 sm:$0xff]   ;;  %v10177_v36 = vld [vmem:[%s14631_s6 + $0x2ac] ss:$24 sps:$4 sm:$0xff]  }
 0x3f2   : > { %4689 = vmatpush1.bf16.msra.mxu0 %v10093_v17  ;;  %9298 = vmatprep.mubr.msk.bf16.mxu1 %vm4647_vm15, %v12167_v21  ;;  %v10141_v17 = vld [vmem:[%s14631_s6 + $0x18c] ss:$24 sps:$4 sm:$0xff]  }
 0x3f3   : > { %4690 = vmatprep.subr.bf16.mxu0 %v10094_v54  ;;  %4826 = vmatmul.mubr.bf16.vlgmr.msra.gmra.mrb[0].mxu1 %v12162_v19  ;;  %v12241_v6 = vpack.c.bf16 %v2547_v43, %v2547_v43  ;;  %v10148_v54 = vld [vmem:[%s14631_s6 + $0x390] ss:$24 sps:$4 sm:$0xff]  }
 0x3f4   : > { %4835 = vmatpush1.bf16.msra.mxu1 %v10090_v28  ;;  %4702 = vmatprep.mubr.bf16.mxu0 %v12197_v42  ;;  %v10165_v28 = vld [vmem:[%s14631_s6 + $0x24c] ss:$24 sps:$4 sm:$0xff]   ;;  %v10187_v43 = vld [vmem:[%s14631_s6 + $0x308] ss:$24 sps:$4 sm:$0xff]  }
 0x3f5   : > { %4836 = vmatprep.subr.bf16.mxu1 %v10098_v24  ;;  %4866 = vmatprep.mubr.bf16.mxu1 %v12197_v42  ;;  %v10172_v24 = vld [vmem:[%s14631_s6 + $0x450] ss:$24 sps:$4 sm:$0xff]  }
 0x3f6   : > { %4691 = vmatpush1.bf16.msra.mxu0 %v10099_v60  ;;  %v10162_v60 = vld [vmem:[%s14631_s6 + $0x3f4] ss:$24 sps:$4 sm:$0xff]  }
 0x3f7   : > { %4692 = vmatprep.subr.bf16.mxu0 %v10100_v61  ;;  %v10145_v61 = vld [vmem:[%s14631_s6 + $0x1b8] ss:$24 sps:$4 sm:$0xff]  }
 0x3f8   : > { %4837 = vmatpush1.bf16.msra.mxu1 %v10096_v0  ;;  %v10186_v0 = vld [vmem:[%s14631_s6 + $0x4b4] ss:$24 sps:$4 sm:$0xff]  }
 0x3f9   : > { %4838 = vmatprep.subr.bf16.mxu1 %v10104_v35  ;;  %v10169_v35 = vld [vmem:[%s14631_s6 + $0x278] ss:$24 sps:$4 sm:$0xff]  }
 0x3fa   : > { %4693 = vmatpush1.bf16.msra.mxu0 %v10105_v22  ;;  %v10166_v22 = vld [vmem:[%s14631_s6 + $0x420] ss:$24 sps:$4 sm:$0xff]  }
 0x3fb   : > { %4694 = vmatprep.subr.bf16.mxu0 %v10106_v33  ;;  %v10174_v33 = vld [vmem:[%s14631_s6 + $0x454] ss:$24 sps:$4 sm:$0xff]  }
 0x3fc   : > { %4839 = vmatpush1.bf16.msra.mxu1 %v10102_v39  ;;  %v10183_v39 = vld [vmem:[%s14631_s6 + $0x2dc] ss:$24 sps:$4 sm:$0xff]  }
 0x3fd   : > { %4840 = vmatprep.subr.bf16.mxu1 %v10110_v41  ;;  %v10190_v41 = vld [vmem:[%s14631_s6 + $0x4e0] ss:$24 sps:$4 sm:$0xff]  }
 0x3fe   : > { %4695 = vmatpush1.bf16.msra.mxu0 %v10111_v29  ;;  %v10163_v29 = vld [vmem:[%s14631_s6 + $0x248] ss:$24 sps:$4 sm:$0xff]  }
 0x3ff   : > { %4696 = vmatprep.subr.bf16.mxu0 %v10112_v25  ;;  %v10171_v25 = vld [vmem:[%s14631_s6 + $0x27c] ss:$24 sps:$4 sm:$0xff]  }
 0x400   : > { %4841 = vmatpush1.bf16.msra.mxu1 %v10108_v50  ;;  %v10189_v50 = vld [vmem:[%s14631_s6 + $0x30c] ss:$24 sps:$4 sm:$0xff]  }
 0x401   : > { %4842 = vmatprep.subr.bf16.mxu1 %v10116_v31  ;;  %v10196_v31 = vld [vmem:[%s14631_s6 + $0x510] ss:$24 sps:$4 sm:$0xff]  }
 0x402   : > { %4697 = vmatpush1.bf16.msra.mxu0 %v10117_v38  ;;  %v10184_v38 = vld [vmem:[%s14631_s6 + $0x4b0] ss:$24 sps:$4 sm:$0xff]  }
 0x403   : > { %4698 = vmatprep.subr.bf16.mxu0 %v10118_v52  ;;  %v10175_v52 = vld [vmem:[%s14631_s6 + $0x2a8] ss:$24 sps:$4 sm:$0xff]  }
 0x404   : > { %4843 = vmatpush1.bf16.msra.mxu1 %v10114_v2  ;;  %v10202_v2 = vld [vmem:[%s14631_s6 + $0x540] ss:$24 sps:$4 sm:$0xff]  }
 0x405   : > { %4844 = vmatprep.subr.bf16.mxu1 %v10122_v3  ;;  %v10210_v3 = vld [vmem:[%s14631_s6 + $0x574] ss:$24 sps:$4 sm:$0xff]  }
 0x406   : > { %4699 = vmatpush1.bf16.msra.mxu0 %v10123_v47  ;;  %v10198_v47 = vld [vmem:[%s14631_s6 + $0x514] ss:$24 sps:$4 sm:$0xff]  }
 0x407   : > { %4700 = vmatprep.subr.bf16.mxu0 %v10124_v49  ;;  %v10181_v49 = vld [vmem:[%s14631_s6 + $0x2d8] ss:$24 sps:$4 sm:$0xff]  }
 0x408   : > { %4845 = vmatpush1.bf16.msra.mxu1 %v10120_v8  ;;  %v10208_v8 = vld [vmem:[%s14631_s6 + $0x570] ss:$24 sps:$4 sm:$0xff]  }
 0x409   : > { %4846 = vmatprep.subr.bf16.mxu1 %v10128_v9  ;;  %v10216_v9 = vld [vmem:[%s14631_s6 + $0x5a4] ss:$24 sps:$4 sm:$0xff]  }
 0x40a   : > { %4701 = vmatpush1.bf16.msra.mxu0 %v10129_v51  ;;  %v10204_v51 = vld [vmem:[%s14631_s6 + $0x544] ss:$24 sps:$4 sm:$0xff]  }
 0x40b   : > { %4711 = vmatprep.subr.bf16.mxu0 %v10132_v1  ;;  %v10195_v1 = vld [vmem:[%s14631_s6 + $0x33c] ss:$24 sps:$4 sm:$0xff]  }
 0x40c   : > { %4847 = vmatpush1.bf16.msra.mxu1 %v10126_v12  ;;  %v10214_v12 = vld [vmem:[%s14631_s6 + $0x5a0] ss:$24 sps:$4 sm:$0xff]  }
 0x40d   : > { %4703 = vmatmul.mubr.bf16.vlgmr.msra.gmra.mrb[0].mxu0 %v12236_v4  ;;  %4848 = vmatprep.subr.bf16.mxu1 %v10135_v13  ;;  %v12417_v13 = vrot.slane %v12148_v57, %v11969_v32  ;;  %v10220_v32 = vld [vmem:[%s14631_s6 + $0x5d0] ss:$24 sps:$4 sm:$0xff]  }
 0x40e   : > { %4712 = vmatpush1.bf16.msra.mxu0 %v10130_v5  ;;  %4743 = vmatprep.mubr.bf16.mxu0 %v12241_v6  ;;  %v10193_v5 = vld [vmem:[%s14631_s6 + $0x338] ss:$24 sps:$4 sm:$0xff]  }
 0x40f   : > { %4713 = vmatprep.subr.bf16.mxu0 %v10138_v7  ;;  %v10201_v7 = vld [vmem:[%s14631_s6 + $0x36c] ss:$24 sps:$4 sm:$0xff]   ;;  %v2563_v57 = vcombine.high %v12417_v13, %v12417_v13 }
 0x410   : > { %4849 = vmatpush1.bf16.msra.mxu1 %v10133_v16  ;;  %v10213_v16 = vld [vmem:[%s14631_s6 + $0x3cc] ss:$24 sps:$4 sm:$0xff]  }
 0x411   : > { %4850 = vmatprep.subr.bf16.mxu1 %v10141_v17  ;;  %v10228_v17 = vld [vmem:[%s14631_s6 + $0x604] ss:$24 sps:$4 sm:$0xff]  }
 0x412   : > { %4714 = vmatpush1.bf16.msra.mxu0 %v10136_v10  ;;  %v10199_v10 = vld [vmem:[%s14631_s6 + $0x368] ss:$24 sps:$4 sm:$0xff]  }
 0x413   : > { %4715 = vmatprep.subr.bf16.mxu0 %v10144_v11  ;;  %v10207_v11 = vld [vmem:[%s14631_s6 + $0x39c] ss:$24 sps:$4 sm:$0xff]  }
 0x414   : > { %4851 = vmatpush1.bf16.msra.mxu1 %v10139_v56  ;;  %v12444_v56 = vpack.c.bf16 %v12211_v48, %v12211_v48  ;;  %v10225_v48 = vld [vmem:[%s14631_s6 + $0x42c] ss:$24 sps:$4 sm:$0xff]  }
 0x415   : > { %4852 = vmatprep.subr.bf16.mxu1 %v10147_v40  ;;  %v10226_v40 = vld [vmem:[%s14631_s6 + $0x600] ss:$24 sps:$4 sm:$0xff]  }
 0x416   : > { %4716 = vmatpush1.bf16.msra.mxu0 %v10142_v14  ;;  %v10222_v14 = vld [vmem:[%s14631_s6 + $0x5d4] ss:$24 sps:$4 sm:$0xff]  }
 0x417   : > { %4717 = vmatprep.subr.bf16.mxu0 %v10150_v15  ;;  %v10205_v15 = vld [vmem:[%s14631_s6 + $0x398] ss:$24 sps:$4 sm:$0xff]  }
 0x418   : > { %4853 = vmatpush1.bf16.msra.mxu1 %v10145_v61  ;;  %v10217_v61 = vld [vmem:[%s14631_s6 + $0x3f8] ss:$24 sps:$4 sm:$0xff]  }
 0x419   : > { %4854 = vmatprep.subr.bf16.mxu1 %v10153_v62  ;;  %v10232_v62 = vld [vmem:[%s14631_s6 + $0x630] ss:$24 sps:$4 sm:$0xff]  }
 0x41a   : > { %4718 = vmatpush1.bf16.msra.mxu0 %v10148_v54  ;;  %v10211_v54 = vld [vmem:[%s14631_s6 + $0x3c8] ss:$24 sps:$4 sm:$0xff]  }
 0x41b   : > { %4719 = vmatprep.subr.bf16.mxu0 %v10156_v55  ;;  %v10219_v55 = vld [vmem:[%s14631_s6 + $0x3fc] ss:$24 sps:$4 sm:$0xff]  }
 0x41c   : > { %4855 = vmatpush1.bf16.msra.mxu1 %v10151_v63  ;;  %v10231_v63 = vld [vmem:[%s14631_s6 + $0x45c] ss:$24 sps:$4 sm:$0xff]  }
 0x41d   : > { %4856 = vmatprep.subr.bf16.mxu1 %v10159_v18  ;;  %v10238_v18 = vld [vmem:[%s14631_s6 + $0x660] ss:$24 sps:$4 sm:$0xff]  }
 0x41e   : > { %4720 = vmatpush1.bf16.msra.mxu0 %v10154_v58  ;;  %v12449_v58 = vpack.c.bf16 %v2563_v57, %v2563_v57  ;;  %v10283_v57 = vld [vmem:[%s14631_s6 + $0x608] ss:$24 sps:$4 sm:$0xff]  }
 0x41f   : > { %4721 = vmatprep.subr.bf16.mxu0 %v10162_v60  ;;  %v10234_v60 = vld [vmem:[%s14631_s6 + $0x634] ss:$24 sps:$4 sm:$0xff]  }
 0x420   : > { %4857 = vmatpush1.bf16.msra.mxu1 %v10157_v20  ;;  %v10237_v20 = vld [vmem:[%s14631_s6 + $0x48c] ss:$24 sps:$4 sm:$0xff]  }
 0x421   : > { %4858 = vmatprep.subr.bf16.mxu1 %v10165_v28  ;;  %v10244_v28 = vld [vmem:[%s14631_s6 + $0x690] ss:$24 sps:$4 sm:$0xff]  }
 0x422   : > { %4722 = vmatpush1.bf16.msra.mxu0 %v10160_v23  ;;  %v10240_v23 = vld [vmem:[%s14631_s6 + $0x664] ss:$24 sps:$4 sm:$0xff]  }
 0x423   : > { %4723 = vmatprep.subr.bf16.mxu0 %v10168_v53  ;;  %v10223_v53 = vld [vmem:[%s14631_s6 + $0x428] ss:$24 sps:$4 sm:$0xff]  }
 0x424   : > { %4859 = vmatpush1.bf16.msra.mxu1 %v10163_v29  ;;  %v10243_v29 = vld [vmem:[%s14631_s6 + $0x4bc] ss:$24 sps:$4 sm:$0xff]  }
 0x425   : > { %4860 = vmatprep.subr.bf16.mxu1 %v10171_v25  ;;  %v10250_v25 = vld [vmem:[%s14631_s6 + $0x6c0] ss:$24 sps:$4 sm:$0xff]  }
 0x426   : > { %4724 = vmatpush1.bf16.msra.mxu0 %v10166_v22  ;;  %v10246_v22 = vld [vmem:[%s14631_s6 + $0x694] ss:$24 sps:$4 sm:$0xff]  }
 0x427   : > { %4725 = vmatprep.subr.bf16.mxu0 %v10174_v33  ;;  %v10229_v33 = vld [vmem:[%s14631_s6 + $0x458] ss:$24 sps:$4 sm:$0xff]  }
 0x428   : > { %4861 = vmatpush1.bf16.msra.mxu1 %v10169_v35  ;;  %v10249_v35 = vld [vmem:[%s14631_s6 + $0x4ec] ss:$24 sps:$4 sm:$0xff]  }
 0x429   : > { %4862 = vmatprep.subr.bf16.mxu1 %v10177_v36  ;;  %v10256_v36 = vld [vmem:[%s14631_s6 + $0x6f0] ss:$24 sps:$4 sm:$0xff]  }
 0x42a   : > { %4726 = vmatpush1.bf16.msra.mxu0 %v10172_v24  ;;  %v10252_v24 = vld [vmem:[%s14631_s6 + $0x6c4] ss:$24 sps:$4 sm:$0xff]  }
 0x42b   : > { %4727 = vmatprep.subr.bf16.mxu0 %v10180_v27  ;;  %v10235_v27 = vld [vmem:[%s14631_s6 + $0x488] ss:$24 sps:$4 sm:$0xff]  }
 0x42c   : > { %4863 = vmatpush1.bf16.msra.mxu1 %v10175_v52  ;;  %v10255_v52 = vld [vmem:[%s14631_s6 + $0x51c] ss:$24 sps:$4 sm:$0xff]  }
 0x42d   : > { %4864 = vmatprep.subr.bf16.mxu1 %v10183_v39  ;;  %v10262_v39 = vld [vmem:[%s14631_s6 + $0x720] ss:$24 sps:$4 sm:$0xff]  }
 0x42e   : > { %4728 = vmatpush1.bf16.msra.mxu0 %v10178_v26  ;;  %v10258_v26 = vld [vmem:[%s14631_s6 + $0x6f4] ss:$24 sps:$4 sm:$0xff]  }
 0x42f   : > { %4729 = vmatprep.subr.bf16.mxu0 %v10186_v0  ;;  %v10241_v0 = vld [vmem:[%s14631_s6 + $0x4b8] ss:$24 sps:$4 sm:$0xff]  }
 0x430   : > { %4865 = vmatpush1.bf16.msra.mxu1 %v10181_v49  ;;  %v10261_v49 = vld [vmem:[%s14631_s6 + $0x54c] ss:$24 sps:$4 sm:$0xff]  }
 0x431   : > { %4875 = vmatprep.subr.bf16.mxu1 %v10189_v50  ;;  %v10268_v50 = vld [vmem:[%s14631_s6 + $0x750] ss:$24 sps:$4 sm:$0xff]  }
 0x432   : > { %4730 = vmatpush1.bf16.msra.mxu0 %v10184_v38  ;;  %v10264_v38 = vld [vmem:[%s14631_s6 + $0x724] ss:$24 sps:$4 sm:$0xff]  }
 0x433   : > { %4731 = vmatprep.subr.bf16.mxu0 %v10192_v59  ;;  %4867 = vmatmul.mubr.bf16.vlgmr.msra.gmra.mrb[4].mxu1 %v12236_v4  ;;  %v10247_v59 = vld [vmem:[%s14631_s6 + $0x4e8] ss:$24 sps:$4 sm:$0xff]  }
 0x434   : > { %4876 = vmatpush1.bf16.msra.mxu1 %v10187_v43  ;;  %4907 = vmatprep.mubr.bf16.mxu1 %v12241_v6  ;;  %v10267_v43 = vld [vmem:[%s14631_s6 + $0x57c] ss:$24 sps:$4 sm:$0xff]  }
 0x435   : > { %4877 = vmatprep.subr.bf16.mxu1 %v10195_v1  ;;  %v10274_v1 = vld [vmem:[%s14631_s6 + $0x780] ss:$24 sps:$4 sm:$0xff]  }
 0x436   : > { %4732 = vmatpush1.bf16.msra.mxu0 %v10190_v41  ;;  %v10270_v41 = vld [vmem:[%s14631_s6 + $0x754] ss:$24 sps:$4 sm:$0xff]  }
 0x437   : > { %4733 = vmatprep.subr.bf16.mxu0 %v10198_v47  ;;  %v10253_v47 = vld [vmem:[%s14631_s6 + $0x518] ss:$24 sps:$4 sm:$0xff]  }
 0x438   : > { %4878 = vmatpush1.bf16.msra.mxu1 %v10193_v5  ;;  %v10273_v5 = vld [vmem:[%s14631_s6 + $0x5ac] ss:$24 sps:$4 sm:$0xff]  }
 0x439   : > { %4879 = vmatprep.subr.bf16.mxu1 %v10201_v7  ;;  %v10280_v7 = vld [vmem:[%s14631_s6 + $0x7b0] ss:$24 sps:$4 sm:$0xff]  }
 0x43a   : > { %4734 = vmatpush1.bf16.msra.mxu0 %v10196_v31  ;;  %v10276_v31 = vld [vmem:[%s14631_s6 + $0x784] ss:$24 sps:$4 sm:$0xff]  }
 0x43b   : > { %4735 = vmatprep.subr.bf16.mxu0 %v10204_v51  ;;  %v10259_v51 = vld [vmem:[%s14631_s6 + $0x548] ss:$24 sps:$4 sm:$0xff]  }
 0x43c   : > { %4880 = vmatpush1.bf16.msra.mxu1 %v10199_v10  ;;  %v10279_v10 = vld [vmem:[%s14631_s6 + $0x5dc] ss:$24 sps:$4 sm:$0xff]  }
 0x43d   : > { %4881 = vmatprep.subr.bf16.mxu1 %v10207_v11  ;;  %v10286_v11 = vld [vmem:[%s14631_s6 + $0x7e0] ss:$24 sps:$4 sm:$0xff]  }
 0x43e   : > { %4736 = vmatpush1.bf16.msra.mxu0 %v10202_v2  ;;  %v10282_v2 = vld [vmem:[%s14631_s6 + $0x7b4] ss:$24 sps:$4 sm:$0xff]  }
 0x43f   : > { %4737 = vmatprep.subr.bf16.mxu0 %v10210_v3  ;;  %v10265_v3 = vld [vmem:[%s14631_s6 + $0x578] ss:$24 sps:$4 sm:$0xff]  }
 0x440   : > { %4882 = vmatpush1.bf16.msra.mxu1 %v10205_v15  ;;  %v10285_v15 = vld [vmem:[%s14631_s6 + $0x60c] ss:$24 sps:$4 sm:$0xff]  }
 0x441   : > { %4883 = vmatprep.subr.bf16.mxu1 %v10213_v16  ;;  %v10292_v16 = vld [vmem:[%s14631_s6 + $0x810] ss:$24 sps:$4 sm:$0xff]  }
 0x442   : > { %4738 = vmatpush1.bf16.msra.mxu0 %v10208_v8  ;;  %v10288_v8 = vld [vmem:[%s14631_s6 + $0x7e4] ss:$24 sps:$4 sm:$0xff]  }
 0x443   : > { %4739 = vmatprep.subr.bf16.mxu0 %v10216_v9  ;;  %v10271_v9 = vld [vmem:[%s14631_s6 + $0x5a8] ss:$24 sps:$4 sm:$0xff]  }
 0x444   : > { %4884 = vmatpush1.bf16.msra.mxu1 %v10211_v54  ;;  %v10298_v54 = vld [vmem:[%s14631_s6 + $0x840] ss:$24 sps:$4 sm:$0xff]  }
 0x445   : > { %4885 = vmatprep.subr.bf16.mxu1 %v10219_v55  ;;  %v10306_v55 = vld [vmem:[%s14631_s6 + $0x874] ss:$24 sps:$4 sm:$0xff]  }
 0x446   : > { %4740 = vmatpush1.bf16.msra.mxu0 %v10214_v12  ;;  %v10294_v12 = vld [vmem:[%s14631_s6 + $0x814] ss:$24 sps:$4 sm:$0xff]  }
 0x447   : > { %4741 = vmatprep.subr.bf16.mxu0 %v10222_v14  ;;  %v10277_v14 = vld [vmem:[%s14631_s6 + $0x5d8] ss:$24 sps:$4 sm:$0xff]  }
 0x448   : > { %4886 = vmatpush1.bf16.msra.mxu1 %v10217_v61  ;;  %v10304_v61 = vld [vmem:[%s14631_s6 + $0x870] ss:$24 sps:$4 sm:$0xff]  }
 0x449   : > { %4887 = vmatprep.subr.bf16.mxu1 %v10225_v48  ;;  %v10312_v48 = vld [vmem:[%s14631_s6 + $0x8a4] ss:$24 sps:$4 sm:$0xff]  }
 0x44a   : > { %4742 = vmatpush1.bf16.msra.mxu0 %v10220_v32  ;;  %v10300_v32 = vld [vmem:[%s14631_s6 + $0x844] ss:$24 sps:$4 sm:$0xff]  }
 0x44b   : > { %4752 = vmatprep.subr.bf16.mxu0 %v10228_v17  ;;  %v10291_v17 = vld [vmem:[%s14631_s6 + $0x63c] ss:$24 sps:$4 sm:$0xff]  }
 0x44c   : > { %4888 = vmatpush1.bf16.msra.mxu1 %v10223_v53  ;;  %v10310_v53 = vld [vmem:[%s14631_s6 + $0x8a0] ss:$24 sps:$4 sm:$0xff]  }
 0x44d   : > { %4744 = vmatmul.mubr.bf16.vlgmr.msra.gmra.mrb[0].mxu0 %v12444_v56  ;;  %4889 = vmatprep.subr.bf16.mxu1 %v10231_v63  ;;  %v10318_v63 = vld [vmem:[%s14631_s6 + $0x8d4] ss:$24 sps:$4 sm:$0xff]  }
 0x44e   : > { %4753 = vmatpush1.bf16.msra.mxu0 %v10226_v40  ;;  %4784 = vmatprep.mubr.bf16.mxu0 %v12449_v58  ;;  %v10289_v40 = vld [vmem:[%s14631_s6 + $0x638] ss:$24 sps:$4 sm:$0xff]  }
 0x44f   : > { %4754 = vmatprep.subr.bf16.mxu0 %v10234_v60  ;;  %v10297_v60 = vld [vmem:[%s14631_s6 + $0x66c] ss:$24 sps:$4 sm:$0xff]  }
 0x450   : > { %4890 = vmatpush1.bf16.msra.mxu1 %v10229_v33  ;;  %v10316_v33 = vld [vmem:[%s14631_s6 + $0x8d0] ss:$24 sps:$4 sm:$0xff]  }
 0x451   : > { %4891 = vmatprep.subr.bf16.mxu1 %v10237_v20  ;;  %v10327_v20 = vld [vmem:[%s14631_s6 + $0x14] ss:$24 sps:$4 sm:$0xff]  }
 0x452   : > { %4755 = vmatpush1.bf16.msra.mxu0 %v10232_v62  ;;  %v10295_v62 = vld [vmem:[%s14631_s6 + $0x668] ss:$24 sps:$4 sm:$0xff]  }
 0x453   : > { %4756 = vmatprep.subr.bf16.mxu0 %v10240_v23  ;;  %v10303_v23 = vld [vmem:[%s14631_s6 + $0x69c] ss:$24 sps:$4 sm:$0xff]  }
 0x454   : > { %4892 = vmatpush1.bf16.msra.mxu1 %v10235_v27  ;;  %v12646_v27 = vpack.c.bf16 %v12417_v13, %v12417_v13  ;;  %v10321_v13 = vld [vmem:[%s14631_s6 + $0x72c] ss:$24 sps:$4 sm:$0xff]  }
 0x455   : > { %4893 = vmatprep.subr.bf16.mxu1 %v10243_v29  ;;  %v10325_v29 = vld [vmem:[%s14631_s6 + $0x10] ss:$24 sps:$4 sm:$0xff]  }
 0x456   : > { %4757 = vmatpush1.bf16.msra.mxu0 %v10238_v18  ;;  %v10301_v18 = vld [vmem:[%s14631_s6 + $0x698] ss:$24 sps:$4 sm:$0xff]  }
 0x457   : > { %4758 = vmatprep.subr.bf16.mxu0 %v10246_v22  ;;  %v10309_v22 = vld [vmem:[%s14631_s6 + $0x6cc] ss:$24 sps:$4 sm:$0xff]  }
 0x458   : > { %4894 = vmatpush1.bf16.msra.mxu1 %v10241_v0  ;;  %v10319_v0 = vld [vmem:[%s14631_s6 + $0x728] ss:$24 sps:$4 sm:$0xff]  }
 0x459   : > { %4895 = vmatprep.subr.bf16.mxu1 %v10249_v35  ;;  %v10331_v35 = vld [vmem:[%s14631_s6 + $0x40] ss:$24 sps:$4 sm:$0xff]  }
 0x45a   : > { %4759 = vmatpush1.bf16.msra.mxu0 %v10244_v28  ;;  %v10307_v28 = vld [vmem:[%s14631_s6 + $0x6c8] ss:$24 sps:$4 sm:$0xff]  }
 0x45b   : > { %4760 = vmatprep.subr.bf16.mxu0 %v10252_v24  ;;  %v10315_v24 = vld [vmem:[%s14631_s6 + $0x6fc] ss:$24 sps:$4 sm:$0xff]  }
 0x45c   : > { %4896 = vmatpush1.bf16.msra.mxu1 %v10247_v59  ;;  %v10322_v59 = vld [vmem:[%s14631_s6 + $0x758] ss:$24 sps:$4 sm:$0xff]  }
 0x45d   : > { %4897 = vmatprep.subr.bf16.mxu1 %v10255_v52  ;;  %v10337_v52 = vld [vmem:[%s14631_s6 + $0x70] ss:$24 sps:$4 sm:$0xff]  }
 0x45e   : > { %4761 = vmatpush1.bf16.msra.mxu0 %v10250_v25  ;;  %v10333_v25 = vld [vmem:[%s14631_s6 + $0x44] ss:$24 sps:$4 sm:$0xff]  }
 0x45f   : > { %4762 = vmatprep.subr.bf16.mxu0 %v10258_v26  ;;  %v10313_v26 = vld [vmem:[%s14631_s6 + $0x6f8] ss:$24 sps:$4 sm:$0xff]  }
 0x460   : > { %4898 = vmatpush1.bf16.msra.mxu1 %v10253_v47  ;;  %v10343_v47 = vld [vmem:[%s14631_s6 + $0xa0] ss:$24 sps:$4 sm:$0xff]  }
 0x461   : > { %4899 = vmatprep.subr.bf16.mxu1 %v10261_v49  ;;  %v10351_v49 = vld [vmem:[%s14631_s6 + $0xd4] ss:$24 sps:$4 sm:$0xff]  }
 0x462   : > { %4763 = vmatpush1.bf16.msra.mxu0 %v10256_v36  ;;  %v10339_v36 = vld [vmem:[%s14631_s6 + $0x74] ss:$24 sps:$4 sm:$0xff]  }
 0x463   : > { %4764 = vmatprep.subr.bf16.mxu0 %v10264_v38  ;;  %v10324_v38 = vld [vmem:[%s14631_s6 + $0x75c] ss:$24 sps:$4 sm:$0xff]  }
 0x464   : > { %4900 = vmatpush1.bf16.msra.mxu1 %v10259_v51  ;;  %v10349_v51 = vld [vmem:[%s14631_s6 + $0xd0] ss:$24 sps:$4 sm:$0xff]  }
 0x465   : > { %4901 = vmatprep.subr.bf16.mxu1 %v10267_v43  ;;  %v10357_v43 = vld [vmem:[%s14631_s6 + $0x104] ss:$24 sps:$4 sm:$0xff]  }
 0x466   : > { %4765 = vmatpush1.bf16.msra.mxu0 %v10262_v39  ;;  %v10330_v39 = vld [vmem:[%s14631_s6 + $0x78c] ss:$24 sps:$4 sm:$0xff]  }
 0x467   : > { %4766 = vmatprep.subr.bf16.mxu0 %v10270_v41  ;;  %v10328_v41 = vld [vmem:[%s14631_s6 + $0x788] ss:$24 sps:$4 sm:$0xff]  }
 0x468   : > { %4902 = vmatpush1.bf16.msra.mxu1 %v10265_v3  ;;  %v10355_v3 = vld [vmem:[%s14631_s6 + $0x100] ss:$24 sps:$4 sm:$0xff]  }
 0x469   : > { %4903 = vmatprep.subr.bf16.mxu1 %v10273_v5  ;;  %v10363_v5 = vld [vmem:[%s14631_s6 + $0x134] ss:$24 sps:$4 sm:$0xff]  }
 0x46a   : > { %4767 = vmatpush1.bf16.msra.mxu0 %v10268_v50  ;;  %v10336_v50 = vld [vmem:[%s14631_s6 + $0x7bc] ss:$24 sps:$4 sm:$0xff]  }
 0x46b   : > { %4768 = vmatprep.subr.bf16.mxu0 %v10276_v31  ;;  %v10334_v31 = vld [vmem:[%s14631_s6 + $0x7b8] ss:$24 sps:$4 sm:$0xff]  }
 0x46c   : > { %4904 = vmatpush1.bf16.msra.mxu1 %v10271_v9  ;;  %v10361_v9 = vld [vmem:[%s14631_s6 + $0x130] ss:$24 sps:$4 sm:$0xff]  }
 0x46d   : > { %4905 = vmatprep.subr.bf16.mxu1 %v10279_v10  ;;  %v10369_v10 = vld [vmem:[%s14631_s6 + $0x164] ss:$24 sps:$4 sm:$0xff]  }
 0x46e   : > { %4769 = vmatpush1.bf16.msra.mxu0 %v10274_v1  ;;  %v10342_v1 = vld [vmem:[%s14631_s6 + $0x7ec] ss:$24 sps:$4 sm:$0xff]  }
 0x46f   : > { %4770 = vmatprep.subr.bf16.mxu0 %v10282_v2  ;;  %v10340_v2 = vld [vmem:[%s14631_s6 + $0x7e8] ss:$24 sps:$4 sm:$0xff]  }
 0x470   : > { %4906 = vmatpush1.bf16.msra.mxu1 %v10277_v14  ;;  %v10367_v14 = vld [vmem:[%s14631_s6 + $0x160] ss:$24 sps:$4 sm:$0xff]  }
 0x471   : > { %4916 = vmatprep.subr.bf16.mxu1 %v10285_v15  ;;  %v10375_v15 = vld [vmem:[%s14631_s6 + $0x194] ss:$24 sps:$4 sm:$0xff]  }
 0x472   : > { %4771 = vmatpush1.bf16.msra.mxu0 %v10280_v7  ;;  %v10348_v7 = vld [vmem:[%s14631_s6 + $0x81c] ss:$24 sps:$4 sm:$0xff]  }
 0x473   : > { %4772 = vmatprep.subr.bf16.mxu0 %v10288_v8  ;;  %4908 = vmatmul.mubr.bf16.vlgmr.msra.gmra.mrb[4].mxu1 %v12444_v56  ;;  %v10346_v8 = vld [vmem:[%s14631_s6 + $0x818] ss:$24 sps:$4 sm:$0xff]  }
 0x474   : > { %4917 = vmatpush1.bf16.msra.mxu1 %v10283_v57  ;;  %4948 = vmatprep.mubr.bf16.mxu1 %v12449_v58  ;;  %v10373_v57 = vld [vmem:[%s14631_s6 + $0x190] ss:$24 sps:$4 sm:$0xff]  }
 0x475   : > { %4918 = vmatprep.subr.bf16.mxu1 %v10291_v17  ;;  %v10366_v17 = vld [vmem:[%s14631_s6 + $0x8ac] ss:$24 sps:$4 sm:$0xff]  }
 0x476   : > { %4773 = vmatpush1.bf16.msra.mxu0 %v10286_v11  ;;  %v10354_v11 = vld [vmem:[%s14631_s6 + $0x84c] ss:$24 sps:$4 sm:$0xff]  }
 0x477   : > { %4774 = vmatprep.subr.bf16.mxu0 %v10294_v12  ;;  %v10352_v12 = vld [vmem:[%s14631_s6 + $0x848] ss:$24 sps:$4 sm:$0xff]  }
 0x478   : > { %4919 = vmatpush1.bf16.msra.mxu1 %v10289_v40  ;;  %v10379_v40 = vld [vmem:[%s14631_s6 + $0x1c0] ss:$24 sps:$4 sm:$0xff]  }
 0x479   : > { %4920 = vmatprep.subr.bf16.mxu1 %v10297_v60  ;;  %v10372_v60 = vld [vmem:[%s14631_s6 + $0x8dc] ss:$24 sps:$4 sm:$0xff]  }
 0x47a   : > { %4775 = vmatpush1.bf16.msra.mxu0 %v10292_v16  ;;  %v10360_v16 = vld [vmem:[%s14631_s6 + $0x87c] ss:$24 sps:$4 sm:$0xff]  }
 0x47b   : > { %4776 = vmatprep.subr.bf16.mxu0 %v10300_v32  ;;  %v10358_v32 = vld [vmem:[%s14631_s6 + $0x878] ss:$24 sps:$4 sm:$0xff]  }
 0x47c   : > { %4921 = vmatpush1.bf16.msra.mxu1 %v10295_v62  ;;  %v10385_v62 = vld [vmem:[%s14631_s6 + $0x1f0] ss:$24 sps:$4 sm:$0xff]  }
 0x47d   : > { %4922 = vmatprep.subr.bf16.mxu1 %v10303_v23  ;;  %v10378_v23 = vld [vmem:[%s14631_s6 + $0x90c] ss:$24 sps:$4 sm:$0xff]  }
 0x47e   : > { %4777 = vmatpush1.bf16.msra.mxu0 %v10298_v54  ;;  %v10381_v54 = vld [vmem:[%s14631_s6 + $0x1c4] ss:$24 sps:$4 sm:$0xff]  }
 0x47f   : > { %4778 = vmatprep.subr.bf16.mxu0 %v10306_v55  ;;  %v10364_v55 = vld [vmem:[%s14631_s6 + $0x8a8] ss:$24 sps:$4 sm:$0xff]  }
 0x480   : > { %4923 = vmatpush1.bf16.msra.mxu1 %v10301_v18  ;;  %v10391_v18 = vld [vmem:[%s14631_s6 + $0x220] ss:$24 sps:$4 sm:$0xff]  }
 0x481   : > { %4924 = vmatprep.subr.bf16.mxu1 %v10309_v22  ;;  %v10384_v22 = vld [vmem:[%s14631_s6 + $0x93c] ss:$24 sps:$4 sm:$0xff]  }
 0x482   : > { %4779 = vmatpush1.bf16.msra.mxu0 %v10304_v61  ;;  %v10387_v61 = vld [vmem:[%s14631_s6 + $0x1f4] ss:$24 sps:$4 sm:$0xff]  }
 0x483   : > { %4780 = vmatprep.subr.bf16.mxu0 %v10312_v48  ;;  %v10370_v48 = vld [vmem:[%s14631_s6 + $0x8d8] ss:$24 sps:$4 sm:$0xff]  }
 0x484   : > { %4925 = vmatpush1.bf16.msra.mxu1 %v10307_v28  ;;  %v10397_v28 = vld [vmem:[%s14631_s6 + $0x250] ss:$24 sps:$4 sm:$0xff]  }
 0x485   : > { %4926 = vmatprep.subr.bf16.mxu1 %v10315_v24  ;;  %v10390_v24 = vld [vmem:[%s14631_s6 + $0x96c] ss:$24 sps:$4 sm:$0xff]  }
 0x486   : > { %4781 = vmatpush1.bf16.msra.mxu0 %v10310_v53  ;;  %v10393_v53 = vld [vmem:[%s14631_s6 + $0x224] ss:$24 sps:$4 sm:$0xff]  }
 0x487   : > { %4782 = vmatprep.subr.bf16.mxu0 %v10318_v63  ;;  %v10376_v63 = vld [vmem:[%s14631_s6 + $0x908] ss:$24 sps:$4 sm:$0xff]  }
 0x488   : > { %4927 = vmatpush1.bf16.msra.mxu1 %v10313_v26  ;;  %v10403_v26 = vld [vmem:[%s14631_s6 + $0x280] ss:$24 sps:$4 sm:$0xff]  }
 0x489   : > { %4928 = vmatprep.subr.bf16.mxu1 %v10321_v13  ;;  %v10396_v13 = vld [vmem:[%s14631_s6 + $0x99c] ss:$24 sps:$4 sm:$0xff]  }
 0x48a   : > { %4783 = vmatpush1.bf16.msra.mxu0 %v10316_v33  ;;  %v10399_v33 = vld [vmem:[%s14631_s6 + $0x254] ss:$24 sps:$4 sm:$0xff]  }
 0x48b   : > { %4998 = vmatprep.subr.bf16.mxu0 %v10327_v20  ;;  %v10382_v20 = vld [vmem:[%s14631_s6 + $0x938] ss:$24 sps:$4 sm:$0xff]  }
 0x48c   : > { %4929 = vmatpush1.bf16.msra.mxu1 %v10319_v0  ;;  %v10411_v0 = vld [vmem:[%s14631_s6 + $0x2b4] ss:$24 sps:$4 sm:$0xff]  }
 0x48d   : > { %4785 = vmatmul.mubr.bf16.vlgmr.msra.gmra.mrb[0].mxu0 %v12646_v27  ;;  %4930 = vmatprep.subr.bf16.mxu1 %v10324_v38  ;;  %v10402_v38 = vld [vmem:[%s14631_s6 + $0x9cc] ss:$24 sps:$4 sm:$0xff]  }
 0x48e   : > { %4999 = vmatpush1.bf16.msra.mxu0 %v10325_v29  ;;  %5030 = vmatprep.mubr.bf16.mxu0 %v12197_v42  ;;  %v10345_v42 = vld [vmem:[%s14631_s6 + $0xa4] ss:$24 sps:$4 sm:$0xff]  }
 0x48f   : > { %5000 = vmatprep.subr.bf16.mxu0 %v10333_v25  ;;  %v10405_v29 = vld [vmem:[%s14631_s6 + $0x284] ss:$24 sps:$4 sm:$0xff]   ;;  %v10388_v25 = vld [vmem:[%s14631_s6 + $0x968] ss:$24 sps:$4 sm:$0xff]  }
 0x490   : > { %4931 = vmatpush1.bf16.msra.mxu1 %v10322_v59  ;;  %v10417_v59 = vld [vmem:[%s14631_s6 + $0x2e4] ss:$24 sps:$4 sm:$0xff]  }
 0x491   : > { %4932 = vmatprep.subr.bf16.mxu1 %v10330_v39  ;;  %v10408_v39 = vld [vmem:[%s14631_s6 + $0x9fc] ss:$24 sps:$4 sm:$0xff]  }
 0x492   : > { %5001 = vmatpush1.bf16.msra.mxu0 %v10331_v35  ;;  %v10394_v35 = vld [vmem:[%s14631_s6 + $0x998] ss:$24 sps:$4 sm:$0xff]  }
 0x493   : > { %5002 = vmatprep.subr.bf16.mxu0 %v10339_v36  ;;  %v10409_v36 = vld [vmem:[%s14631_s6 + $0x2b0] ss:$24 sps:$4 sm:$0xff]  }
 0x494   : > { %4933 = vmatpush1.bf16.msra.mxu1 %v10328_v41  ;;  %v10423_v41 = vld [vmem:[%s14631_s6 + $0x314] ss:$24 sps:$4 sm:$0xff]  }
 0x495   : > { %4934 = vmatprep.subr.bf16.mxu1 %v10336_v50  ;;  %v10414_v50 = vld [vmem:[%s14631_s6 + $0xa2c] ss:$24 sps:$4 sm:$0xff]  }
 0x496   : > { %5003 = vmatpush1.bf16.msra.mxu0 %v10337_v52  ;;  %v10400_v52 = vld [vmem:[%s14631_s6 + $0x9c8] ss:$24 sps:$4 sm:$0xff]  }
 0x497   : > { %5004 = vmatprep.subr.bf16.mxu0 %v10345_v42  ;;  %v10415_v42 = vld [vmem:[%s14631_s6 + $0x2e0] ss:$24 sps:$4 sm:$0xff]  }
 0x498   : > { %4935 = vmatpush1.bf16.msra.mxu1 %v10334_v31  ;;  %v10427_v31 = vld [vmem:[%s14631_s6 + $0x344] ss:$24 sps:$4 sm:$0xff]  }
 0x499   : > { %4936 = vmatprep.subr.bf16.mxu1 %v10342_v1 }
 0x49a   : > { %5005 = vmatpush1.bf16.msra.mxu0 %v10343_v47  ;;  %v10406_v47 = vld [vmem:[%s14631_s6 + $0x9f8] ss:$24 sps:$4 sm:$0xff]  }
 0x49b   : > { %5006 = vmatprep.subr.bf16.mxu0 %v10351_v49  ;;  %v10421_v49 = vld [vmem:[%s14631_s6 + $0x310] ss:$24 sps:$4 sm:$0xff]  }
 0x49c   : > { %4937 = vmatpush1.bf16.msra.mxu1 %v10340_v2  ;;  %v10420_v2 = vld [vmem:[%s14631_s6 + $0xa5c] ss:$24 sps:$4 sm:$0xff]  }
 0x49d   : > { %4938 = vmatprep.subr.bf16.mxu1 %v10348_v7 }
 0x49e   : > { %5007 = vmatpush1.bf16.msra.mxu0 %v10349_v51  ;;  %v10412_v51 = vld [vmem:[%s14631_s6 + $0xa28] ss:$24 sps:$4 sm:$0xff]  }
 0x49f   : > { %5008 = vmatprep.subr.bf16.mxu0 %v10357_v43  ;;  %v10425_v43 = vld [vmem:[%s14631_s6 + $0x340] ss:$24 sps:$4 sm:$0xff]  }
 0x4a0   : > { %4939 = vmatpush1.bf16.msra.mxu1 %v10346_v8  ;;  %v10418_v8 = vld [vmem:[%s14631_s6 + $0xa58] ss:$24 sps:$4 sm:$0xff]  }
 0x4a1   : > { %4940 = vmatprep.subr.bf16.mxu1 %v10354_v11 }
 0x4a2   : > { %5009 = vmatpush1.bf16.msra.mxu0 %v10355_v3  ;;  %v10431_v3 = vld [vmem:[%s14631_s6 + $0x374] ss:$24 sps:$4 sm:$0xff]  }
 0x4a3   : > { %5010 = vmatprep.subr.bf16.mxu0 %v10363_v5 }
 0x4a4   : > { %4941 = vmatpush1.bf16.msra.mxu1 %v10352_v12 }
 0x4a5   : > { %4942 = vmatprep.subr.bf16.mxu1 %v10360_v16  ;;  %v10497_v16 = vld [vmem:[%s14633_s8 + $0x4] ss:$20 sps:$4 sm:$0xff]  }
 0x4a6   : > { %5011 = vmatpush1.bf16.msra.mxu0 %v10361_v9  ;;  %v10429_v9 = vld [vmem:[%s14631_s6 + $0x370] ss:$24 sps:$4 sm:$0xff]  }
 0x4a7   : > { %5012 = vmatprep.subr.bf16.mxu0 %v10369_v10  ;;  %v10434_v10 = vld [vmem:[%s14631_s6 + $0x3a4] ss:$24 sps:$4 sm:$0xff]  }
 0x4a8   : > { %4943 = vmatpush1.bf16.msra.mxu1 %v10358_v32 }
 0x4a9   : > { %4944 = vmatprep.subr.bf16.mxu1 %v10366_v17  ;;  %v10440_v17 = vld [vmem:[%s14631_s6 + $0x404] ss:$24 sps:$4 sm:$0xff]  }
 0x4aa   : > { %5013 = vmatpush1.bf16.msra.mxu0 %v10367_v14  ;;  %v10432_v14 = vld [vmem:[%s14631_s6 + $0x3a0] ss:$24 sps:$4 sm:$0xff]  }
 0x4ab   : > { %5014 = vmatprep.subr.bf16.mxu0 %v10375_v15  ;;  %v10437_v15 = vld [vmem:[%s14631_s6 + $0x3d4] ss:$24 sps:$4 sm:$0xff]  }
 0x4ac   : > { %4945 = vmatpush1.bf16.msra.mxu1 %v10364_v55  ;;  %v10503_v55 = vld [vmem:[%s14633_s8 + $0x2c] ss:$20 sps:$4 sm:$0xff]  }
 0x4ad   : > { %4946 = vmatprep.subr.bf16.mxu1 %v10372_v60  ;;  %v10443_v60 = vld [vmem:[%s14631_s6 + $0x434] ss:$24 sps:$4 sm:$0xff]  }
 0x4ae   : > { %5015 = vmatpush1.bf16.msra.mxu0 %v10373_v57  ;;  %v10435_v57 = vld [vmem:[%s14631_s6 + $0x3d0] ss:$24 sps:$4 sm:$0xff]  }
 0x4af   : > { %5016 = vmatprep.subr.bf16.mxu0 %v10381_v54  ;;  %v10495_v54 = vld [vmem:[%s14633_s8] ss:$20 sps:$4 sm:$0xff]  }
 0x4b0   : > { %4947 = vmatpush1.bf16.msra.mxu1 %v10370_v48  ;;  %v10509_v48 = vld [vmem:[%s14633_s8 + $0x54] ss:$20 sps:$4 sm:$0xff]  }
 0x4b1   : > { %4957 = vmatprep.subr.bf16.mxu1 %v10378_v23  ;;  %v10446_v23 = vld [vmem:[%s14631_s6 + $0x464] ss:$24 sps:$4 sm:$0xff]  }
 0x4b2   : > { %5017 = vmatpush1.bf16.msra.mxu0 %v10379_v40  ;;  %v10438_v40 = vld [vmem:[%s14631_s6 + $0x400] ss:$24 sps:$4 sm:$0xff]  }
 0x4b3   : > { %5018 = vmatprep.subr.bf16.mxu0 %v10387_v61  ;;  %4949 = vmatmul.mubr.bf16.vlgmr.msra.gmra.mrb[4].mxu1 %v12646_v27  ;;  %v10501_v61 = vld [vmem:[%s14633_s8 + $0x28] ss:$20 sps:$4 sm:$0xff]  }
 0x4b4   : > { %4958 = vmatpush1.bf16.msra.mxu1 %v10376_v63  ;;  %9300 = vmatprep.mubr.msk.bf16.mxu1 %vm4647_vm15, %v12167_v21  ;;  %v10515_v63 = vld [vmem:[%s14633_s8 + $0x7c] ss:$20 sps:$4 sm:$0xff]  }
 0x4b5   : > { %4959 = vmatprep.subr.bf16.mxu1 %v10384_v22  ;;  %v10449_v22 = vld [vmem:[%s14631_s6 + $0x494] ss:$24 sps:$4 sm:$0xff]  }
 0x4b6   : > { %5019 = vmatpush1.bf16.msra.mxu0 %v10385_v62  ;;  %v10441_v62 = vld [vmem:[%s14631_s6 + $0x430] ss:$24 sps:$4 sm:$0xff]  }
 0x4b7   : > { %5020 = vmatprep.subr.bf16.mxu0 %v10393_v53  ;;  %v10507_v53 = vld [vmem:[%s14633_s8 + $0x50] ss:$20 sps:$4 sm:$0xff]  }
 0x4b8   : > { %4960 = vmatpush1.bf16.msra.mxu1 %v10382_v20  ;;  %v10521_v20 = vld [vmem:[%s14633_s8 + $0xa4] ss:$20 sps:$4 sm:$0xff]  }
 0x4b9   : > { %4961 = vmatprep.subr.bf16.mxu1 %v10390_v24  ;;  %v10452_v24 = vld [vmem:[%s14631_s6 + $0x4c4] ss:$24 sps:$4 sm:$0xff]  }
 0x4ba   : > { %5021 = vmatpush1.bf16.msra.mxu0 %v10391_v18  ;;  %v10444_v18 = vld [vmem:[%s14631_s6 + $0x460] ss:$24 sps:$4 sm:$0xff]  }
 0x4bb   : > { %5022 = vmatprep.subr.bf16.mxu0 %v10399_v33  ;;  %v10513_v33 = vld [vmem:[%s14633_s8 + $0x78] ss:$20 sps:$4 sm:$0xff]  }
 0x4bc   : > { %4962 = vmatpush1.bf16.msra.mxu1 %v10388_v25  ;;  %v10527_v25 = vld [vmem:[%s14633_s8 + $0xcc] ss:$20 sps:$4 sm:$0xff]  }
 0x4bd   : > { %4963 = vmatprep.subr.bf16.mxu1 %v10396_v13  ;;  %v10455_v13 = vld [vmem:[%s14631_s6 + $0x4f4] ss:$24 sps:$4 sm:$0xff]  }
 0x4be   : > { %5023 = vmatpush1.bf16.msra.mxu0 %v10397_v28  ;;  %v10447_v28 = vld [vmem:[%s14631_s6 + $0x490] ss:$24 sps:$4 sm:$0xff]  }
 0x4bf   : > { %5024 = vmatprep.subr.bf16.mxu0 %v10405_v29  ;;  %v10519_v29 = vld [vmem:[%s14633_s8 + $0xa0] ss:$20 sps:$4 sm:$0xff]  }
 0x4c0   : > { %4964 = vmatpush1.bf16.msra.mxu1 %v10394_v35  ;;  %v10533_v35 = vld [vmem:[%s14633_s8 + $0xf4] ss:$20 sps:$4 sm:$0xff]  }
 0x4c1   : > { %4965 = vmatprep.subr.bf16.mxu1 %v10402_v38  ;;  %v10458_v38 = vld [vmem:[%s14631_s6 + $0x524] ss:$24 sps:$4 sm:$0xff]  }
 0x4c2   : > { %5025 = vmatpush1.bf16.msra.mxu0 %v10403_v26  ;;  %v10450_v26 = vld [vmem:[%s14631_s6 + $0x4c0] ss:$24 sps:$4 sm:$0xff]  }
 0x4c3   : > { %5026 = vmatprep.subr.bf16.mxu0 %v10411_v0  ;;  %v10525_v0 = vld [vmem:[%s14633_s8 + $0xc8] ss:$20 sps:$4 sm:$0xff]  }
 0x4c4   : > { %4966 = vmatpush1.bf16.msra.mxu1 %v10400_v52  ;;  %v10539_v52 = vld [vmem:[%s14633_s8 + $0x11c] ss:$20 sps:$4 sm:$0xff]  }
 0x4c5   : > { %4967 = vmatprep.subr.bf16.mxu1 %v10408_v39  ;;  %v10461_v39 = vld [vmem:[%s14631_s6 + $0x554] ss:$24 sps:$4 sm:$0xff]  }
 0x4c6   : > { %5027 = vmatpush1.bf16.msra.mxu0 %v10409_v36  ;;  %v12865_v1 = vpop.f32.mrb[0].mxu1  ;;  %v10453_v36 = vld [vmem:[%s14631_s6 + $0x4f0] ss:$24 sps:$4 sm:$0xff]  }
 0x4c7   : > { %5028 = vmatprep.subr.bf16.mxu0 %v10417_v59  ;;  %v12876_v5 = vpop.f32.mrb[1].mxu1  ;;  %v10531_v59 = vld [vmem:[%s14633_s8 + $0xf0] ss:$20 sps:$4 sm:$0xff]  }
 0x4c8   : > { %4968 = vmatpush1.bf16.msra.mxu1 %v10406_v47  ;;  %v4831_v7 = vpop.f32.mrb[2].mxu1  ;;  %v10545_v47 = vld [vmem:[%s14633_s8 + $0x144] ss:$20 sps:$4 sm:$0xff]  }
 0x4c9   : > { %4969 = vmatprep.subr.bf16.mxu1 %v10414_v50  ;;  %v10464_v50 = vld [vmem:[%s14631_s6 + $0x584] ss:$24 sps:$4 sm:$0xff]   ;;  %v10465_v7 = vld [vmem:[%s14631_s6 + $0x5b0] ss:$24 sps:$4 sm:$0xff]  }
 0x4ca   : > { %5029 = vmatpush1.bf16.msra.mxu0 %v10415_v42  ;;  %v10456_v42 = vld [vmem:[%s14631_s6 + $0x520] ss:$24 sps:$4 sm:$0xff]  }
 0x4cb   : > { %5039 = vmatprep.subr.bf16.mxu0 %v10423_v41  ;;  %v10537_v41 = vld [vmem:[%s14633_s8 + $0x118] ss:$20 sps:$4 sm:$0xff]  }
 0x4cc   : > { %4970 = vmatpush1.bf16.msra.mxu1 %v10412_v51  ;;  %v10551_v51 = vld [vmem:[%s14633_s8 + $0x16c] ss:$20 sps:$4 sm:$0xff]  }
 0x4cd   : > { %5031 = vmatmul.mubr.bf16.vlgmr.msra.gmra.mrb[4].mxu0 %v12236_v4  ;;  %v2918_v4 = vld [vmem:[%s14631_s6 + $0xa88] sm:$0x33]  ;;  %4971 = vmatprep.subr.bf16.mxu1 %v10420_v2 }
 0x4ce   : > { %5040 = vmatpush1.bf16.msra.mxu0 %v10421_v49  ;;  %5071 = vmatprep.mubr.bf16.mxu0 %v12241_v6  ;;  %v4832_v6 = vpop.f32.mrb[3].mxu1  ;;  %v9293_v11 = vcombine.low %v2918_v4, %v2918_v4  ;;  %v9294_v12 = vcombine.high %v2918_v4, %v2918_v4  ;;  %v10459_v49 = vld [vmem:[%s14631_s6 + $0x550] ss:$24 sps:$4 sm:$0xff]   ;;  %v10467_v2 = vld [vmem:[%s14631_s6 + $0x5b4] ss:$24 sps:$4 sm:$0xff]  }
 0x4cf   : > { %5041 = vmatprep.subr.bf16.mxu0 %v10427_v31  ;;  %v10543_v31 = vld [vmem:[%s14633_s8 + $0x140] ss:$20 sps:$4 sm:$0xff]   ;;  %v10549_v4 = vld [vmem:[%s14633_s8 + $0x168] ss:$20 sps:$4 sm:$0xff]  }
 0x4d0   : > { %4972 = vmatpush1.bf16.msra.mxu1 %v10418_v8  ;;  %v4659_v32 = vsel %vm2369_vm8, %v9293_v11, 0  ;;  %v10470_v6 = vld [vmem:[%s14631_s6 + $0x5e4] ss:$24 sps:$4 sm:$0xff]   ;;  %v10473_v11 = vld [vmem:[%s14631_s6 + $0x614] ss:$24 sps:$4 sm:$0xff]  }
 0x4d1   : > { %9299 = vmatprep.subr.msk.bf16.mxu1 %vm2369_vm8, %v9294_v12  ;;  %v10555_v8 = vld [vmem:[%s14633_s8 + $0x190] ss:$20 sps:$4 sm:$0xff]   ;;  %v10561_v12 = vld [vmem:[%s14633_s8 + $0x1b8] ss:$20 sps:$4 sm:$0xff]  }
 0x4d2   : > { %5042 = vmatpush1.bf16.msra.mxu0 %v10425_v43  ;;  %v10462_v43 = vld [vmem:[%s14631_s6 + $0x580] ss:$24 sps:$4 sm:$0xff]  }
 0x4d3   : > { %5043 = vmatprep.subr.bf16.mxu0 %v10431_v3  ;;  %v10557_v3 = vld [vmem:[%s14633_s8 + $0x194] ss:$20 sps:$4 sm:$0xff]  }
 0x4d4   : > { %4974 = vmatpush1.bf16.msra.mxu1 %v4659_v32  ;;  %v10567_v32 = vld [vmem:[%s14633_s8 + $0x1e0] ss:$20 sps:$4 sm:$0xff]  }
 0x4d5   : > { %6624 = vmatprep.subr.bf16.mxu1 %v10497_v16  ;;  %v10476_v16 = vld [vmem:[%s14631_s6 + $0x644] ss:$24 sps:$4 sm:$0xff]  }
 0x4d6   : > { %5044 = vmatpush1.bf16.msra.mxu0 %v10429_v9  ;;  %v10563_v9 = vld [vmem:[%s14633_s8 + $0x1bc] ss:$20 sps:$4 sm:$0xff]  }
 0x4d7   : > { %5045 = vmatprep.subr.bf16.mxu0 %v10434_v10  ;;  %4990 = vmatmul.mubr.bf16.vlgmr.msra.gmra.mrb[4].mxu1 %v12162_v19  ;;  %v10468_v10 = vld [vmem:[%s14631_s6 + $0x5e0] ss:$24 sps:$4 sm:$0xff]  }
 0x4d8   : > { %6625 = vmatpush1.bf16.msra.mxu1 %v10495_v54  ;;  %v10479_v54 = vld [vmem:[%s14631_s6 + $0x674] ss:$24 sps:$4 sm:$0xff]  }
 0x4d9   : > { %6626 = vmatprep.subr.bf16.mxu1 %v10503_v55  ;;  %v10573_v55 = vld [vmem:[%s14633_s8 + $0x208] ss:$20 sps:$4 sm:$0xff]  }
 0x4da   : > { %5046 = vmatpush1.bf16.msra.mxu0 %v10432_v14  ;;  %v10569_v14 = vld [vmem:[%s14633_s8 + $0x1e4] ss:$20 sps:$4 sm:$0xff]  }
 0x4db   : > { %5047 = vmatprep.subr.bf16.mxu0 %v10437_v15  ;;  %v10471_v15 = vld [vmem:[%s14631_s6 + $0x610] ss:$24 sps:$4 sm:$0xff]  }
 0x4dc   : > { %6627 = vmatpush1.bf16.msra.mxu1 %v10501_v61  ;;  %v10587_v61 = vld [vmem:[%s14633_s8 + $0x25c] ss:$20 sps:$4 sm:$0xff]  }
 0x4dd   : > { %6628 = vmatprep.subr.bf16.mxu1 %v10509_v48  ;;  %v10480_v48 = vld [vmem:[%s14631_s6 + $0x6a0] ss:$24 sps:$4 sm:$0xff]  }
 0x4de   : > { %5048 = vmatpush1.bf16.msra.mxu0 %v10435_v57  ;;  %v10575_v57 = vld [vmem:[%s14633_s8 + $0x20c] ss:$20 sps:$4 sm:$0xff]  }
 0x4df   : > { %5049 = vmatprep.subr.bf16.mxu0 %v10440_v17  ;;  %v10474_v17 = vld [vmem:[%s14631_s6 + $0x640] ss:$24 sps:$4 sm:$0xff]  }
 0x4e0   : > { %6629 = vmatpush1.bf16.msra.mxu1 %v10507_v53  ;;  %v10595_v53 = vld [vmem:[%s14633_s8 + $0x284] ss:$20 sps:$4 sm:$0xff]  }
 0x4e1   : > { %6630 = vmatprep.subr.bf16.mxu1 %v10515_v63  ;;  %v10483_v63 = vld [vmem:[%s14631_s6 + $0x6d0] ss:$24 sps:$4 sm:$0xff]  }
 0x4e2   : > { %5050 = vmatpush1.bf16.msra.mxu0 %v10438_v40  ;;  %v10581_v40 = vld [vmem:[%s14633_s8 + $0x234] ss:$20 sps:$4 sm:$0xff]  }
 0x4e3   : > { %5051 = vmatprep.subr.bf16.mxu0 %v10443_v60  ;;  %v10579_v60 = vld [vmem:[%s14633_s8 + $0x230] ss:$20 sps:$4 sm:$0xff]  }
 0x4e4   : > { %6631 = vmatpush1.bf16.msra.mxu1 %v10513_v33  ;;  %v10491_v33 = vld [vmem:[%s14631_s6 + $0x734] ss:$24 sps:$4 sm:$0xff]  }
 0x4e5   : > { %6632 = vmatprep.subr.bf16.mxu1 %v10521_v20  ;;  %v10489_v20 = vld [vmem:[%s14631_s6 + $0x730] ss:$24 sps:$4 sm:$0xff]  }
 0x4e6   : > { %5052 = vmatpush1.bf16.msra.mxu0 %v10441_v62  ;;  %v10485_v62 = vld [vmem:[%s14631_s6 + $0x6d4] ss:$24 sps:$4 sm:$0xff]  }
 0x4e7   : > { %5053 = vmatprep.subr.bf16.mxu0 %v10446_v23  ;;  %v10585_v23 = vld [vmem:[%s14633_s8 + $0x258] ss:$20 sps:$4 sm:$0xff]  }
 0x4e8   : > { %6633 = vmatpush1.bf16.msra.mxu1 %v10519_v29  ;;  %v10500_v29 = vld [vmem:[%s14631_s6 + $0x794] ss:$24 sps:$4 sm:$0xff]  }
 0x4e9   : > { %6634 = vmatprep.subr.bf16.mxu1 %v10527_v25  ;;  %v10498_v25 = vld [vmem:[%s14631_s6 + $0x790] ss:$24 sps:$4 sm:$0xff]  }
 0x4ea   : > { %5054 = vmatpush1.bf16.msra.mxu0 %v10444_v18  ;;  %v10488_v18 = vld [vmem:[%s14631_s6 + $0x704] ss:$24 sps:$4 sm:$0xff]  }
 0x4eb   : > { %5055 = vmatprep.subr.bf16.mxu0 %v10449_v22  ;;  %v10486_v22 = vld [vmem:[%s14631_s6 + $0x700] ss:$24 sps:$4 sm:$0xff]  }
 0x4ec   : > { %6635 = vmatpush1.bf16.msra.mxu1 %v10525_v0  ;;  %v10512_v0 = vld [vmem:[%s14631_s6 + $0x7f4] ss:$24 sps:$4 sm:$0xff]  }
 0x4ed   : > { %6636 = vmatprep.subr.bf16.mxu1 %v10533_v35  ;;  %v10510_v35 = vld [vmem:[%s14631_s6 + $0x7f0] ss:$24 sps:$4 sm:$0xff]  }
 0x4ee   : > { %5056 = vmatpush1.bf16.msra.mxu0 %v10447_v28  ;;  %v10494_v28 = vld [vmem:[%s14631_s6 + $0x764] ss:$24 sps:$4 sm:$0xff]  }
 0x4ef   : > { %5057 = vmatprep.subr.bf16.mxu0 %v10452_v24  ;;  %v10492_v24 = vld [vmem:[%s14631_s6 + $0x760] ss:$24 sps:$4 sm:$0xff]  }
 0x4f0   : > { %6637 = vmatpush1.bf16.msra.mxu1 %v10531_v59  ;;  %v10524_v59 = vld [vmem:[%s14631_s6 + $0x854] ss:$24 sps:$4 sm:$0xff]  }
 0x4f1   : > { %6638 = vmatprep.subr.bf16.mxu1 %v10539_v52  ;;  %v10522_v52 = vld [vmem:[%s14631_s6 + $0x850] ss:$24 sps:$4 sm:$0xff]  }
 0x4f2   : > { %5058 = vmatpush1.bf16.msra.mxu0 %v10450_v26  ;;  %v10506_v26 = vld [vmem:[%s14631_s6 + $0x7c4] ss:$24 sps:$4 sm:$0xff]  }
 0x4f3   : > { %5059 = vmatprep.subr.bf16.mxu0 %v10455_v13  ;;  %v10504_v13 = vld [vmem:[%s14631_s6 + $0x7c0] ss:$24 sps:$4 sm:$0xff]  }
 0x4f4   : > { %6639 = vmatpush1.bf16.msra.mxu1 %v10537_v41  ;;  %v10536_v41 = vld [vmem:[%s14631_s6 + $0x8b4] ss:$24 sps:$4 sm:$0xff]  }
 0x4f5   : > { %6640 = vmatprep.subr.bf16.mxu1 %v10545_v47  ;;  %v10534_v47 = vld [vmem:[%s14631_s6 + $0x8b0] ss:$24 sps:$4 sm:$0xff]  }
 0x4f6   : > { %5060 = vmatpush1.bf16.msra.mxu0 %v10453_v36  ;;  %v10518_v36 = vld [vmem:[%s14631_s6 + $0x824] ss:$24 sps:$4 sm:$0xff]  }
 0x4f7   : > { %5061 = vmatprep.subr.bf16.mxu0 %v10458_v38  ;;  %v10516_v38 = vld [vmem:[%s14631_s6 + $0x820] ss:$24 sps:$4 sm:$0xff]  }
 0x4f8   : > { %6641 = vmatpush1.bf16.msra.mxu1 %v10543_v31  ;;  %v10548_v31 = vld [vmem:[%s14631_s6 + $0x914] ss:$24 sps:$4 sm:$0xff]  }
 0x4f9   : > { %6642 = vmatprep.subr.bf16.mxu1 %v10551_v51  ;;  %v10546_v51 = vld [vmem:[%s14631_s6 + $0x910] ss:$24 sps:$4 sm:$0xff]  }
 0x4fa   : > { %5062 = vmatpush1.bf16.msra.mxu0 %v10456_v42  ;;  %v10530_v42 = vld [vmem:[%s14631_s6 + $0x884] ss:$24 sps:$4 sm:$0xff]  }
 0x4fb   : > { %5063 = vmatprep.subr.bf16.mxu0 %v10461_v39  ;;  %v10528_v39 = vld [vmem:[%s14631_s6 + $0x880] ss:$24 sps:$4 sm:$0xff]  }
 0x4fc   : > { %6643 = vmatpush1.bf16.msra.mxu1 %v10549_v4  ;;  %v10560_v4 = vld [vmem:[%s14631_s6 + $0x974] ss:$24 sps:$4 sm:$0xff]  }
 0x4fd   : > { %6644 = vmatprep.subr.bf16.mxu1 %v10557_v3  ;;  %v10558_v3 = vld [vmem:[%s14631_s6 + $0x970] ss:$24 sps:$4 sm:$0xff]  }
 0x4fe   : > { %5064 = vmatpush1.bf16.msra.mxu0 %v10459_v49  ;;  %v10542_v49 = vld [vmem:[%s14631_s6 + $0x8e4] ss:$24 sps:$4 sm:$0xff]  }
 0x4ff   : > { %5065 = vmatprep.subr.bf16.mxu0 %v10464_v50  ;;  %v10540_v50 = vld [vmem:[%s14631_s6 + $0x8e0] ss:$24 sps:$4 sm:$0xff]  }
 0x500   : > { %6645 = vmatpush1.bf16.msra.mxu1 %v10555_v8  ;;  %v13198_v8 = vld [vmem:[%s14632_s7] sm:$0x3f] }
 0x501   : > { %6646 = vmatprep.subr.bf16.mxu1 %v10563_v9  ;;  %v10578_v9 = vld [vmem:[%s14631_s6 + $0xa04] ss:$24 sps:$4 sm:$0xff]  }
 0x502   : > { %5066 = vmatpush1.bf16.msra.mxu0 %v10462_v43  ;;  %v10554_v43 = vld [vmem:[%s14631_s6 + $0x944] ss:$24 sps:$4 sm:$0xff]  }
 0x503   : > { %5067 = vmatprep.subr.bf16.mxu0 %v10467_v2  ;;  %v10552_v2 = vld [vmem:[%s14631_s6 + $0x940] ss:$24 sps:$4 sm:$0xff]  }
 0x504   : > { %6647 = vmatpush1.bf16.msra.mxu1 %v10561_v12  ;;  %v10584_v12 = vld [vmem:[%s14631_s6 + $0xa34] ss:$24 sps:$4 sm:$0xff]  }
 0x505   : > { %6648 = vmatprep.subr.bf16.mxu1 %v10569_v14  ;;  %v2929_v14 = vrot.slane %v13198_v8, %v11666_v45 }
 0x506   : > { %5068 = vmatpush1.bf16.msra.mxu0 %v10465_v7  ;;  %v10566_v7 = vld [vmem:[%s14631_s6 + $0x9a4] ss:$24 sps:$4 sm:$0xff]  }
 0x507   : > { %5069 = vmatprep.subr.bf16.mxu0 %v10470_v6  ;;  %v10572_v6 = vld [vmem:[%s14631_s6 + $0x9d4] ss:$24 sps:$4 sm:$0xff]  }
 0x508   : > { %6649 = vmatpush1.bf16.msra.mxu1 %v10567_v32 }
 0x509   : > { %6650 = vmatprep.subr.bf16.mxu1 %v10575_v57 }
 0x50a   : > { %5070 = vmatpush1.bf16.msra.mxu0 %v10468_v10  ;;  %v10576_v10 = vld [vmem:[%s14631_s6 + $0xa00] ss:$24 sps:$4 sm:$0xff]  }
 0x50b   : > { %5080 = vmatprep.subr.bf16.mxu0 %v10473_v11  ;;  %v2925_v11 = vrot.slane %v13198_v8, %v11663_v44 }
 0x50c   : > { %6651 = vmatpush1.bf16.msra.mxu1 %v10573_v55 }
 0x50d   : > { %5072 = vmatmul.mubr.bf16.vlgmr.msra.gmra.mrb[4].mxu0 %v12444_v56  ;;  %v10477_v56 = vld [vmem:[%s14631_s6 + $0x670] ss:$24 sps:$4 sm:$0xff]   ;;  %6652 = vmatprep.subr.bf16.mxu1 %v10581_v40 }
 0x50e   : > { %5081 = vmatpush1.bf16.msra.mxu0 %v10471_v15  ;;  %5112 = vmatprep.mubr.bf16.mxu0 %v12449_v58  ;;  %v10482_v58 = vld [vmem:[%s14631_s6 + $0x6a4] ss:$24 sps:$4 sm:$0xff]   ;;  %v2919_v40 = vld [vmem:[%s14631_s6 + $0xa90] sm:$0x33] }
 0x50f   : > { %5082 = vmatprep.subr.bf16.mxu0 %v10476_v16  ;;  %v10582_v16 = vld [vmem:[%s14631_s6 + $0xa30] ss:$24 sps:$4 sm:$0xff]  }
 0x510   : > { %6653 = vmatpush1.bf16.msra.mxu1 %v10579_v60 }
 0x511   : > { %6654 = vmatprep.subr.bf16.mxu1 %v10587_v61  ;;  %v10588_v61 = vld [vmem:[%s14631_s6 + $0xa60] ss:$24 sps:$4 sm:$0xff]  }
 0x512   : > { %5083 = vmatpush1.bf16.msra.mxu0 %v10474_v17  ;;  %v10590_v17 = vld [vmem:[%s14631_s6 + $0xa64] ss:$24 sps:$4 sm:$0xff]  }
 0x513   : > { %5084 = vmatprep.subr.bf16.mxu0 %v10479_v54 }
 0x514   : > { %6655 = vmatpush1.bf16.msra.mxu1 %v10585_v23  ;;  %v10593_v23 = vld [vmem:[%s14633_s8 + $0x280] ss:$20 sps:$4 sm:$0xff]  }
 0x515   : > { %6665 = vmatprep.subr.bf16.mxu1 %v10595_v53  ;;  %v9296_v53 = vcombine.high %v2919_v40, %v2919_v40 }
 0x516   : > { %5085 = vmatpush1.bf16.msra.mxu0 %v10477_v56 }
 0x517   : > { %5086 = vmatprep.subr.bf16.mxu0 %v10482_v58 }
 0x51a   : > { %5087 = vmatpush1.bf16.msra.mxu0 %v10480_v48 }
 0x51b   : > { %5088 = vmatprep.subr.bf16.mxu0 %v10485_v62 }
 0x51e   : > { %5089 = vmatpush1.bf16.msra.mxu0 %v10483_v63  ;;  %v9295_v63 = vcombine.low %v2919_v40, %v2919_v40  ;;  %v10647_v40 = vld [vmem:[%s14633_s8 + $0x2e0] ss:$20 sps:$4 sm:$0xff]  }
 0x51f   : > { %5090 = vmatprep.subr.bf16.mxu0 %v10488_v18 }
 0x522   : > { %5091 = vmatpush1.bf16.msra.mxu0 %v10486_v22  ;;  %v10596_v22 = vld [vmem:[%s14633_s8 + $0x150] ss:$20 sps:$4 sm:$0xff]  }
 0x523   : > { %5092 = vmatprep.subr.bf16.mxu0 %v10491_v33  ;;  %v10598_v33 = vld [vmem:[%s14633_s8 + $0x2a8] ss:$20 sps:$4 sm:$0xff]  }
 0x526   : > { %5093 = vmatpush1.bf16.msra.mxu0 %v10489_v20  ;;  %v4665_v20 = vsel %vm2369_vm8, %v9295_v63, 0  ;;  %v10661_v63 = vld [vmem:[%s14633_s8 + $0x498] ss:$20 sps:$4 sm:$0xff]  }
 0x527   : > { %5094 = vmatprep.subr.bf16.mxu0 %v10494_v28  ;;  %v10605_v28 = vld [vmem:[%s14633_s8 + $0x2d4] ss:$20 sps:$4 sm:$0xff]  }
 0x52a   : > { %5095 = vmatpush1.bf16.msra.mxu0 %v10492_v24  ;;  %v10597_v24 = vld [vmem:[%s14633_s8 + $0x10] ss:$20 sps:$4 sm:$0xff]  }
 0x52b   : > { %5096 = vmatprep.subr.bf16.mxu0 %v10500_v29  ;;  %v10601_v29 = vld [vmem:[%s14633_s8 + $0x178] ss:$20 sps:$4 sm:$0xff]  }
 0x52e   : > { %5097 = vmatpush1.bf16.msra.mxu0 %v10498_v25  ;;  %v10603_v25 = vld [vmem:[%s14633_s8 + $0x2d0] ss:$20 sps:$4 sm:$0xff]  }
 0x52f   : > { %5098 = vmatprep.subr.bf16.mxu0 %v10506_v26  ;;  %v10610_v26 = vld [vmem:[%s14633_s8 + $0x2fc] ss:$20 sps:$4 sm:$0xff]  }
 0x532   : > { %5099 = vmatpush1.bf16.msra.mxu0 %v10504_v13  ;;  %v10602_v13 = vld [vmem:[%s14633_s8 + $0x38] ss:$20 sps:$4 sm:$0xff]  }
 0x533   : > { %5100 = vmatprep.subr.bf16.mxu0 %v10512_v0  ;;  %v10606_v0 = vld [vmem:[%s14633_s8 + $0x1a0] ss:$20 sps:$4 sm:$0xff]  }
 0x536   : > { %5101 = vmatpush1.bf16.msra.mxu0 %v10510_v35  ;;  %v10608_v35 = vld [vmem:[%s14633_s8 + $0x2f8] ss:$20 sps:$4 sm:$0xff]  }
 0x537   : > { %5102 = vmatprep.subr.bf16.mxu0 %v10518_v36  ;;  %v10615_v36 = vld [vmem:[%s14633_s8 + $0x324] ss:$20 sps:$4 sm:$0xff]  }
 0x53a   : > { %5103 = vmatpush1.bf16.msra.mxu0 %v10516_v38  ;;  %v10611_v38 = vld [vmem:[%s14633_s8 + $0x1c8] ss:$20 sps:$4 sm:$0xff]  }
 0x53b   : > { %5104 = vmatprep.subr.bf16.mxu0 %v10524_v59  ;;  %v10613_v59 = vld [vmem:[%s14633_s8 + $0x320] ss:$20 sps:$4 sm:$0xff]  }
 0x53e   : > { %5105 = vmatpush1.bf16.msra.mxu0 %v10522_v52  ;;  %v10620_v52 = vld [vmem:[%s14633_s8 + $0x34c] ss:$20 sps:$4 sm:$0xff]  }
 0x53f   : > { %5106 = vmatprep.subr.bf16.mxu0 %v10530_v42  ;;  %v10612_v42 = vld [vmem:[%s14633_s8 + $0x88] ss:$20 sps:$4 sm:$0xff]  }
 0x542   : > { %5107 = vmatpush1.bf16.msra.mxu0 %v10528_v39  ;;  %v10616_v39 = vld [vmem:[%s14633_s8 + $0x1f0] ss:$20 sps:$4 sm:$0xff]  }
 0x543   : > { %5108 = vmatprep.subr.bf16.mxu0 %v10536_v41  ;;  %v10618_v41 = vld [vmem:[%s14633_s8 + $0x348] ss:$20 sps:$4 sm:$0xff]  }
 0x546   : > { %5109 = vmatpush1.bf16.msra.mxu0 %v10534_v47  ;;  %v10625_v47 = vld [vmem:[%s14633_s8 + $0x374] ss:$20 sps:$4 sm:$0xff]  }
 0x547   : > { %5110 = vmatprep.subr.bf16.mxu0 %v10542_v49  ;;  %v10617_v49 = vld [vmem:[%s14633_s8 + $0xb0] ss:$20 sps:$4 sm:$0xff]  }
 0x54a   : > { %5111 = vmatpush1.bf16.msra.mxu0 %v10540_v50  ;;  %v10621_v50 = vld [vmem:[%s14633_s8 + $0x218] ss:$20 sps:$4 sm:$0xff]  }
 0x54b   : > { %5121 = vmatprep.subr.bf16.mxu0 %v10548_v31  ;;  %v10623_v31 = vld [vmem:[%s14633_s8 + $0x370] ss:$20 sps:$4 sm:$0xff]  }
 0x54d   : > { %5113 = vmatmul.mubr.bf16.vlgmr.msra.gmra.mrb[4].mxu0 %v12646_v27  ;;  %v10564_v27 = vld [vmem:[%s14631_s6 + $0x9a0] ss:$24 sps:$4 sm:$0xff]  }
 0x54e   : > { %5122 = vmatpush1.bf16.msra.mxu0 %v10546_v51  ;;  %9302 = vmatprep.mubr.msk.bf16.mxu0 %vm4647_vm15, %v12167_v21  ;;  %v10570_v21 = vld [vmem:[%s14631_s6 + $0x9d0] ss:$24 sps:$4 sm:$0xff]  }
 0x54f   : > { %5123 = vmatprep.subr.bf16.mxu0 %v10554_v43  ;;  %v10630_v51 = vld [vmem:[%s14633_s8 + $0x39c] ss:$20 sps:$4 sm:$0xff]   ;;  %v10622_v43 = vld [vmem:[%s14633_s8 + $0xd8] ss:$20 sps:$4 sm:$0xff]  }
 0x552   : > { %5124 = vmatpush1.bf16.msra.mxu0 %v10552_v2  ;;  %v10626_v2 = vld [vmem:[%s14633_s8 + $0x240] ss:$20 sps:$4 sm:$0xff]  }
 0x553   : > { %5125 = vmatprep.subr.bf16.mxu0 %v10560_v4  ;;  %v10628_v4 = vld [vmem:[%s14633_s8 + $0x398] ss:$20 sps:$4 sm:$0xff]  }
 0x556   : > { %5126 = vmatpush1.bf16.msra.mxu0 %v10558_v3  ;;  %v10635_v3 = vld [vmem:[%s14633_s8 + $0x3c4] ss:$20 sps:$4 sm:$0xff]  }
 0x557   : > { %5127 = vmatprep.subr.bf16.mxu0 %v10566_v7  ;;  %v10627_v7 = vld [vmem:[%s14633_s8 + $0x100] ss:$20 sps:$4 sm:$0xff]  }
 0x55a   : > { %5128 = vmatpush1.bf16.msra.mxu0 %v10564_v27  ;;  %v10631_v27 = vld [vmem:[%s14633_s8 + $0x268] ss:$20 sps:$4 sm:$0xff]  }
 0x55b   : > { %5129 = vmatprep.subr.bf16.mxu0 %v10572_v6  ;;  %v10633_v6 = vld [vmem:[%s14633_s8 + $0x3c0] ss:$20 sps:$4 sm:$0xff]  }
 0x55e   : > { %5130 = vmatpush1.bf16.msra.mxu0 %v10570_v21  ;;  %v10640_v21 = vld [vmem:[%s14633_s8 + $0x3ec] ss:$20 sps:$4 sm:$0xff]  }
 0x55f   : > { %5131 = vmatprep.subr.bf16.mxu0 %v10578_v9  ;;  %v10632_v9 = vld [vmem:[%s14633_s8 + $0x128] ss:$20 sps:$4 sm:$0xff]  }
 0x560   : > { %v4786_v15 = vpop.f32.mrb[0].mxu0 }
 0x561   : > { %v9887_v32 = vadd.f32 %v4786_v15, %v2925_v11  ;;  %v4788_v57 = vpop.f32.mrb[1].mxu0  ;;  %v10638_v11 = vld [vmem:[%s14633_s8 + $0x3e8] ss:$20 sps:$4 sm:$0xff]   ;;  %v10641_v15 = vld [vmem:[%s14633_s8 + $0x3f8] ss:$20 sps:$4 sm:$0xff]  }
 0x562   : > { %v9889_v54 = vadd.f32 %v4788_v57, %v2929_v14  ;;  %v4790_v55 = vpop.f32.mrb[2].mxu0  ;;  %5132 = vmatpush1.bf16.msra.mxu0 %v10576_v10  ;;  %v10636_v10 = vld [vmem:[%s14633_s8 + $0x3d0] ss:$20 sps:$4 sm:$0xff]   ;;  %v10642_v57 = vld [vmem:[%s14633_s8 + $0x2b8] ss:$20 sps:$4 sm:$0xff]  }
 0x563   : > { %v9888_v56 = vadd.f32 %v9887_v32, %v12865_v1  ;;  %v4791_v58 = vpop.f32.mrb[3].mxu0  ;;  %5133 = vmatprep.subr.bf16.mxu0 %v10584_v12  ;;  %v10600_v1 = vld [vmem:[%s14633_s8 + $0x2ac] ss:$20 sps:$4 sm:$0xff]   ;;  %v10645_v12 = vld [vmem:[%s14633_s8 + $0x414] ss:$20 sps:$4 sm:$0xff]  }
 0x564   : > { %v9890_v60 = vadd.f32 %v9889_v54, %v12876_v5  ;;  %v10637_v14 = vld [vmem:[%s14633_s8 + $0x290] ss:$20 sps:$4 sm:$0xff]   ;;  %v10648_v54 = vld [vmem:[%s14633_s8 + $0x438] ss:$20 sps:$4 sm:$0xff]   ;;  %v10653_v58 = vld [vmem:[%s14633_s8 + $0x460] ss:$20 sps:$4 sm:$0xff]  }
 0x565   : > { %v5162_v48 = vmax.f32 %v9888_v56, 0.0  ;;  %v10650_v32 = vld [vmem:[%s14633_s8 + $0x43c] ss:$20 sps:$4 sm:$0xff]   ;;  %v10655_v55 = vld [vmem:[%s14633_s8 + $0x464] ss:$20 sps:$4 sm:$0xff]  }
 0x566   : > { %v5163_v62 = vmax.f32 %v9890_v60, 0.0  ;;  %5134 = vmatpush1.bf16.msra.mxu0 %v10582_v16  ;;  %v10643_v16 = vld [vmem:[%s14633_s8 + $0x410] ss:$20 sps:$4 sm:$0xff]   ;;  %v10651_v56 = vld [vmem:[%s14633_s8 + $0x448] ss:$20 sps:$4 sm:$0xff]  }
 0x567   : > { %5135 = vmatprep.subr.bf16.mxu0 %v10590_v17  ;;  %v13235_v5 = vpack.c.bf16 %v5162_v48, %v5162_v48  ;;  %v10646_v17 = vld [vmem:[%s14633_s8 + $0x420] ss:$20 sps:$4 sm:$0xff]   ;;  %v10656_v48 = vld [vmem:[%s14633_s8 + $0x470] ss:$20 sps:$4 sm:$0xff]  }
 0x568   : > { %v13233_v18 = vpack.c.bf16 %v5163_v62, %v5163_v62  ;;  %v10660_v60 = vld [vmem:[%s14633_s8 + $0x48c] ss:$20 sps:$4 sm:$0xff]   ;;  %v10658_v62 = vld [vmem:[%s14633_s8 + $0x488] ss:$20 sps:$4 sm:$0xff]  }
 0x56a   : > { %5136 = vmatpush1.bf16.msra.mxu0 %v10588_v61  ;;  %6656 = vmatprep.mubr.bf16.mxu1 %v13233_v18  ;;  %v10652_v61 = vld [vmem:[%s14633_s8 + $0x308] ss:$20 sps:$4 sm:$0xff]  }
 0x56b   : > { %6657 = vmatmul.mubr.bf16.vlgmr.msra.gmra.mrb[8].mxu1 %v13235_v5  ;;  %9301 = vmatprep.subr.msk.bf16.mxu0 %vm2369_vm8, %v9296_v53  ;;  %v10657_v53 = vld [vmem:[%s14633_s8 + $0x330] ss:$20 sps:$4 sm:$0xff]  }
 0x56c   : > { %6666 = vmatpush1.bf16.msra.mxu1 %v10593_v23  ;;  %v10665_v23 = vld [vmem:[%s14633_s8 + $0x4b4] ss:$20 sps:$4 sm:$0xff]  }
 0x56d   : > { %6667 = vmatprep.subr.bf16.mxu1 %v10600_v1  ;;  %v10663_v1 = vld [vmem:[%s14633_s8 + $0x4b0] ss:$20 sps:$4 sm:$0xff]  }
 0x56e   : > { %5138 = vmatpush1.bf16.msra.mxu0 %v4665_v20  ;;  %v10666_v20 = vld [vmem:[%s14633_s8 + $0x4c0] ss:$20 sps:$4 sm:$0xff]  }
 0x56f   : > { %9773 = vmatprep.subr.bf16.mxu0 %v10596_v22  ;;  %v10670_v22 = vld [vmem:[%s14633_s8 + $0x4dc] ss:$20 sps:$4 sm:$0xff]  }
 0x570   : > { %6668 = vmatpush1.bf16.msra.mxu1 %v10598_v33  ;;  %v10662_v33 = vld [vmem:[%s14633_s8 + $0x358] ss:$20 sps:$4 sm:$0xff]  }
 0x571   : > { %5154 = vmatmul.mubr.bf16.vlgmr.msra.gmra.mrb[4].mxu0 %v12162_v19  ;;  %6669 = vmatprep.subr.bf16.mxu1 %v10605_v28  ;;  %v10607_v19 = vld [vmem:[%s14633_s8 + $0x60] ss:$20 sps:$4 sm:$0xff]   ;;  %v10668_v28 = vld [vmem:[%s14633_s8 + $0x4d8] ss:$20 sps:$4 sm:$0xff]  }
 0x572   : > { %9774 = vmatpush3.bf16.msra.mxu0 %v10597_v24  ;;  %6902 = vmatprep.mubr.bf16.mxu0 %v13233_v18  ;;  %v10675_v24 = vld [vmem:[%s14633_s8 + $0x504] ss:$20 sps:$4 sm:$0xff]  }
 0x573   : > { %9775 = vmatprep.subr.bf16.mxu0 %v10601_v29  ;;  %v10667_v29 = vld [vmem:[%s14633_s8 + $0x380] ss:$20 sps:$4 sm:$0xff]  }
 0x574   : > { %6670 = vmatpush1.bf16.msra.mxu1 %v10603_v25  ;;  %v10671_v25 = vld [vmem:[%s14633_s8 + $0x4e8] ss:$20 sps:$4 sm:$0xff]  }
 0x575   : > { %6671 = vmatprep.subr.bf16.mxu1 %v10610_v26  ;;  %v10672_v26 = vld [vmem:[%s14633_s8 + $0x3a8] ss:$20 sps:$4 sm:$0xff]  }
 0x576   : > { %9776 = vmatpush3.bf16.msra.mxu0 %v10602_v13  ;;  %v2933_v13 = vrot.slane %v13198_v8, %v11726_v30 }
 0x577   : > { %9777 = vmatprep.subr.bf16.mxu0 %v10606_v0  ;;  %v11301_v0 = vmov 0  }
 0x578   : > { %6672 = vmatpush1.bf16.msra.mxu1 %v10608_v35  ;;  %v2937_v35 = vrot.slane %v13198_v8, %v11669_v46 }
 0x579   : > { %6673 = vmatprep.subr.bf16.mxu1 %v10615_v36 }
 0x57a   : > { %9778 = vmatpush3.bf16.msra.mxu0 %v10607_v19 }
 0x57b   : > { %9779 = vmatprep.subr.bf16.mxu0 %v10611_v38 }
 0x57c   : > { %6674 = vmatpush1.bf16.msra.mxu1 %v10613_v59 }
 0x57d   : > { %6675 = vmatprep.subr.bf16.mxu1 %v10620_v52 }
 0x57e   : > { %9780 = vmatpush3.bf16.msra.mxu0 %v10612_v42 }
 0x57f   : > { %9781 = vmatprep.subr.bf16.mxu0 %v10616_v39 }
 0x580   : > { %6676 = vmatpush1.bf16.msra.mxu1 %v10618_v41 }
 0x581   : > { %6677 = vmatprep.subr.bf16.mxu1 %v10625_v47 }
 0x582   : > { %9782 = vmatpush3.bf16.msra.mxu0 %v10617_v49  ;;  %v10673_v49 = vld [vmem:[%s14633_s8 + $0x500] ss:$20 sps:$4 sm:$0xff]  }
 0x583   : > { %9783 = vmatprep.subr.bf16.mxu0 %v10621_v50  ;;  %v10676_v50 = vld [vmem:[%s14633_s8 + $0x510] ss:$20 sps:$4 sm:$0xff]  }
 0x584   : > { %6678 = vmatpush1.bf16.msra.mxu1 %v10623_v31 }
 0x585   : > { %6679 = vmatprep.subr.bf16.mxu1 %v10630_v51  ;;  %v10679_v51 = vld [vmem:[%s14633_s8 + $0x52c] ss:$20 sps:$4 sm:$0xff]  }
 0x586   : > { %9784 = vmatpush3.bf16.msra.mxu0 %v10622_v43  ;;  %v10677_v43 = vld [vmem:[%s14633_s8 + $0x528] ss:$20 sps:$4 sm:$0xff]  }
 0x587   : > { %9785 = vmatprep.subr.bf16.mxu0 %v10626_v2  ;;  %v10680_v2 = vld [vmem:[%s14633_s8 + $0x538] ss:$20 sps:$4 sm:$0xff]  }
 0x588   : > { %6680 = vmatpush1.bf16.msra.mxu1 %v10628_v4  ;;  %v10683_v4 = vld [vmem:[%s14633_s8 + $0x554] ss:$20 sps:$4 sm:$0xff]  }
 0x589   : > { %6681 = vmatprep.subr.bf16.mxu1 %v10635_v3  ;;  %v10681_v3 = vld [vmem:[%s14633_s8 + $0x550] ss:$20 sps:$4 sm:$0xff]  }
 0x58a   : > { %9786 = vmatpush3.bf16.msra.mxu0 %v10627_v7  ;;  %v10684_v7 = vld [vmem:[%s14633_s8 + $0x560] ss:$20 sps:$4 sm:$0xff]  }
 0x58b   : > { %9787 = vmatprep.subr.bf16.mxu0 %v10631_v27  ;;  %v10687_v27 = vld [vmem:[%s14633_s8 + $0x57c] ss:$20 sps:$4 sm:$0xff]  }
 0x58c   : > { %6682 = vmatpush1.bf16.msra.mxu1 %v10633_v6  ;;  %v10685_v6 = vld [vmem:[%s14633_s8 + $0x578] ss:$20 sps:$4 sm:$0xff]  }
 0x58d   : > { %6683 = vmatprep.subr.bf16.mxu1 %v10640_v21  ;;  %v10688_v21 = vld [vmem:[%s14633_s8 + $0x588] ss:$20 sps:$4 sm:$0xff]  }
 0x58e   : > { %9788 = vmatpush3.bf16.msra.mxu0 %v10632_v9  ;;  %v10691_v9 = vld [vmem:[%s14633_s8 + $0x5a4] ss:$20 sps:$4 sm:$0xff]  }
 0x58f   : > { %9795 = vmatprep.subr.bf16.mxu0 %v10636_v10  ;;  %v10689_v10 = vld [vmem:[%s14633_s8 + $0x5a0] ss:$20 sps:$4 sm:$0xff]  }
 0x590   : > { %6684 = vmatpush1.bf16.msra.mxu1 %v10638_v11  ;;  %v10692_v11 = vld [vmem:[%s14633_s8 + $0x5b0] ss:$20 sps:$4 sm:$0xff]  }
 0x591   : > { %6903 = vmatmul.mubr.bf16.vlgmr.msra.gmra.mrb[8].mxu0 %v13235_v5  ;;  %6685 = vmatprep.subr.bf16.mxu1 %v10645_v12  ;;  %v10695_v12 = vld [vmem:[%s14633_s8 + $0x5cc] ss:$20 sps:$4 sm:$0xff]  }
 0x592   : > { %9796 = vmatpush3.bf16.msra.mxu0 %v10637_v14  ;;  %v10693_v14 = vld [vmem:[%s14633_s8 + $0x5c8] ss:$20 sps:$4 sm:$0xff]  }
 0x593   : > { %9797 = vmatprep.subr.bf16.mxu0 %v10641_v15  ;;  %v10696_v15 = vld [vmem:[%s14633_s8 + $0x5d8] ss:$20 sps:$4 sm:$0xff]  }
 0x594   : > { %6686 = vmatpush1.bf16.msra.mxu1 %v10643_v16  ;;  %v10699_v16 = vld [vmem:[%s14633_s8 + $0x5f4] ss:$20 sps:$4 sm:$0xff]  }
 0x595   : > { %6687 = vmatprep.subr.bf16.mxu1 %v10650_v32  ;;  %v10697_v32 = vld [vmem:[%s14633_s8 + $0x5f0] ss:$20 sps:$4 sm:$0xff]  }
 0x596   : > { %9798 = vmatpush3.bf16.msra.mxu0 %v10642_v57  ;;  %v10700_v57 = vld [vmem:[%s14633_s8 + $0x600] ss:$20 sps:$4 sm:$0xff]  }
 0x597   : > { %9799 = vmatprep.subr.bf16.mxu0 %v10646_v17  ;;  %v10703_v17 = vld [vmem:[%s14633_s8 + $0x61c] ss:$20 sps:$4 sm:$0xff]  }
 0x598   : > { %6688 = vmatpush1.bf16.msra.mxu1 %v10648_v54  ;;  %v10701_v54 = vld [vmem:[%s14633_s8 + $0x618] ss:$20 sps:$4 sm:$0xff]  }
 0x599   : > { %6689 = vmatprep.subr.bf16.mxu1 %v10655_v55  ;;  %v10704_v55 = vld [vmem:[%s14633_s8 + $0x628] ss:$20 sps:$4 sm:$0xff]  }
 0x59a   : > { %9800 = vmatpush3.bf16.msra.mxu0 %v10647_v40  ;;  %v10707_v40 = vld [vmem:[%s14633_s8 + $0x644] ss:$20 sps:$4 sm:$0xff]  }
 0x59b   : > { %9801 = vmatprep.subr.bf16.mxu0 %v10651_v56  ;;  %v10705_v56 = vld [vmem:[%s14633_s8 + $0x640] ss:$20 sps:$4 sm:$0xff]  }
 0x59c   : > { %6690 = vmatpush1.bf16.msra.mxu1 %v10653_v58  ;;  %v10708_v58 = vld [vmem:[%s14633_s8 + $0x650] ss:$20 sps:$4 sm:$0xff]  }
 0x59d   : > { %6691 = vmatprep.subr.bf16.mxu1 %v10660_v60  ;;  %v10711_v60 = vld [vmem:[%s14633_s8 + $0x66c] ss:$20 sps:$4 sm:$0xff]  }
 0x59e   : > { %9802 = vmatpush3.bf16.msra.mxu0 %v10652_v61  ;;  %v10709_v61 = vld [vmem:[%s14633_s8 + $0x668] ss:$20 sps:$4 sm:$0xff]  }
 0x59f   : > { %9803 = vmatprep.subr.bf16.mxu0 %v10656_v48  ;;  %v10712_v48 = vld [vmem:[%s14633_s8 + $0x678] ss:$20 sps:$4 sm:$0xff]  }
 0x5a0   : > { %6692 = vmatpush1.bf16.msra.mxu1 %v10658_v62  ;;  %v10715_v62 = vld [vmem:[%s14633_s8 + $0x694] ss:$20 sps:$4 sm:$0xff]  }
 0x5a1   : > { %6693 = vmatprep.subr.bf16.mxu1 %v10665_v23  ;;  %v10713_v23 = vld [vmem:[%s14633_s8 + $0x690] ss:$20 sps:$4 sm:$0xff]  }
 0x5a2   : > { %9804 = vmatpush3.bf16.msra.mxu0 %v10657_v53  ;;  %v10716_v53 = vld [vmem:[%s14633_s8 + $0x6a0] ss:$20 sps:$4 sm:$0xff]  }
 0x5a3   : > { %9805 = vmatprep.subr.bf16.mxu0 %v10661_v63  ;;  %v10717_v63 = vld [vmem:[%s14633_s8 + $0x6bc] ss:$20 sps:$4 sm:$0x3f]  }
 0x5a4   : > { %6694 = vmatpush1.bf16.msra.mxu1 %v10663_v1  ;;  %v10719_v1 = vld [vmem:[%s14633_s8 + $0x6b8] ss:$20 sps:$4 sm:$0x3f]  }
 0x5a5   : > { %6695 = vmatprep.subr.bf16.mxu1 %v10670_v22  ;;  %v10720_v22 = vld [vmem:[%s14633_s8 + $0x6c8] ss:$20 sps:$4 sm:$0x3f]  }
 0x5a6   : > { %9806 = vmatpush3.bf16.msra.mxu0 %v10662_v33  ;;  %v6610_v33 = vsel %vm6608_vm0, %v10719_v1, 0  ;;  %v10865_v1 = vld [vmem:[%s14635_s10 + $0x80] ss:$16 sps:$4 sm:$0xff]  }
 0x5a7   : > { %9807 = vmatprep.subr.bf16.mxu0 %v10666_v20  ;;  %v6622_v20 = vsel %vm6608_vm0, %v10720_v22, 0  ;;  %v10867_v22 = vld [vmem:[%s14635_s10 + $0x84] ss:$16 sps:$4 sm:$0xff]  }
 0x5a8   : > { %6696 = vmatpush1.bf16.msra.mxu1 %v10668_v28  ;;  %v10723_v28 = vld [vmem:[%s14633_s8 + $0xc] ss:$20 sps:$4 sm:$0xff]  }
 0x5a9   : > { %6706 = vmatprep.subr.bf16.mxu1 %v10675_v24  ;;  %v2941_v24 = vrot.slane %v13198_v8, %v11778_v34 }
 0x5aa   : > { %9808 = vmatpush3.bf16.msra.mxu0 %v10667_v29  ;;  %v4991_v36 = vpop.f32.mrb[4].mxu1  ;;  %v2945_v29 = vrot.slane %v13198_v8, %v11731_v37  ;;  %v10726_v37 = vld [vmem:[%s14633_s8 + $0x34] ss:$20 sps:$4 sm:$0xff]   ;;  %v10724_v8 = vld [vmem:[%s14633_s8 + $0x30] ss:$20 sps:$4 sm:$0xff]  }
 0x5ab   : > { %9809 = vmatprep.subr.bf16.mxu0 %v10671_v25  ;;  %v9891_v19 = vadd.f32 %v4991_v36, %v2933_v13  ;;  %v4993_v38 = vpop.f32.mrb[5].mxu1 }
 0x5ac   : > { %v9892_v59 = vadd.f32 %v4993_v38, %v2937_v35  ;;  %v4995_v52 = vpop.f32.mrb[6].mxu1 }
 0x5ad   : > { %v5164_v42 = vmax.f32 %v9891_v19, 0.0  ;;  %v4996_v39 = vpop.f32.mrb[7].mxu1 }
 0x5ae   : > { %9810 = vmatpush3.bf16.msra.mxu0 %v10672_v26  ;;  %v5165_v41 = vmax.f32 %v9892_v59, 0.0 }
 0x5af   : > { %6950 = vmatprep.subr.bf16.mxu0 %v11301_v0  ;;  %v13443_v31 = vpack.c.bf16 %v5164_v42, %v5164_v42  ;;  %v10721_v42 = vld [vmem:[%s14633_s8 + $0x8] ss:$20 sps:$4 sm:$0xff]  }
 0x5b0   : > { %v13435_v47 = vpack.c.bf16 %v5165_v41, %v5165_v41  ;;  %v10729_v41 = vld [vmem:[%s14633_s8 + $0x5c] ss:$20 sps:$4 sm:$0xff]  }
 0x5b2   : > { %6697 = vmatprep.mubr.bf16.mxu1 %v13435_v47  ;;  %6942 = vmatprep.mubr.bf16.mxu0 %v13435_v47 }
 0x5b3   : > { %6698 = vmatmul.mubr.bf16.vlgmr.msra.gmra.mrb[8].mxu1 %v13443_v31  ;;  %6943 = vmatmul.mubr.bf16.vlgmr.msra.gmra.mrb[12].mxu0 %v13443_v31 }
 0x5b4   : > { %6707 = vmatpush1.bf16.msra.mxu1 %v10673_v49  ;;  %6951 = vmatpush1.bf16.msra.mxu0 %v10676_v50  ;;  %v10727_v49 = vld [vmem:[%s14633_s8 + $0x58] ss:$20 sps:$4 sm:$0xff]  }
 0x5b5   : > { %6708 = vmatprep.subr.bf16.mxu1 %v10679_v51  ;;  %6952 = vmatprep.subr.bf16.mxu0 %v11301_v0  ;;  %v10732_v50 = vld [vmem:[%s14633_s8 + $0x84] ss:$20 sps:$4 sm:$0xff]   ;;  %v10735_v51 = vld [vmem:[%s14633_s8 + $0xac] ss:$20 sps:$4 sm:$0xff]  }
 0x5b8   : > { %6709 = vmatpush1.bf16.msra.mxu1 %v10677_v43  ;;  %6953 = vmatpush1.bf16.msra.mxu0 %v10680_v2  ;;  %v10733_v43 = vld [vmem:[%s14633_s8 + $0xa8] ss:$20 sps:$4 sm:$0xff]  }
 0x5b9   : > { %6710 = vmatprep.subr.bf16.mxu1 %v10683_v4  ;;  %6954 = vmatprep.subr.bf16.mxu0 %v11301_v0  ;;  %v10738_v2 = vld [vmem:[%s14633_s8 + $0xd4] ss:$20 sps:$4 sm:$0xff]   ;;  %v10736_v4 = vld [vmem:[%s14633_s8 + $0xd0] ss:$20 sps:$4 sm:$0xff]  }
 0x5bc   : > { %6711 = vmatpush1.bf16.msra.mxu1 %v10681_v3  ;;  %6955 = vmatpush1.bf16.msra.mxu0 %v10684_v7  ;;  %v10741_v3 = vld [vmem:[%s14633_s8 + $0xfc] ss:$20 sps:$4 sm:$0xff]   ;;  %v10739_v7 = vld [vmem:[%s14633_s8 + $0xf8] ss:$20 sps:$4 sm:$0xff]  }
 0x5bd   : > { %6712 = vmatprep.subr.bf16.mxu1 %v10687_v27  ;;  %6956 = vmatprep.subr.bf16.mxu0 %v11301_v0  ;;  %v10744_v27 = vld [vmem:[%s14633_s8 + $0x124] ss:$20 sps:$4 sm:$0xff]  }
 0x5c0   : > { %6713 = vmatpush1.bf16.msra.mxu1 %v10685_v6  ;;  %6957 = vmatpush1.bf16.msra.mxu0 %v10688_v21 }
 0x5c1   : > { %6714 = vmatprep.subr.bf16.mxu1 %v10691_v9  ;;  %6958 = vmatprep.subr.bf16.mxu0 %v11301_v0 }
 0x5c4   : > { %6715 = vmatpush1.bf16.msra.mxu1 %v10689_v10  ;;  %6959 = vmatpush1.bf16.msra.mxu0 %v10692_v11  ;;  %v10742_v11 = vld [vmem:[%s14633_s8 + $0x120] ss:$20 sps:$4 sm:$0xff]  }
 0x5c5   : > { %6716 = vmatprep.subr.bf16.mxu1 %v10695_v12  ;;  %6960 = vmatprep.subr.bf16.mxu0 %v11301_v0 }
 0x5c8   : > { %6717 = vmatpush1.bf16.msra.mxu1 %v10693_v14  ;;  %6961 = vmatpush1.bf16.msra.mxu0 %v10696_v15  ;;  %v10747_v14 = vld [vmem:[%s14633_s8 + $0x14c] ss:$20 sps:$4 sm:$0xff]   ;;  %v10745_v15 = vld [vmem:[%s14633_s8 + $0x148] ss:$20 sps:$4 sm:$0xff]  }
 0x5c9   : > { %6718 = vmatprep.subr.bf16.mxu1 %v10699_v16  ;;  %6962 = vmatprep.subr.bf16.mxu0 %v11301_v0  ;;  %v10841_v16 = vld [vmem:[%s14635_s10] ss:$16 sps:$4 sm:$0xff]  }
 0x5cc   : > { %6719 = vmatpush1.bf16.msra.mxu1 %v10697_v32  ;;  %6963 = vmatpush1.bf16.msra.mxu0 %v10700_v57  ;;  %v10843_v32 = vld [vmem:[%s14635_s10 + $0x4] ss:$16 sps:$4 sm:$0xff]  }
 0x5cd   : > { %6720 = vmatprep.subr.bf16.mxu1 %v10703_v17  ;;  %6964 = vmatprep.subr.bf16.mxu0 %v11301_v0  ;;  %v10750_v57 = vld [vmem:[%s14633_s8 + $0x174] ss:$20 sps:$4 sm:$0xff]   ;;  %v10748_v17 = vld [vmem:[%s14633_s8 + $0x170] ss:$20 sps:$4 sm:$0xff]  }
 0x5d0   : > { %6721 = vmatpush1.bf16.msra.mxu1 %v10701_v54  ;;  %6965 = vmatpush1.bf16.msra.mxu0 %v10704_v55  ;;  %v10847_v54 = vld [vmem:[%s14635_s10 + $0x20] ss:$16 sps:$4 sm:$0xff]   ;;  %v10849_v55 = vld [vmem:[%s14635_s10 + $0x24] ss:$16 sps:$4 sm:$0xff]  }
 0x5d1   : > { %6722 = vmatprep.subr.bf16.mxu1 %v10707_v40  ;;  %6966 = vmatprep.subr.bf16.mxu0 %v11301_v0  ;;  %v10753_v40 = vld [vmem:[%s14633_s8 + $0x19c] ss:$20 sps:$4 sm:$0xff]  }
 0x5d4   : > { %6723 = vmatpush1.bf16.msra.mxu1 %v10705_v56  ;;  %6967 = vmatpush1.bf16.msra.mxu0 %v10708_v58  ;;  %v10751_v56 = vld [vmem:[%s14633_s8 + $0x198] ss:$20 sps:$4 sm:$0xff]   ;;  %v10853_v58 = vld [vmem:[%s14635_s10 + $0x40] ss:$16 sps:$4 sm:$0xff]  }
 0x5d5   : > { %6724 = vmatprep.subr.bf16.mxu1 %v10711_v60  ;;  %6968 = vmatprep.subr.bf16.mxu0 %v11301_v0  ;;  %v10855_v60 = vld [vmem:[%s14635_s10 + $0x44] ss:$16 sps:$4 sm:$0xff]  }
 0x5d8   : > { %6725 = vmatpush1.bf16.msra.mxu1 %v10709_v61  ;;  %6969 = vmatpush1.bf16.msra.mxu0 %v10712_v48  ;;  %v10756_v61 = vld [vmem:[%s14633_s8 + $0x1c4] ss:$20 sps:$4 sm:$0xff]   ;;  %v10754_v48 = vld [vmem:[%s14633_s8 + $0x1c0] ss:$20 sps:$4 sm:$0xff]  }
 0x5d9   : > { %6726 = vmatprep.subr.bf16.mxu1 %v10715_v62  ;;  %6970 = vmatprep.subr.bf16.mxu0 %v11301_v0  ;;  %v10859_v62 = vld [vmem:[%s14635_s10 + $0x60] ss:$16 sps:$4 sm:$0xff]  }
 0x5dc   : > { %6727 = vmatpush1.bf16.msra.mxu1 %v10713_v23  ;;  %6971 = vmatpush1.bf16.msra.mxu0 %v10716_v53  ;;  %v10861_v23 = vld [vmem:[%s14635_s10 + $0x64] ss:$16 sps:$4 sm:$0xff]   ;;  %v10759_v53 = vld [vmem:[%s14633_s8 + $0x1ec] ss:$20 sps:$4 sm:$0xff]  }
 0x5dd   : > { %9523 = vmatprep.subr.msk.bf16.mxu1 %vm6608_vm0, %v10717_v63  ;;  %6972 = vmatprep.subr.bf16.mxu0 %v11301_v0  ;;  %v10757_v63 = vld [vmem:[%s14633_s8 + $0x1e8] ss:$20 sps:$4 sm:$0xff]  }
 0x5e0   : > { %6729 = vmatpush1.bf16.msra.mxu1 %v6610_v33  ;;  %6973 = vmatpush1.bf16.msra.mxu0 %v6622_v20  ;;  %v10762_v33 = vld [vmem:[%s14633_s8 + $0x214] ss:$20 sps:$4 sm:$0xff]   ;;  %v10871_v20 = vld [vmem:[%s14635_s10 + $0xa0] ss:$16 sps:$4 sm:$0xff]  }
 0x5e1   : > { %6747 = vmatprep.subr.bf16.mxu1 %v10723_v28  ;;  %7939 = vmatprep.subr.bf16.mxu0 %v10843_v32  ;;  %v10760_v28 = vld [vmem:[%s14633_s8 + $0x210] ss:$20 sps:$4 sm:$0xff]  }
 0x5e2   : > { %v10913_v32 = vld [vmem:[%s14635_s10 + $0x180] ss:$16 sps:$4 sm:$0xff]  }
 0x644   : > { %v5155_v25 = vpop.f32.mrb[4].mxu0 }
 0x645   : > { %v9893_v26 = vadd.f32 %v5155_v25, %v2941_v24  ;;  %v5157_v13 = vpop.f32.mrb[5].mxu0  ;;  %v10873_v24 = vld [vmem:[%s14635_s10 + $0xa4] ss:$16 sps:$4 sm:$0xff]  }
 0x646   : > { %v9894_v35 = vadd.f32 %v5157_v13, %v2945_v29  ;;  %v5159_v36 = vpop.f32.mrb[6].mxu0  ;;  %v10765_v29 = vld [vmem:[%s14633_s8 + $0x23c] ss:$20 sps:$4 sm:$0xff]   ;;  %v10879_v25 = vld [vmem:[%s14635_s10 + $0xc4] ss:$16 sps:$4 sm:$0xff]  }
 0x647   : > { %v5166_v19 = vmax.f32 %v9893_v26, 0.0  ;;  %v5160_v38 = vpop.f32.mrb[7].mxu0  ;;  %v10877_v26 = vld [vmem:[%s14635_s10 + $0xc0] ss:$16 sps:$4 sm:$0xff]   ;;  %v10763_v13 = vld [vmem:[%s14633_s8 + $0x238] ss:$20 sps:$4 sm:$0xff]  }
 0x648   : > { %v5167_v59 = vmax.f32 %v9894_v35, 0.0  ;;  %v10768_v35 = vld [vmem:[%s14633_s8 + $0x264] ss:$20 sps:$4 sm:$0xff]   ;;  %v10766_v38 = vld [vmem:[%s14633_s8 + $0x260] ss:$20 sps:$4 sm:$0xff]  }
 0x649   : > { %v13574_v39 = vpack.c.bf16 %v5166_v19, %v5166_v19  ;;  %v10885_v36 = vld [vmem:[%s14635_s10 + $0xe4] ss:$16 sps:$4 sm:$0xff]   ;;  %v10883_v19 = vld [vmem:[%s14635_s10 + $0xe0] ss:$16 sps:$4 sm:$0xff]  }
 0x64a   : > { %v13569_v52 = vpack.c.bf16 %v5167_v59, %v5167_v59  ;;  %v10771_v59 = vld [vmem:[%s14633_s8 + $0x28c] ss:$20 sps:$4 sm:$0xff]  }
 0x64c   : > { %9524 = vmatprep.mubr.msk.bf16.mxu1 %vm6604_vm1, %v13569_v52  ;;  %9527 = vmatprep.mubr.msk.bf16.mxu0 %vm6604_vm1, %v13569_v52 }
 0x64d   : > { %6739 = vmatmul.mubr.bf16.vlgmr.msra.gmra.mrb[8].mxu1 %v13574_v39  ;;  %6983 = vmatmul.mubr.bf16.vlgmr.msra.gmra.mrb[16].mxu0 %v13574_v39 }
 0x64e   : > { %6748 = vmatpush1.bf16.msra.mxu1 %v10721_v42  ;;  %6779 = vmatprep.mubr.bf16.mxu1 %v13233_v18  ;;  %v10730_v18 = vld [vmem:[%s14633_s8 + $0x80] ss:$20 sps:$4 sm:$0xff]  }
 0x64f   : > { %6749 = vmatprep.subr.bf16.mxu1 %v10726_v37  ;;  %7940 = vmatpush1.bf16.msra.mxu0 %v10841_v16  ;;  %v10891_v42 = vld [vmem:[%s14635_s10 + $0x104] ss:$16 sps:$4 sm:$0xff]  }
 0x650   : > { %7941 = vmatprep.subr.bf16.mxu0 %v10849_v55  ;;  %v13732_v37 = vld [vmem:[%s14634_s9] sm:$0x1f] }
 0x651   : > { %v10915_v16 = vld [vmem:[%s14635_s10 + $0x184] ss:$16 sps:$4 sm:$0xff]   ;;  %v10919_v55 = vld [vmem:[%s14635_s10 + $0x1a0] ss:$16 sps:$4 sm:$0xff]  }
 0x652   : > { %6750 = vmatpush1.bf16.msra.mxu1 %v10724_v8  ;;  %v10889_v8 = vld [vmem:[%s14635_s10 + $0x100] ss:$16 sps:$4 sm:$0xff]  }
 0x653   : > { %6751 = vmatprep.subr.bf16.mxu1 %v10729_v41  ;;  %7942 = vmatpush1.bf16.msra.mxu0 %v10847_v54  ;;  %v10769_v41 = vld [vmem:[%s14633_s8 + $0x288] ss:$20 sps:$4 sm:$0xff]   ;;  %v10921_v54 = vld [vmem:[%s14635_s10 + $0x1a4] ss:$16 sps:$4 sm:$0xff]  }
 0x654   : > { %7943 = vmatprep.subr.bf16.mxu0 %v10855_v60  ;;  %v10792_v60 = vld [vmem:[%s14633_s8 + $0x3a4] ss:$20 sps:$4 sm:$0xff]  }
 0x656   : > { %6752 = vmatpush1.bf16.msra.mxu1 %v10727_v49  ;;  %v10774_v49 = vld [vmem:[%s14633_s8 + $0x2b4] ss:$20 sps:$4 sm:$0xff]  }
 0x657   : > { %6753 = vmatprep.subr.bf16.mxu1 %v10732_v50  ;;  %7944 = vmatpush1.bf16.msra.mxu0 %v10853_v58  ;;  %v10897_v50 = vld [vmem:[%s14635_s10 + $0x124] ss:$16 sps:$4 sm:$0xff]   ;;  %v10787_v58 = vld [vmem:[%s14633_s8 + $0x378] ss:$20 sps:$4 sm:$0xff]  }
 0x658   : > { %7945 = vmatprep.subr.bf16.mxu0 %v10861_v23  ;;  %v10795_v23 = vld [vmem:[%s14633_s8 + $0x3cc] ss:$20 sps:$4 sm:$0xff]  }
 0x65a   : > { %6754 = vmatpush1.bf16.msra.mxu1 %v10730_v18  ;;  %v5459_v18 = vrot.slane %v13732_v37, %v11778_v34  ;;  %v10777_v34 = vld [vmem:[%s14633_s8 + $0x2dc] ss:$20 sps:$4 sm:$0xff]  }
 0x65b   : > { %6755 = vmatprep.subr.bf16.mxu1 %v10735_v51  ;;  %7946 = vmatpush1.bf16.msra.mxu0 %v10859_v62  ;;  %v10895_v51 = vld [vmem:[%s14635_s10 + $0x120] ss:$16 sps:$4 sm:$0xff]   ;;  %v10927_v62 = vld [vmem:[%s14635_s10 + $0x1c4] ss:$16 sps:$4 sm:$0xff]  }
 0x65c   : > { %7947 = vmatprep.subr.bf16.mxu0 %v10867_v22  ;;  %v10798_v22 = vld [vmem:[%s14633_s8 + $0x3f4] ss:$20 sps:$4 sm:$0xff]  }
 0x65e   : > { %6756 = vmatpush1.bf16.msra.mxu1 %v10733_v43 }
 0x65f   : > { %6757 = vmatprep.subr.bf16.mxu1 %v10738_v2  ;;  %7948 = vmatpush1.bf16.msra.mxu0 %v10865_v1  ;;  %v10772_v2 = vld [vmem:[%s14633_s8 + $0x2b0] ss:$20 sps:$4 sm:$0xff]   ;;  %v10793_v1 = vld [vmem:[%s14633_s8 + $0x3c8] ss:$20 sps:$4 sm:$0xff]  }
 0x660   : > { %7949 = vmatprep.subr.bf16.mxu0 %v10873_v24  ;;  %v10804_v24 = vld [vmem:[%s14633_s8 + $0x444] ss:$20 sps:$4 sm:$0xff]  }
 0x662   : > { %6758 = vmatpush1.bf16.msra.mxu1 %v10736_v4 }
 0x663   : > { %6759 = vmatprep.subr.bf16.mxu1 %v10741_v3  ;;  %7950 = vmatpush1.bf16.msra.mxu0 %v10871_v20  ;;  %v10801_v20 = vld [vmem:[%s14633_s8 + $0x41c] ss:$20 sps:$4 sm:$0xff]  }
 0x664   : > { %v9789_v6 = vpop.f32.mrb[8].mxu0  ;;  %7951 = vmatprep.subr.bf16.mxu0 %v10879_v25  ;;  %v10807_v25 = vld [vmem:[%s14633_s8 + $0x46c] ss:$20 sps:$4 sm:$0xff]  }
 0x665   : > { %v9790_v21 = vpop.f32.mrb[9].mxu0 }
 0x666   : > { %6760 = vmatpush1.bf16.msra.mxu1 %v10739_v7  ;;  %v13622_v9 = vadd.f32 %v9790_v21, %v9789_v6  ;;  %v9792_v10 = vpop.f32.mrb[10].mxu0  ;;  %v10901_v6 = vld [vmem:[%s14635_s10 + $0x140] ss:$16 sps:$4 sm:$0xff]   ;;  %v10775_v21 = vld [vmem:[%s14633_s8 + $0x2d8] ss:$20 sps:$4 sm:$0xff]  }
 0x667   : > { %v9793_v12 = vpop.f32.mrb[11].mxu0  ;;  %6761 = vmatprep.subr.bf16.mxu1 %v10744_v27  ;;  %7952 = vmatpush1.bf16.msra.mxu0 %v10877_v26  ;;  %v10805_v26 = vld [vmem:[%s14633_s8 + $0x468] ss:$20 sps:$4 sm:$0xff]  }
 0x668   : > { %7953 = vmatprep.subr.bf16.mxu0 %v10885_v36  ;;  %v6905_v3 = vadd.f32 %v13622_v9, %v5459_v18  ;;  %v10780_v9 = vld [vmem:[%s14633_s8 + $0x304] ss:$20 sps:$4 sm:$0xff]   ;;  %v10907_v12 = vld [vmem:[%s14635_s10 + $0x160] ss:$16 sps:$4 sm:$0xff]  }
 0x669   : > { %v10808_v36 = vld [vmem:[%s14633_s8 + $0x490] ss:$20 sps:$4 sm:$0xff]  }
 0x66a   : > { %6762 = vmatpush1.bf16.msra.mxu1 %v10742_v11  ;;  %v10909_v11 = vld [vmem:[%s14635_s10 + $0x164] ss:$16 sps:$4 sm:$0xff]   ;;  %v10825_v18 = vld [vmem:[%s14633_s8 + $0x55c] ss:$20 sps:$4 sm:$0xff]  }
 0x66b   : > { %6763 = vmatprep.subr.bf16.mxu1 %v10747_v14  ;;  %7954 = vmatpush1.bf16.msra.mxu0 %v10883_v19  ;;  %v10778_v14 = vld [vmem:[%s14633_s8 + $0x300] ss:$20 sps:$4 sm:$0xff]   ;;  %v10813_v19 = vld [vmem:[%s14633_s8 + $0x4bc] ss:$20 sps:$4 sm:$0xff]  }
 0x66c   : > { %7955 = vmatprep.subr.bf16.mxu0 %v10891_v42  ;;  %v10814_v42 = vld [vmem:[%s14633_s8 + $0x4e0] ss:$20 sps:$4 sm:$0xff]  }
 0x66e   : > { %6764 = vmatpush1.bf16.msra.mxu1 %v10745_v15  ;;  %v10783_v15 = vld [vmem:[%s14633_s8 + $0x32c] ss:$20 sps:$4 sm:$0xff]  }
 0x66f   : > { %6765 = vmatprep.subr.bf16.mxu1 %v10750_v57  ;;  %7956 = vmatpush1.bf16.msra.mxu0 %v10889_v8  ;;  %v10781_v57 = vld [vmem:[%s14633_s8 + $0x328] ss:$20 sps:$4 sm:$0xff]   ;;  %v10819_v8 = vld [vmem:[%s14633_s8 + $0x50c] ss:$20 sps:$4 sm:$0xff]  }
 0x670   : > { %7957 = vmatprep.subr.bf16.mxu0 %v10897_v50  ;;  %v10820_v50 = vld [vmem:[%s14633_s8 + $0x530] ss:$20 sps:$4 sm:$0xff]  }
 0x672   : > { %6766 = vmatpush1.bf16.msra.mxu1 %v10748_v17  ;;  %v10786_v17 = vld [vmem:[%s14633_s8 + $0x354] ss:$20 sps:$4 sm:$0xff]  }
 0x673   : > { %6767 = vmatprep.subr.bf16.mxu1 %v10753_v40  ;;  %7958 = vmatpush1.bf16.msra.mxu0 %v10895_v51  ;;  %v10784_v40 = vld [vmem:[%s14633_s8 + $0x350] ss:$20 sps:$4 sm:$0xff]   ;;  %v10823_v51 = vld [vmem:[%s14633_s8 + $0x558] ss:$20 sps:$4 sm:$0xff]  }
 0x676   : > { %6768 = vmatpush1.bf16.msra.mxu1 %v10751_v56  ;;  %v10789_v56 = vld [vmem:[%s14633_s8 + $0x37c] ss:$20 sps:$4 sm:$0xff]  }
 0x677   : > { %6769 = vmatprep.subr.bf16.mxu1 %v10756_v61  ;;  %v10790_v61 = vld [vmem:[%s14633_s8 + $0x3a0] ss:$20 sps:$4 sm:$0xff]  }
 0x67a   : > { %6770 = vmatpush1.bf16.msra.mxu1 %v10754_v48  ;;  %v10925_v48 = vld [vmem:[%s14635_s10 + $0x1c0] ss:$16 sps:$4 sm:$0xff]  }
 0x67b   : > { %6771 = vmatprep.subr.bf16.mxu1 %v10759_v53  ;;  %v10933_v53 = vld [vmem:[%s14635_s10 + $0x1e4] ss:$16 sps:$4 sm:$0xff]  }
 0x67e   : > { %6772 = vmatpush1.bf16.msra.mxu1 %v10757_v63  ;;  %v10931_v63 = vld [vmem:[%s14635_s10 + $0x1e0] ss:$16 sps:$4 sm:$0xff]  }
 0x67f   : > { %6773 = vmatprep.subr.bf16.mxu1 %v10762_v33  ;;  %v10796_v33 = vld [vmem:[%s14633_s8 + $0x3f0] ss:$20 sps:$4 sm:$0xff]  }
 0x682   : > { %6774 = vmatpush1.bf16.msra.mxu1 %v10760_v28  ;;  %v10799_v28 = vld [vmem:[%s14633_s8 + $0x418] ss:$20 sps:$4 sm:$0xff]  }
 0x683   : > { %6775 = vmatprep.subr.bf16.mxu1 %v10765_v29  ;;  %v10802_v29 = vld [vmem:[%s14633_s8 + $0x440] ss:$20 sps:$4 sm:$0xff]  }
 0x686   : > { %6776 = vmatpush1.bf16.msra.mxu1 %v10763_v13  ;;  %v9811_v43 = vpop.f32.mrb[12].mxu0  ;;  %v10810_v13 = vld [vmem:[%s14633_s8 + $0x494] ss:$20 sps:$4 sm:$0xff]  }
 0x687   : > { %6777 = vmatprep.subr.bf16.mxu1 %v10768_v35  ;;  %v9812_v4 = vpop.f32.mrb[13].mxu0  ;;  %v10951_v35 = vld [vmem:[%s14635_s10 + $0x204] ss:$16 sps:$4 sm:$0xff]  }
 0x688   : > { %v9813_v7 = vadd.f32 %v9812_v4, %v9811_v43  ;;  %v9814_v27 = vpop.f32.mrb[14].mxu0  ;;  %v10831_v43 = vld [vmem:[%s14633_s8 + $0x5ac] ss:$20 sps:$4 sm:$0xff]   ;;  %v10834_v4 = vld [vmem:[%s14633_s8 + $0x5d4] ss:$20 sps:$4 sm:$0xff]  }
 0x689   : > { %v10838_v27 = vld [vmem:[%s14633_s8 + $0x620] ss:$20 sps:$4 sm:$0xff]  }
 0x68a   : > { %6778 = vmatpush1.bf16.msra.mxu1 %v10766_v38  ;;  %v13769_v10 = vadd.f32 %v9813_v7, %v6905_v3  ;;  %v10811_v38 = vld [vmem:[%s14633_s8 + $0x4b8] ss:$20 sps:$4 sm:$0xff]  }
 0x68b   : > { %6788 = vmatprep.subr.bf16.mxu1 %v10771_v59  ;;  %v10816_v59 = vld [vmem:[%s14633_s8 + $0x4e4] ss:$20 sps:$4 sm:$0xff]  }
 0x68c   : > { %v10835_v3 = vld [vmem:[%s14633_s8 + $0x5f8] ss:$20 sps:$4 sm:$0xff]  }
 0x68d   : > { %6780 = vmatmul.mubr.bf16.vlgmr.msra.gmra.mrb[12].mxu1 %v13235_v5  ;;  %v10903_v5 = vld [vmem:[%s14635_s10 + $0x144] ss:$16 sps:$4 sm:$0xff]  }
 0x68e   : > { %6789 = vmatpush1.bf16.msra.mxu1 %v10769_v41  ;;  %6820 = vmatprep.mubr.bf16.mxu1 %v13435_v47  ;;  %v9815_v47 = vpop.f32.mrb[15].mxu0  ;;  %v10817_v41 = vld [vmem:[%s14633_s8 + $0x508] ss:$20 sps:$4 sm:$0xff]   ;;  %v10840_v7 = vld [vmem:[%s14633_s8 + $0x624] ss:$20 sps:$4 sm:$0xff]  }
 0x68f   : > { %6790 = vmatprep.subr.bf16.mxu1 %v10774_v49  ;;  %7959 = vmatprep.subr.bf16.mxu0 %v10903_v5  ;;  %v10822_v49 = vld [vmem:[%s14633_s8 + $0x534] ss:$20 sps:$4 sm:$0xff]   ;;  %v10837_v5 = vld [vmem:[%s14633_s8 + $0x5fc] ss:$20 sps:$4 sm:$0xff]   ;;  %v10846_v47 = vld [vmem:[%s14633_s8 + $0x64c] ss:$20 sps:$4 sm:$0xff]  }
 0x690   : > { %7960 = vmatpush1.bf16.msra.mxu0 %v10901_v6  ;;  %v10844_v6 = vld [vmem:[%s14633_s8 + $0x648] ss:$20 sps:$4 sm:$0xff]  }
 0x691   : > { %7961 = vmatprep.subr.bf16.mxu0 %v10909_v11  ;;  %v10858_v11 = vld [vmem:[%s14633_s8 + $0x69c] ss:$20 sps:$4 sm:$0xff]  }
 0x692   : > { %6791 = vmatpush1.bf16.msra.mxu1 %v10772_v2  ;;  %v10829_v2 = vld [vmem:[%s14633_s8 + $0x5a8] ss:$20 sps:$4 sm:$0xff]  }
 0x693   : > { %6792 = vmatprep.subr.bf16.mxu1 %v10777_v34  ;;  %v10832_v34 = vld [vmem:[%s14633_s8 + $0x5d0] ss:$20 sps:$4 sm:$0xff]  }
 0x694   : > { %7962 = vmatpush1.bf16.msra.mxu0 %v10907_v12  ;;  %v10856_v12 = vld [vmem:[%s14633_s8 + $0x698] ss:$20 sps:$4 sm:$0xff]  }
 0x695   : > { %7963 = vmatprep.subr.bf16.mxu0 %v10915_v16 }
 0x696   : > { %6793 = vmatpush1.bf16.msra.mxu1 %v10775_v21  ;;  %v10852_v21 = vld [vmem:[%s14633_s8 + $0x674] ss:$20 sps:$4 sm:$0xff]  }
 0x697   : > { %6794 = vmatprep.subr.bf16.mxu1 %v10780_v9  ;;  %v10850_v9 = vld [vmem:[%s14633_s8 + $0x670] ss:$20 sps:$4 sm:$0xff]  }
 0x698   : > { %7964 = vmatpush1.bf16.msra.mxu0 %v10913_v32  ;;  %v10870_v32 = vld [vmem:[%s14635_s10 + $0xc] ss:$16 sps:$4 sm:$0xff]  }
 0x699   : > { %7965 = vmatprep.subr.bf16.mxu0 %v10921_v54  ;;  %v10874_v54 = vld [vmem:[%s14635_s10 + $0x28] ss:$16 sps:$4 sm:$0xff]  }
 0x69a   : > { %6795 = vmatpush1.bf16.msra.mxu1 %v10778_v14  ;;  %v10862_v14 = vld [vmem:[%s14633_s8 + $0x6c4] ss:$20 sps:$4 sm:$0x3f]  }
 0x69b   : > { %6796 = vmatprep.subr.bf16.mxu1 %v10783_v15  ;;  %v10864_v15 = vld [vmem:[%s14633_s8 + $0x6c0] ss:$20 sps:$4 sm:$0x3f]  }
 0x69c   : > { %7966 = vmatpush1.bf16.msra.mxu0 %v10919_v55  ;;  %v6616_v16 = vsel %vm6608_vm0, %v10864_v15, 0  ;;  %v10882_v55 = vld [vmem:[%s14635_s10 + $0x4c] ss:$16 sps:$4 sm:$0xff]   ;;  %v10946_v15 = vld [vmem:[%s14635_s10 + $0x1e8] ss:$16 sps:$4 sm:$0xff]  }
 0x69d   : > { %7967 = vmatprep.subr.bf16.mxu0 %v10927_v62  ;;  %v10906_v62 = vld [vmem:[%s14635_s10 + $0xcc] ss:$16 sps:$4 sm:$0xff]  }
 0x69e   : > { %6797 = vmatpush1.bf16.msra.mxu1 %v10781_v57  ;;  %v10868_v57 = vld [vmem:[%s14635_s10 + $0x8] ss:$16 sps:$4 sm:$0xff]  }
 0x69f   : > { %6798 = vmatprep.subr.bf16.mxu1 %v10786_v17  ;;  %v10876_v17 = vld [vmem:[%s14635_s10 + $0x2c] ss:$16 sps:$4 sm:$0xff]  }
 0x6a0   : > { %7968 = vmatpush1.bf16.msra.mxu0 %v10925_v48  ;;  %v10898_v48 = vld [vmem:[%s14635_s10 + $0xa8] ss:$16 sps:$4 sm:$0xff]  }
 0x6a1   : > { %7969 = vmatprep.subr.bf16.mxu0 %v10933_v53  ;;  %v10912_v53 = vld [vmem:[%s14635_s10 + $0xec] ss:$16 sps:$4 sm:$0xff]  }
 0x6a2   : > { %6799 = vmatpush1.bf16.msra.mxu1 %v10784_v40  ;;  %v10880_v40 = vld [vmem:[%s14635_s10 + $0x48] ss:$16 sps:$4 sm:$0xff]  }
 0x6a3   : > { %6800 = vmatprep.subr.bf16.mxu1 %v10789_v56  ;;  %v10886_v56 = vld [vmem:[%s14635_s10 + $0x68] ss:$16 sps:$4 sm:$0xff]  }
 0x6a4   : > { %7970 = vmatpush1.bf16.msra.mxu0 %v10931_v63  ;;  %v10910_v63 = vld [vmem:[%s14635_s10 + $0xe8] ss:$16 sps:$4 sm:$0xff]  }
 0x6a5   : > { %7980 = vmatprep.subr.bf16.mxu0 %v10951_v35 }
 0x6a6   : > { %6801 = vmatpush1.bf16.msra.mxu1 %v10787_v58  ;;  %v10894_v58 = vld [vmem:[%s14635_s10 + $0x8c] ss:$16 sps:$4 sm:$0xff]  }
 0x6a7   : > { %6802 = vmatprep.subr.bf16.mxu1 %v10792_v60  ;;  %v10892_v60 = vld [vmem:[%s14635_s10 + $0x88] ss:$16 sps:$4 sm:$0xff]  }
 0x6aa   : > { %6803 = vmatpush1.bf16.msra.mxu1 %v10790_v61  ;;  %v10900_v61 = vld [vmem:[%s14635_s10 + $0xac] ss:$16 sps:$4 sm:$0xff]  }
 0x6ab   : > { %6804 = vmatprep.subr.bf16.mxu1 %v10795_v23  ;;  %v10904_v23 = vld [vmem:[%s14635_s10 + $0xc8] ss:$16 sps:$4 sm:$0xff]  }
 0x6ae   : > { %6805 = vmatpush1.bf16.msra.mxu1 %v10793_v1  ;;  %v10918_v1 = vld [vmem:[%s14635_s10 + $0x10c] ss:$16 sps:$4 sm:$0xff]  }
 0x6af   : > { %6806 = vmatprep.subr.bf16.mxu1 %v10798_v22  ;;  %v10916_v22 = vld [vmem:[%s14635_s10 + $0x108] ss:$16 sps:$4 sm:$0xff]  }
 0x6b2   : > { %6807 = vmatpush1.bf16.msra.mxu1 %v10796_v33  ;;  %v10924_v33 = vld [vmem:[%s14635_s10 + $0x12c] ss:$16 sps:$4 sm:$0xff]  }
 0x6b3   : > { %6808 = vmatprep.subr.bf16.mxu1 %v10801_v20  ;;  %v5443_v20 = vrot.slane %v13732_v37, %v11663_v44 }
 0x6b6   : > { %6809 = vmatpush1.bf16.msra.mxu1 %v10799_v28  ;;  %v10922_v28 = vld [vmem:[%s14635_s10 + $0x128] ss:$16 sps:$4 sm:$0xff]  }
 0x6b7   : > { %6810 = vmatprep.subr.bf16.mxu1 %v10804_v24  ;;  %v5447_v24 = vrot.slane %v13732_v37, %v11666_v45 }
 0x6ba   : > { %6811 = vmatpush1.bf16.msra.mxu1 %v10802_v29  ;;  %v10930_v29 = vld [vmem:[%s14635_s10 + $0x14c] ss:$16 sps:$4 sm:$0xff]  }
 0x6bb   : > { %6812 = vmatprep.subr.bf16.mxu1 %v10807_v25 }
 0x6be   : > { %6813 = vmatpush1.bf16.msra.mxu1 %v10805_v26 }
 0x6bf   : > { %6814 = vmatprep.subr.bf16.mxu1 %v10810_v13 }
 0x6c2   : > { %6815 = vmatpush1.bf16.msra.mxu1 %v10808_v36 }
 0x6c3   : > { %6816 = vmatprep.subr.bf16.mxu1 %v10813_v19 }
 0x6c6   : > { %6817 = vmatpush1.bf16.msra.mxu1 %v10811_v38 }
 0x6c7   : > { %6818 = vmatprep.subr.bf16.mxu1 %v10816_v59 }
 0x6ca   : > { %6819 = vmatpush1.bf16.msra.mxu1 %v10814_v42 }
 0x6cb   : > { %6829 = vmatprep.subr.bf16.mxu1 %v10819_v8  ;;  %v10928_v8 = vld [vmem:[%s14635_s10 + $0x148] ss:$16 sps:$4 sm:$0xff]  }
 0x6cd   : > { %6821 = vmatmul.mubr.bf16.vlgmr.msra.gmra.mrb[12].mxu1 %v13443_v31  ;;  %v10828_v31 = vld [vmem:[%s14633_s8 + $0x584] ss:$20 sps:$4 sm:$0xff]  }
 0x6ce   : > { %6830 = vmatpush1.bf16.msra.mxu1 %v10817_v41  ;;  %9526 = vmatprep.mubr.msk.bf16.mxu1 %vm6604_vm1, %v13569_v52  ;;  %v10826_v52 = vld [vmem:[%s14633_s8 + $0x580] ss:$20 sps:$4 sm:$0xff]  }
 0x6cf   : > { %6831 = vmatprep.subr.bf16.mxu1 %v10822_v49 }
 0x6d2   : > { %6832 = vmatpush1.bf16.msra.mxu1 %v10820_v50 }
 0x6d3   : > { %6833 = vmatprep.subr.bf16.mxu1 %v10825_v18  ;;  %v10936_v18 = vld [vmem:[%s14635_s10 + $0x16c] ss:$16 sps:$4 sm:$0xff]  }
 0x6d6   : > { %6834 = vmatpush1.bf16.msra.mxu1 %v10823_v51 }
 0x6d7   : > { %6835 = vmatprep.subr.bf16.mxu1 %v10828_v31  ;;  %v10934_v31 = vld [vmem:[%s14635_s10 + $0x168] ss:$16 sps:$4 sm:$0xff]  }
 0x6da   : > { %6836 = vmatpush1.bf16.msra.mxu1 %v10826_v52  ;;  %v10949_v52 = vld [vmem:[%s14635_s10 + $0x200] ss:$16 sps:$4 sm:$0xff]  }
 0x6db   : > { %6837 = vmatprep.subr.bf16.mxu1 %v10831_v43 }
 0x6de   : > { %6838 = vmatpush1.bf16.msra.mxu1 %v10829_v2  ;;  %v10939_v2 = vld [vmem:[%s14635_s10 + $0x18c] ss:$16 sps:$4 sm:$0xff]  }
 0x6df   : > { %6839 = vmatprep.subr.bf16.mxu1 %v10834_v4  ;;  %v10957_v4 = vld [vmem:[%s14635_s10 + $0x224] ss:$16 sps:$4 sm:$0xff]  }
 0x6e2   : > { %6840 = vmatpush1.bf16.msra.mxu1 %v10832_v34  ;;  %v10937_v34 = vld [vmem:[%s14635_s10 + $0x188] ss:$16 sps:$4 sm:$0xff]  }
 0x6e3   : > { %6841 = vmatprep.subr.bf16.mxu1 %v10837_v5  ;;  %v10955_v5 = vld [vmem:[%s14635_s10 + $0x220] ss:$16 sps:$4 sm:$0xff]  }
 0x6e6   : > { %6842 = vmatpush1.bf16.msra.mxu1 %v10835_v3  ;;  %v10942_v3 = vld [vmem:[%s14635_s10 + $0x1ac] ss:$16 sps:$4 sm:$0xff]  }
 0x6e7   : > { %6843 = vmatprep.subr.bf16.mxu1 %v10840_v7  ;;  %v10963_v7 = vld [vmem:[%s14635_s10 + $0x244] ss:$16 sps:$4 sm:$0xff]  }
 0x6ea   : > { %6844 = vmatpush1.bf16.msra.mxu1 %v10838_v27  ;;  %v10940_v27 = vld [vmem:[%s14635_s10 + $0x1a8] ss:$16 sps:$4 sm:$0xff]  }
 0x6eb   : > { %6845 = vmatprep.subr.bf16.mxu1 %v10846_v47  ;;  %v10961_v47 = vld [vmem:[%s14635_s10 + $0x240] ss:$16 sps:$4 sm:$0xff]  }
 0x6ee   : > { %6846 = vmatpush1.bf16.msra.mxu1 %v10844_v6  ;;  %v10945_v6 = vld [vmem:[%s14635_s10 + $0x1cc] ss:$16 sps:$4 sm:$0xff]  }
 0x6ef   : > { %6847 = vmatprep.subr.bf16.mxu1 %v10852_v21  ;;  %v10969_v21 = vld [vmem:[%s14635_s10 + $0x264] ss:$16 sps:$4 sm:$0xff]  }
 0x6f2   : > { %6848 = vmatpush1.bf16.msra.mxu1 %v10850_v9  ;;  %v10943_v9 = vld [vmem:[%s14635_s10 + $0x1c8] ss:$16 sps:$4 sm:$0xff]  }
 0x6f3   : > { %6849 = vmatprep.subr.bf16.mxu1 %v10858_v11  ;;  %v10967_v11 = vld [vmem:[%s14635_s10 + $0x260] ss:$16 sps:$4 sm:$0xff]  }
 0x6f6   : > { %6850 = vmatpush1.bf16.msra.mxu1 %v10856_v12  ;;  %v10948_v12 = vld [vmem:[%s14635_s10 + $0x1ec] ss:$16 sps:$4 sm:$0xff]  }
 0x6f7   : > { %9525 = vmatprep.subr.msk.bf16.mxu1 %vm6608_vm0, %v10862_v14  ;;  %v10975_v14 = vld [vmem:[%s14635_s10 + $0x284] ss:$16 sps:$4 sm:$0xff]  }
 0x6fa   : > { %6852 = vmatpush1.bf16.msra.mxu1 %v6616_v16  ;;  %v10973_v16 = vld [vmem:[%s14635_s10 + $0x280] ss:$16 sps:$4 sm:$0xff]  }
 0x6fb   : > { %8062 = vmatprep.subr.bf16.mxu1 %v10870_v32  ;;  %v10954_v32 = vld [vmem:[%s14635_s10 + $0x20c] ss:$16 sps:$4 sm:$0xff]  }
 0x6fd   : > { %6862 = vmatmul.mubr.bf16.vlgmr.msra.gmra.mrb[12].mxu1 %v13574_v39  ;;  %v10888_v39 = vld [vmem:[%s14635_s10 + $0x6c] ss:$16 sps:$4 sm:$0xff]  }
 0x6fe   : > { %8063 = vmatpush1.bf16.msra.mxu1 %v10868_v57  ;;  %v10981_v57 = vld [vmem:[%s14635_s10 + $0x2a4] ss:$16 sps:$4 sm:$0xff]  }
 0x6ff   : > { %8064 = vmatprep.subr.bf16.mxu1 %v10876_v17  ;;  %v10952_v17 = vld [vmem:[%s14635_s10 + $0x208] ss:$16 sps:$4 sm:$0xff]  }
 0x702   : > { %8065 = vmatpush1.bf16.msra.mxu1 %v10874_v54  ;;  %v10979_v54 = vld [vmem:[%s14635_s10 + $0x2a0] ss:$16 sps:$4 sm:$0xff]  }
 0x703   : > { %8066 = vmatprep.subr.bf16.mxu1 %v10882_v55  ;;  %v10960_v55 = vld [vmem:[%s14635_s10 + $0x22c] ss:$16 sps:$4 sm:$0xff]  }
 0x706   : > { %8067 = vmatpush1.bf16.msra.mxu1 %v10880_v40  ;;  %v10987_v40 = vld [vmem:[%s14635_s10 + $0x2c4] ss:$16 sps:$4 sm:$0xff]  }
 0x707   : > { %8068 = vmatprep.subr.bf16.mxu1 %v10888_v39  ;;  %v10958_v39 = vld [vmem:[%s14635_s10 + $0x228] ss:$16 sps:$4 sm:$0xff]  }
 0x70a   : > { %8069 = vmatpush1.bf16.msra.mxu1 %v10886_v56  ;;  %v10985_v56 = vld [vmem:[%s14635_s10 + $0x2c0] ss:$16 sps:$4 sm:$0xff]  }
 0x70b   : > { %8070 = vmatprep.subr.bf16.mxu1 %v10894_v58  ;;  %v10966_v58 = vld [vmem:[%s14635_s10 + $0x24c] ss:$16 sps:$4 sm:$0xff]  }
 0x70e   : > { %8071 = vmatpush1.bf16.msra.mxu1 %v10892_v60  ;;  %v10993_v60 = vld [vmem:[%s14635_s10 + $0x2e4] ss:$16 sps:$4 sm:$0xff]  }
 0x70f   : > { %8072 = vmatprep.subr.bf16.mxu1 %v10900_v61  ;;  %v10964_v61 = vld [vmem:[%s14635_s10 + $0x248] ss:$16 sps:$4 sm:$0xff]  }
 0x712   : > { %8073 = vmatpush1.bf16.msra.mxu1 %v10898_v48  ;;  %v10991_v48 = vld [vmem:[%s14635_s10 + $0x2e0] ss:$16 sps:$4 sm:$0xff]  }
 0x713   : > { %8074 = vmatprep.subr.bf16.mxu1 %v10906_v62  ;;  %v10972_v62 = vld [vmem:[%s14635_s10 + $0x26c] ss:$16 sps:$4 sm:$0xff]  }
 0x716   : > { %8075 = vmatpush1.bf16.msra.mxu1 %v10904_v23  ;;  %v10999_v23 = vld [vmem:[%s14635_s10 + $0x304] ss:$16 sps:$4 sm:$0xff]  }
 0x717   : > { %8076 = vmatprep.subr.bf16.mxu1 %v10912_v53  ;;  %v10970_v53 = vld [vmem:[%s14635_s10 + $0x268] ss:$16 sps:$4 sm:$0xff]  }
 0x71a   : > { %8077 = vmatpush1.bf16.msra.mxu1 %v10910_v63  ;;  %v10997_v63 = vld [vmem:[%s14635_s10 + $0x300] ss:$16 sps:$4 sm:$0xff]  }
 0x71b   : > { %8078 = vmatprep.subr.bf16.mxu1 %v10918_v1  ;;  %v10978_v1 = vld [vmem:[%s14635_s10 + $0x28c] ss:$16 sps:$4 sm:$0xff]  }
 0x71e   : > { %8079 = vmatpush1.bf16.msra.mxu1 %v10916_v22  ;;  %v11005_v22 = vld [vmem:[%s14635_s10 + $0x324] ss:$16 sps:$4 sm:$0xff]  }
 0x71f   : > { %8080 = vmatprep.subr.bf16.mxu1 %v10924_v33  ;;  %v10976_v33 = vld [vmem:[%s14635_s10 + $0x288] ss:$16 sps:$4 sm:$0xff]  }
 0x720   : > { %v6740_v25 = vpop.f32.mrb[8].mxu1  ;;  %v6984_v26 = vpop.f32.mrb[16].mxu0 }
 0x721   : > { %v9895_v13 = vadd.f32 %v6740_v25, %v5443_v20  ;;  %v14028_v35 = vadd.f32 %v6984_v26, %v13769_v10  ;;  %v6742_v36 = vpop.f32.mrb[9].mxu1  ;;  %v6986_v19 = vpop.f32.mrb[17].mxu0  ;;  %v11003_v20 = vld [vmem:[%s14635_s10 + $0x320] ss:$16 sps:$4 sm:$0xff]   ;;  %v10990_v26 = vld [vmem:[%s14635_s10 + $0x2cc] ss:$16 sps:$4 sm:$0xff]  }
 0x722   : > { %v9896_v38 = vadd.f32 %v6742_v36, %v5447_v24  ;;  %8081 = vmatpush1.bf16.msra.mxu1 %v10922_v28  ;;  %v6744_v59 = vpop.f32.mrb[10].mxu1  ;;  %v6987_v42 = vpop.f32.mrb[18].mxu0  ;;  %v10984_v28 = vld [vmem:[%s14635_s10 + $0x2ac] ss:$16 sps:$4 sm:$0xff]   ;;  %v11011_v24 = vld [vmem:[%s14635_s10 + $0x344] ss:$16 sps:$4 sm:$0xff]  }
 0x723   : > { %v6990_v41 = vmax.f32 %v9895_v13, 0.0  ;;  %v6745_v49 = vpop.f32.mrb[11].mxu1  ;;  %v6988_v50 = vpop.f32.mrb[19].mxu0  ;;  %8082 = vmatprep.subr.bf16.mxu1 %v10930_v29  ;;  %v10982_v29 = vld [vmem:[%s14635_s10 + $0x2a8] ss:$16 sps:$4 sm:$0xff]  }
 0x724   : > { %v6991_v10 = vmax.f32 %v9896_v38, 0.0  ;;  %v11009_v25 = vld [vmem:[%s14635_s10 + $0x340] ss:$16 sps:$4 sm:$0xff]   ;;  %v11017_v13 = vld [vmem:[%s14635_s10 + $0x364] ss:$16 sps:$4 sm:$0xff]  }
 0x725   : > { %v6995_v43 = vpack.c.bf16 %v6990_v41, %v6990_v41  ;;  %v10988_v36 = vld [vmem:[%s14635_s10 + $0x2c8] ss:$16 sps:$4 sm:$0xff]   ;;  %v11015_v19 = vld [vmem:[%s14635_s10 + $0x360] ss:$16 sps:$4 sm:$0xff]   ;;  %v10996_v38 = vld [vmem:[%s14635_s10 + $0x2ec] ss:$16 sps:$4 sm:$0xff]  }
 0x726   : > { %v6996_v51 = vpack.c.bf16 %v6991_v10, %v6991_v10  ;;  %8083 = vmatpush1.bf16.msra.mxu1 %v10928_v8  ;;  %v11023_v59 = vld [vmem:[%s14635_s10 + $0x384] ss:$16 sps:$4 sm:$0xff]   ;;  %v10994_v42 = vld [vmem:[%s14635_s10 + $0x2e8] ss:$16 sps:$4 sm:$0xff]   ;;  %v11021_v8 = vld [vmem:[%s14635_s10 + $0x380] ss:$16 sps:$4 sm:$0xff]  }
 0x727   : > { %8084 = vmatprep.subr.bf16.mxu1 %v10936_v18  ;;  %v11002_v41 = vld [vmem:[%s14635_s10 + $0x30c] ss:$16 sps:$4 sm:$0xff]   ;;  %v11029_v49 = vld [vmem:[%s14635_s10 + $0x3a4] ss:$16 sps:$4 sm:$0xff]   ;;  %v11000_v50 = vld [vmem:[%s14635_s10 + $0x308] ss:$16 sps:$4 sm:$0xff]  }
 0x728   : > { %7971 = vmatprep.mubr.bf16.mxu0 %v6996_v51  ;;  %8094 = vmatprep.mubr.bf16.mxu1 %v6996_v51  ;;  %v11027_v18 = vld [vmem:[%s14635_s10 + $0x3a0] ss:$16 sps:$4 sm:$0xff]   ;;  %v11008_v10 = vld [vmem:[%s14635_s10 + $0x32c] ss:$16 sps:$4 sm:$0xff]   ;;  %v11035_v51 = vld [vmem:[%s14635_s10 + $0x3c4] ss:$16 sps:$4 sm:$0xff]  }
 0x729   : > { %7972 = vmatmul.mubr.bf16.vlgmr.msra.gmra.mrb[20].mxu0 %v6995_v43 }
 0x72a   : > { %8085 = vmatpush1.bf16.msra.mxu1 %v10934_v31  ;;  %7981 = vmatpush1.bf16.msra.mxu0 %v10949_v52  ;;  %v11006_v31 = vld [vmem:[%s14635_s10 + $0x328] ss:$16 sps:$4 sm:$0xff]   ;;  %v11033_v52 = vld [vmem:[%s14635_s10 + $0x3c0] ss:$16 sps:$4 sm:$0xff]  }
 0x72b   : > { %8086 = vmatprep.subr.bf16.mxu1 %v10939_v2  ;;  %7982 = vmatprep.subr.bf16.mxu0 %v10957_v4  ;;  %v11041_v2 = vld [vmem:[%s14635_s10 + $0x3e4] ss:$16 sps:$4 sm:$0xff]   ;;  %v11012_v4 = vld [vmem:[%s14635_s10 + $0x348] ss:$16 sps:$4 sm:$0xff]  }
 0x72e   : > { %8087 = vmatpush1.bf16.msra.mxu1 %v10937_v34  ;;  %7983 = vmatpush1.bf16.msra.mxu0 %v10955_v5  ;;  %v11039_v34 = vld [vmem:[%s14635_s10 + $0x3e0] ss:$16 sps:$4 sm:$0xff]   ;;  %v11020_v5 = vld [vmem:[%s14635_s10 + $0x36c] ss:$16 sps:$4 sm:$0xff]  }
 0x72f   : > { %8088 = vmatprep.subr.bf16.mxu1 %v10942_v3  ;;  %7984 = vmatprep.subr.bf16.mxu0 %v10963_v7  ;;  %v11047_v3 = vld [vmem:[%s14635_s10 + $0x404] ss:$16 sps:$4 sm:$0xff]   ;;  %v11018_v7 = vld [vmem:[%s14635_s10 + $0x368] ss:$16 sps:$4 sm:$0xff]  }
 0x732   : > { %8089 = vmatpush1.bf16.msra.mxu1 %v10940_v27  ;;  %7985 = vmatpush1.bf16.msra.mxu0 %v10961_v47  ;;  %v11026_v27 = vld [vmem:[%s14635_s10 + $0x38c] ss:$16 sps:$4 sm:$0xff]   ;;  %v11024_v47 = vld [vmem:[%s14635_s10 + $0x388] ss:$16 sps:$4 sm:$0xff]  }
 0x733   : > { %8090 = vmatprep.subr.bf16.mxu1 %v10945_v6  ;;  %7986 = vmatprep.subr.bf16.mxu0 %v10969_v21  ;;  %v11032_v6 = vld [vmem:[%s14635_s10 + $0x3ac] ss:$16 sps:$4 sm:$0xff]   ;;  %v11030_v21 = vld [vmem:[%s14635_s10 + $0x3a8] ss:$16 sps:$4 sm:$0xff]  }
 0x736   : > { %8091 = vmatpush1.bf16.msra.mxu1 %v10943_v9  ;;  %7987 = vmatpush1.bf16.msra.mxu0 %v10967_v11  ;;  %v11038_v9 = vld [vmem:[%s14635_s10 + $0x3cc] ss:$16 sps:$4 sm:$0xff]   ;;  %v11036_v11 = vld [vmem:[%s14635_s10 + $0x3c8] ss:$16 sps:$4 sm:$0xff]  }
 0x737   : > { %8092 = vmatprep.subr.bf16.mxu1 %v10948_v12  ;;  %7988 = vmatprep.subr.bf16.mxu0 %v10975_v14  ;;  %v11044_v12 = vld [vmem:[%s14635_s10 + $0x3ec] ss:$16 sps:$4 sm:$0xff]   ;;  %v11042_v14 = vld [vmem:[%s14635_s10 + $0x3e8] ss:$16 sps:$4 sm:$0xff]  }
 0x73a   : > { %8093 = vmatpush1.bf16.msra.mxu1 %v10946_v15  ;;  %7989 = vmatpush1.bf16.msra.mxu0 %v10973_v16  ;;  %v11050_v15 = vld [vmem:[%s14635_s10 + $0x40c] ss:$16 sps:$4 sm:$0xff]   ;;  %v5451_v16 = vrot.slane %v13732_v37, %v11726_v30 }
 0x73b   : > { %8103 = vmatprep.subr.bf16.mxu1 %v10954_v32  ;;  %7990 = vmatprep.subr.bf16.mxu0 %v10981_v57  ;;  %v5455_v32 = vrot.slane %v13732_v37, %v11669_v46  ;;  %v11053_v37 = vld [vmem:[%s14635_s10 + $0x424] ss:$16 sps:$4 sm:$0xff]  }
 0x73d   : > { %8095 = vmatmul.mubr.bf16.vlgmr.msra.gmra.mrb[16].mxu1 %v6995_v43  ;;  %v11014_v43 = vld [vmem:[%s14635_s10 + $0x34c] ss:$16 sps:$4 sm:$0xff]  }
 0x73e   : > { %8104 = vmatpush1.bf16.msra.mxu1 %v10952_v17  ;;  %7991 = vmatpush1.bf16.msra.mxu0 %v10979_v54 }
 0x73f   : > { %8105 = vmatprep.subr.bf16.mxu1 %v10960_v55  ;;  %7992 = vmatprep.subr.bf16.mxu0 %v10987_v40 }
 0x742   : > { %8106 = vmatpush1.bf16.msra.mxu1 %v10958_v39  ;;  %7993 = vmatpush1.bf16.msra.mxu0 %v10985_v56 }
 0x743   : > { %8107 = vmatprep.subr.bf16.mxu1 %v10966_v58  ;;  %7994 = vmatprep.subr.bf16.mxu0 %v10993_v60 }
 0x746   : > { %8108 = vmatpush1.bf16.msra.mxu1 %v10964_v61  ;;  %7995 = vmatpush1.bf16.msra.mxu0 %v10991_v48  ;;  %v11045_v61 = vld [vmem:[%s14635_s10 + $0x400] ss:$16 sps:$4 sm:$0xff]   ;;  %v11048_v48 = vld [vmem:[%s14635_s10 + $0x408] ss:$16 sps:$4 sm:$0xff]  }
 0x747   : > { %8109 = vmatprep.subr.bf16.mxu1 %v10972_v62  ;;  %7996 = vmatprep.subr.bf16.mxu0 %v10999_v23  ;;  %v11056_v23 = vld [vmem:[%s14635_s10 + $0x42c] ss:$16 sps:$4 sm:$0xff]  }
 0x74a   : > { %8110 = vmatpush1.bf16.msra.mxu1 %v10970_v53  ;;  %7997 = vmatpush1.bf16.msra.mxu0 %v10997_v63  ;;  %v11051_v53 = vld [vmem:[%s14635_s10 + $0x420] ss:$16 sps:$4 sm:$0xff]   ;;  %v11054_v63 = vld [vmem:[%s14635_s10 + $0x428] ss:$16 sps:$4 sm:$0xff]  }
 0x74b   : > { %8111 = vmatprep.subr.bf16.mxu1 %v10978_v1  ;;  %7998 = vmatprep.subr.bf16.mxu0 %v11005_v22  ;;  %v11059_v1 = vld [vmem:[%s14635_s10 + $0x444] ss:$16 sps:$4 sm:$0xff]   ;;  %v11062_v22 = vld [vmem:[%s14635_s10 + $0x44c] ss:$16 sps:$4 sm:$0xff]  }
 0x74e   : > { %8112 = vmatpush1.bf16.msra.mxu1 %v10976_v33  ;;  %7999 = vmatpush1.bf16.msra.mxu0 %v11003_v20  ;;  %v11057_v33 = vld [vmem:[%s14635_s10 + $0x440] ss:$16 sps:$4 sm:$0xff]   ;;  %v11060_v20 = vld [vmem:[%s14635_s10 + $0x448] ss:$16 sps:$4 sm:$0xff]  }
 0x74f   : > { %8113 = vmatprep.subr.bf16.mxu1 %v10984_v28  ;;  %8000 = vmatprep.subr.bf16.mxu0 %v11011_v24  ;;  %v11065_v28 = vld [vmem:[%s14635_s10 + $0x464] ss:$16 sps:$4 sm:$0xff]   ;;  %v11063_v24 = vld [vmem:[%s14635_s10 + $0x460] ss:$16 sps:$4 sm:$0xff]  }
 0x752   : > { %8114 = vmatpush1.bf16.msra.mxu1 %v10982_v29  ;;  %8001 = vmatpush1.bf16.msra.mxu0 %v11009_v25  ;;  %v11066_v29 = vld [vmem:[%s14635_s10 + $0x468] ss:$16 sps:$4 sm:$0xff]   ;;  %v11071_v25 = vld [vmem:[%s14635_s10 + $0x484] ss:$16 sps:$4 sm:$0xff]  }
 0x753   : > { %8115 = vmatprep.subr.bf16.mxu1 %v10990_v26  ;;  %8002 = vmatprep.subr.bf16.mxu0 %v11017_v13  ;;  %v11074_v26 = vld [vmem:[%s14635_s10 + $0x48c] ss:$16 sps:$4 sm:$0xff]   ;;  %v7148_v13 = vld [vmem:[%s14635_s10 + $0x4a0] sm:$0xff] }
 0x756   : > { %8116 = vmatpush1.bf16.msra.mxu1 %v10988_v36  ;;  %8003 = vmatpush1.bf16.msra.mxu0 %v11015_v19  ;;  %v7149_v36 = vld [vmem:[%s14635_s10 + $0x4a8] sm:$0xff]  ;;  %v11069_v19 = vld [vmem:[%s14635_s10 + $0x480] ss:$16 sps:$4 sm:$0xff]  }
 0x757   : > { %8117 = vmatprep.subr.bf16.mxu1 %v10996_v38  ;;  %8004 = vmatprep.subr.bf16.mxu0 %v11023_v59  ;;  %v11072_v38 = vld [vmem:[%s14635_s10 + $0x488] ss:$16 sps:$4 sm:$0xff]   ;;  %v9677_v59 = vcombine.high %v7148_v13, %v7148_v13 }
 0x75a   : > { %8118 = vmatpush1.bf16.msra.mxu1 %v10994_v42  ;;  %8005 = vmatpush1.bf16.msra.mxu0 %v11021_v8  ;;  %v9679_v42 = vcombine.high %v7149_v36, %v7149_v36  ;;  %v9676_v8 = vcombine.low %v7148_v13, %v7148_v13 }
 0x75b   : > { %8119 = vmatprep.subr.bf16.mxu1 %v11002_v41  ;;  %8006 = vmatprep.subr.bf16.mxu0 %v11029_v49  ;;  %v9678_v41 = vcombine.low %v7149_v36, %v7149_v36  ;;  %v6994_v49 = vmax.f32 %v14028_v35, 0.0  ;;  %v11084_v35 = vld [vmem:[%s14637_s12 + $0x14] ss:$8 sps:$4 sm:$0xff]  }
 0x75e   : > { %8120 = vmatpush1.bf16.msra.mxu1 %v11000_v50  ;;  %8007 = vmatpush1.bf16.msra.mxu0 %v11027_v18  ;;  %v7928_v50 = vsel %vm7926_vm2, %v9676_v8, 0  ;;  %v7934_v18 = vsel %vm7926_vm2, %v9678_v41, 0 }
 0x75f   : > { %8121 = vmatprep.subr.bf16.mxu1 %v11008_v10  ;;  %8008 = vmatprep.subr.bf16.mxu0 %v11035_v51  ;;  %v11081_v10 = vld [vmem:[%s14637_s12 + $0x4] ss:$8 sps:$4 sm:$0xff]   ;;  %v11079_v51 = vld [vmem:[%s14637_s12] ss:$8 sps:$4 sm:$0xff]  }
 0x762   : > { %8122 = vmatpush1.bf16.msra.mxu1 %v11006_v31  ;;  %8009 = vmatpush1.bf16.msra.mxu0 %v11033_v52  ;;  %v6999_v31 = vpack.c.bf16 %v6994_v49, %v6994_v49  ;;  %v11082_v52 = vld [vmem:[%s14637_s12 + $0x10] ss:$8 sps:$4 sm:$0xff]  }
 0x763   : > { %8123 = vmatprep.subr.bf16.mxu1 %v11014_v43  ;;  %8010 = vmatprep.subr.bf16.mxu0 %v11041_v2  ;;  %v11087_v43 = vld [vmem:[%s14637_s12 + $0x24] ss:$8 sps:$4 sm:$0xff]   ;;  %v11085_v2 = vld [vmem:[%s14637_s12 + $0x20] ss:$8 sps:$4 sm:$0xff]  }
 0x766   : > { %8124 = vmatpush1.bf16.msra.mxu1 %v11012_v4  ;;  %8011 = vmatpush1.bf16.msra.mxu0 %v11039_v34  ;;  %v11090_v4 = vld [vmem:[%s14637_s12 + $0x34] ss:$8 sps:$4 sm:$0xff]   ;;  %v11088_v34 = vld [vmem:[%s14637_s12 + $0x30] ss:$8 sps:$4 sm:$0xff]  }
 0x767   : > { %8125 = vmatprep.subr.bf16.mxu1 %v11020_v5  ;;  %8021 = vmatprep.subr.bf16.mxu0 %v11047_v3  ;;  %v11093_v5 = vld [vmem:[%s14637_s12 + $0x44] ss:$8 sps:$4 sm:$0xff]   ;;  %v11091_v3 = vld [vmem:[%s14637_s12 + $0x40] ss:$8 sps:$4 sm:$0xff]  }
 0x76a   : > { %8126 = vmatpush1.bf16.msra.mxu1 %v11018_v7  ;;  %v11096_v7 = vld [vmem:[%s14637_s12 + $0x54] ss:$8 sps:$4 sm:$0xff]  }
 0x76b   : > { %8127 = vmatprep.subr.bf16.mxu1 %v11026_v27  ;;  %v11094_v27 = vld [vmem:[%s14637_s12 + $0x50] ss:$8 sps:$4 sm:$0xff]  }
 0x76e   : > { %8128 = vmatpush1.bf16.msra.mxu1 %v11024_v47  ;;  %v11099_v47 = vld [vmem:[%s14637_s12 + $0x64] ss:$8 sps:$4 sm:$0xff]  }
 0x76f   : > { %8129 = vmatprep.subr.bf16.mxu1 %v11032_v6  ;;  %v11097_v6 = vld [vmem:[%s14637_s12 + $0x60] ss:$8 sps:$4 sm:$0xff]  }
 0x772   : > { %8130 = vmatpush1.bf16.msra.mxu1 %v11030_v21  ;;  %v11102_v21 = vld [vmem:[%s14637_s12 + $0x74] ss:$8 sps:$4 sm:$0xff]  }
 0x773   : > { %8131 = vmatprep.subr.bf16.mxu1 %v11038_v9  ;;  %v11100_v9 = vld [vmem:[%s14637_s12 + $0x70] ss:$8 sps:$4 sm:$0xff]  }
 0x776   : > { %8132 = vmatpush1.bf16.msra.mxu1 %v11036_v11  ;;  %v11105_v11 = vld [vmem:[%s14637_s12 + $0x84] ss:$8 sps:$4 sm:$0xff]  }
 0x777   : > { %8133 = vmatprep.subr.bf16.mxu1 %v11044_v12  ;;  %v11103_v12 = vld [vmem:[%s14637_s12 + $0x80] ss:$8 sps:$4 sm:$0xff]  }
 0x77a   : > { %8134 = vmatpush1.bf16.msra.mxu1 %v11042_v14  ;;  %v11108_v14 = vld [vmem:[%s14637_s12 + $0x94] ss:$8 sps:$4 sm:$0xff]  }
 0x77b   : > { %8144 = vmatprep.subr.bf16.mxu1 %v11050_v15  ;;  %v11106_v15 = vld [vmem:[%s14637_s12 + $0x90] ss:$8 sps:$4 sm:$0xff]  }
 0x7d0   : > { %v6863_v57 = vpop.f32.mrb[12].mxu1 }
 0x7d1   : > { %v9897_v17 = vadd.f32 %v6863_v57, %v5451_v16  ;;  %v6865_v54 = vpop.f32.mrb[13].mxu1  ;;  %v11111_v16 = vld [vmem:[%s14637_s12 + $0xa4] ss:$8 sps:$4 sm:$0xff]   ;;  %v11114_v57 = vld [vmem:[%s14637_s12 + $0xb4] ss:$8 sps:$4 sm:$0xff]  }
 0x7d2   : > { %v9898_v55 = vadd.f32 %v6865_v54, %v5455_v32  ;;  %v6867_v40 = vpop.f32.mrb[14].mxu1  ;;  %v11109_v32 = vld [vmem:[%s14637_s12 + $0xa0] ss:$8 sps:$4 sm:$0xff]   ;;  %v11117_v54 = vld [vmem:[%s14637_s12 + $0xc4] ss:$8 sps:$4 sm:$0xff]  }
 0x7d3   : > { %v6992_v39 = vmax.f32 %v9897_v17, 0.0  ;;  %v6868_v56 = vpop.f32.mrb[15].mxu1  ;;  %v11112_v17 = vld [vmem:[%s14637_s12 + $0xb0] ss:$8 sps:$4 sm:$0xff]   ;;  %v11120_v40 = vld [vmem:[%s14637_s12 + $0xd4] ss:$8 sps:$4 sm:$0xff]  }
 0x7d4   : > { %v6993_v58 = vmax.f32 %v9898_v55, 0.0  ;;  %v11115_v55 = vld [vmem:[%s14637_s12 + $0xc0] ss:$8 sps:$4 sm:$0xff]  }
 0x7d5   : > { %v6997_v62 = vpack.c.bf16 %v6992_v39, %v6992_v39  ;;  %v11118_v39 = vld [vmem:[%s14637_s12 + $0xd0] ss:$8 sps:$4 sm:$0xff]   ;;  %v11121_v56 = vld [vmem:[%s14637_s12 + $0xe0] ss:$8 sps:$4 sm:$0xff]  }
 0x7d6   : > { %v6998_v60 = vpack.c.bf16 %v6993_v58, %v6993_v58  ;;  %v11123_v58 = vld [vmem:[%s14637_s12 + $0xe4] ss:$8 sps:$4 sm:$0xff]  }
 0x7d8   : > { %8012 = vmatprep.mubr.bf16.mxu0 %v6998_v60  ;;  %8135 = vmatprep.mubr.bf16.mxu1 %v6998_v60  ;;  %v11126_v60 = vld [vmem:[%s14637_s12 + $0xf4] ss:$8 sps:$4 sm:$0xff]  }
 0x7d9   : > { %8013 = vmatmul.mubr.bf16.vlgmr.msra.gmra.mrb[20].mxu0 %v6997_v62  ;;  %8136 = vmatmul.mubr.bf16.vlgmr.msra.gmra.mrb[16].mxu1 %v6997_v62  ;;  %v11175_v62 = vld [vmem:[%s14639_s14 + $0x40] sm:$0xff]  }
 0x7da   : > { %8022 = vmatpush1.bf16.msra.mxu0 %v11045_v61  ;;  %8145 = vmatpush1.bf16.msra.mxu1 %v11048_v48  ;;  %v11124_v61 = vld [vmem:[%s14637_s12 + $0xf0] ss:$8 sps:$4 sm:$0xff]   ;;  %v11129_v48 = vld [vmem:[%s14637_s12 + $0x104] ss:$8 sps:$4 sm:$0xff]  }
 0x7db   : > { %8023 = vmatprep.subr.bf16.mxu0 %v11053_v37  ;;  %8146 = vmatprep.subr.bf16.mxu1 %v11056_v23  ;;  %v11176_v37 = vld [vmem:[%s14639_s14] sm:$0xff]   ;;  %v11177_v23 = vld [vmem:[%s14639_s14 + $0x48] sm:$0xff]  }
 0x7dc   : > { %8053 = vmatprep.mubr.bf16.mxu0 %v11301_v0  ;;  %8176 = vmatprep.mubr.bf16.mxu1 %v11301_v0  ;;  %v11068_v0 = vld [vmem:[%s14635_s10 + $0x46c] ss:$16 sps:$4 sm:$0xff]  }
 0x7de   : > { %8024 = vmatpush1.bf16.msra.mxu0 %v11051_v53  ;;  %8147 = vmatpush1.bf16.msra.mxu1 %v11054_v63  ;;  %v11178_v53 = vld [vmem:[%s14639_s14 + $0x8] sm:$0xff]   ;;  %v11179_v63 = vld [vmem:[%s14639_s14 + $0x50] sm:$0xff]  }
 0x7df   : > { %8025 = vmatprep.subr.bf16.mxu0 %v11059_v1  ;;  %8148 = vmatprep.subr.bf16.mxu1 %v11062_v22  ;;  %v11180_v1 = vld [vmem:[%s14639_s14 + $0x10] sm:$0xff]   ;;  %v11181_v22 = vld [vmem:[%s14639_s14 + $0x58] sm:$0xff]  }
 0x7e2   : > { %8026 = vmatpush1.bf16.msra.mxu0 %v11057_v33  ;;  %8149 = vmatpush1.bf16.msra.mxu1 %v11060_v20  ;;  %v11182_v33 = vld [vmem:[%s14639_s14 + $0x18] sm:$0xff]   ;;  %v11183_v20 = vld [vmem:[%s14639_s14 + $0x60] sm:$0xff]  }
 0x7e3   : > { %8027 = vmatprep.subr.bf16.mxu0 %v11065_v28  ;;  %8150 = vmatprep.subr.bf16.mxu1 %v11068_v0  ;;  %v11184_v28 = vld [vmem:[%s14639_s14 + $0x20] sm:$0xff]   ;;  %v11185_v0 = vld [vmem:[%s14639_s14 + $0x68] sm:$0xff]  }
 0x7e6   : > { %8028 = vmatpush1.bf16.msra.mxu0 %v11063_v24  ;;  %8151 = vmatpush1.bf16.msra.mxu1 %v11066_v29  ;;  %v11186_v24 = vld [vmem:[%s14639_s14 + $0x28] sm:$0xff]   ;;  %v14463_v29 = vld [vmem:[%s14636_s11] sm:$0xf] }
 0x7e7   : > { %8029 = vmatprep.subr.bf16.mxu0 %v11071_v25  ;;  %8152 = vmatprep.subr.bf16.mxu1 %v11074_v26  ;;  %v7155_v25 = vrot.slane %v14463_v29, %v11663_v44  ;;  %v7159_v26 = vrot.slane %v14463_v29, %v11666_v45  ;;  %v7167_v13 = vrot.slane %v14463_v29, %v11669_v46  ;;  %v11127_v46 = vld [vmem:[%s14637_s12 + $0x100] ss:$8 sps:$4 sm:$0xff]  }
 0x7ea   : > { %8030 = vmatpush1.bf16.msra.mxu0 %v11069_v19  ;;  %8153 = vmatpush1.bf16.msra.mxu1 %v11072_v38 }
 0x7eb   : > { %9680 = vmatprep.subr.msk.bf16.mxu0 %vm7926_vm2, %v9677_v59  ;;  %9682 = vmatprep.subr.msk.bf16.mxu1 %vm7926_vm2, %v9679_v42 }
 0x7ee   : > { %8032 = vmatpush1.bf16.msra.mxu0 %v7928_v50  ;;  %8155 = vmatpush1.bf16.msra.mxu1 %v7934_v18 }
 0x7ef   : > { %8589 = vmatprep.subr.bf16.mxu0 %v11081_v10  ;;  %9817 = vmatprep.subr.bf16.mxu1 %v11175_v62  ;;  %v11171_v62 = vld [vmem:[%s14637_s12 + $0x1e4] ss:$8 sps:$4 sm:$0xff]  }
 0x7f1   : > { %9681 = vmatmul.mubr.msk.bf16.vlgmr.msra.gmra.mrb[20].mxu0 %vm7922_vm3, %v6999_v31  ;;  %9683 = vmatmul.mubr.msk.bf16.vlgmr.msra.gmra.mrb[16].mxu1 %vm7922_vm3, %v6999_v31 }
 0x7f2   : > { %8590 = vmatpush1.bf16.msra.mxu0 %v11079_v51  ;;  %9818 = vmatpush3.bf16.msra.mxu1 %v11176_v37  ;;  %v11169_v37 = vld [vmem:[%s14637_s12 + $0x1e0] ss:$8 sps:$4 sm:$0xff]  }
 0x7f3   : > { %8591 = vmatprep.subr.bf16.mxu0 %v11084_v35  ;;  %9819 = vmatprep.subr.bf16.mxu1 %v11177_v23 }
 0x7f6   : > { %8592 = vmatpush1.bf16.msra.mxu0 %v11082_v52  ;;  %9820 = vmatpush3.bf16.msra.mxu1 %v11178_v53  ;;  %v11174_v53 = vld [vmem:[%s14637_s12 + $0x1f4] ss:$8 sps:$4 sm:$0xff]  }
 0x7f7   : > { %8593 = vmatprep.subr.bf16.mxu0 %v11087_v43  ;;  %9821 = vmatprep.subr.bf16.mxu1 %v11179_v63 }
 0x7fa   : > { %8594 = vmatpush1.bf16.msra.mxu0 %v11085_v2  ;;  %9822 = vmatpush3.bf16.msra.mxu1 %v11180_v1  ;;  %v11132_v2 = vld [vmem:[%s14637_s12 + $0x114] ss:$8 sps:$4 sm:$0xff]  }
 0x7fb   : > { %8595 = vmatprep.subr.bf16.mxu0 %v11090_v4  ;;  %9823 = vmatprep.subr.bf16.mxu1 %v11181_v22  ;;  %v11187_v22 = vld [vmem:[%s14639_s14 + $0x70] sm:$0xff]  }
 0x7fe   : > { %8596 = vmatpush1.bf16.msra.mxu0 %v11088_v34  ;;  %9824 = vmatpush3.bf16.msra.mxu1 %v11182_v33  ;;  %v11130_v34 = vld [vmem:[%s14637_s12 + $0x110] ss:$8 sps:$4 sm:$0xff]  }
 0x7ff   : > { %8597 = vmatprep.subr.bf16.mxu0 %v11093_v5  ;;  %9825 = vmatprep.subr.bf16.mxu1 %v11183_v20  ;;  %v11135_v5 = vld [vmem:[%s14637_s12 + $0x124] ss:$8 sps:$4 sm:$0xff]   ;;  %v11188_v33 = vld [vmem:[%s14639_s14 + $0x30] sm:$0xff]   ;;  %v11189_v20 = vld [vmem:[%s14639_s14 + $0x78] sm:$0xff]  }
 0x802   : > { %8598 = vmatpush1.bf16.msra.mxu0 %v11091_v3  ;;  %9826 = vmatpush3.bf16.msra.mxu1 %v11184_v28  ;;  %v11133_v3 = vld [vmem:[%s14637_s12 + $0x120] ss:$8 sps:$4 sm:$0xff]   ;;  %v11190_v28 = vld [vmem:[%s14639_s14 + $0x38] sm:$0xff]  }
 0x803   : > { %8599 = vmatprep.subr.bf16.mxu0 %v11096_v7  ;;  %9827 = vmatprep.subr.bf16.mxu1 %v11185_v0  ;;  %v11138_v7 = vld [vmem:[%s14637_s12 + $0x134] ss:$8 sps:$4 sm:$0xff]   ;;  %v8257_v0 = vld [vmem:[%s14638_s13] sm:$0x3] }
 0x806   : > { %8600 = vmatpush1.bf16.msra.mxu0 %v11094_v27  ;;  %9828 = vmatpush3.bf16.msra.mxu1 %v11186_v24  ;;  %v11136_v27 = vld [vmem:[%s14637_s12 + $0x130] ss:$8 sps:$4 sm:$0xff]   ;;  %v8262_v24 = vrot.slane %v8257_v0, %v11663_v44 }
 0x807   : > { %8601 = vmatprep.subr.bf16.mxu0 %v11099_v47  ;;  %v11141_v47 = vld [vmem:[%s14637_s12 + $0x144] ss:$8 sps:$4 sm:$0xff]   ;;  %9829 = vmatprep.subr.bf16.mxu1 %v11187_v22 }
 0x80a   : > { %8602 = vmatpush1.bf16.msra.mxu0 %v11097_v6  ;;  %v11139_v6 = vld [vmem:[%s14637_s12 + $0x140] ss:$8 sps:$4 sm:$0xff]   ;;  %9830 = vmatpush3.bf16.msra.mxu1 %v11188_v33 }
 0x80b   : > { %8603 = vmatprep.subr.bf16.mxu0 %v11102_v21  ;;  %v11144_v21 = vld [vmem:[%s14637_s12 + $0x154] ss:$8 sps:$4 sm:$0xff]   ;;  %9831 = vmatprep.subr.bf16.mxu1 %v11189_v20 }
 0x80e   : > { %8604 = vmatpush1.bf16.msra.mxu0 %v11100_v9  ;;  %v11142_v9 = vld [vmem:[%s14637_s12 + $0x150] ss:$8 sps:$4 sm:$0xff]   ;;  %9832 = vmatpush3.bf16.msra.mxu1 %v11190_v28 }
 0x80f   : > { %8605 = vmatprep.subr.bf16.mxu0 %v11105_v11  ;;  %v11147_v11 = vld [vmem:[%s14637_s12 + $0x164] ss:$8 sps:$4 sm:$0xff]  }
 0x812   : > { %8606 = vmatpush1.bf16.msra.mxu0 %v11103_v12  ;;  %v11145_v12 = vld [vmem:[%s14637_s12 + $0x160] ss:$8 sps:$4 sm:$0xff]  }
 0x813   : > { %8607 = vmatprep.subr.bf16.mxu0 %v11108_v14  ;;  %v11150_v14 = vld [vmem:[%s14637_s12 + $0x174] ss:$8 sps:$4 sm:$0xff]  }
 0x816   : > { %8608 = vmatpush1.bf16.msra.mxu0 %v11106_v15  ;;  %v11148_v15 = vld [vmem:[%s14637_s12 + $0x170] ss:$8 sps:$4 sm:$0xff]  }
 0x817   : > { %8609 = vmatprep.subr.bf16.mxu0 %v11111_v16  ;;  %v11153_v16 = vld [vmem:[%s14637_s12 + $0x184] ss:$8 sps:$4 sm:$0xff]  }
 0x81a   : > { %8610 = vmatpush1.bf16.msra.mxu0 %v11109_v32  ;;  %v11151_v32 = vld [vmem:[%s14637_s12 + $0x180] ss:$8 sps:$4 sm:$0xff]  }
 0x81b   : > { %8611 = vmatprep.subr.bf16.mxu0 %v11114_v57  ;;  %v11156_v57 = vld [vmem:[%s14637_s12 + $0x194] ss:$8 sps:$4 sm:$0xff]  }
 0x81e   : > { %8612 = vmatpush1.bf16.msra.mxu0 %v11112_v17  ;;  %v11154_v17 = vld [vmem:[%s14637_s12 + $0x190] ss:$8 sps:$4 sm:$0xff]  }
 0x81f   : > { %8613 = vmatprep.subr.bf16.mxu0 %v11117_v54  ;;  %v11159_v54 = vld [vmem:[%s14637_s12 + $0x1a4] ss:$8 sps:$4 sm:$0xff]  }
 0x822   : > { %8614 = vmatpush1.bf16.msra.mxu0 %v11115_v55  ;;  %v11157_v55 = vld [vmem:[%s14637_s12 + $0x1a0] ss:$8 sps:$4 sm:$0xff]  }
 0x823   : > { %8615 = vmatprep.subr.bf16.mxu0 %v11120_v40  ;;  %v11162_v40 = vld [vmem:[%s14637_s12 + $0x1b4] ss:$8 sps:$4 sm:$0xff]  }
 0x826   : > { %8616 = vmatpush1.bf16.msra.mxu0 %v11118_v39  ;;  %v11160_v39 = vld [vmem:[%s14637_s12 + $0x1b0] ss:$8 sps:$4 sm:$0xff]  }
 0x827   : > { %8617 = vmatprep.subr.bf16.mxu0 %v11123_v58  ;;  %v11163_v58 = vld [vmem:[%s14637_s12 + $0x1c0] ss:$8 sps:$4 sm:$0xff]  }
 0x82a   : > { %8618 = vmatpush1.bf16.msra.mxu0 %v11121_v56  ;;  %v11165_v56 = vld [vmem:[%s14637_s12 + $0x1c4] ss:$8 sps:$4 sm:$0xff]  }
 0x82b   : > { %8619 = vmatprep.subr.bf16.mxu0 %v11126_v60  ;;  %v11168_v60 = vld [vmem:[%s14637_s12 + $0x1d4] ss:$8 sps:$4 sm:$0xff]  }
 0x82e   : > { %8620 = vmatpush1.bf16.msra.mxu0 %v11124_v61  ;;  %v11166_v61 = vld [vmem:[%s14637_s12 + $0x1d0] ss:$8 sps:$4 sm:$0xff]  }
 0x82f   : > { %8630 = vmatprep.subr.bf16.mxu0 %v11129_v48  ;;  %v7163_v48 = vrot.slane %v14463_v29, %v11726_v30  ;;  %v11172_v30 = vld [vmem:[%s14637_s12 + $0x1f0] ss:$8 sps:$4 sm:$0xff]   ;;  %v8266_v29 = vrot.slane %v8257_v0, %v11666_v45 }
 0x8c4   : > { %v8055_v36 = vpop.f32.mrb[20].mxu0  ;;  %v14471_v19 = vpop.f32.mrb[16].mxu1 }
 0x8c5   : > { %v9899_v38 = vadd.f32 %v8055_v36, %v7155_v25  ;;  %v8057_v59 = vpop.f32.mrb[21].mxu0  ;;  %v8180_v42 = vpop.f32.mrb[17].mxu1  ;;  %v9901_v23 = vadd.f32 %v14471_v19, %v7163_v48 }
 0x8c6   : > { %v9900_v8 = vadd.f32 %v8057_v59, %v7159_v26  ;;  %v9902_v41 = vadd.f32 %v8180_v42, %v7167_v13  ;;  %v8059_v49 = vpop.f32.mrb[22].mxu0  ;;  %v8182_v50 = vpop.f32.mrb[18].mxu1 }
 0x8c7   : > { %v8185_v18 = vmax.f32 %v9899_v38, 0.0  ;;  %v8060_v10 = vpop.f32.mrb[23].mxu0  ;;  %v8183_v51 = vpop.f32.mrb[19].mxu1  ;;  %v8187_v63 = vmax.f32 %v9901_v23, 0.0  ;;  %v9748_v50 = vld [vmem:[%s14640_s15] ss:$0 sm:$0xff] }
 0x8c8   : > { %v8186_v31 = vmax.f32 %v9900_v8, 0.0  ;;  %v8188_v35 = vmax.f32 %v9902_v41, 0.0 }
 0x8c9   : > { %v8189_v43 = vpack.c.bf16 %v8185_v18, %v8185_v18  ;;  %v8191_v1 = vpack.c.bf16 %v8187_v63, %v8187_v63 }
 0x8ca   : > { %v8190_v52 = vpack.c.bf16 %v8186_v31, %v8186_v31  ;;  %v8192_v4 = vpack.c.bf16 %v8188_v35, %v8188_v35 }
 0x8cc   : > { %8621 = vmatprep.mubr.bf16.mxu0 %v8190_v52 }
 0x8cd   : > { %8622 = vmatmul.mubr.bf16.vlgmr.msra.gmra.mrb[24].mxu0 %v8189_v43 }
 0x8ce   : > { %8631 = vmatpush1.bf16.msra.mxu0 %v11127_v46  ;;  %8662 = vmatprep.mubr.bf16.mxu0 %v8192_v4 }
 0x8cf   : > { %8632 = vmatprep.subr.bf16.mxu0 %v11132_v2 }
 0x8d2   : > { %8633 = vmatpush1.bf16.msra.mxu0 %v11130_v34 }
 0x8d3   : > { %8634 = vmatprep.subr.bf16.mxu0 %v11135_v5 }
 0x8d6   : > { %8635 = vmatpush1.bf16.msra.mxu0 %v11133_v3 }
 0x8d7   : > { %8636 = vmatprep.subr.bf16.mxu0 %v11138_v7 }
 0x8da   : > { %8637 = vmatpush1.bf16.msra.mxu0 %v11136_v27 }
 0x8db   : > { %8638 = vmatprep.subr.bf16.mxu0 %v11141_v47 }
 0x8de   : > { %8639 = vmatpush1.bf16.msra.mxu0 %v11139_v6 }
 0x8df   : > { %8640 = vmatprep.subr.bf16.mxu0 %v11144_v21 }
 0x8e2   : > { %8641 = vmatpush1.bf16.msra.mxu0 %v11142_v9 }
 0x8e3   : > { %8642 = vmatprep.subr.bf16.mxu0 %v11147_v11 }
 0x8e6   : > { %8643 = vmatpush1.bf16.msra.mxu0 %v11145_v12 }
 0x8e7   : > { %8644 = vmatprep.subr.bf16.mxu0 %v11150_v14 }
 0x8ea   : > { %8645 = vmatpush1.bf16.msra.mxu0 %v11148_v15 }
 0x8eb   : > { %8646 = vmatprep.subr.bf16.mxu0 %v11153_v16 }
 0x8ee   : > { %8647 = vmatpush1.bf16.msra.mxu0 %v11151_v32 }
 0x8ef   : > { %8648 = vmatprep.subr.bf16.mxu0 %v11156_v57 }
 0x8f2   : > { %8649 = vmatpush1.bf16.msra.mxu0 %v11154_v17 }
 0x8f3   : > { %8650 = vmatprep.subr.bf16.mxu0 %v11159_v54 }
 0x8f6   : > { %8651 = vmatpush1.bf16.msra.mxu0 %v11157_v55 }
 0x8f7   : > { %8652 = vmatprep.subr.bf16.mxu0 %v11162_v40 }
 0x8fa   : > { %8653 = vmatpush1.bf16.msra.mxu0 %v11160_v39 }
 0x8fb   : > { %8654 = vmatprep.subr.bf16.mxu0 %v11165_v56 }
 0x8fe   : > { %8655 = vmatpush1.bf16.msra.mxu0 %v11163_v58 }
 0x8ff   : > { %8656 = vmatprep.subr.bf16.mxu0 %v11168_v60 }
 0x902   : > { %8657 = vmatpush1.bf16.msra.mxu0 %v11166_v61 }
 0x903   : > { %8658 = vmatprep.subr.bf16.mxu0 %v11171_v62 }
 0x906   : > { %8659 = vmatpush1.bf16.msra.mxu0 %v11169_v37 }
 0x907   : > { %8660 = vmatprep.subr.bf16.mxu0 %v11174_v53 }
 0x90a   : > { %8661 = vmatpush1.bf16.msra.mxu0 %v11172_v30 }
 0x90d   : > { %8663 = vmatmul.mubr.bf16.vlgmr.msra.gmra.mrb[24].mxu0 %v8191_v1 }
 0x9e0   : > { %v8664_v25 = vpop.f32.mrb[24].mxu0 }
 0x9e1   : > { %v9903_v26 = vadd.f32 %v8664_v25, %v8262_v24  ;;  %v8666_v13 = vpop.f32.mrb[25].mxu0 }
 0x9e2   : > { %v9904_v36 = vadd.f32 %v8666_v13, %v8266_v29  ;;  %v8668_v19 = vpop.f32.mrb[26].mxu0 }
 0x9e3   : > { %v8671_v38 = vmax.f32 %v9903_v26, 0.0  ;;  %v8669_v59 = vpop.f32.mrb[27].mxu0 }
 0x9e4   : > { %v8672_v42 = vmax.f32 %v9904_v36, 0.0 }
 0x9e5   : > { %v8673_v41 = vpack.c.bf16 %v8671_v38, %v8671_v38 }
 0x9e6   : > { %v8674_v8 = vpack.c.bf16 %v8672_v42, %v8672_v42 }
 0x9e8   : > { %8842 = vmatprep.mubr.bf16.mxu1 %v8674_v8 }
 0x9e9   : > { %8843 = vmatmul.mubr.bf16.vlgmr.msra.gmra.mrb[20].mxu1 %v8673_v41 }
 0xabc   : > { %v9833_v49 = vpop.f32.mrb[20].mxu1 }
 0xabd   : > { %v9834_v44 = vpop.f32.mrb[21].mxu1 }
 0xabe   : > { %v9835_v18 = vadd.f32 %v9834_v44, %v9833_v49  ;;  %v9836_v45 = vpop.f32.mrb[22].mxu1 }
 0xabf   : > { %v9837_v10 = vpop.f32.mrb[23].mxu1 }
 0xac0   : > { %v8845_v51 = vadd.f32 %v9835_v18, %v9748_v50 }
 0xac2   : > { %8850 = vst [vmem:[#allocation6] sm:$0x3] %v8845_v51 }
 0xac3 PF: > { %p9986_p5 = scmp.eq.s32.totalorder %s11407_s25, 5  ;;  %s11302_s19 = smov [#allocation6]  }
 0xac4   : > { %s8858_s21 = sshll.u32 %s11302_s19, 4  ;;  %s8859_s21 = int_to_ptr.vmem [resolvable:$true] %s8858_s21 }
 0xac5   : > { %s11221_s20 = scalar_lea.vmem %s8859_s21, 32  ;;  %p11228_p0 = scmp.lt.s32.totalorder %s8859_s21, %s8859_s21 }
 0xac6   : > { %p11222_p6 = scmp.ne.s32.totalorder %s8859_s21, %s11221_s20  ;;  %p11229_p1 = scmp.lt.s32.totalorder %s11221_s20, %s11221_s20 }
 0xac8   : > { %p11223_p10 = pnand %p11222_p6, %p9986_p5  ;;  %p11230_p2 = por %p11229_p1, %p11228_p0 }
 0xaca   : > { %p11224_p12 = pneg %p11223_p10 }
 0xacc   : > { %p11231_p11 = pnand %p11230_p2, %p11224_p12 }
 0xace   : > { %11234 = shalt.err (!%p11231_p11)
}
 0xacf   : > { %s14656_s16 = sld [smem:[#allocation13_spill]] }
 0xad5   : > { %s11235_s26 = scalar_lea.hbm %s14656_s16, 32 }
 0xad6   : > { %p11236_p13 = scmp.ne.s32.totalorder %s14656_s16, %s11235_s26  ;;  %p11241_p9 = scmp.lt.u32.totalorder %s11235_s26, %s14656_s16 }
 0xad8   : > { %p11237_p3 = pnand %p11236_p13, %p9986_p5 }
 0xada   : > { %p11238_p8 = pneg %p11237_p3 }
 0xadc   : > { %p11243_p7 = pnand %p11241_p9, %p11238_p8 }
 0xade   : > { %11246 = shalt.err (!%p11243_p7)
}
 0xadf   : > { %9978 = dma.vmem_to_hbm [thread:$0]  (%p9986_p5), %s8859_s21, 32, %s14656_s16, [#allocation5]  }
 0xae0   : > { %11272 = dma.done.wait (%p9986_p5), [#allocation5], 32  }
 0xae1   : > { %11274 = vsyncadd (%p9986_p5), [#allocation5], 4294967264 }
 0xae2 PF: > { %s14657_s24 = sld [smem:[#allocation10_spill]]  ;;  %s14658_s28 = sld [smem:[#allocation9_spill]] }
 0xae3   : > { %s14659_s23 = sld [smem:[#allocation11_spill]]  ;;  %s14660_s21 = smov %s11281_s22 }
 0xae8   : > { %p27_p4 = scmp.ge.s32.totalorder %s14657_s24, 8   ;;  %s14661_s22 = smov %s14658_s28 }
 0xaea   :  { %29 = sbr.rel (!%p27_p4) target bundleno = 7 (0x7), region = 152 }
 0xaf1   :  { %8871 = vsyncpa [#allocation4], 1 }
 0xaf2   :  { %8873 = vsyncpa [#allocation4 + $0x1], 1 }
 0xaf3   :  { %8874 = vsyncpa [#allocation5], 1 }
 0xaf4   :  { %8876 = vsyncpa [#allocation5 + $0x1], 1 }

</bundles_post_ra>
